<compile_context>
chip_gen: v7x
topology: tpu7x:2x2x1
jax: 0.10.0
libtpu: 0.0.40
codegen_flags: <defaults>
</compile_context>

<pallas_src>
import math

import jax
import jax.numpy as jnp
from jax import lax
from jax.experimental import pallas as pl
from jax.experimental.pallas import tpu as pltpu


_CONV1_DMA_CHUNKS = 4  # tunable; 1 disables the conv1 M-chunk DMA pipeline


def _const_map(n):
    return lambda c: (0,) * n


# --------------------------------------------------------------------------- fused kernel
def _make_encoder_kernel(B, Cin, H, W, C1, C2, C3, NC, CHUNK, eps=1e-5):
    H1, W1 = (H - 4) // 2 + 1, (W - 4) // 2 + 1        # conv1: k=4, s=2
    Hp1, Wp1 = H1 // 2, W1 // 2                        # pool1: 2x2 (floor)
    H2, W2 = (Hp1 - 3) // 2 + 1, (Wp1 - 3) // 2 + 1    # conv2: k=3, s=2
    Hp2, Wp2 = H2 // 2, W2 // 2                        # pool2: 2x2 (floor)
    H3, W3 = (Hp2 - 2) // 2 + 1, (Wp2 - 2) // 2 + 1    # conv3: k=2, s=2
    assert min(H1, W1, Hp1, Wp1, H2, W2, Hp2, Wp2, H3, W3) >= 1, "input too small"
    M1 = H1 * W1 * B
    assert M1 % 8 == 0, "choose B a multiple of 8 for tile-aligned reshapes"
    assert NC * CHUNK >= M1 and CHUNK % 8 == 0

    def maxpool2x2(t, hp, wp):
        # (h, w, b, c) -> (hp, wp, b, c); floor semantics. Contiguous slices + reshapes only.
        h, w, bb, cc = t.shape
        a = t[:2 * hp].reshape(hp, 2, w, bb, cc)
        rows = jnp.maximum(a[:, 0], a[:, 1])                      # (hp, w, b, c)
        cols = rows[:, :2 * wp].reshape(hp, wp, 2, bb, cc)
        return jnp.maximum(cols[:, :, 0], cols[:, :, 1])          # (hp, wp, b, c)

    def halve_rows(t):
        # even/odd split along axis 0 (pad odd length with a copy of the last row; the
        # padded row is never addressed by a valid-conv tap).
        if t.shape[0] % 2:
            t = jnp.concatenate([t, t[-1:]], axis=0)
        r = t.reshape(t.shape[0] // 2, 2, *t.shape[1:])
        return r[:, 0], r[:, 1]

    def halve_cols(t):
        if t.shape[1] % 2:
            t = jnp.concatenate([t, t[:, -1:]], axis=1)
        r = t.reshape(t.shape[0], t.shape[1] // 2, 2, *t.shape[2:])
        return r[:, :, 0], r[:, :, 1]

    def stride2_taps(src, k, ho, wo):
        # src: (h, w, b, c).  Returns the k*k im2col slabs of a stride-2 VALID conv,
        # each (ho*wo*b, c).  One parity decomposition + contiguous unit-stride slices
        # per tap — no per-tap concatenates, no strided slices.
        ev, od = halve_rows(src)
        quad = (halve_cols(ev), halve_cols(od))        # quad[i%2][j%2]
        bb, cc = src.shape[2], src.shape[3]
        slabs = []
        for i in range(k):
            for j in range(k):
                s = quad[i % 2][j % 2]
                s = s[i // 2:i // 2 + ho, j // 2:j // 2 + wo]
                slabs.append(s.reshape(ho * wo * bb, cc))
        return slabs

    def bn_relu(y, g, be, n):
        # One-pass batch statistics (sum / sum-of-squares), biased variance — PyTorch
        # BatchNorm2d training-mode semantics.
        mu = jnp.sum(y, axis=0, keepdims=True) / n
        var = jnp.sum(y * y, axis=0, keepdims=True) / n - mu * mu
        return jnp.maximum((y - mu) * lax.rsqrt(var + eps) * g + be, 0.0)

    def kernel(p1_ref, w1_ref, g1_ref, be1_ref,
               w2_ref, g2_ref, be2_ref,
               w3_ref, b3_ref,
               out_ref, y1_scr, s1_scr, q1_scr):
        c = pl.program_id(0)

        @pl.when(c == 0)
        def _init():
            s1_scr[...] = jnp.zeros_like(s1_scr)
            q1_scr[...] = jnp.zeros_like(q1_scr)

        # ---- conv1, one M-chunk per grid step: bf16 GEMM on the MXU, f32 accumulate.
        # The p1 DMA for step c+1 overlaps this compute via BlockSpec double-buffering.
        # Padded (all-zero) rows contribute exactly zero to the statistics below.
        y1c = jnp.dot(p1_ref[0], w1_ref[...], preferred_element_type=jnp.float32)
        y1_scr[c] = y1c                                           # stash pre-BN activations
        s1_scr[...] += jnp.sum(y1c, axis=0, keepdims=True)
        q1_scr[...] += jnp.sum(y1c * y1c, axis=0, keepdims=True)

        @pl.when(c == NC - 1)
        def _finalize():
            # ---- BatchNorm1 (batch stats from chunk accumulators) + ReLU + maxpool1.
            # conv1/conv2 biases are omitted: bias followed by training-mode BN cancels
            # exactly (the batch mean absorbs it).
            mu1 = s1_scr[...] / M1
            var1 = q1_scr[...] / M1 - mu1 * mu1
            y1 = y1_scr[...].reshape(NC * CHUNK, C1)[:M1]         # drop padded rows
            y1 = jnp.maximum(
                (y1 - mu1) * lax.rsqrt(var1 + eps) * g1_ref[...] + be1_ref[...], 0.0)
            pooled1 = maxpool2x2(y1.reshape(H1, W1, B, C1), Hp1, Wp1)   # (Hp1, Wp1, B, C1)

            # ---- conv2 (k=3, s=2): ONE K-concatenated GEMM, K = 9*C1.
            lhs2 = jnp.concatenate(stride2_taps(pooled1, 3, H2, W2), axis=-1)
            y2 = jnp.dot(lhs2.astype(jnp.bfloat16), w2_ref[...],
                         preferred_element_type=jnp.float32)
            y2 = bn_relu(y2, g2_ref[...], be2_ref[...], H2 * W2 * B)
            pooled2 = maxpool2x2(y2.reshape(H2, W2, B, C2), Hp2, Wp2)   # (Hp2, Wp2, B, C2)

            # ---- conv3 (k=2, s=2): ONE K-concatenated GEMM, K = 4*C2, + bias + tanh.
            # norm3 = identity Lambda, pool3 = MaxPool2d(1,1): both no-ops.
            lhs3 = jnp.concatenate(stride2_taps(pooled2, 2, H3, W3), axis=-1)
            y3 = jnp.tanh(jnp.dot(lhs3.astype(jnp.bfloat16), w3_ref[...],
                                  preferred_element_type=jnp.float32) + b3_ref[...])

            # ---- AdaptiveAvgPool2d((1,1)) + Flatten: mean over spatial positions.
            out_ref[...] = jnp.mean(y3.reshape(H3 * W3, B, C3), axis=0)  # (B, C3) lane-dense

    return kernel, (H1, W1, M1)


# --------------------------------------------------------------------------- wrapper
def _im2col_conv1(x, H1, W1):
    # (B, Cin, H, W) -> (H1*W1*B, 16*Cin); rows ordered (h1, w1, b), K ordered (ki, kj, cin).
    B, Cin = x.shape[0], x.shape[1]
    x_t = jnp.transpose(x, (2, 3, 0, 1))                          # (H, W, B, Cin)
    slabs = [x_t[i:i + 2 * H1:2, j:j + 2 * W1:2] for i in range(4) for j in range(4)]
    return jnp.stack(slabs, axis=3).reshape(H1 * W1 * B, 16 * Cin)


@jax.jit
def small_encoder_forward(x, params):
    """x: (B, Cin, H, W) float32 (NCHW, matching the PyTorch module)."""
    B, Cin, H, W = x.shape
    C1 = params["g1"].shape[1]
    C2 = params["g2"].shape[1]
    C3 = params["b3"].shape[1]

    H1, W1 = (H - 4) // 2 + 1, (W - 4) // 2 + 1
    M1 = H1 * W1 * B
    K1 = 16 * Cin
    NC = _CONV1_DMA_CHUNKS
    CHUNK = (((M1 + NC - 1) // NC) + 7) // 8 * 8                  # multiple of 8 rows

    kernel, _ = _make_encoder_kernel(B, Cin, H, W, C1, C2, C3, NC, CHUNK)

    # Host-side im2col for conv1 only, emitted directly in bf16; zero-pad to NC*CHUNK rows
    # and expose it as (NC, CHUNK, K1) so the grid can stream one chunk per step.
    p1 = _im2col_conv1(x, H1, W1).astype(jnp.bfloat16)
    pad = NC * CHUNK - M1
    if pad:
        p1 = jnp.concatenate([p1, jnp.zeros((pad, K1), jnp.bfloat16)], axis=0)
    p1 = p1.reshape(NC, CHUNK, K1)

    # bf16 MXU operands; biases b1/b2 are not passed (they cancel under batch-stat BN).
    args = (p1,
            params["w1"].astype(jnp.bfloat16), params["g1"], params["be1"],
            params["w2"].astype(jnp.bfloat16), params["g2"], params["be2"],
            params["w3"].astype(jnp.bfloat16), params["b3"])

    in_specs = [pl.BlockSpec((1, CHUNK, K1), lambda c: (c, 0, 0))]
    in_specs += [pl.BlockSpec(a.shape, _const_map(a.ndim)) for a in args[1:]]
    out_specs = pl.BlockSpec((B, C3), _const_map(2))

    return pl.pallas_call(
        kernel,
        out_shape=jax.ShapeDtypeStruct((B, C3), jnp.float32),
        grid=(NC,),
        in_specs=in_specs,
        out_specs=out_specs,
        scratch_shapes=[
            pltpu.VMEM((NC, CHUNK, C1), jnp.float32),   # pre-BN conv1 activations
            pltpu.VMEM((1, C1), jnp.float32),           # per-channel sum
            pltpu.VMEM((1, C1), jnp.float32),           # per-channel sum of squares
        ],
        compiler_params=pltpu.CompilerParams(
            dimension_semantics=("arbitrary",),
            vmem_limit_bytes=32 * 1024 * 1024),
    )(*args)


# --------------------------------------------------------------------------- params / reference
def init_params(key, l0, l1, l2, l3):
    ks = jax.random.split(key, 6)

    def u(k, shape, fan_in):
        b = 1.0 / math.sqrt(fan_in)
        return jax.random.uniform(k, shape, jnp.float32, -b, b)

    p = {}
    p["w1"] = u(ks[0], (4, 4, l0, l1), 16 * l0).reshape(16 * l0, l1)   # (ki,kj,cin)-major K
    p["b1"] = u(ks[1], (1, l1), 16 * l0)
    p["g1"] = jnp.ones((1, l1), jnp.float32)
    p["be1"] = jnp.zeros((1, l1), jnp.float32)
    p["w2"] = u(ks[2], (3, 3, l1, l2), 9 * l1).reshape(9 * l1, l2)
    p["b2"] = u(ks[3], (1, l2), 9 * l1)
    p["g2"] = jnp.ones((1, l2), jnp.float32)
    p["be2"] = jnp.zeros((1, l2), jnp.float32)
    p["w3"] = u(ks[4], (2, 2, l2, l3), 4 * l2).reshape(4 * l2, l3)
    p["b3"] = u(ks[5], (1, l3), 4 * l2)
    return p


def small_encoder_reference(x, params, eps=1e-5):
    """Pure-JAX (XLA) reference mirroring the PyTorch forward, for correctness checking."""
    Cin = x.shape[1]
    C1, C2, C3 = params["g1"].shape[1], params["g2"].shape[1], params["b3"].shape[1]
    w1 = params["w1"].reshape(4, 4, Cin, C1)
    w2 = params["w2"].reshape(3, 3, C1, C2)
    w3 = params["w3"].reshape(2, 2, C2, C3)

    def conv(y, w, b, s):
        y = lax.conv_general_dilated(y, w, (s, s), "VALID",
                                     dimension_numbers=("NCHW", "HWIO", "NCHW"),
                                     precision=lax.Precision.HIGHEST)
        return y + b.reshape(1, -1, 1, 1)

    def bn(y, g, be):
        mu = jnp.mean(y, axis=(0, 2, 3), keepdims=True)
        var = jnp.mean(jnp.square(y - mu), axis=(0, 2, 3), keepdims=True)
        return (y - mu) / jnp.sqrt(var + eps) * g.reshape(1, -1, 1, 1) + be.reshape(1, -1, 1, 1)

    def maxpool2(y):
        return lax.reduce_window(y, -jnp.inf, lax.max, (1, 1, 2, 2), (1, 1, 2, 2), "VALID")

    y = maxpool2(jax.nn.relu(bn(conv(x, w1, params["b1"], 2), params["g1"], params["be1"])))
    y = maxpool2(jax.nn.relu(bn(conv(y, w2, params["b2"], 2), params["g2"], params["be2"])))
    y = jnp.tanh(conv(y, w3, params["b3"], 2))      # norm3 = identity, pool3(1,1) = identity
    return jnp.mean(y, axis=(2, 3))                 # AdaptiveAvgPool2d((1,1)) + Flatten


# --------------------------------------------------------------------------- main
if __name__ == "__main__":
    # 48x48 is the smallest round size that survives the conv/pool chain (conv3 out = 1x1);
    # B is a multiple of 8 so the in-kernel (H, W, B, C) layout is tile-aligned, and
    # l3 = 128 makes the kernel's only HBM store lane-dense.
    B, Cin, H, W = 8, 4, 48, 48
    L1, L2, L3 = 32, 64, 128

    key = jax.random.PRNGKey(0)
    kx, kp = jax.random.split(key)
    x = jax.random.normal(kx, (B, Cin, H, W), dtype=jnp.float32)
    params = init_params(kp, Cin, L1, L2, L3)

    out = jax.block_until_ready(small_encoder_forward(x, params))

    assert out.shape == (B, L3), out.shape
    assert bool(jnp.all(jnp.isfinite(out)))

    ref = small_encoder_reference(x, params)
    # Tolerance covers explicit bf16 MXU operands (f32 accumulate) vs. the HIGHEST-precision
    # XLA reference; a structural bug would show up as O(0.1-1) errors on these outputs.
    err = float(jnp.max(jnp.abs(out - ref)))
    assert bool(jnp.allclose(out, ref, atol=3e-2, rtol=3e-2)), err
    print("KERNEL_OK")
</pallas_src>

<mosaic_0001>
module attributes {stable_mosaic.version = 11 : i64} {
  func.func @kernel(%arg0: i32, %arg1: memref<1x1064x64xbf16, #tpu.memory_space<vmem>>, %arg2: memref<64x32xbf16, #tpu.memory_space<vmem>>, %arg3: memref<1x32xf32, #tpu.memory_space<vmem>>, %arg4: memref<1x32xf32, #tpu.memory_space<vmem>>, %arg5: memref<288x64xbf16, #tpu.memory_space<vmem>>, %arg6: memref<1x64xf32, #tpu.memory_space<vmem>>, %arg7: memref<1x64xf32, #tpu.memory_space<vmem>>, %arg8: memref<256x128xbf16, #tpu.memory_space<vmem>>, %arg9: memref<1x128xf32, #tpu.memory_space<vmem>>, %arg10: memref<8x128xf32, #tpu.memory_space<vmem>>, %arg11: memref<4x1064x32xf32, #tpu.memory_space<vmem>>, %arg12: memref<1x32xf32, #tpu.memory_space<vmem>>, %arg13: memref<1x32xf32, #tpu.memory_space<vmem>>) attributes {dimension_semantics = [#tpu.dimension_semantics<arbitrary>], iteration_bounds = array<i64: 4>, scalar_prefetch = 0 : i64, scratch_operands = 3 : i64, tpu.core_type = #tpu.core_type<tc>, window_params = [{transform_indices = @transform_0, window_bounds = array<i64: 1, 1064, 64>}, {pipeline_mode = #tpu.pipeline_mode<synchronous>, transform_indices = @transform_1, window_bounds = array<i64: 64, 32>}, {pipeline_mode = #tpu.pipeline_mode<synchronous>, transform_indices = @transform_2, window_bounds = array<i64: 1, 32>}, {pipeline_mode = #tpu.pipeline_mode<synchronous>, transform_indices = @transform_3, window_bounds = array<i64: 1, 32>}, {pipeline_mode = #tpu.pipeline_mode<synchronous>, transform_indices = @transform_4, window_bounds = array<i64: 288, 64>}, {pipeline_mode = #tpu.pipeline_mode<synchronous>, transform_indices = @transform_5, window_bounds = array<i64: 1, 64>}, {pipeline_mode = #tpu.pipeline_mode<synchronous>, transform_indices = @transform_6, window_bounds = array<i64: 1, 64>}, {pipeline_mode = #tpu.pipeline_mode<synchronous>, transform_indices = @transform_7, window_bounds = array<i64: 256, 128>}, {pipeline_mode = #tpu.pipeline_mode<synchronous>, transform_indices = @transform_8, window_bounds = array<i64: 1, 128>}, {pipeline_mode = #tpu.pipeline_mode<synchronous>, transform_indices = @transform_9, window_bounds = array<i64: 8, 128>}]} {
    %c0_i32 = arith.constant 0 : i32
    %0 = arith.cmpi eq, %arg0, %c0_i32 : i32
    %1 = arith.extui %0 : i1 to i32
    %c0_i32_0 = arith.constant 0 : i32
    %2 = arith.cmpi ne, %1, %c0_i32_0 : i32
    scf.if %2 {
      %cst_18 = arith.constant 0.000000e+00 : f32
      %25 = vector.broadcast %cst_18 : f32 to vector<1x32xf32>
      %c0_19 = arith.constant 0 : index
      %c0_20 = arith.constant 0 : index
      %26 = vector.load %arg12[%c0_19, %c0_20] : memref<1x32xf32, #tpu.memory_space<vmem>>, vector<1x32xf32>
      tpu.vector_store %arg12[%c0_19, %c0_20], %25 {strides = array<i32>} : memref<1x32xf32, #tpu.memory_space<vmem>>, vector<1x32xf32>,
      %cst_21 = arith.constant 0.000000e+00 : f32
      %27 = vector.broadcast %cst_21 : f32 to vector<1x32xf32>
      %c0_22 = arith.constant 0 : index
      %c0_23 = arith.constant 0 : index
      %28 = vector.load %arg13[%c0_22, %c0_23] : memref<1x32xf32, #tpu.memory_space<vmem>>, vector<1x32xf32>
      tpu.vector_store %arg13[%c0_22, %c0_23], %27 {strides = array<i32>} : memref<1x32xf32, #tpu.memory_space<vmem>>, vector<1x32xf32>,
    } else {
    }
    %c0 = arith.constant 0 : index
    %c0_1 = arith.constant 0 : index
    %c0_2 = arith.constant 0 : index
    %3 = vector.load %arg1[%c0, %c0_1, %c0_2] : memref<1x1064x64xbf16, #tpu.memory_space<vmem>>, vector<1x1064x64xbf16>
    %4 = vector.shape_cast %3 : vector<1x1064x64xbf16> to vector<1064x64xbf16>
    %c0_3 = arith.constant 0 : index
    %c0_4 = arith.constant 0 : index
    %5 = vector.load %arg2[%c0_3, %c0_4] : memref<64x32xbf16, #tpu.memory_space<vmem>>, vector<64x32xbf16>
    %cst = arith.constant dense<0.000000e+00> : vector<1064x32xf32>
    %6 = tpu.matmul %4, %5, %cst {dimension_numbers = #tpu.dot_dimension_numbers<[1], [0], [0], [1], [0, 0, 1, 1], [], []>} : vector<1064x64xbf16>, vector<64x32xbf16>, vector<1064x32xf32> -> vector<1064x32xf32>
    %7 = arith.index_cast %arg0 : i32 to index
    %c0_5 = arith.constant 0 : index
    %c0_6 = arith.constant 0 : index
    %8 = vector.load %arg11[%7, %c0_5, %c0_6] : memref<4x1064x32xf32, #tpu.memory_space<vmem>>, vector<1x1064x32xf32>
    %9 = vector.shape_cast %8 : vector<1x1064x32xf32> to vector<1064x32xf32>
    %10 = vector.shape_cast %6 : vector<1064x32xf32> to vector<1x1064x32xf32>
    tpu.vector_store %arg11[%7, %c0_5, %c0_6], %10 {strides = array<i32>} : memref<4x1064x32xf32, #tpu.memory_space<vmem>>, vector<1x1064x32xf32>,
    %c0_7 = arith.constant 0 : index
    %c0_8 = arith.constant 0 : index
    %11 = vector.load %arg12[%c0_7, %c0_8] : memref<1x32xf32, #tpu.memory_space<vmem>>, vector<1x32xf32>
    %cst_9 = arith.constant dense<0.000000e+00> : vector<32xf32>
    %12 = vector.multi_reduction <add>, %6, %cst_9 [0] : vector<1064x32xf32> to vector<32xf32>
    %13 = vector.shape_cast %12 : vector<32xf32> to vector<1x32xf32>
    %14 = arith.addf %11, %13 : vector<1x32xf32>
    %c0_10 = arith.constant 0 : index
    %c0_11 = arith.constant 0 : index
    %15 = vector.load %arg12[%c0_10, %c0_11] : memref<1x32xf32, #tpu.memory_space<vmem>>, vector<1x32xf32>
    tpu.vector_store %arg12[%c0_10, %c0_11], %14 {strides = array<i32>} : memref<1x32xf32, #tpu.memory_space<vmem>>, vector<1x32xf32>,
    %c0_12 = arith.constant 0 : index
    %c0_13 = arith.constant 0 : index
    %16 = vector.load %arg13[%c0_12, %c0_13] : memref<1x32xf32, #tpu.memory_space<vmem>>, vector<1x32xf32>
    %17 = arith.mulf %6, %6 : vector<1064x32xf32>
    %cst_14 = arith.constant dense<0.000000e+00> : vector<32xf32>
    %18 = vector.multi_reduction <add>, %17, %cst_14 [0] : vector<1064x32xf32> to vector<32xf32>
    %19 = vector.shape_cast %18 : vector<32xf32> to vector<1x32xf32>
    %20 = arith.addf %16, %19 : vector<1x32xf32>
    %c0_15 = arith.constant 0 : index
    %c0_16 = arith.constant 0 : index
    %21 = vector.load %arg13[%c0_15, %c0_16] : memref<1x32xf32, #tpu.memory_space<vmem>>, vector<1x32xf32>
    tpu.vector_store %arg13[%c0_15, %c0_16], %20 {strides = array<i32>} : memref<1x32xf32, #tpu.memory_space<vmem>>, vector<1x32xf32>,
    %c3_i32 = arith.constant 3 : i32
    %22 = arith.cmpi eq, %arg0, %c3_i32 : i32
    %23 = arith.extui %22 : i1 to i32
    %c0_i32_17 = arith.constant 0 : i32
    %24 = arith.cmpi ne, %23, %c0_i32_17 : i32
    scf.if %24 {
      %c0_18 = arith.constant 0 : index
      %c0_19 = arith.constant 0 : index
      %25 = vector.load %arg12[%c0_18, %c0_19] : memref<1x32xf32, #tpu.memory_space<vmem>>, vector<1x32xf32>
      %cst_20 = arith.constant 4.232000e+03 : f32
      %26 = vector.broadcast %cst_20 : f32 to vector<1x32xf32>
      %27 = arith.divf %25, %26 : vector<1x32xf32>
      %c0_21 = arith.constant 0 : index
      %c0_22 = arith.constant 0 : index
      %28 = vector.load %arg13[%c0_21, %c0_22] : memref<1x32xf32, #tpu.memory_space<vmem>>, vector<1x32xf32>
      %cst_23 = arith.constant 4.232000e+03 : f32
      %29 = vector.broadcast %cst_23 : f32 to vector<1x32xf32>
      %30 = arith.divf %28, %29 : vector<1x32xf32>
      %31 = arith.mulf %27, %27 : vector<1x32xf32>
      %32 = arith.subf %30, %31 : vector<1x32xf32>
      %c0_24 = arith.constant 0 : index
      %c0_25 = arith.constant 0 : index
      %c0_26 = arith.constant 0 : index
      %33 = vector.load %arg11[%c0_24, %c0_25, %c0_26] : memref<4x1064x32xf32, #tpu.memory_space<vmem>>, vector<4x1064x32xf32>
      %34 = vector.shape_cast %33 : vector<4x1064x32xf32> to vector<4256x32xf32>
      %35 = vector.extract_strided_slice %34 {offsets = [0, 0], sizes = [4232, 32], strides = [1, 1]} : vector<4256x32xf32> to vector<4232x32xf32>
      %36 = vector.broadcast %27 : vector<1x32xf32> to vector<4232x32xf32>
      %37 = arith.subf %35, %36 : vector<4232x32xf32>
      %cst_27 = arith.constant 9.99999974E-6 : f32
      %38 = vector.broadcast %cst_27 : f32 to vector<1x32xf32>
      %39 = arith.addf %32, %38 : vector<1x32xf32>
      %40 = math.rsqrt %39 : vector<1x32xf32>
      %41 = vector.broadcast %40 : vector<1x32xf32> to vector<4232x32xf32>
      %42 = arith.mulf %37, %41 : vector<4232x32xf32>
      %c0_28 = arith.constant 0 : index
      %c0_29 = arith.constant 0 : index
      %43 = vector.load %arg3[%c0_28, %c0_29] : memref<1x32xf32, #tpu.memory_space<vmem>>, vector<1x32xf32>
      %44 = vector.broadcast %43 : vector<1x32xf32> to vector<4232x32xf32>
      %45 = arith.mulf %42, %44 : vector<4232x32xf32>
      %c0_30 = arith.constant 0 : index
      %c0_31 = arith.constant 0 : index
      %46 = vector.load %arg4[%c0_30, %c0_31] : memref<1x32xf32, #tpu.memory_space<vmem>>, vector<1x32xf32>
      %47 = vector.broadcast %46 : vector<1x32xf32> to vector<4232x32xf32>
      %48 = arith.addf %45, %47 : vector<4232x32xf32>
      %cst_32 = arith.constant 0.000000e+00 : f32
      %49 = vector.broadcast %cst_32 : f32 to vector<4232x32xf32>
      %50 = arith.maximumf %48, %49 : vector<4232x32xf32>
      %51 = vector.shape_cast %50 : vector<4232x32xf32> to vector<23x23x8x32xf32>
      %52 = vector.extract_strided_slice %51 {offsets = [0, 0, 0, 0], sizes = [22, 23, 8, 32], strides = [1, 1, 1, 1]} : vector<23x23x8x32xf32> to vector<22x23x8x32xf32>
      %53 = vector.shape_cast %52 : vector<22x23x8x32xf32> to vector<11x2x23x8x32xf32>
      %54 = vector.extract_strided_slice %53 {offsets = [0, 0, 0, 0, 0], sizes = [11, 1, 23, 8, 32], strides = [1, 1, 1, 1, 1]} : vector<11x2x23x8x32xf32> to vector<11x1x23x8x32xf32>
      %55 = vector.shape_cast %54 : vector<11x1x23x8x32xf32> to vector<11x23x8x32xf32>
      %56 = vector.extract_strided_slice %53 {offsets = [0, 1, 0, 0, 0], sizes = [11, 1, 23, 8, 32], strides = [1, 1, 1, 1, 1]} : vector<11x2x23x8x32xf32> to vector<11x1x23x8x32xf32>
      %57 = vector.shape_cast %56 : vector<11x1x23x8x32xf32> to vector<11x23x8x32xf32>
      %58 = arith.maximumf %55, %57 : vector<11x23x8x32xf32>
      %59 = vector.extract_strided_slice %58 {offsets = [0, 0, 0, 0], sizes = [11, 22, 8, 32], strides = [1, 1, 1, 1]} : vector<11x23x8x32xf32> to vector<11x22x8x32xf32>
      %60 = vector.shape_cast %59 : vector<11x22x8x32xf32> to vector<11x11x2x8x32xf32>
      %61 = vector.extract_strided_slice %60 {offsets = [0, 0, 0, 0, 0], sizes = [11, 11, 1, 8, 32], strides = [1, 1, 1, 1, 1]} : vector<11x11x2x8x32xf32> to vector<11x11x1x8x32xf32>
      %62 = vector.shape_cast %61 : vector<11x11x1x8x32xf32> to vector<11x11x8x32xf32>
      %63 = vector.extract_strided_slice %60 {offsets = [0, 0, 1, 0, 0], sizes = [11, 11, 1, 8, 32], strides = [1, 1, 1, 1, 1]} : vector<11x11x2x8x32xf32> to vector<11x11x1x8x32xf32>
      %64 = vector.shape_cast %63 : vector<11x11x1x8x32xf32> to vector<11x11x8x32xf32>
      %65 = arith.maximumf %62, %64 : vector<11x11x8x32xf32>
      %66 = vector.extract_strided_slice %65 {offsets = [10, 0, 0, 0], sizes = [1, 11, 8, 32], strides = [1, 1, 1, 1]} : vector<11x11x8x32xf32> to vector<1x11x8x32xf32>
      %67 = tpu.concatenate %65, %66 in 0 : vector<11x11x8x32xf32>, vector<1x11x8x32xf32> -> vector<12x11x8x32xf32>
      %68 = vector.shape_cast %67 : vector<12x11x8x32xf32> to vector<6x2x11x8x32xf32>
      %69 = vector.extract_strided_slice %68 {offsets = [0, 0, 0, 0, 0], sizes = [6, 1, 11, 8, 32], strides = [1, 1, 1, 1, 1]} : vector<6x2x11x8x32xf32> to vector<6x1x11x8x32xf32>
      %70 = vector.shape_cast %69 : vector<6x1x11x8x32xf32> to vector<6x11x8x32xf32>
      %71 = vector.extract_strided_slice %68 {offsets = [0, 1, 0, 0, 0], sizes = [6, 1, 11, 8, 32], strides = [1, 1, 1, 1, 1]} : vector<6x2x11x8x32xf32> to vector<6x1x11x8x32xf32>
      %72 = vector.shape_cast %71 : vector<6x1x11x8x32xf32> to vector<6x11x8x32xf32>
      %73 = vector.extract_strided_slice %70 {offsets = [0, 10, 0, 0], sizes = [6, 1, 8, 32], strides = [1, 1, 1, 1]} : vector<6x11x8x32xf32> to vector<6x1x8x32xf32>
      %74 = tpu.concatenate %70, %73 in 1 : vector<6x11x8x32xf32>, vector<6x1x8x32xf32> -> vector<6x12x8x32xf32>
      %75 = vector.shape_cast %74 : vector<6x12x8x32xf32> to vector<6x6x2x8x32xf32>
      %76 = vector.extract_strided_slice %75 {offsets = [0, 0, 0, 0, 0], sizes = [6, 6, 1, 8, 32], strides = [1, 1, 1, 1, 1]} : vector<6x6x2x8x32xf32> to vector<6x6x1x8x32xf32>
      %77 = vector.shape_cast %76 : vector<6x6x1x8x32xf32> to vector<6x6x8x32xf32>
      %78 = vector.extract_strided_slice %75 {offsets = [0, 0, 1, 0, 0], sizes = [6, 6, 1, 8, 32], strides = [1, 1, 1, 1, 1]} : vector<6x6x2x8x32xf32> to vector<6x6x1x8x32xf32>
      %79 = vector.shape_cast %78 : vector<6x6x1x8x32xf32> to vector<6x6x8x32xf32>
      %80 = vector.extract_strided_slice %72 {offsets = [0, 10, 0, 0], sizes = [6, 1, 8, 32], strides = [1, 1, 1, 1]} : vector<6x11x8x32xf32> to vector<6x1x8x32xf32>
      %81 = tpu.concatenate %72, %80 in 1 : vector<6x11x8x32xf32>, vector<6x1x8x32xf32> -> vector<6x12x8x32xf32>
      %82 = vector.shape_cast %81 : vector<6x12x8x32xf32> to vector<6x6x2x8x32xf32>
      %83 = vector.extract_strided_slice %82 {offsets = [0, 0, 0, 0, 0], sizes = [6, 6, 1, 8, 32], strides = [1, 1, 1, 1, 1]} : vector<6x6x2x8x32xf32> to vector<6x6x1x8x32xf32>
      %84 = vector.shape_cast %83 : vector<6x6x1x8x32xf32> to vector<6x6x8x32xf32>
      %85 = vector.extract_strided_slice %82 {offsets = [0, 0, 1, 0, 0], sizes = [6, 6, 1, 8, 32], strides = [1, 1, 1, 1, 1]} : vector<6x6x2x8x32xf32> to vector<6x6x1x8x32xf32>
      %86 = vector.shape_cast %85 : vector<6x6x1x8x32xf32> to vector<6x6x8x32xf32>
      %87 = vector.extract_strided_slice %77 {offsets = [0, 0, 0, 0], sizes = [5, 5, 8, 32], strides = [1, 1, 1, 1]} : vector<6x6x8x32xf32> to vector<5x5x8x32xf32>
      %88 = vector.shape_cast %87 : vector<5x5x8x32xf32> to vector<200x32xf32>
      %89 = vector.extract_strided_slice %79 {offsets = [0, 0, 0, 0], sizes = [5, 5, 8, 32], strides = [1, 1, 1, 1]} : vector<6x6x8x32xf32> to vector<5x5x8x32xf32>
      %90 = vector.shape_cast %89 : vector<5x5x8x32xf32> to vector<200x32xf32>
      %91 = vector.extract_strided_slice %77 {offsets = [0, 1, 0, 0], sizes = [5, 5, 8, 32], strides = [1, 1, 1, 1]} : vector<6x6x8x32xf32> to vector<5x5x8x32xf32>
      %92 = vector.shape_cast %91 : vector<5x5x8x32xf32> to vector<200x32xf32>
      %93 = vector.extract_strided_slice %84 {offsets = [0, 0, 0, 0], sizes = [5, 5, 8, 32], strides = [1, 1, 1, 1]} : vector<6x6x8x32xf32> to vector<5x5x8x32xf32>
      %94 = vector.shape_cast %93 : vector<5x5x8x32xf32> to vector<200x32xf32>
      %95 = vector.extract_strided_slice %86 {offsets = [0, 0, 0, 0], sizes = [5, 5, 8, 32], strides = [1, 1, 1, 1]} : vector<6x6x8x32xf32> to vector<5x5x8x32xf32>
      %96 = vector.shape_cast %95 : vector<5x5x8x32xf32> to vector<200x32xf32>
      %97 = vector.extract_strided_slice %84 {offsets = [0, 1, 0, 0], sizes = [5, 5, 8, 32], strides = [1, 1, 1, 1]} : vector<6x6x8x32xf32> to vector<5x5x8x32xf32>
      %98 = vector.shape_cast %97 : vector<5x5x8x32xf32> to vector<200x32xf32>
      %99 = vector.extract_strided_slice %77 {offsets = [1, 0, 0, 0], sizes = [5, 5, 8, 32], strides = [1, 1, 1, 1]} : vector<6x6x8x32xf32> to vector<5x5x8x32xf32>
      %100 = vector.shape_cast %99 : vector<5x5x8x32xf32> to vector<200x32xf32>
      %101 = vector.extract_strided_slice %79 {offsets = [1, 0, 0, 0], sizes = [5, 5, 8, 32], strides = [1, 1, 1, 1]} : vector<6x6x8x32xf32> to vector<5x5x8x32xf32>
      %102 = vector.shape_cast %101 : vector<5x5x8x32xf32> to vector<200x32xf32>
      %103 = vector.extract_strided_slice %77 {offsets = [1, 1, 0, 0], sizes = [5, 5, 8, 32], strides = [1, 1, 1, 1]} : vector<6x6x8x32xf32> to vector<5x5x8x32xf32>
      %104 = vector.shape_cast %103 : vector<5x5x8x32xf32> to vector<200x32xf32>
      %105 = tpu.concatenate %88, %90, %92, %94, %96, %98, %100, %102, %104 in 1 : vector<200x32xf32>, vector<200x32xf32>, vector<200x32xf32>, vector<200x32xf32>, vector<200x32xf32>, vector<200x32xf32>, vector<200x32xf32>, vector<200x32xf32>, vector<200x32xf32> -> vector<200x288xf32>
      %106 = arith.truncf %105 : vector<200x288xf32> to vector<200x288xbf16>
      %c0_33 = arith.constant 0 : index
      %c0_34 = arith.constant 0 : index
      %107 = vector.load %arg5[%c0_33, %c0_34] : memref<288x64xbf16, #tpu.memory_space<vmem>>, vector<288x64xbf16>
      %cst_35 = arith.constant dense<0.000000e+00> : vector<200x64xf32>
      %108 = tpu.matmul %106, %107, %cst_35 {dimension_numbers = #tpu.dot_dimension_numbers<[1], [0], [0], [1], [0, 0, 1, 1], [], []>} : vector<200x288xbf16>, vector<288x64xbf16>, vector<200x64xf32> -> vector<200x64xf32>
      %c0_36 = arith.constant 0 : index
      %c0_37 = arith.constant 0 : index
      %109 = vector.load %arg6[%c0_36, %c0_37] : memref<1x64xf32, #tpu.memory_space<vmem>>, vector<1x64xf32>
      %c0_38 = arith.constant 0 : index
      %c0_39 = arith.constant 0 : index
      %110 = vector.load %arg7[%c0_38, %c0_39] : memref<1x64xf32, #tpu.memory_space<vmem>>, vector<1x64xf32>
      %cst_40 = arith.constant dense<0.000000e+00> : vector<64xf32>
      %111 = vector.multi_reduction <add>, %108, %cst_40 [0] : vector<200x64xf32> to vector<64xf32>
      %112 = vector.shape_cast %111 : vector<64xf32> to vector<1x64xf32>
      %cst_41 = arith.constant 2.000000e+02 : f32
      %113 = vector.broadcast %cst_41 : f32 to vector<1x64xf32>
      %114 = arith.divf %112, %113 : vector<1x64xf32>
      %115 = arith.mulf %108, %108 : vector<200x64xf32>
      %cst_42 = arith.constant dense<0.000000e+00> : vector<64xf32>
      %116 = vector.multi_reduction <add>, %115, %cst_42 [0] : vector<200x64xf32> to vector<64xf32>
      %117 = vector.shape_cast %116 : vector<64xf32> to vector<1x64xf32>
      %cst_43 = arith.constant 2.000000e+02 : f32
      %118 = vector.broadcast %cst_43 : f32 to vector<1x64xf32>
      %119 = arith.divf %117, %118 : vector<1x64xf32>
      %120 = arith.mulf %114, %114 : vector<1x64xf32>
      %121 = arith.subf %119, %120 : vector<1x64xf32>
      %122 = vector.broadcast %114 : vector<1x64xf32> to vector<200x64xf32>
      %123 = arith.subf %108, %122 : vector<200x64xf32>
      %cst_44 = arith.constant 9.99999974E-6 : f32
      %124 = vector.broadcast %cst_44 : f32 to vector<1x64xf32>
      %125 = arith.addf %121, %124 : vector<1x64xf32>
      %126 = math.rsqrt %125 : vector<1x64xf32>
      %127 = vector.broadcast %126 : vector<1x64xf32> to vector<200x64xf32>
      %128 = arith.mulf %123, %127 : vector<200x64xf32>
      %129 = vector.broadcast %109 : vector<1x64xf32> to vector<200x64xf32>
      %130 = arith.mulf %128, %129 : vector<200x64xf32>
      %131 = vector.broadcast %110 : vector<1x64xf32> to vector<200x64xf32>
      %132 = arith.addf %130, %131 : vector<200x64xf32>
      %cst_45 = arith.constant 0.000000e+00 : f32
      %133 = vector.broadcast %cst_45 : f32 to vector<200x64xf32>
      %134 = arith.maximumf %132, %133 : vector<200x64xf32>
      %135 = vector.shape_cast %134 : vector<200x64xf32> to vector<5x5x8x64xf32>
      %136 = vector.extract_strided_slice %135 {offsets = [0, 0, 0, 0], sizes = [4, 5, 8, 64], strides = [1, 1, 1, 1]} : vector<5x5x8x64xf32> to vector<4x5x8x64xf32>
      %137 = vector.shape_cast %136 : vector<4x5x8x64xf32> to vector<2x2x5x8x64xf32>
      %138 = vector.extract_strided_slice %137 {offsets = [0, 0, 0, 0, 0], sizes = [2, 1, 5, 8, 64], strides = [1, 1, 1, 1, 1]} : vector<2x2x5x8x64xf32> to vector<2x1x5x8x64xf32>
      %139 = vector.shape_cast %138 : vector<2x1x5x8x64xf32> to vector<2x5x8x64xf32>
      %140 = vector.extract_strided_slice %137 {offsets = [0, 1, 0, 0, 0], sizes = [2, 1, 5, 8, 64], strides = [1, 1, 1, 1, 1]} : vector<2x2x5x8x64xf32> to vector<2x1x5x8x64xf32>
      %141 = vector.shape_cast %140 : vector<2x1x5x8x64xf32> to vector<2x5x8x64xf32>
      %142 = arith.maximumf %139, %141 : vector<2x5x8x64xf32>
      %143 = vector.extract_strided_slice %142 {offsets = [0, 0, 0, 0], sizes = [2, 4, 8, 64], strides = [1, 1, 1, 1]} : vector<2x5x8x64xf32> to vector<2x4x8x64xf32>
      %144 = vector.shape_cast %143 : vector<2x4x8x64xf32> to vector<2x2x2x8x64xf32>
      %145 = vector.extract_strided_slice %144 {offsets = [0, 0, 0, 0, 0], sizes = [2, 2, 1, 8, 64], strides = [1, 1, 1, 1, 1]} : vector<2x2x2x8x64xf32> to vector<2x2x1x8x64xf32>
      %146 = vector.shape_cast %145 : vector<2x2x1x8x64xf32> to vector<2x2x8x64xf32>
      %147 = vector.extract_strided_slice %144 {offsets = [0, 0, 1, 0, 0], sizes = [2, 2, 1, 8, 64], strides = [1, 1, 1, 1, 1]} : vector<2x2x2x8x64xf32> to vector<2x2x1x8x64xf32>
      %148 = vector.shape_cast %147 : vector<2x2x1x8x64xf32> to vector<2x2x8x64xf32>
      %149 = arith.maximumf %146, %148 : vector<2x2x8x64xf32>
      %150 = vector.shape_cast %149 : vector<2x2x8x64xf32> to vector<1x2x2x8x64xf32>
      %151 = vector.extract_strided_slice %150 {offsets = [0, 0, 0, 0, 0], sizes = [1, 1, 2, 8, 64], strides = [1, 1, 1, 1, 1]} : vector<1x2x2x8x64xf32> to vector<1x1x2x8x64xf32>
      %152 = vector.shape_cast %151 : vector<1x1x2x8x64xf32> to vector<1x2x8x64xf32>
      %153 = vector.extract_strided_slice %150 {offsets = [0, 1, 0, 0, 0], sizes = [1, 1, 2, 8, 64], strides = [1, 1, 1, 1, 1]} : vector<1x2x2x8x64xf32> to vector<1x1x2x8x64xf32>
      %154 = vector.shape_cast %153 : vector<1x1x2x8x64xf32> to vector<1x2x8x64xf32>
      %155 = vector.shape_cast %152 : vector<1x2x8x64xf32> to vector<1x1x2x8x64xf32>
      %156 = vector.extract_strided_slice %155 {offsets = [0, 0, 0, 0, 0], sizes = [1, 1, 1, 8, 64], strides = [1, 1, 1, 1, 1]} : vector<1x1x2x8x64xf32> to vector<1x1x1x8x64xf32>
      %157 = vector.shape_cast %156 : vector<1x1x1x8x64xf32> to vector<1x1x8x64xf32>
      %158 = vector.extract_strided_slice %155 {offsets = [0, 0, 1, 0, 0], sizes = [1, 1, 1, 8, 64], strides = [1, 1, 1, 1, 1]} : vector<1x1x2x8x64xf32> to vector<1x1x1x8x64xf32>
      %159 = vector.shape_cast %158 : vector<1x1x1x8x64xf32> to vector<1x1x8x64xf32>
      %160 = vector.shape_cast %154 : vector<1x2x8x64xf32> to vector<1x1x2x8x64xf32>
      %161 = vector.extract_strided_slice %160 {offsets = [0, 0, 0, 0, 0], sizes = [1, 1, 1, 8, 64], strides = [1, 1, 1, 1, 1]} : vector<1x1x2x8x64xf32> to vector<1x1x1x8x64xf32>
      %162 = vector.shape_cast %161 : vector<1x1x1x8x64xf32> to vector<1x1x8x64xf32>
      %163 = vector.extract_strided_slice %160 {offsets = [0, 0, 1, 0, 0], sizes = [1, 1, 1, 8, 64], strides = [1, 1, 1, 1, 1]} : vector<1x1x2x8x64xf32> to vector<1x1x1x8x64xf32>
      %164 = vector.shape_cast %163 : vector<1x1x1x8x64xf32> to vector<1x1x8x64xf32>
      %165 = vector.shape_cast %157 : vector<1x1x8x64xf32> to vector<8x64xf32>
      %166 = vector.shape_cast %159 : vector<1x1x8x64xf32> to vector<8x64xf32>
      %167 = vector.shape_cast %162 : vector<1x1x8x64xf32> to vector<8x64xf32>
      %168 = vector.shape_cast %164 : vector<1x1x8x64xf32> to vector<8x64xf32>
      %169 = tpu.concatenate %165, %166, %167, %168 in 1 : vector<8x64xf32>, vector<8x64xf32>, vector<8x64xf32>, vector<8x64xf32> -> vector<8x256xf32>
      %170 = arith.truncf %169 : vector<8x256xf32> to vector<8x256xbf16>
      %c0_46 = arith.constant 0 : index
      %c0_47 = arith.constant 0 : index
      %171 = vector.load %arg8[%c0_46, %c0_47] : memref<256x128xbf16, #tpu.memory_space<vmem>>, vector<256x128xbf16>
      %cst_48 = arith.constant dense<0.000000e+00> : vector<8x128xf32>
      %172 = tpu.matmul %170, %171, %cst_48 {dimension_numbers = #tpu.dot_dimension_numbers<[1], [0], [0], [1], [0, 0, 1, 1], [], []>} : vector<8x256xbf16>, vector<256x128xbf16>, vector<8x128xf32> -> vector<8x128xf32>
      %c0_49 = arith.constant 0 : index
      %c0_50 = arith.constant 0 : index
      %173 = vector.load %arg9[%c0_49, %c0_50] : memref<1x128xf32, #tpu.memory_space<vmem>>, vector<1x128xf32>
      %174 = vector.broadcast %173 : vector<1x128xf32> to vector<8x128xf32>
      %175 = arith.addf %172, %174 : vector<8x128xf32>
      %176 = math.tanh %175 : vector<8x128xf32>
      %177 = vector.shape_cast %176 : vector<8x128xf32> to vector<1x8x128xf32>
      %cst_51 = arith.constant dense<0.000000e+00> : vector<8x128xf32>
      %178 = vector.multi_reduction <add>, %177, %cst_51 [0] : vector<1x8x128xf32> to vector<8x128xf32>
      %cst_52 = arith.constant 1.000000e+00 : f32
      %179 = vector.broadcast %cst_52 : f32 to vector<8x128xf32>
      %180 = arith.divf %178, %179 : vector<8x128xf32>
      %c0_53 = arith.constant 0 : index
      %c0_54 = arith.constant 0 : index
      %181 = vector.load %arg10[%c0_53, %c0_54] : memref<8x128xf32, #tpu.memory_space<vmem>>, vector<8x128xf32>
      tpu.vector_store %arg10[%c0_53, %c0_54], %180 {strides = array<i32>} : memref<8x128xf32, #tpu.memory_space<vmem>>, vector<8x128xf32>,
    } else {
    }
    return
  }
  func.func @transform_0(%arg0: i32) -> (i32, i32, i32) {
    %c0_i32 = arith.constant 0 : i32
    %c0_i32_0 = arith.constant 0 : i32
    %c0_i32_1 = arith.constant 0 : i32
    return %arg0, %c0_i32, %c0_i32_0 : i32, i32, i32
  }
  func.func @transform_1(%arg0: i32) -> (i32, i32) {
    %c0_i32 = arith.constant 0 : i32
    %c0_i32_0 = arith.constant 0 : i32
    %c0_i32_1 = arith.constant 0 : i32
    return %c0_i32, %c0_i32_0 : i32, i32
  }
  func.func @transform_2(%arg0: i32) -> (i32, i32) {
    %c0_i32 = arith.constant 0 : i32
    %c0_i32_0 = arith.constant 0 : i32
    %c0_i32_1 = arith.constant 0 : i32
    return %c0_i32, %c0_i32_0 : i32, i32
  }
  func.func @transform_3(%arg0: i32) -> (i32, i32) {
    %c0_i32 = arith.constant 0 : i32
    %c0_i32_0 = arith.constant 0 : i32
    %c0_i32_1 = arith.constant 0 : i32
    return %c0_i32, %c0_i32_0 : i32, i32
  }
  func.func @transform_4(%arg0: i32) -> (i32, i32) {
    %c0_i32 = arith.constant 0 : i32
    %c0_i32_0 = arith.constant 0 : i32
    %c0_i32_1 = arith.constant 0 : i32
    return %c0_i32, %c0_i32_0 : i32, i32
  }
  func.func @transform_5(%arg0: i32) -> (i32, i32) {
    %c0_i32 = arith.constant 0 : i32
    %c0_i32_0 = arith.constant 0 : i32
    %c0_i32_1 = arith.constant 0 : i32
    return %c0_i32, %c0_i32_0 : i32, i32
  }
  func.func @transform_6(%arg0: i32) -> (i32, i32) {
    %c0_i32 = arith.constant 0 : i32
    %c0_i32_0 = arith.constant 0 : i32
    %c0_i32_1 = arith.constant 0 : i32
    return %c0_i32, %c0_i32_0 : i32, i32
  }
  func.func @transform_7(%arg0: i32) -> (i32, i32) {
    %c0_i32 = arith.constant 0 : i32
    %c0_i32_0 = arith.constant 0 : i32
    %c0_i32_1 = arith.constant 0 : i32
    return %c0_i32, %c0_i32_0 : i32, i32
  }
  func.func @transform_8(%arg0: i32) -> (i32, i32) {
    %c0_i32 = arith.constant 0 : i32
    %c0_i32_0 = arith.constant 0 : i32
    %c0_i32_1 = arith.constant 0 : i32
    return %c0_i32, %c0_i32_0 : i32, i32
  }
  func.func @transform_9(%arg0: i32) -> (i32, i32) {
    %c0_i32 = arith.constant 0 : i32
    %c0_i32_0 = arith.constant 0 : i32
    %c0_i32_1 = arith.constant 0 : i32
    return %c0_i32, %c0_i32_0 : i32, i32
  }
}

</mosaic_0001>

<bundles_post_ra>
// kernel: small_encoder_forward.1
= control target key start
LH: loop header
LB: loop body
LE: loop exit
PB: predicated region body
PF: predicated region fallthrough
CT: control target
= control target key end

     0   :  { %14 = vsyncpa [#allocation6], 0  ;;  %s8675_s30 = smov 0   ;;  %s13583_s0 = inlined_call_operand.vmem [shape: bf16[4,1064,64], index: 0, kind: input, shape index: {}]   ;;  %s13584_s1 = inlined_call_operand.vmem [shape: bf16[64,32], index: 1, kind: input, shape index: {}]   ;;  %s13585_s2 = inlined_call_operand.vmem [shape: f32[1,32], index: 2, kind: input, shape index: {}]   ;;  %s13586_s3 = inlined_call_operand.vmem [shape: f32[1,32], index: 3, kind: input, shape index: {}]   ;;  %s13587_s4 = inlined_call_operand.vmem [shape: bf16[288,64], index: 4, kind: input, shape index: {}]   ;;  %s13588_s5 = inlined_call_operand.vmem [shape: f32[1,64], index: 5, kind: input, shape index: {}]   ;;  %s13589_s6 = inlined_call_operand.vmem [shape: f32[1,64], index: 6, kind: input, shape index: {}]   ;;  %s13590_s7 = inlined_call_operand.vmem [shape: bf16[256,128], index: 7, kind: input, shape index: {}]   ;;  %s13591_s8 = inlined_call_operand.vmem [shape: f32[1,128], index: 8, kind: input, shape index: {}]   ;;  %s13592_s9 = inlined_call_operand.hbm [shape: f32[8,128], index: 9, kind: output, shape index: {}]  }
   0x1 LB: > { %s8681_s10 = sadd.s32 4294967295, %s8614_s30   ;;  %p7349_p0 = scmp.ge.s32.totalorder %s8614_s30, 1  ;;  %s8614_s30 = sphi %s8675_s30, %s20_s30  }
   0x2   : > { %p283_p1 = scmp.lt.s32.totalorder %s8614_s30, 5 }
   0x4   : > { %p284_p2 = pnand %p7349_p0, %p283_p1 }
   0x6   : > { %287 = sbr.rel (%p284_p2) target bundleno = 2132 (0x854), region = 56 }
   0xd   : > { %p314_p3 = scmp.lt.s32.totalorder %s8681_s10, 3  ;;  %p7351_p4 = scmp.ne.s32.totalorder %s8681_s10, 0 }
   0xe   : > { %vm324_vm0 = vcmask (!%p7351_p4), 253952   ;;  %v8616_v0 = vmov (!%p7351_p4), 0.0  }
   0xf   : > { %s315_s11 = scalar_select %p314_p3, %s8681_s10, 3 }
  0x10   : > { %323 = sbr.rel (%p7351_p4) target bundleno = 23 (0x17), region = 60  ;;  %325 = vst.msk [vmem:[#allocation3] sm:$0x1] (!%p7351_p4), %vm324_vm0, %v8616_v0  ;;  %326 = vst.msk [vmem:[#allocation4] sm:$0x1] (!%p7351_p4), %vm324_vm0, %v8616_v0 }
  0x11   : > { %s8089_s12 = smul.u32 532, %s315_s11 }
  0x13   : > { %s8690_s15 = scalar_lea.vmem %s13583_s0, %s8089_s12 }
  0x17 PF: > { %v8113_v1 = vld [vmem:[%s13584_s1] sm:$0xff]   ;;  %v8617_v2 = vmov 0.0   ;;  %v8114_v3 = vld [vmem:[%s13584_s1 + $0x8] sm:$0xff]   ;;  %vm8618_vm1 = vmmov 0   ;;  %v8115_v4 = vld [vmem:[%s13584_s1 + $0x10] sm:$0xff]   ;;  %vm825_vm2 = vcmask 523264  }
  0x18   : > { %7749 = vmatprep.subr.bf16.mxu0 %v8617_v2  ;;  %8081 = vmatprep.subr.bf16.mxu1 %v8617_v2  ;;  %v8116_v5 = vld [vmem:[%s13584_s1 + $0x18] sm:$0xff]   ;;  %v8117_v6 = vld [vmem:[%s8690_s15] sm:$0xff]   ;;  %v8118_v7 = vld [vmem:[%s8690_s15 + $0x8] sm:$0xff]   ;;  %s1595_s24 = smul.u32 1064, %s8681_s10  ;;  %vm1597_vm3 = vcmask 261120   ;;  %vm2004_vm4 = vcmask 253952  }
  0x19   : > { %7750 = vmatpush3.bf16.msra.mxu0 %v8113_v1  ;;  %7757 = vmatprep.mubr.msk.bf16.mxu0 %vm8618_vm1, %v8617_v2  ;;  %v8135_v8 = vld [vmem:[%s8690_s15 + $0x110] sm:$0xff]   ;;  %v8137_v10 = vld [vmem:[%s8690_s15 + $0x118] sm:$0xff]   ;;  %v8139_v12 = vld [vmem:[%s8690_s15 + $0x120] sm:$0xff]   ;;  %p7490_p5 = scmp.ne.s32.totalorder %s8681_s10, 3 }
  0x1a   : > { %7751 = vmatprep.subr.bf16.mxu0 %v8617_v2  ;;  %8085 = vmatpush3.bf16.msra.mxu1 %v8113_v1  ;;  %v8119_v9 = vld [vmem:[%s8690_s15 + $0x10] sm:$0xff]   ;;  %v8120_v11 = vld [vmem:[%s8690_s15 + $0x18] sm:$0xff]   ;;  %v8121_v13 = vld [vmem:[%s8690_s15 + $0x20] sm:$0xff]   ;;  %s8930_s25 = scalar_lea.vmem [#allocation2], %s1595_s24 }
  0x1b   : > { %8082 = vmatprep.subr.bf16.mxu1 %v8617_v2  ;;  %7893 = vmatprep.mubr.msk.bf16.mxu1 %vm8618_vm1, %v8617_v2  ;;  %v8141_v14 = vld [vmem:[%s8690_s15 + $0x128] sm:$0xff]   ;;  %v8143_v16 = vld [vmem:[%s8690_s15 + $0x130] sm:$0xff]   ;;  %v8145_v18 = vld [vmem:[%s8690_s15 + $0x138] sm:$0xff]  }
  0x1c   : > { %v8122_v15 = vld [vmem:[%s8690_s15 + $0x28] sm:$0xff]   ;;  %v8123_v17 = vld [vmem:[%s8690_s15 + $0x30] sm:$0xff]   ;;  %v8124_v19 = vld [vmem:[%s8690_s15 + $0x38] sm:$0xff]  }
  0x1d   : > { %7752 = vmatpush3.bf16.msra.mxu0 %v8114_v3  ;;  %v8147_v20 = vld [vmem:[%s8690_s15 + $0x140] sm:$0xff]   ;;  %v8149_v22 = vld [vmem:[%s8690_s15 + $0x148] sm:$0xff]   ;;  %v8151_v24 = vld [vmem:[%s8690_s15 + $0x150] sm:$0xff]  }
  0x1e   : > { %7753 = vmatprep.subr.bf16.mxu0 %v8617_v2  ;;  %8086 = vmatpush3.bf16.msra.mxu1 %v8114_v3  ;;  %v8125_v21 = vld [vmem:[%s8690_s15 + $0x40] sm:$0xff]   ;;  %v8126_v23 = vld [vmem:[%s8690_s15 + $0x48] sm:$0xff]   ;;  %v8127_v25 = vld [vmem:[%s8690_s15 + $0x50] sm:$0xff]  }
  0x1f   : > { %8083 = vmatprep.subr.bf16.mxu1 %v8617_v2  ;;  %v8153_v26 = vld [vmem:[%s8690_s15 + $0x158] sm:$0xff]   ;;  %v8155_v28 = vld [vmem:[%s8690_s15 + $0x160] sm:$0xff]   ;;  %v8157_v30 = vld [vmem:[%s8690_s15 + $0x168] sm:$0xff]  }
  0x20   : > { %v8128_v27 = vld [vmem:[%s8690_s15 + $0x58] sm:$0xff]   ;;  %v8129_v29 = vld [vmem:[%s8690_s15 + $0x60] sm:$0xff]   ;;  %v8130_v31 = vld [vmem:[%s8690_s15 + $0x68] sm:$0xff]  }
  0x21   : > { %7754 = vmatpush3.bf16.msra.mxu0 %v8115_v4  ;;  %v8159_v32 = vld [vmem:[%s8690_s15 + $0x170] sm:$0xff]   ;;  %v8161_v34 = vld [vmem:[%s8690_s15 + $0x178] sm:$0xff]   ;;  %v8163_v36 = vld [vmem:[%s8690_s15 + $0x180] sm:$0xff]  }
  0x22   : > { %7755 = vmatprep.subr.bf16.mxu0 %v8617_v2  ;;  %8087 = vmatpush3.bf16.msra.mxu1 %v8115_v4  ;;  %v8131_v33 = vld [vmem:[%s8690_s15 + $0x70] sm:$0xff]   ;;  %v8132_v35 = vld [vmem:[%s8690_s15 + $0x78] sm:$0xff]   ;;  %v8133_v37 = vld [vmem:[%s8690_s15 + $0x80] sm:$0xff]  }
  0x23   : > { %8084 = vmatprep.subr.bf16.mxu1 %v8617_v2  ;;  %v8165_v38 = vld [vmem:[%s8690_s15 + $0x188] sm:$0xff]   ;;  %v8167_v40 = vld [vmem:[%s8690_s15 + $0x190] sm:$0xff]   ;;  %v8168_v42 = vld [vmem:[%s8690_s15 + $0x198] sm:$0xff]  }
  0x24   : > { %v8134_v39 = vld [vmem:[%s8690_s15 + $0x88] sm:$0xff]   ;;  %v8136_v41 = vld [vmem:[%s8690_s15 + $0x90] sm:$0xff]   ;;  %v8138_v43 = vld [vmem:[%s8690_s15 + $0x98] sm:$0xff]  }
  0x25   : > { %7756 = vmatpush3.bf16.msra.mxu0 %v8116_v5  ;;  %v8169_v44 = vld [vmem:[%s8690_s15 + $0x1a0] sm:$0xff]   ;;  %v8170_v46 = vld [vmem:[%s8690_s15 + $0x1a8] sm:$0xff]   ;;  %v8171_v48 = vld [vmem:[%s8690_s15 + $0x1b0] sm:$0xff]  }
  0x26   : > { %8088 = vmatpush3.bf16.msra.mxu1 %v8116_v5  ;;  %v8140_v45 = vld [vmem:[%s8690_s15 + $0xa0] sm:$0xff]   ;;  %v8142_v47 = vld [vmem:[%s8690_s15 + $0xa8] sm:$0xff]   ;;  %v8144_v49 = vld [vmem:[%s8690_s15 + $0xb0] sm:$0xff]  }
  0x27   : > { %v8172_v50 = vld [vmem:[%s8690_s15 + $0x1b8] sm:$0xff]   ;;  %v8173_v52 = vld [vmem:[%s8690_s15 + $0x1c0] sm:$0xff]   ;;  %v8174_v54 = vld [vmem:[%s8690_s15 + $0x1c8] sm:$0xff]  }
  0x28   : > { %7758 = vmatmul.mubr.msk.bf16.vlgmr.msra.gmra.mrb[0].mxu0 %vm825_vm2, %v8117_v6  ;;  %v8146_v51 = vld [vmem:[%s8690_s15 + $0xb8] sm:$0xff]   ;;  %v8148_v53 = vld [vmem:[%s8690_s15 + $0xc0] sm:$0xff]   ;;  %v8150_v55 = vld [vmem:[%s8690_s15 + $0xc8] sm:$0xff]  }
  0x29   : > { %7761 = vmatprep.mubr.msk.bf16.mxu0 %vm8618_vm1, %v8617_v2  ;;  %7894 = vmatmul.mubr.msk.bf16.vlgmr.msra.gmra.mrb[0].mxu1 %vm825_vm2, %v8135_v8  ;;  %v8175_v56 = vld [vmem:[%s8690_s15 + $0x1d0] sm:$0xff]   ;;  %v8176_v58 = vld [vmem:[%s8690_s15 + $0x1d8] sm:$0xff]   ;;  %v8177_v6 = vld [vmem:[%s8690_s15 + $0x1e0] sm:$0xff]  }
  0x2a   : > { %7897 = vmatprep.mubr.msk.bf16.mxu1 %vm8618_vm1, %v8617_v2  ;;  %v8152_v57 = vld [vmem:[%s8690_s15 + $0xd0] sm:$0xff]   ;;  %v8154_v62 = vld [vmem:[%s8690_s15 + $0xd8] sm:$0xff]  }
  0x30   : > { %7762 = vmatmul.mubr.msk.bf16.gmra.mrb[4].mxu0 %vm825_vm2, %v8118_v7 }
  0x31   : > { %7765 = vmatprep.mubr.msk.bf16.mxu0 %vm8618_vm1, %v8617_v2  ;;  %7898 = vmatmul.mubr.msk.bf16.gmra.mrb[4].mxu1 %vm825_vm2, %v8137_v10 }
  0x32   : > { %7901 = vmatprep.mubr.msk.bf16.mxu1 %vm8618_vm1, %v8617_v2 }
  0x38   : > { %7766 = vmatmul.mubr.msk.bf16.gmra.mrb[8].mxu0 %vm825_vm2, %v8119_v9 }
  0x39   : > { %7769 = vmatprep.mubr.msk.bf16.mxu0 %vm8618_vm1, %v8617_v2  ;;  %7902 = vmatmul.mubr.msk.bf16.gmra.mrb[8].mxu1 %vm825_vm2, %v8139_v12 }
  0x3a   : > { %7905 = vmatprep.mubr.msk.bf16.mxu1 %vm8618_vm1, %v8617_v2 }
  0x40   : > { %7770 = vmatmul.mubr.msk.bf16.gmra.mrb[12].mxu0 %vm825_vm2, %v8120_v11 }
  0x41   : > { %7773 = vmatprep.mubr.msk.bf16.mxu0 %vm8618_vm1, %v8617_v2  ;;  %7906 = vmatmul.mubr.msk.bf16.gmra.mrb[12].mxu1 %vm825_vm2, %v8141_v14  ;;  %v8156_v14 = vld [vmem:[%s8690_s15 + $0xe0] sm:$0xff]  }
  0x42   : > { %7909 = vmatprep.mubr.msk.bf16.mxu1 %vm8618_vm1, %v8617_v2 }
  0x48   : > { %7774 = vmatmul.mubr.msk.bf16.gmra.mrb[16].mxu0 %vm825_vm2, %v8121_v13 }
  0x49   : > { %7777 = vmatprep.mubr.msk.bf16.mxu0 %vm8618_vm1, %v8617_v2  ;;  %7910 = vmatmul.mubr.msk.bf16.gmra.mrb[16].mxu1 %vm825_vm2, %v8143_v16 }
  0x4a   : > { %7913 = vmatprep.mubr.msk.bf16.mxu1 %vm8618_vm1, %v8617_v2 }
  0x50   : > { %7778 = vmatmul.mubr.msk.bf16.gmra.mrb[20].mxu0 %vm825_vm2, %v8122_v15 }
  0x51   : > { %7781 = vmatprep.mubr.msk.bf16.mxu0 %vm8618_vm1, %v8617_v2  ;;  %7914 = vmatmul.mubr.msk.bf16.gmra.mrb[20].mxu1 %vm825_vm2, %v8145_v18 }
  0x52   : > { %7917 = vmatprep.mubr.msk.bf16.mxu1 %vm8618_vm1, %v8617_v2 }
  0x58   : > { %7782 = vmatmul.mubr.msk.bf16.gmra.mrb[24].mxu0 %vm825_vm2, %v8123_v17 }
  0x59   : > { %7785 = vmatprep.mubr.msk.bf16.mxu0 %vm8618_vm1, %v8617_v2  ;;  %7918 = vmatmul.mubr.msk.bf16.gmra.mrb[24].mxu1 %vm825_vm2, %v8147_v20 }
  0x5a   : > { %7921 = vmatprep.mubr.msk.bf16.mxu1 %vm8618_vm1, %v8617_v2 }
  0x60   : > { %7786 = vmatmul.mubr.msk.bf16.gmra.mrb[28].mxu0 %vm825_vm2, %v8124_v19 }
  0x61   : > { %7789 = vmatprep.mubr.msk.bf16.mxu0 %vm8618_vm1, %v8617_v2  ;;  %7922 = vmatmul.mubr.msk.bf16.gmra.mrb[28].mxu1 %vm825_vm2, %v8149_v22 }
  0x62   : > { %7925 = vmatprep.mubr.msk.bf16.mxu1 %vm8618_vm1, %v8617_v2 }
  0x68   : > { %7790 = vmatmul.mubr.msk.bf16.gmra.mrb[32].mxu0 %vm825_vm2, %v8125_v21 }
  0x69   : > { %7793 = vmatprep.mubr.msk.bf16.mxu0 %vm8618_vm1, %v8617_v2  ;;  %7926 = vmatmul.mubr.msk.bf16.gmra.mrb[32].mxu1 %vm825_vm2, %v8151_v24 }
  0x6a   : > { %7929 = vmatprep.mubr.msk.bf16.mxu1 %vm8618_vm1, %v8617_v2 }
  0x70   : > { %7794 = vmatmul.mubr.msk.bf16.gmra.mrb[36].mxu0 %vm825_vm2, %v8126_v23 }
  0x71   : > { %7797 = vmatprep.mubr.msk.bf16.mxu0 %vm8618_vm1, %v8617_v2  ;;  %7930 = vmatmul.mubr.msk.bf16.gmra.mrb[36].mxu1 %vm825_vm2, %v8153_v26 }
  0x72   : > { %7933 = vmatprep.mubr.msk.bf16.mxu1 %vm8618_vm1, %v8617_v2 }
  0x78   : > { %7798 = vmatmul.mubr.msk.bf16.gmra.mrb[40].mxu0 %vm825_vm2, %v8127_v25 }
  0x79   : > { %7801 = vmatprep.mubr.msk.bf16.mxu0 %vm8618_vm1, %v8617_v2  ;;  %7934 = vmatmul.mubr.msk.bf16.gmra.mrb[40].mxu1 %vm825_vm2, %v8155_v28 }
  0x7a   : > { %7937 = vmatprep.mubr.msk.bf16.mxu1 %vm8618_vm1, %v8617_v2 }
  0x80   : > { %7802 = vmatmul.mubr.msk.bf16.gmra.mrb[44].mxu0 %vm825_vm2, %v8128_v27  ;;  %v8178_v27 = vld [vmem:[%s8690_s15 + $0x1e8] sm:$0xff]  }
  0x81   : > { %7805 = vmatprep.mubr.msk.bf16.mxu0 %vm8618_vm1, %v8617_v2  ;;  %7938 = vmatmul.mubr.msk.bf16.gmra.mrb[44].mxu1 %vm825_vm2, %v8157_v30 }
  0x82   : > { %7941 = vmatprep.mubr.msk.bf16.mxu1 %vm8618_vm1, %v8617_v2 }
  0x88   : > { %7806 = vmatmul.mubr.msk.bf16.gmra.mrb[48].mxu0 %vm825_vm2, %v8129_v29 }
  0x89   : > { %7809 = vmatprep.mubr.msk.bf16.mxu0 %vm8618_vm1, %v8617_v2  ;;  %7942 = vmatmul.mubr.msk.bf16.gmra.mrb[48].mxu1 %vm825_vm2, %v8159_v32 }
  0x8a   : > { %7945 = vmatprep.mubr.msk.bf16.mxu1 %vm8618_vm1, %v8617_v2 }
  0x90   : > { %7810 = vmatmul.mubr.msk.bf16.gmra.mrb[52].mxu0 %vm825_vm2, %v8130_v31 }
  0x91   : > { %7813 = vmatprep.mubr.msk.bf16.mxu0 %vm8618_vm1, %v8617_v2  ;;  %7946 = vmatmul.mubr.msk.bf16.gmra.mrb[52].mxu1 %vm825_vm2, %v8161_v34  ;;  %v8158_v34 = vld [vmem:[%s8690_s15 + $0xe8] sm:$0xff]  }
  0x92   : > { %7949 = vmatprep.mubr.msk.bf16.mxu1 %vm8618_vm1, %v8617_v2 }
  0x98   : > { %7814 = vmatmul.mubr.msk.bf16.gmra.mrb[56].mxu0 %vm825_vm2, %v8131_v33 }
  0x99   : > { %7817 = vmatprep.mubr.msk.bf16.mxu0 %vm8618_vm1, %v8617_v2  ;;  %7950 = vmatmul.mubr.msk.bf16.gmra.mrb[56].mxu1 %vm825_vm2, %v8163_v36 }
  0x9a   : > { %7953 = vmatprep.mubr.msk.bf16.mxu1 %vm8618_vm1, %v8617_v2 }
  0xa0   : > { %7818 = vmatmul.mubr.msk.bf16.gmra.mrb[60].mxu0 %vm825_vm2, %v8132_v35 }
  0xa1   : > { %7821 = vmatprep.mubr.msk.bf16.mxu0 %vm8618_vm1, %v8617_v2  ;;  %7954 = vmatmul.mubr.msk.bf16.gmra.mrb[60].mxu1 %vm825_vm2, %v8165_v38 }
  0xa2   : > { %7957 = vmatprep.mubr.msk.bf16.mxu1 %vm8618_vm1, %v8617_v2 }
  0xa8   : > { %7822 = vmatmul.mubr.msk.bf16.gmra.mrb[64].mxu0 %vm825_vm2, %v8133_v37 }
  0xa9   : > { %7825 = vmatprep.mubr.msk.bf16.mxu0 %vm8618_vm1, %v8617_v2  ;;  %7958 = vmatmul.mubr.msk.bf16.gmra.mrb[64].mxu1 %vm825_vm2, %v8167_v40 }
  0xaa   : > { %7961 = vmatprep.mubr.msk.bf16.mxu1 %vm8618_vm1, %v8617_v2 }
  0xb0   : > { %7826 = vmatmul.mubr.msk.bf16.gmra.mrb[68].mxu0 %vm825_vm2, %v8134_v39 }
  0xb1   : > { %7829 = vmatprep.mubr.msk.bf16.mxu0 %vm8618_vm1, %v8617_v2  ;;  %7962 = vmatmul.mubr.msk.bf16.gmra.mrb[68].mxu1 %vm825_vm2, %v8168_v42 }
  0xb2   : > { %7965 = vmatprep.mubr.msk.bf16.mxu1 %vm8618_vm1, %v8617_v2 }
  0xb8   : > { %7830 = vmatmul.mubr.msk.bf16.gmra.mrb[72].mxu0 %vm825_vm2, %v8136_v41 }
  0xb9   : > { %7833 = vmatprep.mubr.msk.bf16.mxu0 %vm8618_vm1, %v8617_v2  ;;  %7966 = vmatmul.mubr.msk.bf16.gmra.mrb[72].mxu1 %vm825_vm2, %v8169_v44 }
  0xba   : > { %7969 = vmatprep.mubr.msk.bf16.mxu1 %vm8618_vm1, %v8617_v2 }
  0xc0   : > { %7834 = vmatmul.mubr.msk.bf16.gmra.mrb[76].mxu0 %vm825_vm2, %v8138_v43 }
  0xc1   : > { %7837 = vmatprep.mubr.msk.bf16.mxu0 %vm8618_vm1, %v8617_v2  ;;  %7970 = vmatmul.mubr.msk.bf16.gmra.mrb[76].mxu1 %vm825_vm2, %v8170_v46 }
  0xc2   : > { %7973 = vmatprep.mubr.msk.bf16.mxu1 %vm8618_vm1, %v8617_v2 }
  0xc8   : > { %7838 = vmatmul.mubr.msk.bf16.gmra.mrb[80].mxu0 %vm825_vm2, %v8140_v45 }
  0xc9   : > { %7841 = vmatprep.mubr.msk.bf16.mxu0 %vm8618_vm1, %v8617_v2  ;;  %7974 = vmatmul.mubr.msk.bf16.gmra.mrb[80].mxu1 %vm825_vm2, %v8171_v48 }
  0xca   : > { %7977 = vmatprep.mubr.msk.bf16.mxu1 %vm8618_vm1, %v8617_v2 }
  0xd0   : > { %7842 = vmatmul.mubr.msk.bf16.gmra.mrb[84].mxu0 %vm825_vm2, %v8142_v47  ;;  %v8179_v47 = vld [vmem:[%s8690_s15 + $0x1f0] sm:$0xff]  }
  0xd1   : > { %7845 = vmatprep.mubr.msk.bf16.mxu0 %vm8618_vm1, %v8617_v2  ;;  %7978 = vmatmul.mubr.msk.bf16.gmra.mrb[84].mxu1 %vm825_vm2, %v8172_v50 }
  0xd2   : > { %7981 = vmatprep.mubr.msk.bf16.mxu1 %vm8618_vm1, %v8617_v2 }
  0xd8   : > { %7846 = vmatmul.mubr.msk.bf16.gmra.mrb[88].mxu0 %vm825_vm2, %v8144_v49 }
  0xd9   : > { %7849 = vmatprep.mubr.msk.bf16.mxu0 %vm8618_vm1, %v8617_v2  ;;  %7982 = vmatmul.mubr.msk.bf16.gmra.mrb[88].mxu1 %vm825_vm2, %v8173_v52 }
  0xda   : > { %7985 = vmatprep.mubr.msk.bf16.mxu1 %vm8618_vm1, %v8617_v2 }
  0xe0   : > { %7850 = vmatmul.mubr.msk.bf16.gmra.mrb[92].mxu0 %vm825_vm2, %v8146_v51 }
  0xe1   : > { %7853 = vmatprep.mubr.msk.bf16.mxu0 %vm8618_vm1, %v8617_v2  ;;  %7986 = vmatmul.mubr.msk.bf16.gmra.mrb[92].mxu1 %vm825_vm2, %v8174_v54  ;;  %v8160_v54 = vld [vmem:[%s8690_s15 + $0xf0] sm:$0xff]  }
  0xe2   : > { %7989 = vmatprep.mubr.msk.bf16.mxu1 %vm8618_vm1, %v8617_v2 }
  0xe8   : > { %7854 = vmatmul.mubr.msk.bf16.gmra.mrb[96].mxu0 %vm825_vm2, %v8148_v53 }
  0xe9   : > { %7857 = vmatprep.mubr.msk.bf16.mxu0 %vm8618_vm1, %v8617_v2  ;;  %7990 = vmatmul.mubr.msk.bf16.gmra.mrb[96].mxu1 %vm825_vm2, %v8175_v56 }
  0xea   : > { %7993 = vmatprep.mubr.msk.bf16.mxu1 %vm8618_vm1, %v8617_v2 }
  0xf0   : > { %7858 = vmatmul.mubr.msk.bf16.gmra.mrb[100].mxu0 %vm825_vm2, %v8150_v55 }
  0xf1   : > { %7861 = vmatprep.mubr.msk.bf16.mxu0 %vm8618_vm1, %v8617_v2  ;;  %7994 = vmatmul.mubr.msk.bf16.gmra.mrb[100].mxu1 %vm825_vm2, %v8176_v58 }
  0xf2   : > { %7997 = vmatprep.mubr.msk.bf16.mxu1 %vm8618_vm1, %v8617_v2 }
  0xf8   : > { %7862 = vmatmul.mubr.msk.bf16.gmra.mrb[104].mxu0 %vm825_vm2, %v8152_v57 }
  0xf9   : > { %7865 = vmatprep.mubr.msk.bf16.mxu0 %vm8618_vm1, %v8617_v2  ;;  %7998 = vmatmul.mubr.msk.bf16.gmra.mrb[104].mxu1 %vm825_vm2, %v8177_v6 }
  0xfa   : > { %8001 = vmatprep.mubr.msk.bf16.mxu1 %vm8618_vm1, %v8617_v2 }
  0xfb   : > { %v1061_v59 = vpop.f32.mrb[0].mxu0 }
  0xfc   : > { %1598 = vst.msk [vmem:[%s8930_s25] sm:$0xff] %vm1597_vm3, %v1061_v59  ;;  %v2007_v60 = vmul.f32 %v1061_v59, %v1061_v59  ;;  %v7759_v61 = vpop.f32.mrb[1].mxu0  ;;  %v1732_v0 = vsel %vm1597_vm3, %v1061_v59, 0.0  ;;  %v8952_v15 = vpop.f32.mrb[0].mxu1 }
  0xfd   : > { %v1064_v63 = vpop.f32.mrb[2].mxu0  ;;  %1666 = vst.msk [vmem:[%s8930_s25 + $0x220] sm:$0xff] %vm1597_vm3, %v8952_v15  ;;  %v7895_v18 = vpop.f32.mrb[1].mxu1 }
  0xfe   : > { %1599 = vst.msk [vmem:[%s8930_s25 + $0x8] sm:$0xff] %vm1597_vm3, %v1064_v63  ;;  %v1733_v1 = vsel %vm1597_vm3, %v1064_v63, 0.0  ;;  %v2008_v3 = vmul.f32 %v1064_v63, %v1064_v63  ;;  %v7760_v4 = vpop.f32.mrb[3].mxu0  ;;  %v2140_v7 = vsel %vm1597_vm3, %v2007_v60, 0.0  ;;  %v8961_v23 = vpop.f32.mrb[2].mxu1 }
  0xff   : > { %v1734_v5 = vadd.f32 %v1733_v1, %v1732_v0  ;;  %1667 = vst.msk [vmem:[%s8930_s25 + $0x228] sm:$0xff] %vm1597_vm3, %v8961_v23  ;;  %v7896_v26 = vpop.f32.mrb[3].mxu1  ;;  %v8180_v4 = vld [vmem:[%s8690_s15 + $0x1f8] sm:$0xff]  }
 0x100   : > { %v2141_v8 = vsel %vm1597_vm3, %v2008_v3, 0.0  ;;  %7866 = vmatmul.mubr.msk.bf16.gmra.mrb[108].mxu0 %vm825_vm2, %v8154_v62  ;;  %v8181_v26 = vld [vmem:[%s8690_s15 + $0x200] sm:$0xff]  }
 0x101   : > { %v2142_v9 = vadd.f32 %v2141_v8, %v2140_v7  ;;  %7869 = vmatprep.mubr.msk.bf16.mxu0 %vm8618_vm1, %v8617_v2  ;;  %8002 = vmatmul.mubr.msk.bf16.gmra.mrb[108].mxu1 %vm825_vm2, %v8178_v27 }
 0x102   : > { %8005 = vmatprep.mubr.msk.bf16.mxu1 %vm8618_vm1, %v8617_v2 }
 0x103   : > { %v1069_v10 = vpop.f32.mrb[4].mxu0 }
 0x104   : > { %1600 = vst.msk [vmem:[%s8930_s25 + $0x10] sm:$0xff] %vm1597_vm3, %v1069_v10  ;;  %v1735_v11 = vsel %vm1597_vm3, %v1069_v10, 0.0  ;;  %v2009_v12 = vmul.f32 %v1069_v10, %v1069_v10  ;;  %v7763_v13 = vpop.f32.mrb[5].mxu0  ;;  %v8978_v35 = vpop.f32.mrb[4].mxu1 }
 0x105   : > { %v1736_v16 = vadd.f32 %v1735_v11, %v1734_v5  ;;  %v1072_v17 = vpop.f32.mrb[6].mxu0  ;;  %1668 = vst.msk [vmem:[%s8930_s25 + $0x230] sm:$0xff] %vm1597_vm3, %v8978_v35  ;;  %v7899_v38 = vpop.f32.mrb[5].mxu1  ;;  %v8162_v11 = vld [vmem:[%s8690_s15 + $0xf8] sm:$0xff]  }
 0x106   : > { %v2143_v19 = vsel %vm1597_vm3, %v2009_v12, 0.0  ;;  %1601 = vst.msk [vmem:[%s8930_s25 + $0x18] sm:$0xff] %vm1597_vm3, %v1072_v17  ;;  %v1737_v20 = vsel %vm1597_vm3, %v1072_v17, 0.0  ;;  %v2010_v21 = vmul.f32 %v1072_v17, %v1072_v17  ;;  %v7764_v22 = vpop.f32.mrb[7].mxu0  ;;  %v8987_v43 = vpop.f32.mrb[6].mxu1 }
 0x107   : > { %v2144_v24 = vadd.f32 %v2143_v19, %v2142_v9  ;;  %v1738_v25 = vadd.f32 %v1737_v20, %v1736_v16  ;;  %1669 = vst.msk [vmem:[%s8930_s25 + $0x238] sm:$0xff] %vm1597_vm3, %v8987_v43  ;;  %v7900_v46 = vpop.f32.mrb[7].mxu1 }
 0x108   : > { %v2145_v28 = vsel %vm1597_vm3, %v2010_v21, 0.0  ;;  %7870 = vmatmul.mubr.msk.bf16.gmra.mrb[112].mxu0 %vm825_vm2, %v8156_v14 }
 0x109   : > { %v2146_v29 = vadd.f32 %v2145_v28, %v2144_v24  ;;  %7873 = vmatprep.mubr.msk.bf16.mxu0 %vm8618_vm1, %v8617_v2  ;;  %8006 = vmatmul.mubr.msk.bf16.gmra.mrb[112].mxu1 %vm825_vm2, %v8179_v47 }
 0x10a   : > { %8009 = vmatprep.mubr.msk.bf16.mxu1 %vm8618_vm1, %v8617_v2 }
 0x10b   : > { %v1077_v30 = vpop.f32.mrb[8].mxu0 }
 0x10c   : > { %1602 = vst.msk [vmem:[%s8930_s25 + $0x20] sm:$0xff] %vm1597_vm3, %v1077_v30  ;;  %v1739_v31 = vsel %vm1597_vm3, %v1077_v30, 0.0  ;;  %v2011_v32 = vmul.f32 %v1077_v30, %v1077_v30  ;;  %v7767_v33 = vpop.f32.mrb[9].mxu0  ;;  %v9004_v55 = vpop.f32.mrb[8].mxu1 }
 0x10d   : > { %v1740_v36 = vadd.f32 %v1739_v31, %v1738_v25  ;;  %v1080_v37 = vpop.f32.mrb[10].mxu0  ;;  %1670 = vst.msk [vmem:[%s8930_s25 + $0x240] sm:$0xff] %vm1597_vm3, %v9004_v55  ;;  %v7903_v58 = vpop.f32.mrb[9].mxu1  ;;  %v8164_v33 = vld [vmem:[%s8690_s15 + $0x100] sm:$0xff]  }
 0x10e   : > { %v2147_v39 = vsel %vm1597_vm3, %v2011_v32, 0.0  ;;  %1603 = vst.msk [vmem:[%s8930_s25 + $0x28] sm:$0xff] %vm1597_vm3, %v1080_v37  ;;  %v1741_v40 = vsel %vm1597_vm3, %v1080_v37, 0.0  ;;  %v2012_v41 = vmul.f32 %v1080_v37, %v1080_v37  ;;  %v7768_v42 = vpop.f32.mrb[11].mxu0  ;;  %v9013_v63 = vpop.f32.mrb[10].mxu1 }
 0x10f   : > { %v2148_v44 = vadd.f32 %v2147_v39, %v2146_v29  ;;  %v1742_v45 = vadd.f32 %v1741_v40, %v1740_v36  ;;  %1671 = vst.msk [vmem:[%s8930_s25 + $0x248] sm:$0xff] %vm1597_vm3, %v9013_v63  ;;  %v7904_v3 = vpop.f32.mrb[11].mxu1 }
 0x110   : > { %v2149_v48 = vsel %vm1597_vm3, %v2012_v41, 0.0  ;;  %7874 = vmatmul.mubr.msk.bf16.gmra.mrb[116].mxu0 %vm825_vm2, %v8158_v34 }
 0x111   : > { %v2150_v49 = vadd.f32 %v2149_v48, %v2148_v44  ;;  %7877 = vmatprep.mubr.msk.bf16.mxu0 %vm8618_vm1, %v8617_v2  ;;  %8010 = vmatmul.mubr.msk.bf16.gmra.mrb[116].mxu1 %vm825_vm2, %v8180_v4  ;;  %v8182_v48 = vld [vmem:[%s8690_s15 + $0x208] sm:$0xff]  }
 0x112   : > { %8013 = vmatprep.mubr.msk.bf16.mxu1 %vm8618_vm1, %v8617_v2 }
 0x113   : > { %v1085_v50 = vpop.f32.mrb[12].mxu0 }
 0x114   : > { %1604 = vst.msk [vmem:[%s8930_s25 + $0x30] sm:$0xff] %vm1597_vm3, %v1085_v50  ;;  %v1743_v51 = vsel %vm1597_vm3, %v1085_v50, 0.0  ;;  %v2013_v52 = vmul.f32 %v1085_v50, %v1085_v50  ;;  %v7771_v53 = vpop.f32.mrb[13].mxu0  ;;  %v9030_v12 = vpop.f32.mrb[12].mxu1 }
 0x115   : > { %v1744_v56 = vadd.f32 %v1743_v51, %v1742_v45  ;;  %v1088_v57 = vpop.f32.mrb[14].mxu0  ;;  %1672 = vst.msk [vmem:[%s8930_s25 + $0x250] sm:$0xff] %vm1597_vm3, %v9030_v12  ;;  %v7907_v16 = vpop.f32.mrb[13].mxu1 }
 0x116   : > { %v2151_v59 = vsel %vm1597_vm3, %v2013_v52, 0.0  ;;  %1605 = vst.msk [vmem:[%s8930_s25 + $0x38] sm:$0xff] %vm1597_vm3, %v1088_v57  ;;  %v1745_v60 = vsel %vm1597_vm3, %v1088_v57, 0.0  ;;  %v2014_v61 = vmul.f32 %v1088_v57, %v1088_v57  ;;  %v7772_v62 = vpop.f32.mrb[15].mxu0  ;;  %v9039_v21 = vpop.f32.mrb[14].mxu1 }
 0x117   : > { %v2152_v0 = vadd.f32 %v2151_v59, %v2150_v49  ;;  %v1746_v1 = vadd.f32 %v1745_v60, %v1744_v56  ;;  %1673 = vst.msk [vmem:[%s8930_s25 + $0x258] sm:$0xff] %vm1597_vm3, %v9039_v21  ;;  %v7908_v25 = vpop.f32.mrb[15].mxu1  ;;  %v8166_v56 = vld [vmem:[%s8690_s15 + $0x108] sm:$0xff]  }
 0x118   : > { %v2153_v5 = vsel %vm1597_vm3, %v2014_v61, 0.0  ;;  %7878 = vmatmul.mubr.msk.bf16.gmra.mrb[120].mxu0 %vm825_vm2, %v8160_v54 }
 0x119   : > { %v2154_v6 = vadd.f32 %v2153_v5, %v2152_v0  ;;  %7881 = vmatprep.mubr.msk.bf16.mxu0 %vm8618_vm1, %v8617_v2  ;;  %8014 = vmatmul.mubr.msk.bf16.gmra.mrb[120].mxu1 %vm825_vm2, %v8181_v26 }
 0x11a   : > { %8017 = vmatprep.mubr.msk.bf16.mxu1 %vm8618_vm1, %v8617_v2 }
 0x11b   : > { %v1093_v7 = vpop.f32.mrb[16].mxu0 }
 0x11c   : > { %1606 = vst.msk [vmem:[%s8930_s25 + $0x40] sm:$0xff] %vm1597_vm3, %v1093_v7  ;;  %v1747_v8 = vsel %vm1597_vm3, %v1093_v7, 0.0  ;;  %v2015_v9 = vmul.f32 %v1093_v7, %v1093_v7  ;;  %v7775_v10 = vpop.f32.mrb[17].mxu0  ;;  %v9056_v34 = vpop.f32.mrb[16].mxu1 }
 0x11d   : > { %v1748_v13 = vadd.f32 %v1747_v8, %v1746_v1  ;;  %v1096_v14 = vpop.f32.mrb[18].mxu0  ;;  %1674 = vst.msk [vmem:[%s8930_s25 + $0x260] sm:$0xff] %vm1597_vm3, %v9056_v34  ;;  %v7911_v38 = vpop.f32.mrb[17].mxu1 }
 0x11e   : > { %v2155_v17 = vsel %vm1597_vm3, %v2015_v9, 0.0  ;;  %1607 = vst.msk [vmem:[%s8930_s25 + $0x48] sm:$0xff] %vm1597_vm3, %v1096_v14  ;;  %v1749_v18 = vsel %vm1597_vm3, %v1096_v14, 0.0  ;;  %v2016_v19 = vmul.f32 %v1096_v14, %v1096_v14  ;;  %v7776_v20 = vpop.f32.mrb[19].mxu0  ;;  %v9065_v44 = vpop.f32.mrb[18].mxu1 }
 0x11f   : > { %v2156_v22 = vadd.f32 %v2155_v17, %v2154_v6  ;;  %v1750_v24 = vadd.f32 %v1749_v18, %v1748_v13  ;;  %1675 = vst.msk [vmem:[%s8930_s25 + $0x268] sm:$0xff] %vm1597_vm3, %v9065_v44  ;;  %v7912_v47 = vpop.f32.mrb[19].mxu1  ;;  %v8183_v6 = vld [vmem:[%s8690_s15 + $0x210] ss:$0 sps:$4 sm:$0xff]  }
 0x120   : > { %v2157_v27 = vsel %vm1597_vm3, %v2016_v19, 0.0  ;;  %7882 = vmatmul.mubr.msk.bf16.gmra.mrb[124].mxu0 %vm825_vm2, %v8162_v11 }
 0x121   : > { %v2158_v28 = vadd.f32 %v2157_v27, %v2156_v22  ;;  %7885 = vmatprep.mubr.msk.bf16.mxu0 %vm8618_vm1, %v8617_v2  ;;  %8018 = vmatmul.mubr.msk.bf16.gmra.mrb[124].mxu1 %vm825_vm2, %v8182_v48 }
 0x122   : > { %8021 = vmatprep.mubr.msk.bf16.mxu1 %vm8618_vm1, %v8617_v2 }
 0x123   : > { %v1101_v29 = vpop.f32.mrb[20].mxu0 }
 0x124   : > { %1608 = vst.msk [vmem:[%s8930_s25 + $0x50] sm:$0xff] %vm1597_vm3, %v1101_v29  ;;  %v1751_v30 = vsel %vm1597_vm3, %v1101_v29, 0.0  ;;  %v2017_v31 = vmul.f32 %v1101_v29, %v1101_v29  ;;  %v7779_v32 = vpop.f32.mrb[21].mxu0  ;;  %v9082_v57 = vpop.f32.mrb[20].mxu1 }
 0x125   : > { %v1752_v36 = vadd.f32 %v1751_v30, %v1750_v24  ;;  %v1104_v37 = vpop.f32.mrb[22].mxu0  ;;  %1676 = vst.msk [vmem:[%s8930_s25 + $0x270] sm:$0xff] %vm1597_vm3, %v9082_v57  ;;  %v7915_v60 = vpop.f32.mrb[21].mxu1 }
 0x126   : > { %v2159_v39 = vsel %vm1597_vm3, %v2017_v31, 0.0  ;;  %1609 = vst.msk [vmem:[%s8930_s25 + $0x58] sm:$0xff] %vm1597_vm3, %v1104_v37  ;;  %v1753_v40 = vsel %vm1597_vm3, %v1104_v37, 0.0  ;;  %v2018_v41 = vmul.f32 %v1104_v37, %v1104_v37  ;;  %v7780_v42 = vpop.f32.mrb[23].mxu0  ;;  %v9091_v1 = vpop.f32.mrb[22].mxu1 }
 0x127   : > { %v2160_v45 = vadd.f32 %v2159_v39, %v2158_v28  ;;  %v1754_v46 = vadd.f32 %v1753_v40, %v1752_v36  ;;  %1677 = vst.msk [vmem:[%s8930_s25 + $0x278] sm:$0xff] %vm1597_vm3, %v9091_v1  ;;  %v7916_v5 = vpop.f32.mrb[23].mxu1 }
 0x128   : > { %v2161_v49 = vsel %vm1597_vm3, %v2018_v41, 0.0  ;;  %7886 = vmatmul.mubr.msk.bf16.gmra.mrb[128].mxu0 %vm825_vm2, %v8164_v33 }
 0x129   : > { %v2162_v50 = vadd.f32 %v2161_v49, %v2160_v45  ;;  %7889 = vmatprep.mubr.msk.bf16.mxu0 %vm8618_vm1, %v8617_v2  ;;  %8022 = vmatmul.mubr.msk.bf16.gmra.mrb[128].mxu1 %vm825_vm2, %v8183_v6 }
 0x12b   : > { %v1109_v51 = vpop.f32.mrb[24].mxu0 }
 0x12c   : > { %1610 = vst.msk [vmem:[%s8930_s25 + $0x60] sm:$0xff] %vm1597_vm3, %v1109_v51  ;;  %v1755_v52 = vsel %vm1597_vm3, %v1109_v51, 0.0  ;;  %v2019_v53 = vmul.f32 %v1109_v51, %v1109_v51  ;;  %v7783_v54 = vpop.f32.mrb[25].mxu0  ;;  %v9103_v14 = vpop.f32.mrb[24].mxu1 }
 0x12d   : > { %v1756_v58 = vadd.f32 %v1755_v52, %v1754_v46  ;;  %v1112_v59 = vpop.f32.mrb[26].mxu0  ;;  %1678 = vst.msk [vmem:[%s8930_s25 + $0x280] sm:$0xff] %vm1597_vm3, %v9103_v14  ;;  %v7919_v18 = vpop.f32.mrb[25].mxu1 }
 0x12e   : > { %v2163_v2 = vsel %vm1597_vm3, %v2019_v53, 0.0  ;;  %1611 = vst.msk [vmem:[%s8930_s25 + $0x68] sm:$0xff] %vm1597_vm3, %v1112_v59  ;;  %v1757_v61 = vsel %vm1597_vm3, %v1112_v59, 0.0  ;;  %v2020_v62 = vmul.f32 %v1112_v59, %v1112_v59  ;;  %v7784_v0 = vpop.f32.mrb[27].mxu0  ;;  %v9112_v25 = vpop.f32.mrb[26].mxu1 }
 0x12f   : > { %v2164_v3 = vadd.f32 %v2163_v2, %v2162_v50  ;;  %v1758_v4 = vadd.f32 %v1757_v61, %v1756_v58  ;;  %1679 = vst.msk [vmem:[%s8930_s25 + $0x288] sm:$0xff] %vm1597_vm3, %v9112_v25  ;;  %v7920_v28 = vpop.f32.mrb[27].mxu1 }
 0x130   : > { %v2165_v7 = vsel %vm1597_vm3, %v2020_v62, 0.0  ;;  %7890 = vmatmul.mubr.msk.bf16.gmra.mrb[132].mxu0 %vm825_vm2, %v8166_v56 }
 0x131   : > { %v2166_v8 = vadd.f32 %v2165_v7, %v2164_v3 }
 0x133   : > { %v1117_v9 = vpop.f32.mrb[28].mxu0 }
 0x134   : > { %1612 = vst.msk [vmem:[%s8930_s25 + $0x70] sm:$0xff] %vm1597_vm3, %v1117_v9  ;;  %v1759_v10 = vsel %vm1597_vm3, %v1117_v9, 0.0  ;;  %v2021_v11 = vmul.f32 %v1117_v9, %v1117_v9  ;;  %v7787_v13 = vpop.f32.mrb[29].mxu0  ;;  %v9121_v37 = vpop.f32.mrb[28].mxu1 }
 0x135   : > { %v1760_v16 = vadd.f32 %v1759_v10, %v1758_v4  ;;  %v1120_v17 = vpop.f32.mrb[30].mxu0  ;;  %1680 = vst.msk [vmem:[%s8930_s25 + $0x290] sm:$0xff] %vm1597_vm3, %v9121_v37  ;;  %v7923_v40 = vpop.f32.mrb[29].mxu1 }
 0x136   : > { %v2167_v19 = vsel %vm1597_vm3, %v2021_v11, 0.0  ;;  %1613 = vst.msk [vmem:[%s8930_s25 + $0x78] sm:$0xff] %vm1597_vm3, %v1120_v17  ;;  %v1761_v20 = vsel %vm1597_vm3, %v1120_v17, 0.0  ;;  %v2022_v22 = vmul.f32 %v1120_v17, %v1120_v17  ;;  %v7788_v24 = vpop.f32.mrb[31].mxu0  ;;  %v9130_v47 = vpop.f32.mrb[30].mxu1 }
 0x137   : > { %v2168_v26 = vadd.f32 %v2167_v19, %v2166_v8  ;;  %v1762_v27 = vadd.f32 %v1761_v20, %v1760_v16  ;;  %1681 = vst.msk [vmem:[%s8930_s25 + $0x298] sm:$0xff] %vm1597_vm3, %v9130_v47  ;;  %v7924_v50 = vpop.f32.mrb[31].mxu1 }
 0x138   : > { %v2169_v29 = vsel %vm1597_vm3, %v2022_v22, 0.0 }
 0x139   : > { %v2170_v30 = vadd.f32 %v2169_v29, %v2168_v26 }
 0x13b   : > { %v1125_v31 = vpop.f32.mrb[32].mxu0 }
 0x13c   : > { %1614 = vst.msk [vmem:[%s8930_s25 + $0x80] sm:$0xff] %vm1597_vm3, %v1125_v31  ;;  %v1763_v32 = vsel %vm1597_vm3, %v1125_v31, 0.0  ;;  %v2023_v33 = vmul.f32 %v1125_v31, %v1125_v31  ;;  %v7791_v36 = vpop.f32.mrb[33].mxu0  ;;  %v9139_v59 = vpop.f32.mrb[32].mxu1 }
 0x13d   : > { %v1764_v38 = vadd.f32 %v1763_v32, %v1762_v27  ;;  %v1128_v39 = vpop.f32.mrb[34].mxu0  ;;  %1682 = vst.msk [vmem:[%s8930_s25 + $0x2a0] sm:$0xff] %vm1597_vm3, %v9139_v59  ;;  %v7927_v61 = vpop.f32.mrb[33].mxu1 }
 0x13e   : > { %v2171_v41 = vsel %vm1597_vm3, %v2023_v33, 0.0  ;;  %1615 = vst.msk [vmem:[%s8930_s25 + $0x88] sm:$0xff] %vm1597_vm3, %v1128_v39  ;;  %v1765_v42 = vsel %vm1597_vm3, %v1128_v39, 0.0  ;;  %v2024_v45 = vmul.f32 %v1128_v39, %v1128_v39  ;;  %v7792_v46 = vpop.f32.mrb[35].mxu0  ;;  %v9148_v5 = vpop.f32.mrb[34].mxu1 }
 0x13f   : > { %v2172_v48 = vadd.f32 %v2171_v41, %v2170_v30  ;;  %v1766_v49 = vadd.f32 %v1765_v42, %v1764_v38  ;;  %1683 = vst.msk [vmem:[%s8930_s25 + $0x2a8] sm:$0xff] %vm1597_vm3, %v9148_v5  ;;  %v7928_v8 = vpop.f32.mrb[35].mxu1 }
 0x140   : > { %v2173_v51 = vsel %vm1597_vm3, %v2024_v45, 0.0 }
 0x141   : > { %v2174_v52 = vadd.f32 %v2173_v51, %v2172_v48 }
 0x143   : > { %v1133_v53 = vpop.f32.mrb[36].mxu0 }
 0x144   : > { %1616 = vst.msk [vmem:[%s8930_s25 + $0x90] sm:$0xff] %vm1597_vm3, %v1133_v53  ;;  %v1767_v54 = vsel %vm1597_vm3, %v1133_v53, 0.0  ;;  %v2025_v56 = vmul.f32 %v1133_v53, %v1133_v53  ;;  %v7795_v58 = vpop.f32.mrb[37].mxu0  ;;  %v9157_v18 = vpop.f32.mrb[36].mxu1 }
 0x145   : > { %v1768_v60 = vadd.f32 %v1767_v54, %v1766_v49  ;;  %v1136_v2 = vpop.f32.mrb[38].mxu0  ;;  %1684 = vst.msk [vmem:[%s8930_s25 + $0x2b0] sm:$0xff] %vm1597_vm3, %v9157_v18  ;;  %v7931_v22 = vpop.f32.mrb[37].mxu1 }
 0x146   : > { %v2175_v62 = vsel %vm1597_vm3, %v2025_v56, 0.0  ;;  %1617 = vst.msk [vmem:[%s8930_s25 + $0x98] sm:$0xff] %vm1597_vm3, %v1136_v2  ;;  %v1769_v0 = vsel %vm1597_vm3, %v1136_v2, 0.0  ;;  %v2026_v3 = vmul.f32 %v1136_v2, %v1136_v2  ;;  %v7796_v4 = vpop.f32.mrb[39].mxu0  ;;  %v9166_v29 = vpop.f32.mrb[38].mxu1 }
 0x147   : > { %v2176_v6 = vadd.f32 %v2175_v62, %v2174_v52  ;;  %v1770_v7 = vadd.f32 %v1769_v0, %v1768_v60  ;;  %1685 = vst.msk [vmem:[%s8930_s25 + $0x2b8] sm:$0xff] %vm1597_vm3, %v9166_v29  ;;  %v7932_v32 = vpop.f32.mrb[39].mxu1 }
 0x148   : > { %v2177_v9 = vsel %vm1597_vm3, %v2026_v3, 0.0 }
 0x149   : > { %v2178_v10 = vadd.f32 %v2177_v9, %v2176_v6 }
 0x14b   : > { %v1141_v11 = vpop.f32.mrb[40].mxu0 }
 0x14c   : > { %1618 = vst.msk [vmem:[%s8930_s25 + $0xa0] sm:$0xff] %vm1597_vm3, %v1141_v11  ;;  %v1771_v13 = vsel %vm1597_vm3, %v1141_v11, 0.0  ;;  %v2027_v16 = vmul.f32 %v1141_v11, %v1141_v11  ;;  %v7799_v17 = vpop.f32.mrb[41].mxu0  ;;  %v9175_v42 = vpop.f32.mrb[40].mxu1 }
 0x14d   : > { %v1772_v19 = vadd.f32 %v1771_v13, %v1770_v7  ;;  %v1144_v20 = vpop.f32.mrb[42].mxu0  ;;  %1686 = vst.msk [vmem:[%s8930_s25 + $0x2c0] sm:$0xff] %vm1597_vm3, %v9175_v42  ;;  %v7935_v48 = vpop.f32.mrb[41].mxu1 }
 0x14e   : > { %v2179_v24 = vsel %vm1597_vm3, %v2027_v16, 0.0  ;;  %1619 = vst.msk [vmem:[%s8930_s25 + $0xa8] sm:$0xff] %vm1597_vm3, %v1144_v20  ;;  %v1773_v26 = vsel %vm1597_vm3, %v1144_v20, 0.0  ;;  %v2028_v27 = vmul.f32 %v1144_v20, %v1144_v20  ;;  %v7800_v28 = vpop.f32.mrb[43].mxu0  ;;  %v9184_v53 = vpop.f32.mrb[42].mxu1 }
 0x14f   : > { %v2180_v30 = vadd.f32 %v2179_v24, %v2178_v10  ;;  %v1774_v31 = vadd.f32 %v1773_v26, %v1772_v19  ;;  %1687 = vst.msk [vmem:[%s8930_s25 + $0x2c8] sm:$0xff] %vm1597_vm3, %v9184_v53  ;;  %v7936_v58 = vpop.f32.mrb[43].mxu1 }
 0x150   : > { %v2181_v33 = vsel %vm1597_vm3, %v2028_v27, 0.0 }
 0x151   : > { %v2182_v36 = vadd.f32 %v2181_v33, %v2180_v30 }
 0x153   : > { %v1149_v38 = vpop.f32.mrb[44].mxu0 }
 0x154   : > { %1620 = vst.msk [vmem:[%s8930_s25 + $0xb0] sm:$0xff] %vm1597_vm3, %v1149_v38  ;;  %v1775_v39 = vsel %vm1597_vm3, %v1149_v38, 0.0  ;;  %v2029_v40 = vmul.f32 %v1149_v38, %v1149_v38  ;;  %v7803_v41 = vpop.f32.mrb[45].mxu0  ;;  %v9193_v4 = vpop.f32.mrb[44].mxu1 }
 0x155   : > { %v1776_v45 = vadd.f32 %v1775_v39, %v1774_v31  ;;  %v1152_v46 = vpop.f32.mrb[46].mxu0  ;;  %1688 = vst.msk [vmem:[%s8930_s25 + $0x2d0] sm:$0xff] %vm1597_vm3, %v9193_v4  ;;  %v7939_v8 = vpop.f32.mrb[45].mxu1 }
 0x156   : > { %v2183_v49 = vsel %vm1597_vm3, %v2029_v40, 0.0  ;;  %1621 = vst.msk [vmem:[%s8930_s25 + $0xb8] sm:$0xff] %vm1597_vm3, %v1152_v46  ;;  %v1777_v50 = vsel %vm1597_vm3, %v1152_v46, 0.0  ;;  %v2030_v51 = vmul.f32 %v1152_v46, %v1152_v46  ;;  %v7804_v52 = vpop.f32.mrb[47].mxu0  ;;  %v9202_v16 = vpop.f32.mrb[46].mxu1 }
 0x157   : > { %v2184_v54 = vadd.f32 %v2183_v49, %v2182_v36  ;;  %v1778_v56 = vadd.f32 %v1777_v50, %v1776_v45  ;;  %1689 = vst.msk [vmem:[%s8930_s25 + $0x2d8] sm:$0xff] %vm1597_vm3, %v9202_v16  ;;  %v7940_v20 = vpop.f32.mrb[47].mxu1 }
 0x158   : > { %v2185_v60 = vsel %vm1597_vm3, %v2030_v51, 0.0 }
 0x159   : > { %v2186_v2 = vadd.f32 %v2185_v60, %v2184_v54 }
 0x15b   : > { %v1157_v61 = vpop.f32.mrb[48].mxu0 }
 0x15c   : > { %1622 = vst.msk [vmem:[%s8930_s25 + $0xc0] sm:$0xff] %vm1597_vm3, %v1157_v61  ;;  %v1779_v62 = vsel %vm1597_vm3, %v1157_v61, 0.0  ;;  %v2031_v0 = vmul.f32 %v1157_v61, %v1157_v61  ;;  %v7807_v3 = vpop.f32.mrb[49].mxu0  ;;  %v9211_v31 = vpop.f32.mrb[48].mxu1 }
 0x15d   : > { %v1780_v6 = vadd.f32 %v1779_v62, %v1778_v56  ;;  %v1160_v7 = vpop.f32.mrb[50].mxu0  ;;  %1690 = vst.msk [vmem:[%s8930_s25 + $0x2e0] sm:$0xff] %vm1597_vm3, %v9211_v31  ;;  %v7943_v36 = vpop.f32.mrb[49].mxu1 }
 0x15e   : > { %v2187_v9 = vsel %vm1597_vm3, %v2031_v0, 0.0  ;;  %1623 = vst.msk [vmem:[%s8930_s25 + $0xc8] sm:$0xff] %vm1597_vm3, %v1160_v7  ;;  %v1781_v10 = vsel %vm1597_vm3, %v1160_v7, 0.0  ;;  %v2032_v11 = vmul.f32 %v1160_v7, %v1160_v7  ;;  %v7808_v13 = vpop.f32.mrb[51].mxu0  ;;  %v9220_v45 = vpop.f32.mrb[50].mxu1 }
 0x15f   : > { %v2188_v17 = vadd.f32 %v2187_v9, %v2186_v2  ;;  %v1782_v19 = vadd.f32 %v1781_v10, %v1780_v6  ;;  %1691 = vst.msk [vmem:[%s8930_s25 + $0x2e8] sm:$0xff] %vm1597_vm3, %v9220_v45  ;;  %v7944_v49 = vpop.f32.mrb[51].mxu1 }
 0x160   : > { %v2189_v22 = vsel %vm1597_vm3, %v2032_v11, 0.0 }
 0x161   : > { %v2190_v24 = vadd.f32 %v2189_v22, %v2188_v17 }
 0x163   : > { %v1165_v26 = vpop.f32.mrb[52].mxu0 }
 0x164   : > { %1624 = vst.msk [vmem:[%s8930_s25 + $0xd0] sm:$0xff] %vm1597_vm3, %v1165_v26  ;;  %v1783_v27 = vsel %vm1597_vm3, %v1165_v26, 0.0  ;;  %v2033_v28 = vmul.f32 %v1165_v26, %v1165_v26  ;;  %v7811_v30 = vpop.f32.mrb[53].mxu0  ;;  %v9229_v60 = vpop.f32.mrb[52].mxu1 }
 0x165   : > { %v1784_v32 = vadd.f32 %v1783_v27, %v1782_v19  ;;  %v1168_v33 = vpop.f32.mrb[54].mxu0  ;;  %1692 = vst.msk [vmem:[%s8930_s25 + $0x2f0] sm:$0xff] %vm1597_vm3, %v9229_v60  ;;  %v7947_v62 = vpop.f32.mrb[53].mxu1 }
 0x166   : > { %v2191_v38 = vsel %vm1597_vm3, %v2033_v28, 0.0  ;;  %1625 = vst.msk [vmem:[%s8930_s25 + $0xd8] sm:$0xff] %vm1597_vm3, %v1168_v33  ;;  %v1785_v39 = vsel %vm1597_vm3, %v1168_v33, 0.0  ;;  %v2034_v40 = vmul.f32 %v1168_v33, %v1168_v33  ;;  %v7812_v41 = vpop.f32.mrb[55].mxu0  ;;  %v9238_v8 = vpop.f32.mrb[54].mxu1 }
 0x167   : > { %v2192_v46 = vadd.f32 %v2191_v38, %v2190_v24  ;;  %v1786_v48 = vadd.f32 %v1785_v39, %v1784_v32  ;;  %1693 = vst.msk [vmem:[%s8930_s25 + $0x2f8] sm:$0xff] %vm1597_vm3, %v9238_v8  ;;  %v7948_v11 = vpop.f32.mrb[55].mxu1 }
 0x168   : > { %v2193_v50 = vsel %vm1597_vm3, %v2034_v40, 0.0 }
 0x169   : > { %v2194_v51 = vadd.f32 %v2193_v50, %v2192_v46 }
 0x16b   : > { %v1173_v52 = vpop.f32.mrb[56].mxu0 }
 0x16c   : > { %1626 = vst.msk [vmem:[%s8930_s25 + $0xe0] sm:$0xff] %vm1597_vm3, %v1173_v52  ;;  %v1787_v54 = vsel %vm1597_vm3, %v1173_v52, 0.0  ;;  %v2035_v56 = vmul.f32 %v1173_v52, %v1173_v52  ;;  %v7815_v58 = vpop.f32.mrb[57].mxu0  ;;  %v9247_v26 = vpop.f32.mrb[56].mxu1 }
 0x16d   : > { %v1788_v2 = vadd.f32 %v1787_v54, %v1786_v48  ;;  %v1176_v61 = vpop.f32.mrb[58].mxu0  ;;  %1694 = vst.msk [vmem:[%s8930_s25 + $0x300] sm:$0xff] %vm1597_vm3, %v9247_v26  ;;  %v7951_v30 = vpop.f32.mrb[57].mxu1 }
 0x16e   : > { %v2195_v0 = vsel %vm1597_vm3, %v2035_v56, 0.0  ;;  %1627 = vst.msk [vmem:[%s8930_s25 + $0xe8] sm:$0xff] %vm1597_vm3, %v1176_v61  ;;  %v1789_v3 = vsel %vm1597_vm3, %v1176_v61, 0.0  ;;  %v2036_v6 = vmul.f32 %v1176_v61, %v1176_v61  ;;  %v7816_v7 = vpop.f32.mrb[59].mxu0  ;;  %v9256_v39 = vpop.f32.mrb[58].mxu1 }
 0x16f   : > { %v2196_v9 = vadd.f32 %v2195_v0, %v2194_v51  ;;  %v1790_v10 = vadd.f32 %v1789_v3, %v1788_v2  ;;  %1695 = vst.msk [vmem:[%s8930_s25 + $0x308] sm:$0xff] %vm1597_vm3, %v9256_v39  ;;  %v7952_v46 = vpop.f32.mrb[59].mxu1 }
 0x170   : > { %v2197_v13 = vsel %vm1597_vm3, %v2036_v6, 0.0 }
 0x171   : > { %v2198_v17 = vadd.f32 %v2197_v13, %v2196_v9 }
 0x173   : > { %v1181_v19 = vpop.f32.mrb[60].mxu0 }
 0x174   : > { %1628 = vst.msk [vmem:[%s8930_s25 + $0xf0] sm:$0xff] %vm1597_vm3, %v1181_v19  ;;  %v1791_v20 = vsel %vm1597_vm3, %v1181_v19, 0.0  ;;  %v2037_v22 = vmul.f32 %v1181_v19, %v1181_v19  ;;  %v7819_v24 = vpop.f32.mrb[61].mxu0  ;;  %v9265_v56 = vpop.f32.mrb[60].mxu1 }
 0x175   : > { %v1792_v27 = vadd.f32 %v1791_v20, %v1790_v10  ;;  %v1184_v28 = vpop.f32.mrb[62].mxu0  ;;  %1696 = vst.msk [vmem:[%s8930_s25 + $0x310] sm:$0xff] %vm1597_vm3, %v9265_v56  ;;  %v7955_v61 = vpop.f32.mrb[61].mxu1 }
 0x176   : > { %v2199_v32 = vsel %vm1597_vm3, %v2037_v22, 0.0  ;;  %1629 = vst.msk [vmem:[%s8930_s25 + $0xf8] sm:$0xff] %vm1597_vm3, %v1184_v28  ;;  %v1793_v33 = vsel %vm1597_vm3, %v1184_v28, 0.0  ;;  %v2038_v36 = vmul.f32 %v1184_v28, %v1184_v28  ;;  %v7820_v38 = vpop.f32.mrb[63].mxu0  ;;  %v9274_v7 = vpop.f32.mrb[62].mxu1 }
 0x177   : > { %v2200_v40 = vadd.f32 %v2199_v32, %v2198_v17  ;;  %v1794_v41 = vadd.f32 %v1793_v33, %v1792_v27  ;;  %1697 = vst.msk [vmem:[%s8930_s25 + $0x318] sm:$0xff] %vm1597_vm3, %v9274_v7  ;;  %v7956_v11 = vpop.f32.mrb[63].mxu1 }
 0x178   : > { %v2201_v48 = vsel %vm1597_vm3, %v2038_v36, 0.0 }
 0x179   : > { %v2202_v49 = vadd.f32 %v2201_v48, %v2200_v40 }
 0x17b   : > { %v1189_v50 = vpop.f32.mrb[64].mxu0 }
 0x17c   : > { %1630 = vst.msk [vmem:[%s8930_s25 + $0x100] sm:$0xff] %vm1597_vm3, %v1189_v50  ;;  %v1795_v51 = vsel %vm1597_vm3, %v1189_v50, 0.0  ;;  %v2039_v52 = vmul.f32 %v1189_v50, %v1189_v50  ;;  %v7823_v54 = vpop.f32.mrb[65].mxu0  ;;  %v9283_v27 = vpop.f32.mrb[64].mxu1 }
 0x17d   : > { %v1796_v58 = vadd.f32 %v1795_v51, %v1794_v41  ;;  %v1192_v2 = vpop.f32.mrb[66].mxu0  ;;  %1698 = vst.msk [vmem:[%s8930_s25 + $0x320] sm:$0xff] %vm1597_vm3, %v9283_v27  ;;  %v7959_v32 = vpop.f32.mrb[65].mxu1 }
 0x17e   : > { %v2203_v62 = vsel %vm1597_vm3, %v2039_v52, 0.0  ;;  %1631 = vst.msk [vmem:[%s8930_s25 + $0x108] sm:$0xff] %vm1597_vm3, %v1192_v2  ;;  %v1797_v0 = vsel %vm1597_vm3, %v1192_v2, 0.0  ;;  %v2040_v3 = vmul.f32 %v1192_v2, %v1192_v2  ;;  %v7824_v6 = vpop.f32.mrb[67].mxu0  ;;  %v9292_v41 = vpop.f32.mrb[66].mxu1 }
 0x17f   : > { %v2204_v9 = vadd.f32 %v2203_v62, %v2202_v49  ;;  %v1798_v10 = vadd.f32 %v1797_v0, %v1796_v58  ;;  %1699 = vst.msk [vmem:[%s8930_s25 + $0x328] sm:$0xff] %vm1597_vm3, %v9292_v41  ;;  %v7960_v49 = vpop.f32.mrb[67].mxu1 }
 0x180   : > { %v2205_v13 = vsel %vm1597_vm3, %v2040_v3, 0.0 }
 0x181   : > { %v2206_v17 = vadd.f32 %v2205_v13, %v2204_v9 }
 0x183   : > { %v1197_v19 = vpop.f32.mrb[68].mxu0 }
 0x184   : > { %1632 = vst.msk [vmem:[%s8930_s25 + $0x110] sm:$0xff] %vm1597_vm3, %v1197_v19  ;;  %v1799_v20 = vsel %vm1597_vm3, %v1197_v19, 0.0  ;;  %v2041_v22 = vmul.f32 %v1197_v19, %v1197_v19  ;;  %v7827_v24 = vpop.f32.mrb[69].mxu0  ;;  %v9301_v61 = vpop.f32.mrb[68].mxu1 }
 0x185   : > { %v1800_v28 = vadd.f32 %v1799_v20, %v1798_v10  ;;  %v1200_v30 = vpop.f32.mrb[70].mxu0  ;;  %1700 = vst.msk [vmem:[%s8930_s25 + $0x330] sm:$0xff] %vm1597_vm3, %v9301_v61  ;;  %v7963_v3 = vpop.f32.mrb[69].mxu1 }
 0x186   : > { %v2207_v33 = vsel %vm1597_vm3, %v2041_v22, 0.0  ;;  %1633 = vst.msk [vmem:[%s8930_s25 + $0x118] sm:$0xff] %vm1597_vm3, %v1200_v30  ;;  %v1801_v36 = vsel %vm1597_vm3, %v1200_v30, 0.0  ;;  %v2042_v38 = vmul.f32 %v1200_v30, %v1200_v30  ;;  %v7828_v40 = vpop.f32.mrb[71].mxu0  ;;  %v9310_v13 = vpop.f32.mrb[70].mxu1 }
 0x187   : > { %v2208_v46 = vadd.f32 %v2207_v33, %v2206_v17  ;;  %v1802_v48 = vadd.f32 %v1801_v36, %v1800_v28  ;;  %1701 = vst.msk [vmem:[%s8930_s25 + $0x338] sm:$0xff] %vm1597_vm3, %v9310_v13  ;;  %v7964_v20 = vpop.f32.mrb[71].mxu1 }
 0x188   : > { %v2209_v50 = vsel %vm1597_vm3, %v2042_v38, 0.0 }
 0x189   : > { %v2210_v51 = vadd.f32 %v2209_v50, %v2208_v46 }
 0x18b   : > { %v1205_v52 = vpop.f32.mrb[72].mxu0 }
 0x18c   : > { %1634 = vst.msk [vmem:[%s8930_s25 + $0x120] sm:$0xff] %vm1597_vm3, %v1205_v52  ;;  %v1803_v54 = vsel %vm1597_vm3, %v1205_v52, 0.0  ;;  %v2043_v58 = vmul.f32 %v1205_v52, %v1205_v52  ;;  %v7831_v2 = vpop.f32.mrb[73].mxu0  ;;  %v9319_v36 = vpop.f32.mrb[72].mxu1 }
 0x18d   : > { %v1804_v62 = vadd.f32 %v1803_v54, %v1802_v48  ;;  %v1208_v0 = vpop.f32.mrb[74].mxu0  ;;  %1702 = vst.msk [vmem:[%s8930_s25 + $0x340] sm:$0xff] %vm1597_vm3, %v9319_v36  ;;  %v7967_v46 = vpop.f32.mrb[73].mxu1 }
 0x18e   : > { %v2211_v6 = vsel %vm1597_vm3, %v2043_v58, 0.0  ;;  %1635 = vst.msk [vmem:[%s8930_s25 + $0x128] sm:$0xff] %vm1597_vm3, %v1208_v0  ;;  %v1805_v9 = vsel %vm1597_vm3, %v1208_v0, 0.0  ;;  %v2044_v10 = vmul.f32 %v1208_v0, %v1208_v0  ;;  %v7832_v11 = vpop.f32.mrb[75].mxu0  ;;  %v9328_v52 = vpop.f32.mrb[74].mxu1 }
 0x18f   : > { %v2212_v17 = vadd.f32 %v2211_v6, %v2210_v51  ;;  %v1806_v19 = vadd.f32 %v1805_v9, %v1804_v62  ;;  %1703 = vst.msk [vmem:[%s8930_s25 + $0x348] sm:$0xff] %vm1597_vm3, %v9328_v52  ;;  %v7968_v2 = vpop.f32.mrb[75].mxu1 }
 0x190   : > { %v2213_v22 = vsel %vm1597_vm3, %v2044_v10, 0.0 }
 0x191   : > { %v2214_v24 = vadd.f32 %v2213_v22, %v2212_v17 }
 0x193   : > { %v1213_v28 = vpop.f32.mrb[76].mxu0 }
 0x194   : > { %1636 = vst.msk [vmem:[%s8930_s25 + $0x130] sm:$0xff] %vm1597_vm3, %v1213_v28  ;;  %v1807_v30 = vsel %vm1597_vm3, %v1213_v28, 0.0  ;;  %v2045_v32 = vmul.f32 %v1213_v28, %v1213_v28  ;;  %v7835_v33 = vpop.f32.mrb[77].mxu0  ;;  %v9337_v11 = vpop.f32.mrb[76].mxu1 }
 0x195   : > { %v1808_v38 = vadd.f32 %v1807_v30, %v1806_v19  ;;  %v1216_v40 = vpop.f32.mrb[78].mxu0  ;;  %1704 = vst.msk [vmem:[%s8930_s25 + $0x350] sm:$0xff] %vm1597_vm3, %v9337_v11  ;;  %v7971_v20 = vpop.f32.mrb[77].mxu1 }
 0x196   : > { %v2215_v48 = vsel %vm1597_vm3, %v2045_v32, 0.0  ;;  %1637 = vst.msk [vmem:[%s8930_s25 + $0x138] sm:$0xff] %vm1597_vm3, %v1216_v40  ;;  %v1809_v49 = vsel %vm1597_vm3, %v1216_v40, 0.0  ;;  %v2046_v50 = vmul.f32 %v1216_v40, %v1216_v40  ;;  %v7836_v51 = vpop.f32.mrb[79].mxu0  ;;  %v9346_v32 = vpop.f32.mrb[78].mxu1 }
 0x197   : > { %v2216_v54 = vadd.f32 %v2215_v48, %v2214_v24  ;;  %v1810_v58 = vadd.f32 %v1809_v49, %v1808_v38  ;;  %1705 = vst.msk [vmem:[%s8930_s25 + $0x358] sm:$0xff] %vm1597_vm3, %v9346_v32  ;;  %v7972_v40 = vpop.f32.mrb[79].mxu1 }
 0x198   : > { %v2217_v62 = vsel %vm1597_vm3, %v2046_v50, 0.0 }
 0x199   : > { %v2218_v0 = vadd.f32 %v2217_v62, %v2216_v54 }
 0x19b   : > { %v1221_v3 = vpop.f32.mrb[80].mxu0 }
 0x19c   : > { %1638 = vst.msk [vmem:[%s8930_s25 + $0x140] sm:$0xff] %vm1597_vm3, %v1221_v3  ;;  %v1811_v6 = vsel %vm1597_vm3, %v1221_v3, 0.0  ;;  %v2047_v9 = vmul.f32 %v1221_v3, %v1221_v3  ;;  %v7839_v10 = vpop.f32.mrb[81].mxu0 }
 0x19d   : > { %v1812_v17 = vadd.f32 %v1811_v6, %v1810_v58  ;;  %v1224_v19 = vpop.f32.mrb[82].mxu0  ;;  %v9355_v58 = vpop.f32.mrb[80].mxu1 }
 0x19e   : > { %v2219_v22 = vsel %vm1597_vm3, %v2047_v9, 0.0  ;;  %1639 = vst.msk [vmem:[%s8930_s25 + $0x148] sm:$0xff] %vm1597_vm3, %v1224_v19  ;;  %v1813_v24 = vsel %vm1597_vm3, %v1224_v19, 0.0  ;;  %v2048_v28 = vmul.f32 %v1224_v19, %v1224_v19  ;;  %v7840_v30 = vpop.f32.mrb[83].mxu0  ;;  %1706 = vst.msk [vmem:[%s8930_s25 + $0x360] sm:$0xff] %vm1597_vm3, %v9355_v58 }
 0x19f   : > { %v2220_v33 = vadd.f32 %v2219_v22, %v2218_v0  ;;  %v1814_v38 = vadd.f32 %v1813_v24, %v1812_v17  ;;  %v7975_v0 = vpop.f32.mrb[81].mxu1 }
 0x1a0   : > { %v2221_v46 = vsel %vm1597_vm3, %v2048_v28, 0.0  ;;  %v9364_v17 = vpop.f32.mrb[82].mxu1 }
 0x1a1   : > { %v2222_v48 = vadd.f32 %v2221_v46, %v2220_v33  ;;  %1707 = vst.msk [vmem:[%s8930_s25 + $0x368] sm:$0xff] %vm1597_vm3, %v9364_v17  ;;  %v7976_v22 = vpop.f32.mrb[83].mxu1 }
 0x1a3   : > { %v1229_v49 = vpop.f32.mrb[84].mxu0 }
 0x1a4   : > { %1640 = vst.msk [vmem:[%s8930_s25 + $0x150] sm:$0xff] %vm1597_vm3, %v1229_v49  ;;  %v1815_v50 = vsel %vm1597_vm3, %v1229_v49, 0.0  ;;  %v2049_v51 = vmul.f32 %v1229_v49, %v1229_v49  ;;  %v7843_v54 = vpop.f32.mrb[85].mxu0  ;;  %v9373_v46 = vpop.f32.mrb[84].mxu1 }
 0x1a5   : > { %v1816_v2 = vadd.f32 %v1815_v50, %v1814_v38  ;;  %v1232_v62 = vpop.f32.mrb[86].mxu0  ;;  %1708 = vst.msk [vmem:[%s8930_s25 + $0x370] sm:$0xff] %vm1597_vm3, %v9373_v46  ;;  %v7979_v50 = vpop.f32.mrb[85].mxu1 }
 0x1a6   : > { %v2223_v3 = vsel %vm1597_vm3, %v2049_v51, 0.0  ;;  %1641 = vst.msk [vmem:[%s8930_s25 + $0x158] sm:$0xff] %vm1597_vm3, %v1232_v62  ;;  %v1817_v6 = vsel %vm1597_vm3, %v1232_v62, 0.0  ;;  %v2050_v9 = vmul.f32 %v1232_v62, %v1232_v62  ;;  %v7844_v10 = vpop.f32.mrb[87].mxu0  ;;  %v9382_v0 = vpop.f32.mrb[86].mxu1 }
 0x1a7   : > { %v2224_v19 = vadd.f32 %v2223_v3, %v2222_v48  ;;  %v1818_v20 = vadd.f32 %v1817_v6, %v1816_v2  ;;  %1709 = vst.msk [vmem:[%s8930_s25 + $0x378] sm:$0xff] %vm1597_vm3, %v9382_v0 }
 0x1a8   : > { %v2225_v24 = vsel %vm1597_vm3, %v2050_v9, 0.0  ;;  %v7980_v9 = vpop.f32.mrb[87].mxu1 }
 0x1a9   : > { %v2226_v28 = vadd.f32 %v2225_v24, %v2224_v19 }
 0x1ab   : > { %v1237_v30 = vpop.f32.mrb[88].mxu0 }
 0x1ac   : > { %1642 = vst.msk [vmem:[%s8930_s25 + $0x160] sm:$0xff] %vm1597_vm3, %v1237_v30  ;;  %v1819_v33 = vsel %vm1597_vm3, %v1237_v30, 0.0  ;;  %v2051_v38 = vmul.f32 %v1237_v30, %v1237_v30  ;;  %v7847_v40 = vpop.f32.mrb[89].mxu0 }
 0x1ad   : > { %v1820_v48 = vadd.f32 %v1819_v33, %v1818_v20  ;;  %v1240_v49 = vpop.f32.mrb[90].mxu0  ;;  %v9391_v33 = vpop.f32.mrb[88].mxu1 }
 0x1ae   : > { %v2227_v51 = vsel %vm1597_vm3, %v2051_v38, 0.0  ;;  %1643 = vst.msk [vmem:[%s8930_s25 + $0x168] sm:$0xff] %vm1597_vm3, %v1240_v49  ;;  %v1821_v54 = vsel %vm1597_vm3, %v1240_v49, 0.0  ;;  %v2052_v2 = vmul.f32 %v1240_v49, %v1240_v49  ;;  %v7848_v62 = vpop.f32.mrb[91].mxu0  ;;  %1710 = vst.msk [vmem:[%s8930_s25 + $0x380] sm:$0xff] %vm1597_vm3, %v9391_v33  ;;  %v7983_v40 = vpop.f32.mrb[89].mxu1 }
 0x1af   : > { %v2228_v3 = vadd.f32 %v2227_v51, %v2226_v28  ;;  %v1822_v6 = vadd.f32 %v1821_v54, %v1820_v48  ;;  %v9400_v54 = vpop.f32.mrb[90].mxu1 }
 0x1b0   : > { %v2229_v10 = vsel %vm1597_vm3, %v2052_v2, 0.0  ;;  %1711 = vst.msk [vmem:[%s8930_s25 + $0x388] sm:$0xff] %vm1597_vm3, %v9400_v54 }
 0x1b1   : > { %v2230_v19 = vadd.f32 %v2229_v10, %v2228_v3  ;;  %v7984_v3 = vpop.f32.mrb[91].mxu1 }
 0x1b3   : > { %v1245_v20 = vpop.f32.mrb[92].mxu0 }
 0x1b4   : > { %1644 = vst.msk [vmem:[%s8930_s25 + $0x170] sm:$0xff] %vm1597_vm3, %v1245_v20  ;;  %v1823_v22 = vsel %vm1597_vm3, %v1245_v20, 0.0  ;;  %v2053_v24 = vmul.f32 %v1245_v20, %v1245_v20  ;;  %v7851_v30 = vpop.f32.mrb[93].mxu0 }
 0x1b5   : > { %v1824_v28 = vadd.f32 %v1823_v22, %v1822_v6  ;;  %v1248_v38 = vpop.f32.mrb[94].mxu0  ;;  %v9409_v30 = vpop.f32.mrb[92].mxu1 }
 0x1b6   : > { %v2231_v48 = vsel %vm1597_vm3, %v2053_v24, 0.0  ;;  %1645 = vst.msk [vmem:[%s8930_s25 + $0x178] sm:$0xff] %vm1597_vm3, %v1248_v38  ;;  %v1825_v49 = vsel %vm1597_vm3, %v1248_v38, 0.0  ;;  %v2054_v50 = vmul.f32 %v1248_v38, %v1248_v38  ;;  %v7852_v51 = vpop.f32.mrb[95].mxu0  ;;  %13660 = vst [vmem:[#allocation8_spill] sm:$0xff] %v9409_v30  ;;  %v7987_v38 = vpop.f32.mrb[93].mxu1 }
 0x1b7   : > { %v2232_v2 = vadd.f32 %v2231_v48, %v2230_v19  ;;  %v1826_v62 = vadd.f32 %v1825_v49, %v1824_v28  ;;  %1712 = vst.msk [vmem:[%s8930_s25 + $0x390] sm:$0xff] %vm1597_vm3, %v9409_v30  ;;  %v9418_v51 = vpop.f32.mrb[94].mxu1 }
 0x1b8   : > { %v2233_v6 = vsel %vm1597_vm3, %v2054_v50, 0.0  ;;  %13661 = vst [vmem:[#allocation9_spill] sm:$0xff] %v9418_v51  ;;  %1713 = vst.msk [vmem:[%s8930_s25 + $0x398] sm:$0xff] %vm1597_vm3, %v9418_v51 }
 0x1b9   : > { %v2234_v9 = vadd.f32 %v2233_v6, %v2232_v2 }
 0x1bb   : > { %v1253_v10 = vpop.f32.mrb[96].mxu0 }
 0x1bc   : > { %1646 = vst.msk [vmem:[%s8930_s25 + $0x180] sm:$0xff] %vm1597_vm3, %v1253_v10  ;;  %v1827_v20 = vsel %vm1597_vm3, %v1253_v10, 0.0  ;;  %v2055_v22 = vmul.f32 %v1253_v10, %v1253_v10  ;;  %v7855_v24 = vpop.f32.mrb[97].mxu0 }
 0x1bd   : > { %v1828_v19 = vadd.f32 %v1827_v20, %v1826_v62  ;;  %v1256_v28 = vpop.f32.mrb[98].mxu0  ;;  %v7988_v62 = vpop.f32.mrb[95].mxu1 }
 0x1be   : > { %v2235_v40 = vsel %vm1597_vm3, %v2055_v22, 0.0  ;;  %1647 = vst.msk [vmem:[%s8930_s25 + $0x188] sm:$0xff] %vm1597_vm3, %v1256_v28  ;;  %v1829_v48 = vsel %vm1597_vm3, %v1256_v28, 0.0  ;;  %v2056_v49 = vmul.f32 %v1256_v28, %v1256_v28  ;;  %v7856_v50 = vpop.f32.mrb[99].mxu0  ;;  %v9427_v38 = vpop.f32.mrb[96].mxu1 }
 0x1bf   : > { %v2236_v2 = vadd.f32 %v2235_v40, %v2234_v9  ;;  %v1830_v3 = vadd.f32 %v1829_v48, %v1828_v19  ;;  %13662 = vst [vmem:[#allocation10_spill] sm:$0xff] %v9427_v38  ;;  %1714 = vst.msk [vmem:[%s8930_s25 + $0x3a0] sm:$0xff] %vm1597_vm3, %v9427_v38  ;;  %v7991_v40 = vpop.f32.mrb[97].mxu1 }
 0x1c0   : > { %v2237_v6 = vsel %vm1597_vm3, %v2056_v49, 0.0  ;;  %v9436_v62 = vpop.f32.mrb[98].mxu1 }
 0x1c1   : > { %v2238_v10 = vadd.f32 %v2237_v6, %v2236_v2  ;;  %13663 = vst [vmem:[#allocation11_spill] sm:$0xff] %v9436_v62  ;;  %1715 = vst.msk [vmem:[%s8930_s25 + $0x3a8] sm:$0xff] %vm1597_vm3, %v9436_v62 }
 0x1c3   : > { %v1261_v20 = vpop.f32.mrb[100].mxu0 }
 0x1c4   : > { %1648 = vst.msk [vmem:[%s8930_s25 + $0x190] sm:$0xff] %vm1597_vm3, %v1261_v20  ;;  %v1831_v22 = vsel %vm1597_vm3, %v1261_v20, 0.0  ;;  %v2057_v24 = vmul.f32 %v1261_v20, %v1261_v20  ;;  %v7859_v28 = vpop.f32.mrb[101].mxu0 }
 0x1c5   : > { %v1832_v9 = vadd.f32 %v1831_v22, %v1830_v3  ;;  %v1264_v19 = vpop.f32.mrb[102].mxu0  ;;  %v7992_v3 = vpop.f32.mrb[99].mxu1 }
 0x1c6   : > { %v2239_v48 = vsel %vm1597_vm3, %v2057_v24, 0.0  ;;  %1649 = vst.msk [vmem:[%s8930_s25 + $0x198] sm:$0xff] %vm1597_vm3, %v1264_v19  ;;  %v1833_v49 = vsel %vm1597_vm3, %v1264_v19, 0.0  ;;  %v2058_v50 = vmul.f32 %v1264_v19, %v1264_v19  ;;  %v7860_v2 = vpop.f32.mrb[103].mxu0  ;;  %v9445_v38 = vpop.f32.mrb[100].mxu1 }
 0x1c7   : > { %v2240_v6 = vadd.f32 %v2239_v48, %v2238_v10  ;;  %v1834_v20 = vadd.f32 %v1833_v49, %v1832_v9  ;;  %13664 = vst [vmem:[#allocation12_spill] sm:$0xff] %v9445_v38  ;;  %1716 = vst.msk [vmem:[%s8930_s25 + $0x3b0] sm:$0xff] %vm1597_vm3, %v9445_v38  ;;  %v7995_v48 = vpop.f32.mrb[101].mxu1 }
 0x1c8   : > { %v2241_v22 = vsel %vm1597_vm3, %v2058_v50, 0.0 }
 0x1c9   : > { %v2242_v28 = vadd.f32 %v2241_v22, %v2240_v6  ;;  %v9454_v22 = vpop.f32.mrb[102].mxu1 }
 0x1ca   : > { %13665 = vst [vmem:[#allocation13_spill] sm:$0xff] %v9454_v22  ;;  %1717 = vst.msk [vmem:[%s8930_s25 + $0x3b8] sm:$0xff] %vm1597_vm3, %v9454_v22 }
 0x1cb   : > { %v1269_v24 = vpop.f32.mrb[104].mxu0 }
 0x1cc   : > { %1650 = vst.msk [vmem:[%s8930_s25 + $0x1a0] sm:$0xff] %vm1597_vm3, %v1269_v24  ;;  %v1835_v40 = vsel %vm1597_vm3, %v1269_v24, 0.0  ;;  %v2059_v19 = vmul.f32 %v1269_v24, %v1269_v24  ;;  %v7863_v2 = vpop.f32.mrb[105].mxu0 }
 0x1cd   : > { %v1836_v10 = vadd.f32 %v1835_v40, %v1834_v20  ;;  %v1272_v9 = vpop.f32.mrb[106].mxu0  ;;  %v7996_v20 = vpop.f32.mrb[103].mxu1 }
 0x1ce   : > { %v2243_v49 = vsel %vm1597_vm3, %v2059_v19, 0.0  ;;  %1651 = vst.msk [vmem:[%s8930_s25 + $0x1a8] sm:$0xff] %vm1597_vm3, %v1272_v9  ;;  %v1837_v50 = vsel %vm1597_vm3, %v1272_v9, 0.0  ;;  %v2060_v6 = vmul.f32 %v1272_v9, %v1272_v9  ;;  %v7864_v3 = vpop.f32.mrb[107].mxu0  ;;  %v9463_v62 = vpop.f32.mrb[104].mxu1 }
 0x1cf   : > { %v2244_v24 = vadd.f32 %v2243_v49, %v2242_v28  ;;  %v1838_v2 = vadd.f32 %v1837_v50, %v1836_v10  ;;  %13666 = vst [vmem:[#allocation14_spill] sm:$0xff] %v9463_v62  ;;  %1718 = vst.msk [vmem:[%s8930_s25 + $0x3c0] sm:$0xff] %vm1597_vm3, %v9463_v62  ;;  %v7999_v49 = vpop.f32.mrb[105].mxu1 }
 0x1d0   : > { %v2245_v40 = vsel %vm1597_vm3, %v2060_v6, 0.0 }
 0x1d1   : > { %v2246_v48 = vadd.f32 %v2245_v40, %v2244_v24  ;;  %v9472_v40 = vpop.f32.mrb[106].mxu1 }
 0x1d2   : > { %13667 = vst [vmem:[#allocation15_spill] sm:$0xff] %v9472_v40  ;;  %1719 = vst.msk [vmem:[%s8930_s25 + $0x3c8] sm:$0xff] %vm1597_vm3, %v9472_v40 }
 0x1d3   : > { %v1277_v19 = vpop.f32.mrb[108].mxu0 }
 0x1d4   : > { %1652 = vst.msk [vmem:[%s8930_s25 + $0x1b0] sm:$0xff] %vm1597_vm3, %v1277_v19  ;;  %v1839_v38 = vsel %vm1597_vm3, %v1277_v19, 0.0  ;;  %v2061_v9 = vmul.f32 %v1277_v19, %v1277_v19  ;;  %v7867_v3 = vpop.f32.mrb[109].mxu0 }
 0x1d5   : > { %v1840_v28 = vadd.f32 %v1839_v38, %v1838_v2  ;;  %v1280_v10 = vpop.f32.mrb[110].mxu0  ;;  %v8000_v38 = vpop.f32.mrb[107].mxu1 }
 0x1d6   : > { %v2247_v50 = vsel %vm1597_vm3, %v2061_v9, 0.0  ;;  %1653 = vst.msk [vmem:[%s8930_s25 + $0x1b8] sm:$0xff] %vm1597_vm3, %v1280_v10  ;;  %v1841_v6 = vsel %vm1597_vm3, %v1280_v10, 0.0  ;;  %v2062_v24 = vmul.f32 %v1280_v10, %v1280_v10  ;;  %v7868_v20 = vpop.f32.mrb[111].mxu0  ;;  %v9481_v22 = vpop.f32.mrb[108].mxu1 }
 0x1d7   : > { %v2248_v19 = vadd.f32 %v2247_v50, %v2246_v48  ;;  %v1842_v3 = vadd.f32 %v1841_v6, %v1840_v28  ;;  %13668 = vst [vmem:[#allocation16_spill] sm:$0xff] %v9481_v22  ;;  %1720 = vst.msk [vmem:[%s8930_s25 + $0x3d0] sm:$0xff] %vm1597_vm3, %v9481_v22  ;;  %v8003_v50 = vpop.f32.mrb[109].mxu1 }
 0x1d8   : > { %v2249_v2 = vsel %vm1597_vm3, %v2062_v24, 0.0 }
 0x1d9   : > { %v2250_v49 = vadd.f32 %v2249_v2, %v2248_v19  ;;  %v9490_v2 = vpop.f32.mrb[110].mxu1 }
 0x1da   : > { %13669 = vst [vmem:[#allocation17_spill] sm:$0xff] %v9490_v2  ;;  %1721 = vst.msk [vmem:[%s8930_s25 + $0x3d8] sm:$0xff] %vm1597_vm3, %v9490_v2 }
 0x1db   : > { %v1285_v9 = vpop.f32.mrb[112].mxu0 }
 0x1dc   : > { %1654 = vst.msk [vmem:[%s8930_s25 + $0x1c0] sm:$0xff] %vm1597_vm3, %v1285_v9  ;;  %v1843_v62 = vsel %vm1597_vm3, %v1285_v9, 0.0  ;;  %v2063_v10 = vmul.f32 %v1285_v9, %v1285_v9  ;;  %v7871_v20 = vpop.f32.mrb[113].mxu0 }
 0x1dd   : > { %v1844_v48 = vadd.f32 %v1843_v62, %v1842_v3  ;;  %v1288_v28 = vpop.f32.mrb[114].mxu0  ;;  %v8004_v62 = vpop.f32.mrb[111].mxu1 }
 0x1de   : > { %v2251_v6 = vsel %vm1597_vm3, %v2063_v10, 0.0  ;;  %1655 = vst.msk [vmem:[%s8930_s25 + $0x1c8] sm:$0xff] %vm1597_vm3, %v1288_v28  ;;  %v1845_v24 = vsel %vm1597_vm3, %v1288_v28, 0.0  ;;  %v2064_v19 = vmul.f32 %v1288_v28, %v1288_v28  ;;  %v7872_v38 = vpop.f32.mrb[115].mxu0  ;;  %v9499_v40 = vpop.f32.mrb[112].mxu1 }
 0x1df   : > { %v2252_v9 = vadd.f32 %v2251_v6, %v2250_v49  ;;  %v1846_v20 = vadd.f32 %v1845_v24, %v1844_v48  ;;  %13670 = vst [vmem:[#allocation18_spill] sm:$0xff] %v9499_v40  ;;  %1722 = vst.msk [vmem:[%s8930_s25 + $0x3e0] sm:$0xff] %vm1597_vm3, %v9499_v40  ;;  %v8007_v6 = vpop.f32.mrb[113].mxu1 }
 0x1e0   : > { %v2253_v3 = vsel %vm1597_vm3, %v2064_v19, 0.0 }
 0x1e1   : > { %v2254_v50 = vadd.f32 %v2253_v3, %v2252_v9  ;;  %v9508_v3 = vpop.f32.mrb[114].mxu1 }
 0x1e2   : > { %13671 = vst [vmem:[#allocation19_spill] sm:$0xff] %v9508_v3  ;;  %1723 = vst.msk [vmem:[%s8930_s25 + $0x3e8] sm:$0xff] %vm1597_vm3, %v9508_v3 }
 0x1e3   : > { %v1293_v10 = vpop.f32.mrb[116].mxu0 }
 0x1e4   : > { %1656 = vst.msk [vmem:[%s8930_s25 + $0x1d0] sm:$0xff] %vm1597_vm3, %v1293_v10  ;;  %v1847_v22 = vsel %vm1597_vm3, %v1293_v10, 0.0  ;;  %v2065_v28 = vmul.f32 %v1293_v10, %v1293_v10  ;;  %v7875_v38 = vpop.f32.mrb[117].mxu0 }
 0x1e5   : > { %v1848_v49 = vadd.f32 %v1847_v22, %v1846_v20  ;;  %v1296_v48 = vpop.f32.mrb[118].mxu0  ;;  %v8008_v22 = vpop.f32.mrb[115].mxu1 }
 0x1e6   : > { %v2255_v24 = vsel %vm1597_vm3, %v2065_v28, 0.0  ;;  %1657 = vst.msk [vmem:[%s8930_s25 + $0x1d8] sm:$0xff] %vm1597_vm3, %v1296_v48  ;;  %v1849_v19 = vsel %vm1597_vm3, %v1296_v48, 0.0  ;;  %v2066_v9 = vmul.f32 %v1296_v48, %v1296_v48  ;;  %v7876_v62 = vpop.f32.mrb[119].mxu0  ;;  %v9517_v2 = vpop.f32.mrb[116].mxu1 }
 0x1e7   : > { %v2256_v10 = vadd.f32 %v2255_v24, %v2254_v50  ;;  %v1850_v38 = vadd.f32 %v1849_v19, %v1848_v49  ;;  %13672 = vst [vmem:[#allocation20_spill] sm:$0xff] %v9517_v2  ;;  %1724 = vst.msk [vmem:[%s8930_s25 + $0x3f0] sm:$0xff] %vm1597_vm3, %v9517_v2  ;;  %v8011_v24 = vpop.f32.mrb[117].mxu1 }
 0x1e8   : > { %v2257_v20 = vsel %vm1597_vm3, %v2066_v9, 0.0 }
 0x1e9   : > { %v2258_v6 = vadd.f32 %v2257_v20, %v2256_v10  ;;  %v9526_v20 = vpop.f32.mrb[118].mxu1 }
 0x1ea   : > { %13673 = vst [vmem:[#allocation21_spill] sm:$0xff] %v9526_v20  ;;  %1725 = vst.msk [vmem:[%s8930_s25 + $0x3f8] sm:$0xff] %vm1597_vm3, %v9526_v20 }
 0x1eb   : > { %v1301_v28 = vpop.f32.mrb[120].mxu0 }
 0x1ec   : > { %1658 = vst.msk [vmem:[%s8930_s25 + $0x1e0] sm:$0xff] %vm1597_vm3, %v1301_v28  ;;  %v1851_v40 = vsel %vm1597_vm3, %v1301_v28, 0.0  ;;  %v2067_v48 = vmul.f32 %v1301_v28, %v1301_v28  ;;  %v7879_v62 = vpop.f32.mrb[121].mxu0 }
 0x1ed   : > { %v1852_v50 = vadd.f32 %v1851_v40, %v1850_v38  ;;  %v1304_v49 = vpop.f32.mrb[122].mxu0  ;;  %v8012_v40 = vpop.f32.mrb[119].mxu1 }
 0x1ee   : > { %v2259_v19 = vsel %vm1597_vm3, %v2067_v48, 0.0  ;;  %1659 = vst.msk [vmem:[%s8930_s25 + $0x1e8] sm:$0xff] %vm1597_vm3, %v1304_v49  ;;  %v1853_v9 = vsel %vm1597_vm3, %v1304_v49, 0.0  ;;  %v2068_v10 = vmul.f32 %v1304_v49, %v1304_v49  ;;  %v7880_v22 = vpop.f32.mrb[123].mxu0  ;;  %v9535_v3 = vpop.f32.mrb[120].mxu1 }
 0x1ef   : > { %v2260_v28 = vadd.f32 %v2259_v19, %v2258_v6  ;;  %v1854_v62 = vadd.f32 %v1853_v9, %v1852_v50  ;;  %13674 = vst [vmem:[#allocation22_spill] sm:$0xff] %v9535_v3  ;;  %1726 = vst.msk [vmem:[%s8930_s25 + $0x400] sm:$0xff] %vm1597_vm3, %v9535_v3  ;;  %v8015_v19 = vpop.f32.mrb[121].mxu1 }
 0x1f0   : > { %v2261_v38 = vsel %vm1597_vm3, %v2068_v10, 0.0 }
 0x1f1   : > { %v2262_v24 = vadd.f32 %v2261_v38, %v2260_v28  ;;  %v9544_v38 = vpop.f32.mrb[122].mxu1 }
 0x1f2   : > { %13675 = vst [vmem:[#allocation23_spill] sm:$0xff] %v9544_v38  ;;  %1727 = vst.msk [vmem:[%s8930_s25 + $0x408] sm:$0xff] %vm1597_vm3, %v9544_v38 }
 0x1f3   : > { %v1309_v48 = vpop.f32.mrb[124].mxu0 }
 0x1f4   : > { %1660 = vst.msk [vmem:[%s8930_s25 + $0x1f0] sm:$0xff] %vm1597_vm3, %v1309_v48  ;;  %v1855_v2 = vsel %vm1597_vm3, %v1309_v48, 0.0  ;;  %v2069_v49 = vmul.f32 %v1309_v48, %v1309_v48  ;;  %v7883_v22 = vpop.f32.mrb[125].mxu0 }
 0x1f5   : > { %v1856_v6 = vadd.f32 %v1855_v2, %v1854_v62  ;;  %v1312_v50 = vpop.f32.mrb[126].mxu0  ;;  %v8016_v2 = vpop.f32.mrb[123].mxu1 }
 0x1f6   : > { %v2263_v9 = vsel %vm1597_vm3, %v2069_v49, 0.0  ;;  %1661 = vst.msk [vmem:[%s8930_s25 + $0x1f8] sm:$0xff] %vm1597_vm3, %v1312_v50  ;;  %v1857_v10 = vsel %vm1597_vm3, %v1312_v50, 0.0  ;;  %v2070_v28 = vmul.f32 %v1312_v50, %v1312_v50  ;;  %v7884_v40 = vpop.f32.mrb[127].mxu0  ;;  %v9553_v20 = vpop.f32.mrb[124].mxu1 }
 0x1f7   : > { %v2264_v48 = vadd.f32 %v2263_v9, %v2262_v24  ;;  %v1858_v22 = vadd.f32 %v1857_v10, %v1856_v6  ;;  %13676 = vst [vmem:[#allocation24_spill] sm:$0xff] %v9553_v20  ;;  %1728 = vst.msk [vmem:[%s8930_s25 + $0x410] sm:$0xff] %vm1597_vm3, %v9553_v20  ;;  %v8019_v9 = vpop.f32.mrb[125].mxu1 }
 0x1f8   : > { %v2265_v62 = vsel %vm1597_vm3, %v2070_v28, 0.0 }
 0x1f9   : > { %v2266_v19 = vadd.f32 %v2265_v62, %v2264_v48  ;;  %v9562_v62 = vpop.f32.mrb[126].mxu1 }
 0x1fa   : > { %13677 = vst [vmem:[#allocation25_spill] sm:$0xff] %v9562_v62  ;;  %1729 = vst.msk [vmem:[%s8930_s25 + $0x418] sm:$0xff] %vm1597_vm3, %v9562_v62 }
 0x1fb   : > { %v1317_v49 = vpop.f32.mrb[128].mxu0 }
 0x1fc   : > { %1662 = vst.msk [vmem:[%s8930_s25 + $0x200] sm:$0xff] %vm1597_vm3, %v1317_v49  ;;  %v1859_v3 = vsel %vm1597_vm3, %v1317_v49, 0.0  ;;  %v2071_v50 = vmul.f32 %v1317_v49, %v1317_v49  ;;  %v7887_v40 = vpop.f32.mrb[129].mxu0 }
 0x1fd   : > { %v1860_v24 = vadd.f32 %v1859_v3, %v1858_v22  ;;  %v1320_v6 = vpop.f32.mrb[130].mxu0  ;;  %v8020_v3 = vpop.f32.mrb[127].mxu1 }
 0x1fe   : > { %v2267_v10 = vsel %vm1597_vm3, %v2071_v50, 0.0  ;;  %1663 = vst.msk [vmem:[%s8930_s25 + $0x208] sm:$0xff] %vm1597_vm3, %v1320_v6  ;;  %v1861_v28 = vsel %vm1597_vm3, %v1320_v6, 0.0  ;;  %v2072_v48 = vmul.f32 %v1320_v6, %v1320_v6  ;;  %v7888_v2 = vpop.f32.mrb[131].mxu0  ;;  %v9571_v38 = vpop.f32.mrb[128].mxu1 }
 0x1ff   : > { %v2268_v49 = vadd.f32 %v2267_v10, %v2266_v19  ;;  %v1862_v40 = vadd.f32 %v1861_v28, %v1860_v24  ;;  %13678 = vst [vmem:[#allocation26_spill] sm:$0xff] %v9571_v38  ;;  %1730 = vst.msk [vmem:[%s8930_s25 + $0x420] sm:$0xff] %vm1597_vm3, %v9571_v38  ;;  %v8023_v24 = vpop.f32.mrb[129].mxu1  ;;  %v2075_v10 = vmul.f32 %v8952_v15, %v8952_v15 }
 0x200   : > { %v2269_v22 = vsel %vm1597_vm3, %v2072_v48, 0.0  ;;  %v2076_v24 = vmul.f32 %v8961_v23, %v8961_v23 }
 0x201   : > { %v2270_v9 = vadd.f32 %v2269_v22, %v2268_v49  ;;  %v1592_v22 = vpop.f32.mrb[130].mxu1  ;;  %v2275_v30 = vsel %vm1597_vm3, %v2075_v10, 0.0 }
 0x202   : > { %v2079_v22 = vmul.f32 %v9004_v55, %v9004_v55 }
 0x203   : > { %v1325_v50 = vpop.f32.mrb[132].mxu0 }
 0x204   : > { %1664 = vst.msk [vmem:[%s8930_s25 + $0x210] sm:$0xff] %vm1597_vm3, %v1325_v50  ;;  %v1863_v20 = vsel %vm1597_vm3, %v1325_v50, 0.0  ;;  %v2073_v6 = vmul.f32 %v1325_v50, %v1325_v50  ;;  %v7891_v2 = vpop.f32.mrb[133].mxu0 }
 0x205   : > { %v1864_v51 = vadd.f32 %v1863_v20, %v1862_v40  ;;  %v1328_v19 = vpop.f32.mrb[134].mxu0  ;;  %v8024_v20 = vpop.f32.mrb[131].mxu1  ;;  %v1867_v40 = vsel %vm1597_vm3, %v8952_v15, 0.0  ;;  %v1871_v15 = vsel %vm1597_vm3, %v8978_v35, 0.0 }
 0x206   : > { %v2271_v28 = vsel %vm1597_vm3, %v2073_v6, 0.0  ;;  %1665 = vst.msk [vmem:[%s8930_s25 + $0x218] sm:$0xff] %vm1597_vm3, %v1328_v19  ;;  %v1865_v48 = vsel %vm1597_vm3, %v1328_v19, 0.0  ;;  %v2074_v49 = vmul.f32 %v1328_v19, %v1328_v19  ;;  %v7892_v3 = vpop.f32.mrb[135].mxu0  ;;  %v1869_v19 = vsel %vm1597_vm3, %v8961_v23, 0.0 }
 0x207   : > { %v2272_v50 = vadd.f32 %v2271_v28, %v2270_v9  ;;  %v1866_v2 = vadd.f32 %v1865_v48, %v1864_v51  ;;  %v2077_v9 = vmul.f32 %v8978_v35, %v8978_v35  ;;  %v2277_v48 = vsel %vm1597_vm3, %v2076_v24, 0.0 }
 0x208   : > { %v2273_v38 = vsel %vm1597_vm3, %v2074_v49, 0.0  ;;  %v2078_v49 = vmul.f32 %v8987_v43, %v8987_v43  ;;  %v1873_v23 = vsel %vm1597_vm3, %v8987_v43, 0.0  ;;  %v1875_v35 = vsel %vm1597_vm3, %v9004_v55, 0.0 }
 0x209   : > { %v1868_v62 = vadd.f32 %v1867_v40, %v1866_v2  ;;  %v2274_v6 = vadd.f32 %v2273_v38, %v2272_v50  ;;  %v2279_v10 = vsel %vm1597_vm3, %v2077_v9, 0.0  ;;  %v2080_v2 = vmul.f32 %v9013_v63, %v9013_v63 }
 0x20a   : > { %v2281_v50 = vsel %vm1597_vm3, %v2078_v49, 0.0  ;;  %v2283_v24 = vsel %vm1597_vm3, %v2079_v22, 0.0  ;;  %v1877_v43 = vsel %vm1597_vm3, %v9013_v63, 0.0  ;;  %v1879_v55 = vsel %vm1597_vm3, %v9030_v12, 0.0 }
 0x20b   : > { %v1870_v51 = vadd.f32 %v1869_v19, %v1868_v62  ;;  %v2276_v28 = vadd.f32 %v2275_v30, %v2274_v6  ;;  %v2081_v6 = vmul.f32 %v9030_v12, %v9030_v12  ;;  %v1881_v63 = vsel %vm1597_vm3, %v9039_v21, 0.0 }
 0x20c   : > { %v1883_v12 = vsel %vm1597_vm3, %v9056_v34, 0.0  ;;  %v2084_v22 = vmul.f32 %v9065_v44, %v9065_v44 }
 0x20d   : > { %v1872_v3 = vadd.f32 %v1871_v15, %v1870_v51  ;;  %v2278_v38 = vadd.f32 %v2277_v48, %v2276_v28  ;;  %v2285_v51 = vsel %vm1597_vm3, %v2080_v2, 0.0  ;;  %v2082_v28 = vmul.f32 %v9039_v21, %v9039_v21 }
 0x20e   : > { %v2287_v49 = vsel %vm1597_vm3, %v2081_v6, 0.0  ;;  %v1885_v21 = vsel %vm1597_vm3, %v9065_v44, 0.0  ;;  %v1889_v44 = vsel %vm1597_vm3, %v9091_v1, 0.0 }
 0x20f   : > { %v1874_v62 = vadd.f32 %v1873_v23, %v1872_v3  ;;  %v2280_v30 = vadd.f32 %v2279_v10, %v2278_v38  ;;  %v2083_v3 = vmul.f32 %v9056_v34, %v9056_v34  ;;  %v2289_v23 = vsel %vm1597_vm3, %v2082_v28, 0.0 }
 0x210   : > { %v1887_v34 = vsel %vm1597_vm3, %v9082_v57, 0.0 }
 0x211   : > { %v1876_v20 = vadd.f32 %v1875_v35, %v1874_v62  ;;  %v2282_v40 = vadd.f32 %v2281_v50, %v2280_v30  ;;  %v2291_v50 = vsel %vm1597_vm3, %v2083_v3, 0.0  ;;  %v2085_v35 = vmul.f32 %v9082_v57, %v9082_v57 }
 0x212   : > { %v1891_v57 = vsel %vm1597_vm3, %v9103_v14, 0.0  ;;  %v2089_v3 = vmul.f32 %v9121_v37, %v9121_v37 }
 0x213   : > { %v1878_v19 = vadd.f32 %v1877_v43, %v1876_v20  ;;  %v2284_v9 = vadd.f32 %v2283_v24, %v2282_v40  ;;  %v2293_v40 = vsel %vm1597_vm3, %v2084_v22, 0.0  ;;  %v2086_v24 = vmul.f32 %v9091_v1, %v9091_v1 }
 0x214   : > { %v1893_v1 = vsel %vm1597_vm3, %v9112_v25, 0.0 }
 0x215   : > { %v1880_v48 = vadd.f32 %v1879_v55, %v1878_v19  ;;  %v2286_v15 = vadd.f32 %v2285_v51, %v2284_v9  ;;  %v2295_v19 = vsel %vm1597_vm3, %v2085_v35, 0.0  ;;  %v2087_v9 = vmul.f32 %v9103_v14, %v9103_v14 }
 0x216   : > { %v2297_v28 = vsel %vm1597_vm3, %v2086_v24, 0.0  ;;  %v1895_v14 = vsel %vm1597_vm3, %v9121_v37, 0.0  ;;  %v1899_v37 = vsel %vm1597_vm3, %v9139_v59, 0.0 }
 0x217   : > { %v1882_v38 = vadd.f32 %v1881_v63, %v1880_v48  ;;  %v2288_v10 = vadd.f32 %v2287_v49, %v2286_v15  ;;  %v2088_v48 = vmul.f32 %v9112_v25, %v9112_v25  ;;  %v2299_v63 = vsel %vm1597_vm3, %v2087_v9, 0.0 }
 0x218   : > { %v1897_v25 = vsel %vm1597_vm3, %v9130_v47, 0.0  ;;  %v2094_v9 = vmul.f32 %v9166_v29, %v9166_v29 }
 0x219   : > { %v1884_v62 = vadd.f32 %v1883_v12, %v1882_v38  ;;  %v2290_v30 = vadd.f32 %v2289_v23, %v2288_v10  ;;  %v2301_v23 = vsel %vm1597_vm3, %v2088_v48, 0.0  ;;  %v2090_v12 = vmul.f32 %v9130_v47, %v9130_v47 }
 0x21a   : > { %v1901_v47 = vsel %vm1597_vm3, %v9148_v5, 0.0 }
 0x21b   : > { %v1886_v2 = vadd.f32 %v1885_v21, %v1884_v62  ;;  %v2292_v20 = vadd.f32 %v2291_v50, %v2290_v30  ;;  %v2303_v30 = vsel %vm1597_vm3, %v2089_v3, 0.0  ;;  %v2091_v50 = vmul.f32 %v9139_v59, %v9139_v59 }
 0x21c   : > { %v1903_v59 = vsel %vm1597_vm3, %v9157_v18, 0.0 }
 0x21d   : > { %v1888_v43 = vadd.f32 %v1887_v34, %v1886_v2  ;;  %v2294_v6 = vadd.f32 %v2293_v40, %v2292_v20  ;;  %v2305_v2 = vsel %vm1597_vm3, %v2090_v12, 0.0  ;;  %v2092_v20 = vmul.f32 %v9148_v5, %v9148_v5 }
 0x21e   : > { %v2307_v24 = vsel %vm1597_vm3, %v2091_v50, 0.0  ;;  %v1905_v5 = vsel %vm1597_vm3, %v9166_v29, 0.0  ;;  %v1909_v29 = vsel %vm1597_vm3, %v9184_v53, 0.0  ;;  %v2099_v50 = vmul.f32 %v9211_v31, %v9211_v31 }
 0x21f   : > { %v1890_v51 = vadd.f32 %v1889_v44, %v1888_v43  ;;  %v2296_v55 = vadd.f32 %v2295_v19, %v2294_v6  ;;  %v2093_v43 = vmul.f32 %v9157_v18, %v9157_v18  ;;  %v2309_v44 = vsel %vm1597_vm3, %v2092_v20, 0.0 }
 0x220   : > { %v1907_v18 = vsel %vm1597_vm3, %v9175_v42, 0.0 }
 0x221   : > { %v1892_v15 = vadd.f32 %v1891_v57, %v1890_v51  ;;  %v2298_v49 = vadd.f32 %v2297_v28, %v2296_v55  ;;  %v2311_v28 = vsel %vm1597_vm3, %v2093_v43, 0.0  ;;  %v2095_v57 = vmul.f32 %v9175_v42, %v9175_v42 }
 0x222   : > { %v1911_v42 = vsel %vm1597_vm3, %v9193_v4, 0.0 }
 0x223   : > { %v1894_v38 = vadd.f32 %v1893_v1, %v1892_v15  ;;  %v2300_v10 = vadd.f32 %v2299_v63, %v2298_v49  ;;  %v2313_v49 = vsel %vm1597_vm3, %v2094_v9, 0.0  ;;  %v2096_v63 = vmul.f32 %v9184_v53, %v9184_v53 }
 0x224   : > { %v1913_v53 = vsel %vm1597_vm3, %v9202_v16, 0.0 }
 0x225   : > { %v1896_v22 = vadd.f32 %v1895_v14, %v1894_v38  ;;  %v2302_v62 = vadd.f32 %v2301_v23, %v2300_v10  ;;  %v2315_v38 = vsel %vm1597_vm3, %v2095_v57, 0.0  ;;  %v2097_v10 = vmul.f32 %v9193_v4, %v9193_v4 }
 0x226   : > { %v2317_v12 = vsel %vm1597_vm3, %v2096_v63, 0.0  ;;  %v1915_v4 = vsel %vm1597_vm3, %v9211_v31, 0.0  ;;  %v1919_v31 = vsel %vm1597_vm3, %v9229_v60, 0.0  ;;  %v2104_v57 = vmul.f32 %v9256_v39, %v9256_v39 }
 0x227   : > { %v1898_v21 = vadd.f32 %v1897_v25, %v1896_v22  ;;  %v2304_v35 = vadd.f32 %v2303_v30, %v2302_v62  ;;  %v2098_v22 = vmul.f32 %v9202_v16, %v9202_v16  ;;  %v2319_v25 = vsel %vm1597_vm3, %v2097_v10, 0.0 }
 0x228   : > { %v1917_v16 = vsel %vm1597_vm3, %v9220_v45, 0.0 }
 0x229   : > { %v1900_v40 = vadd.f32 %v1899_v37, %v1898_v21  ;;  %v2306_v34 = vadd.f32 %v2305_v2, %v2304_v35  ;;  %v2321_v2 = vsel %vm1597_vm3, %v2098_v22, 0.0  ;;  %v2100_v37 = vmul.f32 %v9220_v45, %v9220_v45 }
 0x22a   : > { %v1921_v45 = vsel %vm1597_vm3, %v9238_v8, 0.0 }
 0x22b   : > { %v2308_v6 = vadd.f32 %v2307_v24, %v2306_v34  ;;  %v1902_v19 = vadd.f32 %v1901_v47, %v1900_v40  ;;  %v2323_v34 = vsel %vm1597_vm3, %v2099_v50, 0.0  ;;  %v2101_v24 = vmul.f32 %v9229_v60, %v9229_v60 }
 0x22c   : > { %v1923_v60 = vsel %vm1597_vm3, %v9247_v26, 0.0  ;;  %v2109_v50 = vmul.f32 %v9301_v61, %v9301_v61 }
 0x22d   : > { %v1904_v51 = vadd.f32 %v1903_v59, %v1902_v19  ;;  %v2310_v55 = vadd.f32 %v2309_v44, %v2308_v6  ;;  %v2325_v6 = vsel %vm1597_vm3, %v2100_v37, 0.0  ;;  %v2102_v19 = vmul.f32 %v9238_v8, %v9238_v8 }
 0x22e   : > { %v2327_v9 = vsel %vm1597_vm3, %v2101_v24, 0.0  ;;  %v1925_v8 = vsel %vm1597_vm3, %v9256_v39, 0.0  ;;  %v1929_v39 = vsel %vm1597_vm3, %v9274_v7, 0.0 }
 0x22f   : > { %v1906_v48 = vadd.f32 %v1905_v5, %v1904_v51  ;;  %v2312_v15 = vadd.f32 %v2311_v28, %v2310_v55  ;;  %v2103_v51 = vmul.f32 %v9247_v26, %v9247_v26  ;;  %v2329_v5 = vsel %vm1597_vm3, %v2102_v19, 0.0 }
 0x230   : > { %v1927_v26 = vsel %vm1597_vm3, %v9265_v56, 0.0 }
 0x231   : > { %v1908_v1 = vadd.f32 %v1907_v18, %v1906_v48  ;;  %v2314_v3 = vadd.f32 %v2313_v49, %v2312_v15  ;;  %v2331_v49 = vsel %vm1597_vm3, %v2103_v51, 0.0  ;;  %v2105_v18 = vmul.f32 %v9265_v56, %v9265_v56 }
 0x232   : > { %v1931_v56 = vsel %vm1597_vm3, %v9283_v27, 0.0  ;;  %v2114_v51 = vmul.f32 %v9346_v32, %v9346_v32 }
 0x233   : > { %v1910_v23 = vadd.f32 %v1909_v29, %v1908_v1  ;;  %v2316_v14 = vadd.f32 %v2315_v38, %v2314_v3  ;;  %v2333_v3 = vsel %vm1597_vm3, %v2104_v57, 0.0  ;;  %v2106_v38 = vmul.f32 %v9274_v7, %v9274_v7 }
 0x234   : > { %v1933_v7 = vsel %vm1597_vm3, %v9292_v41, 0.0 }
 0x235   : > { %v1912_v62 = vadd.f32 %v1911_v42, %v1910_v23  ;;  %v2318_v30 = vadd.f32 %v2317_v12, %v2316_v14  ;;  %v2335_v23 = vsel %vm1597_vm3, %v2105_v18, 0.0  ;;  %v2107_v14 = vmul.f32 %v9283_v27, %v9283_v27 }
 0x236   : > { %v2337_v22 = vsel %vm1597_vm3, %v2106_v38, 0.0  ;;  %v1935_v27 = vsel %vm1597_vm3, %v9301_v61, 0.0  ;;  %v1939_v61 = vsel %vm1597_vm3, %v9319_v36, 0.0 }
 0x237   : > { %v1914_v21 = vadd.f32 %v1913_v53, %v1912_v62  ;;  %v2320_v35 = vadd.f32 %v2319_v25, %v2318_v30  ;;  %v2108_v62 = vmul.f32 %v9292_v41, %v9292_v41  ;;  %v2339_v53 = vsel %vm1597_vm3, %v2107_v14, 0.0 }
 0x238   : > { %v1937_v41 = vsel %vm1597_vm3, %v9310_v13, 0.0  ;;  %v2119_v14 = vmul.f32 %v9391_v33, %v9391_v33 }
 0x239   : > { %v1916_v20 = vadd.f32 %v1915_v4, %v1914_v21  ;;  %v2322_v40 = vadd.f32 %v2321_v2, %v2320_v35  ;;  %v2341_v2 = vsel %vm1597_vm3, %v2108_v62, 0.0  ;;  %v2110_v4 = vmul.f32 %v9310_v13, %v9310_v13 }
 0x23a   : > { %v1941_v13 = vsel %vm1597_vm3, %v9328_v52, 0.0 }
 0x23b   : > { %v1918_v47 = vadd.f32 %v1917_v16, %v1916_v20  ;;  %v2324_v43 = vadd.f32 %v2323_v34, %v2322_v40  ;;  %v2343_v40 = vsel %vm1597_vm3, %v2109_v50, 0.0  ;;  %v2111_v34 = vmul.f32 %v9319_v36, %v9319_v36 }
 0x23c   : > { %v1943_v36 = vsel %vm1597_vm3, %v9337_v11, 0.0 }
 0x23d   : > { %v1920_v44 = vadd.f32 %v1919_v31, %v1918_v47  ;;  %v2326_v59 = vadd.f32 %v2325_v6, %v2324_v43  ;;  %v2345_v47 = vsel %vm1597_vm3, %v2110_v4, 0.0  ;;  %v2112_v43 = vmul.f32 %v9328_v52, %v9328_v52 }
 0x23e   : > { %v2347_v19 = vsel %vm1597_vm3, %v2111_v34, 0.0  ;;  %v1945_v52 = vsel %vm1597_vm3, %v9346_v32, 0.0  ;;  %v1949_v32 = vsel %vm1597_vm3, %v9364_v17, 0.0 }
 0x23f   : > { %v1922_v55 = vadd.f32 %v1921_v45, %v1920_v44  ;;  %v2328_v28 = vadd.f32 %v2327_v9, %v2326_v59  ;;  %v2113_v44 = vmul.f32 %v9337_v11, %v9337_v11  ;;  %v2349_v45 = vsel %vm1597_vm3, %v2112_v43, 0.0 }
 0x240   : > { %v1947_v11 = vsel %vm1597_vm3, %v9355_v58, 0.0 }
 0x241   : > { %v1924_v48 = vadd.f32 %v1923_v60, %v1922_v55  ;;  %v2330_v15 = vadd.f32 %v2329_v5, %v2328_v28  ;;  %v2351_v5 = vsel %vm1597_vm3, %v2113_v44, 0.0  ;;  %v2115_v60 = vmul.f32 %v9355_v58, %v9355_v58  ;;  %v13683_v44 = vld [vmem:[#allocation12_spill] sm:$0xff] }
 0x242   : > { %v1951_v58 = vsel %vm1597_vm3, %v9373_v46, 0.0 }
 0x243   : > { %v1926_v63 = vadd.f32 %v1925_v8, %v1924_v48  ;;  %v2332_v1 = vadd.f32 %v2331_v49, %v2330_v15  ;;  %v2353_v15 = vsel %vm1597_vm3, %v2114_v51, 0.0  ;;  %v2116_v49 = vmul.f32 %v9364_v17, %v9364_v17 }
 0x244   : > { %v1953_v17 = vsel %vm1597_vm3, %v9382_v0, 0.0  ;;  %v1967_v51 = vsel %vm1597_vm3, %v13683_v44, 0.0 }
 0x245   : > { %v1928_v29 = vadd.f32 %v1927_v26, %v1926_v63  ;;  %v2334_v10 = vadd.f32 %v2333_v3, %v2332_v1  ;;  %v2355_v63 = vsel %vm1597_vm3, %v2115_v60, 0.0  ;;  %v2117_v1 = vmul.f32 %v9373_v46, %v9373_v46 }
 0x246   : > { %v2357_v38 = vsel %vm1597_vm3, %v2116_v49, 0.0  ;;  %v1955_v46 = vsel %vm1597_vm3, %v9391_v33, 0.0 }
 0x247   : > { %v1930_v12 = vadd.f32 %v1929_v39, %v1928_v29  ;;  %v2336_v42 = vadd.f32 %v2335_v23, %v2334_v10  ;;  %v2118_v29 = vmul.f32 %v9382_v0, %v9382_v0  ;;  %v2359_v39 = vsel %vm1597_vm3, %v2117_v1, 0.0 }
 0x248   : > { %v1957_v0 = vsel %vm1597_vm3, %v9400_v54, 0.0 }
 0x249   : > { %v1932_v30 = vadd.f32 %v1931_v56, %v1930_v12  ;;  %v2338_v25 = vadd.f32 %v2337_v22, %v2336_v42  ;;  %v2361_v22 = vsel %vm1597_vm3, %v2118_v29, 0.0  ;;  %v2120_v56 = vmul.f32 %v9400_v54, %v9400_v54 }
 0x24b   : > { %v1934_v21 = vadd.f32 %v1933_v7, %v1932_v30  ;;  %v2340_v35 = vadd.f32 %v2339_v53, %v2338_v25  ;;  %v2363_v25 = vsel %vm1597_vm3, %v2119_v14, 0.0  ;;  %v13679_v53 = vld [vmem:[#allocation8_spill] sm:$0xff]  ;;  %v13688_v14 = vld [vmem:[#allocation17_spill] sm:$0xff] }
 0x24c   : > { %v2121_v7 = vmul.f32 %v13679_v53, %v13679_v53  ;;  %v1959_v33 = vsel %vm1597_vm3, %v13679_v53, 0.0 }
 0x24d   : > { %v2342_v37 = vadd.f32 %v2341_v2, %v2340_v35  ;;  %v1936_v20 = vadd.f32 %v1935_v27, %v1934_v21  ;;  %v2365_v35 = vsel %vm1597_vm3, %v2120_v56, 0.0  ;;  %v13680_v2 = vld [vmem:[#allocation9_spill] sm:$0xff]  ;;  %v1977_v56 = vsel %vm1597_vm3, %v13688_v14, 0.0 }
 0x24e   : > { %v2122_v27 = vmul.f32 %v13680_v2, %v13680_v2  ;;  %v1961_v54 = vsel %vm1597_vm3, %v13680_v2, 0.0 }
 0x24f   : > { %v2344_v16 = vadd.f32 %v2343_v40, %v2342_v37  ;;  %v1938_v24 = vadd.f32 %v1937_v41, %v1936_v20  ;;  %v2367_v20 = vsel %vm1597_vm3, %v2121_v7, 0.0  ;;  %v13681_v40 = vld [vmem:[#allocation10_spill] sm:$0xff] }
 0x250   : > { %v2123_v41 = vmul.f32 %v13681_v40, %v13681_v40 }
 0x251   : > { %v2346_v6 = vadd.f32 %v2345_v47, %v2344_v16  ;;  %v1940_v31 = vadd.f32 %v1939_v61, %v1938_v24  ;;  %v2369_v24 = vsel %vm1597_vm3, %v2122_v27, 0.0  ;;  %v1963_v47 = vsel %vm1597_vm3, %v13681_v40, 0.0  ;;  %v13682_v61 = vld [vmem:[#allocation11_spill] sm:$0xff] }
 0x252   : > { %v2124_v43 = vmul.f32 %v13682_v61, %v13682_v61 }
 0x253   : > { %v2348_v59 = vadd.f32 %v2347_v19, %v2346_v6  ;;  %v1942_v9 = vadd.f32 %v1941_v13, %v1940_v31  ;;  %v2371_v19 = vsel %vm1597_vm3, %v2123_v41, 0.0  ;;  %v1965_v13 = vsel %vm1597_vm3, %v13682_v61, 0.0 }
 0x255   : > { %v2350_v55 = vadd.f32 %v2349_v45, %v2348_v59  ;;  %v1944_v28 = vadd.f32 %v1943_v36, %v1942_v9  ;;  %v2125_v59 = vmul.f32 %v13683_v44, %v13683_v44  ;;  %v2373_v36 = vsel %vm1597_vm3, %v2124_v43, 0.0 }
 0x257   : > { %v2352_v57 = vadd.f32 %v2351_v5, %v2350_v55  ;;  %v1946_v48 = vadd.f32 %v1945_v52, %v1944_v28  ;;  %v13684_v55 = vld [vmem:[#allocation13_spill] sm:$0xff]  ;;  %v2375_v60 = vsel %vm1597_vm3, %v2125_v59, 0.0 }
 0x258   : > { %v2126_v28 = vmul.f32 %v13684_v55, %v13684_v55 }
 0x259   : > { %v2354_v8 = vadd.f32 %v2353_v15, %v2352_v57  ;;  %v1948_v18 = vadd.f32 %v1947_v11, %v1946_v48  ;;  %v1969_v57 = vsel %vm1597_vm3, %v13684_v55, 0.0  ;;  %v13685_v48 = vld [vmem:[#allocation14_spill] sm:$0xff] }
 0x25a   : > { %v2127_v15 = vmul.f32 %v13685_v48, %v13685_v48 }
 0x25b   : > { %v2356_v3 = vadd.f32 %v2355_v63, %v2354_v8  ;;  %v1950_v26 = vadd.f32 %v1949_v32, %v1948_v18  ;;  %v2377_v8 = vsel %vm1597_vm3, %v2126_v28, 0.0  ;;  %v1971_v18 = vsel %vm1597_vm3, %v13685_v48, 0.0  ;;  %v13686_v63 = vld [vmem:[#allocation15_spill] sm:$0xff] }
 0x25c   : > { %v2128_v32 = vmul.f32 %v13686_v63, %v13686_v63 }
 0x25d   : > { %v2358_v10 = vadd.f32 %v2357_v38, %v2356_v3  ;;  %v1952_v23 = vadd.f32 %v1951_v58, %v1950_v26  ;;  %v2379_v26 = vsel %vm1597_vm3, %v2127_v15, 0.0  ;;  %v1973_v38 = vsel %vm1597_vm3, %v13686_v63, 0.0  ;;  %v13687_v58 = vld [vmem:[#allocation16_spill] sm:$0xff] }
 0x25e   : > { %v2129_v29 = vmul.f32 %v13687_v58, %v13687_v58 }
 0x25f   : > { %v2360_v12 = vadd.f32 %v2359_v39, %v2358_v10  ;;  %v1954_v42 = vadd.f32 %v1953_v17, %v1952_v23  ;;  %v2381_v39 = vsel %vm1597_vm3, %v2128_v32, 0.0  ;;  %v1975_v17 = vsel %vm1597_vm3, %v13687_v58, 0.0 }
 0x261   : > { %v2362_v62 = vadd.f32 %v2361_v22, %v2360_v12  ;;  %v1956_v30 = vadd.f32 %v1955_v46, %v1954_v42  ;;  %v2130_v12 = vmul.f32 %v13688_v14, %v13688_v14  ;;  %v2383_v46 = vsel %vm1597_vm3, %v2129_v29, 0.0 }
 0x263   : > { %v2364_v50 = vadd.f32 %v2363_v25, %v2362_v62  ;;  %v1958_v21 = vadd.f32 %v1957_v0, %v1956_v30  ;;  %v13689_v62 = vld [vmem:[#allocation18_spill] sm:$0xff]  ;;  %v2385_v53 = vsel %vm1597_vm3, %v2130_v12, 0.0 }
 0x264   : > { %v2131_v30 = vmul.f32 %v13689_v62, %v13689_v62  ;;  %v1979_v7 = vsel %vm1597_vm3, %v13689_v62, 0.0 }
 0x265   : > { %v2366_v4 = vadd.f32 %v2365_v35, %v2364_v50  ;;  %v1960_v37 = vadd.f32 %v1959_v33, %v1958_v21  ;;  %v13690_v50 = vld [vmem:[#allocation19_spill] sm:$0xff] }
 0x266   : > { %v2132_v21 = vmul.f32 %v13690_v50, %v13690_v50  ;;  %v2387_v2 = vsel %vm1597_vm3, %v2131_v30, 0.0  ;;  %v1981_v27 = vsel %vm1597_vm3, %v13690_v50, 0.0  ;;  %v2006_v50 = vld [vmem:[#allocation4] sm:$0x1] }
 0x267   : > { %v2368_v34 = vadd.f32 %v2367_v20, %v2366_v4  ;;  %v1962_v16 = vadd.f32 %v1961_v54, %v1960_v37  ;;  %v13691_v4 = vld [vmem:[#allocation20_spill] sm:$0xff] }
 0x268   : > { %v2133_v37 = vmul.f32 %v13691_v4, %v13691_v4  ;;  %v2389_v40 = vsel %vm1597_vm3, %v2132_v21, 0.0  ;;  %v1983_v41 = vsel %vm1597_vm3, %v13691_v4, 0.0 }
 0x269   : > { %v2370_v6 = vadd.f32 %v2369_v24, %v2368_v34  ;;  %v1964_v31 = vadd.f32 %v1963_v47, %v1962_v16  ;;  %v13692_v34 = vld [vmem:[#allocation21_spill] sm:$0xff] }
 0x26a   : > { %v2134_v16 = vmul.f32 %v13692_v34, %v13692_v34  ;;  %v2391_v61 = vsel %vm1597_vm3, %v2133_v37, 0.0  ;;  %v1985_v43 = vsel %vm1597_vm3, %v13692_v34, 0.0 }
 0x26b   : > { %v2372_v9 = vadd.f32 %v2371_v19, %v2370_v6  ;;  %v1966_v45 = vadd.f32 %v1965_v13, %v1964_v31  ;;  %v13693_v6 = vld [vmem:[#allocation22_spill] sm:$0xff] }
 0x26c   : > { %v2135_v31 = vmul.f32 %v13693_v6, %v13693_v6  ;;  %v2393_v44 = vsel %vm1597_vm3, %v2134_v16, 0.0  ;;  %v1987_v59 = vsel %vm1597_vm3, %v13693_v6, 0.0 }
 0x26d   : > { %v2374_v5 = vadd.f32 %v2373_v36, %v2372_v9  ;;  %v1968_v52 = vadd.f32 %v1967_v51, %v1966_v45  ;;  %v13694_v9 = vld [vmem:[#allocation23_spill] sm:$0xff] }
 0x26e   : > { %v2136_v45 = vmul.f32 %v13694_v9, %v13694_v9  ;;  %v2395_v55 = vsel %vm1597_vm3, %v2135_v31, 0.0  ;;  %v1989_v28 = vsel %vm1597_vm3, %v13694_v9, 0.0 }
 0x26f   : > { %v2376_v11 = vadd.f32 %v2375_v60, %v2374_v5  ;;  %v1970_v49 = vadd.f32 %v1969_v57, %v1968_v52  ;;  %v13695_v5 = vld [vmem:[#allocation24_spill] sm:$0xff] }
 0x270   : > { %v2137_v52 = vmul.f32 %v13695_v5, %v13695_v5  ;;  %v2397_v48 = vsel %vm1597_vm3, %v2136_v45, 0.0  ;;  %v1991_v15 = vsel %vm1597_vm3, %v13695_v5, 0.0 }
 0x271   : > { %v2378_v1 = vadd.f32 %v2377_v8, %v2376_v11  ;;  %v1972_v3 = vadd.f32 %v1971_v18, %v1970_v49  ;;  %v13696_v11 = vld [vmem:[#allocation25_spill] sm:$0xff]  ;;  %v13697_v8 = vld [vmem:[#allocation26_spill] sm:$0xff] }
 0x272   : > { %v2138_v49 = vmul.f32 %v13696_v11, %v13696_v11  ;;  %v2139_v18 = vmul.f32 %v13697_v8, %v13697_v8 }
 0x273   : > { %v2380_v10 = vadd.f32 %v2379_v26, %v2378_v1  ;;  %v1974_v23 = vadd.f32 %v1973_v38, %v1972_v3  ;;  %v2399_v1 = vsel %vm1597_vm3, %v2137_v52, 0.0  ;;  %v1993_v3 = vsel %vm1597_vm3, %v13696_v11, 0.0 }
 0x274   : > { %v1995_v26 = vsel %vm1597_vm3, %v13697_v8, 0.0  ;;  %v2401_v29 = vsel %vm1597_vm3, %v2138_v49, 0.0 }
 0x275   : > { %v2382_v42 = vadd.f32 %v2381_v39, %v2380_v10  ;;  %v1976_v22 = vadd.f32 %v1975_v17, %v1974_v23  ;;  %v2403_v10 = vsel %vm1597_vm3, %v2139_v18, 0.0 }
 0x277   : > { %v2384_v25 = vadd.f32 %v2383_v46, %v2382_v42  ;;  %v1978_v0 = vadd.f32 %v1977_v56, %v1976_v22 }
 0x279   : > { %v2386_v35 = vadd.f32 %v2385_v53, %v2384_v25  ;;  %v1980_v33 = vadd.f32 %v1979_v7, %v1978_v0  ;;  %v1731_v0 = vld [vmem:[#allocation3] sm:$0x1] }
 0x27b   : > { %v2388_v20 = vadd.f32 %v2387_v2, %v2386_v35  ;;  %v1982_v54 = vadd.f32 %v1981_v27, %v1980_v33 }
 0x27d   : > { %v2390_v24 = vadd.f32 %v2389_v40, %v2388_v20  ;;  %v1984_v47 = vadd.f32 %v1983_v41, %v1982_v54 }
 0x27f   : > { %v2392_v19 = vadd.f32 %v2391_v61, %v2390_v24  ;;  %v1986_v13 = vadd.f32 %v1985_v43, %v1984_v47 }
 0x281   : > { %v2394_v36 = vadd.f32 %v2393_v44, %v2392_v19  ;;  %v1988_v51 = vadd.f32 %v1987_v59, %v1986_v13 }
 0x283   : > { %v2396_v60 = vadd.f32 %v2395_v55, %v2394_v36  ;;  %v1990_v57 = vadd.f32 %v1989_v28, %v1988_v51 }
 0x285   : > { %v2398_v63 = vadd.f32 %v2397_v48, %v2396_v60  ;;  %v1992_v32 = vadd.f32 %v1991_v15, %v1990_v57 }
 0x287   : > { %v2400_v38 = vadd.f32 %v2399_v1, %v2398_v63  ;;  %v1994_v58 = vadd.f32 %v1993_v3, %v1992_v32 }
 0x289   : > { %v2402_v23 = vadd.f32 %v2401_v29, %v2400_v38  ;;  %v1996_v39 = vadd.f32 %v1995_v26, %v1994_v58 }
 0x28b   : > { %v1997_v17 = vrot.slane %v1996_v39, 4  ;;  %v2404_v14 = vadd.f32 %v2403_v10, %v2402_v23 }
 0x28d   : > { %v1998_v12 = vadd.f32 %v1997_v17, %v1996_v39  ;;  %v2405_v42 = vrot.slane %v2404_v14, 4 }
 0x28f   : > { %v1999_v22 = vrot.slane %v1998_v12, 2  ;;  %v2406_v46 = vadd.f32 %v2405_v42, %v2404_v14 }
 0x291   : > { %v2000_v56 = vadd.f32 %v1999_v22, %v1998_v12  ;;  %v2407_v62 = vrot.slane %v2406_v46, 2 }
 0x293   : > { %v2001_v30 = vrot.slane %v2000_v56, 1  ;;  %v2408_v25 = vadd.f32 %v2407_v62, %v2406_v46 }
 0x295   : > { %v2002_v53 = vadd.f32 %v2001_v30, %v2000_v56  ;;  %v2409_v7 = vrot.slane %v2408_v25, 1  ;;  %2416 = sbr.rel (%p7490_p5) target bundleno = 2107 (0x83b), region = 64 }
 0x297   : > { %v2003_v21 = vadd.f32 %v2002_v53, %v1731_v0  ;;  %v2410_v35 = vadd.f32 %v2409_v7, %v2408_v25 }
 0x299   : > { %2005 = vst.msk [vmem:[#allocation3] sm:$0x1] %vm2004_vm4, %v2003_v21  ;;  %v2411_v33 = vadd.f32 %v2410_v35, %v2006_v50 }
 0x29b   : > { %2412 = vst.msk [vmem:[#allocation4] sm:$0x1] %vm2004_vm4, %v2411_v33 }
 0x29c   : > { %v2909_v4 = vlaneseq  ;;  %v9909_v41 = vld [vmem:[#allocation2 + $0x2e0] sm:$0xff]  ;;  %v9911_v34 = vld [vmem:[#allocation2 + $0x2e8] sm:$0xff]  ;;  %v9917_v47 = vld [vmem:[#allocation2 + $0x398] sm:$0xff]  ;;  %s8619_s11 = smov 64   ;;  %s8620_s12 = smov 32   ;;  %vm6265_vm5 = vcmask 785408  }
 0x29d   : > { %v9913_v16 = vld [vmem:[#allocation2 + $0x300] sm:$0xff]  ;;  %v9915_v24 = vld [vmem:[#allocation2 + $0x308] sm:$0xff]  ;;  %v9921_v43 = vld [vmem:[#allocation2 + $0x3b8] sm:$0xff]  ;;  %s8621_s13 = smov 96   ;;  %vm8623_vm6 = vmmov 0  }
 0x29e   : > { %v9907_v54 = vshrl.u32 %v2909_v4, 7  ;;  %v9919_v61 = vld [vmem:[#allocation2 + $0x3a0] sm:$0xff]  ;;  %v9926_v13 = vld [vmem:[#allocation2 + $0x190] sm:$0xff]  ;;  %v9928_v44 = vld [vmem:[#allocation2 + $0x198] sm:$0xff] }
 0x29f   : > { %v9923_v6 = vld [vmem:[#allocation2 + $0x3c0] sm:$0xff]  ;;  %v9930_v59 = vld [vmem:[#allocation2 + $0x1b0] sm:$0xff]  ;;  %v9936_v45 = vld [vmem:[#allocation2 + $0x1b8] sm:$0xff] }
 0x2a0   : > { %v2417_v2 = vld [vmem:[#allocation3] sm:$0x1]  ;;  %v13631_v31 = vsub.s32 0, %v9907_v54  ;;  %v9938_v36 = vld [vmem:[#allocation2 + $0x248] sm:$0xff]  ;;  %v9940_v51 = vld [vmem:[#allocation2 + $0x250] sm:$0xff] }
 0x2a1   : > { %v2419_v37 = vmul.f32 0.0002362949, %v2417_v2  ;;  %v9942_v55 = vld [vmem:[#allocation2 + $0x268] sm:$0xff]  ;;  %v9944_v5 = vld [vmem:[#allocation2 + $0x270] sm:$0xff]  ;;  %v9946_v52 = vld [vmem:[#allocation2 + $0x20] sm:$0xff] }
 0x2a2   : > { %v2420_v27 = vld [vmem:[#allocation4] sm:$0x1]  ;;  %v9948_v60 = vld [vmem:[#allocation2 + $0x28] sm:$0xff]  ;;  %v9962_v18 = vld [vmem:[#allocation2 + $0xd8] sm:$0xff] }
 0x2a3   : > { %v2421_v20 = vmul.f32 0.0002362949, %v2420_v27  ;;  %v2422_v40 = vmul.f32 %v2419_v37, %v2419_v37  ;;  %v9934_v9 = vrot.slane %v2419_v37, %v13631_v31  ;;  %v9950_v57 = vld [vmem:[#allocation2 + $0x40] sm:$0xff]  ;;  %v9960_v8 = vld [vmem:[#allocation2 + $0x48] sm:$0xff]  ;;  %v9974_v38 = vld [vmem:[#allocation2 + $0xf8] sm:$0xff] }
 0x2a4   : > { %v9964_v63 = vld [vmem:[#allocation2 + $0xe0] sm:$0xff]  ;;  %v9978_v29 = vld [vmem:[#allocation2 + $0x10] sm:$0xff]  ;;  %v9986_v17 = vld [vmem:[#allocation2 + $0x18] sm:$0xff] }
 0x2a5   : > { %v2423_v19 = vsub.f32 %v2421_v20, %v2422_v40  ;;  %v9976_v58 = vld [vmem:[#allocation2 + $0x100] sm:$0xff]  ;;  %v9988_v14 = vld [vmem:[#allocation2 + $0x30] sm:$0xff]  ;;  %v9990_v12 = vld [vmem:[#allocation2 + $0x38] sm:$0xff]  ;;  %v13711_v26 = vsub.f32 %v9909_v41, %v9934_v9  ;;  %v13712_v48 = vsub.f32 %v9911_v34, %v9934_v9  ;;  %v13715_v41 = vsub.f32 %v9917_v47, %v9934_v9 }
 0x2a6   : > { %v10000_v62 = vld [vmem:[#allocation2 + $0xc8] sm:$0xff]  ;;  %v10002_v30 = vld [vmem:[#allocation2 + $0xd0] sm:$0xff]  ;;  %v10018_v33 = vld [vmem:[#allocation2 + $0x178] sm:$0xff]  ;;  %v13716_v34 = vsub.f32 %v9919_v61, %v9934_v9 }
 0x2a7   : > { %v3398_v28 = vadd.f32 1e-05, %v2423_v19  ;;  %v10004_v25 = vld [vmem:[#allocation2 + $0xe8] sm:$0xff]  ;;  %v10014_v21 = vld [vmem:[#allocation2 + $0xf0] sm:$0xff]  ;;  %v10042_v50 = vld [vmem:[#allocation2 + $0x2f8] sm:$0xff] }
 0x2a8   : > { %v10016_v35 = vld [vmem:[#allocation2 + $0x170] sm:$0xff]  ;;  %v10028_v20 = vld [vmem:[#allocation2 + $0x228] sm:$0xff]  ;;  %v10046_v7 = vld [vmem:[#allocation2 + $0x318] sm:$0xff] }
 0x2a9   : > { %8558 = vrsqrt.f32 %v3398_v28  ;;  %v10030_v40 = vld [vmem:[#allocation2 + $0x230] sm:$0xff]  ;;  %v10056_v0 = vld [vmem:[#allocation2 + $0x3a8] sm:$0xff]  ;;  %v10074_v42 = vld [vmem:[#allocation2 + $0x58] sm:$0xff] }
 0x2aa   : > { %v10032_v19 = vld [vmem:[#allocation2 + $0x2f0] sm:$0xff]  ;;  %v10060_v56 = vld [vmem:[#allocation2 + $0x3c8] sm:$0xff]  ;;  %13699 = vst [vmem:[#allocation28_spill] sm:$0xff] %v10074_v42  ;;  %v10086_v2 = vld [vmem:[#allocation2 + $0x78] sm:$0xff]  ;;  %v13710_v42 = vsub.s32 0, %v9907_v54 }
 0x2ab   : > { %v10044_v37 = vld [vmem:[#allocation2 + $0x310] sm:$0xff]  ;;  %v10088_v10 = vld [vmem:[#allocation2 + $0x108] sm:$0xff]  ;;  %v10114_v53 = vld [vmem:[#allocation2 + $0x1d8] sm:$0xff] }
 0x2ac   : > { %v10058_v4 = vld [vmem:[#allocation2 + $0x3b0] sm:$0xff]  ;;  %v10100_v28 = vld [vmem:[#allocation2 + $0x128] sm:$0xff]  ;;  %13705 = vst [vmem:[#allocation34_spill] sm:$0xff] %v10114_v53  ;;  %v10126_v46 = vld [vmem:[#allocation2 + $0x1f8] sm:$0xff] }
 0x2ad   : > { %v10070_v22 = vld [vmem:[#allocation2 + $0x3d0] sm:$0xff]  ;;  %13702 = vst [vmem:[#allocation31_spill] sm:$0xff] %v10100_v28  ;;  %13707 = vst [vmem:[#allocation36_spill] sm:$0xff] %v10126_v46  ;;  %v10128_v31 = vld [vmem:[#allocation2 + $0x288] sm:$0xff]  ;;  %v13713_v28 = vsub.f32 %v9913_v16, %v9934_v9  ;;  %v13717_v16 = vsub.f32 %v9921_v43, %v9934_v9 }
 0x2ae   : > { %v10072_v27 = vld [vmem:[#allocation2 + $0x50] sm:$0xff]  ;;  %13708 = vst [vmem:[#allocation37_spill] sm:$0xff] %v10128_v31  ;;  %v10145_v39 = vld [vmem:[%s13585_s2] ss:$0 sm:$0xff] }
 0x2af   : > { %13698 = vst [vmem:[#allocation27_spill] sm:$0xff] %v10072_v27  ;;  %v10084_v23 = vld [vmem:[#allocation2 + $0x70] sm:$0xff]  ;;  %v10190_v47 = vld [vmem:[%s13586_s3] ss:$0 sm:$0xff] }
 0x2b0   : > { %13700 = vst [vmem:[#allocation29_spill] sm:$0xff] %v10084_v23  ;;  %v10098_v3 = vld [vmem:[#allocation2 + $0x110] sm:$0xff] }
 0x2b1   : > { %13701 = vst [vmem:[#allocation30_spill] sm:$0xff] %v10098_v3  ;;  %v10102_v1 = vld [vmem:[#allocation2 + $0x130] sm:$0xff] }
 0x2b2   : > { %13703 = vst [vmem:[#allocation32_spill] sm:$0xff] %v10102_v1  ;;  %v10112_v49 = vld [vmem:[#allocation2 + $0x1d0] sm:$0xff] }
 0x2b3   : > { %13704 = vst [vmem:[#allocation33_spill] sm:$0xff] %v10112_v49  ;;  %v10116_v11 = vld [vmem:[#allocation2 + $0x1f0] sm:$0xff]  ;;  %v8559_v15 = vpop.eup %8558 }
 0x2b4   : > { %13706 = vst [vmem:[#allocation35_spill] sm:$0xff] %v10116_v11  ;;  %v10130_v23 = vld [vmem:[#allocation2 + $0x290] sm:$0xff]  ;;  %v10134_v27 = vrot.slane %v8559_v15, %v13710_v42  ;;  %v13714_v15 = vsub.f32 %v9915_v24, %v9934_v9  ;;  %v13718_v24 = vsub.f32 %v9923_v6, %v9934_v9 }
 0x2b5   : > { %13709 = vst [vmem:[#allocation38_spill] sm:$0xff] %v10130_v23 }
 0x2b6   : > { %v3494_v32 = vmul.f32 %v10134_v27, %v13711_v26  ;;  %v3495_v53 = vmul.f32 %v10134_v27, %v13712_v48  ;;  %v3498_v54 = vmul.f32 %v10134_v27, %v13713_v28  ;;  %v3499_v42 = vmul.f32 %v10134_v27, %v13714_v15 }
 0x2b7   : > { %v3516_v26 = vmul.f32 %v10134_v27, %v13715_v41  ;;  %v3517_v48 = vmul.f32 %v10134_v27, %v13716_v34  ;;  %v3520_v28 = vmul.f32 %v10134_v27, %v13717_v16  ;;  %v3521_v15 = vmul.f32 %v10134_v27, %v13718_v24 }
 0x2b8   : > { %v3985_v41 = vmul.f32 %v10145_v39, %v3494_v32  ;;  %v3986_v61 = vmul.f32 %v10145_v39, %v3495_v53  ;;  %v3989_v34 = vmul.f32 %v10145_v39, %v3498_v54  ;;  %v3990_v43 = vmul.f32 %v10145_v39, %v3499_v42 }
 0x2b9   : > { %v4007_v16 = vmul.f32 %v10145_v39, %v3516_v26  ;;  %v4008_v23 = vmul.f32 %v10145_v39, %v3517_v48  ;;  %v4011_v6 = vmul.f32 %v10145_v39, %v3520_v28  ;;  %v4012_v24 = vmul.f32 %v10145_v39, %v3521_v15 }
 0x2ba   : > { %v4476_v31 = vadd.f32 %v10190_v47, %v3985_v41  ;;  %v4477_v46 = vadd.f32 %v10190_v47, %v3986_v61  ;;  %v4480_v32 = vadd.f32 %v10190_v47, %v3989_v34  ;;  %v4481_v53 = vadd.f32 %v10190_v47, %v3990_v43 }
 0x2bb   : > { %v4498_v54 = vadd.f32 %v10190_v47, %v4007_v16  ;;  %v4499_v42 = vadd.f32 %v10190_v47, %v4008_v23  ;;  %v4502_v26 = vadd.f32 %v10190_v47, %v4011_v6  ;;  %v4503_v48 = vadd.f32 %v10190_v47, %v4012_v24 }
 0x2bc   : > { %v4960_v11 = vmax.f32 %v4476_v31, 0.0  ;;  %v4961_v28 = vmax.f32 %v4477_v46, 0.0  ;;  %v4964_v49 = vmax.f32 %v4480_v32, 0.0  ;;  %v4965_v15 = vmax.f32 %v4481_v53, 0.0 }
 0x2bd   : > { %v4982_v1 = vmax.f32 %v4498_v54, 0.0  ;;  %v4983_v41 = vmax.f32 %v4499_v42, 0.0  ;;  %v4986_v3 = vmax.f32 %v4502_v26, 0.0  ;;  %v4987_v61 = vmax.f32 %v4503_v48, 0.0 }
 0x2be   : > { %v13719_v34 = vsub.f32 %v9926_v13, %v9934_v9  ;;  %v13720_v23 = vsub.f32 %v9928_v44, %v9934_v9  ;;  %v13721_v31 = vsub.f32 %v9930_v59, %v9934_v9  ;;  %v13722_v6 = vsub.f32 %v9936_v45, %v9934_v9 }
 0x2bf   : > { %v5400_v32 = vmax.f32 %v4960_v11, %v4982_v1  ;;  %v5401_v53 = vmax.f32 %v4961_v28, %v4983_v41  ;;  %v5404_v13 = vmax.f32 %v4964_v49, %v4986_v3  ;;  %v5405_v54 = vmax.f32 %v4965_v15, %v4987_v61 }
 0x2c0   : > { %v3454_v43 = vmul.f32 %v10134_v27, %v13719_v34  ;;  %v3455_v16 = vmul.f32 %v10134_v27, %v13720_v23  ;;  %v3458_v46 = vmul.f32 %v10134_v27, %v13721_v31  ;;  %v3459_v24 = vmul.f32 %v10134_v27, %v13722_v6 }
 0x2c1   : > { %v13723_v42 = vsub.f32 %v9938_v36, %v9934_v9  ;;  %v13724_v26 = vsub.f32 %v9940_v51, %v9934_v9  ;;  %v13725_v48 = vsub.f32 %v9942_v55, %v9934_v9  ;;  %v13726_v11 = vsub.f32 %v9944_v5, %v9934_v9 }
 0x2c2   : > { %v10240_v1 = vmax.f32 %v5400_v32, %v5401_v53  ;;  %v10242_v36 = vmax.f32 %v5404_v13, %v5405_v54  ;;  %v3945_v3 = vmul.f32 %v10145_v39, %v3454_v43  ;;  %v3946_v51 = vmul.f32 %v10145_v39, %v3455_v16 }
 0x2c3   : > { %v3476_v44 = vmul.f32 %v10134_v27, %v13723_v42  ;;  %v3477_v59 = vmul.f32 %v10134_v27, %v13724_v26  ;;  %v3480_v45 = vmul.f32 %v10134_v27, %v13725_v48  ;;  %v3481_v49 = vmul.f32 %v10134_v27, %v13726_v11 }
 0x2c4   : > { %v3949_v28 = vmul.f32 %v10145_v39, %v3458_v46  ;;  %v3950_v15 = vmul.f32 %v10145_v39, %v3459_v24  ;;  %v8194_v5 = vpack.i.bf16 %v10240_v1, %v10242_v36  ;;  %v4436_v23 = vadd.f32 %v10190_v47, %v3945_v3 }
 0x2c5   : > { %v3967_v55 = vmul.f32 %v10145_v39, %v3476_v44  ;;  %v3968_v41 = vmul.f32 %v10145_v39, %v3477_v59  ;;  %v3971_v61 = vmul.f32 %v10145_v39, %v3480_v45  ;;  %v3972_v34 = vmul.f32 %v10145_v39, %v3481_v49 }
 0x2c6   : > { %v4437_v43 = vadd.f32 %v10190_v47, %v3946_v51  ;;  %v4440_v16 = vadd.f32 %v10190_v47, %v3949_v28  ;;  %v4441_v31 = vadd.f32 %v10190_v47, %v3950_v15  ;;  %8195 = vrot.lane.b32.xlu1 %v8194_v5, %s8619_s11  ;;  %v4920_v53 = vmax.f32 %v4436_v23, 0.0 }
 0x2c7   : > { %v4458_v46 = vadd.f32 %v10190_v47, %v3967_v55  ;;  %v4459_v6 = vadd.f32 %v10190_v47, %v3968_v41  ;;  %v4462_v24 = vadd.f32 %v10190_v47, %v3971_v61  ;;  %v4463_v32 = vadd.f32 %v10190_v47, %v3972_v34 }
 0x2c8   : > { %v4921_v13 = vmax.f32 %v4437_v43, 0.0  ;;  %v4924_v54 = vmax.f32 %v4440_v16, 0.0  ;;  %v4925_v42 = vmax.f32 %v4441_v31, 0.0  ;;  %v13727_v45 = vsub.f32 %v9946_v52, %v9934_v9 }
 0x2c9   : > { %v4942_v44 = vmax.f32 %v4458_v46, 0.0  ;;  %v4943_v26 = vmax.f32 %v4459_v6, 0.0  ;;  %v4946_v59 = vmax.f32 %v4462_v24, 0.0  ;;  %v4947_v48 = vmax.f32 %v4463_v32, 0.0 }
 0x2ca   : > { %v3410_v11 = vmul.f32 %v10134_v27, %v13727_v45  ;;  %v13728_v3 = vsub.f32 %v9948_v60, %v9934_v9  ;;  %v13729_v28 = vsub.f32 %v9950_v57, %v9934_v9  ;;  %v13730_v55 = vsub.f32 %v9960_v8, %v9934_v9 }
 0x2cb   : > { %v5382_v49 = vmax.f32 %v4920_v53, %v4942_v44  ;;  %v5383_v5 = vmax.f32 %v4921_v13, %v4943_v26  ;;  %v5386_v52 = vmax.f32 %v4924_v54, %v4946_v59  ;;  %v5387_v61 = vmax.f32 %v4925_v42, %v4947_v48 }
 0x2cc   : > { %v3411_v51 = vmul.f32 %v10134_v27, %v13728_v3  ;;  %v3414_v15 = vmul.f32 %v10134_v27, %v13729_v28  ;;  %v3415_v41 = vmul.f32 %v10134_v27, %v13730_v55  ;;  %v13731_v34 = vsub.f32 %v9962_v18, %v9934_v9 }
 0x2cd   : > { %v13732_v23 = vsub.f32 %v9964_v63, %v9934_v9  ;;  %v13733_v43 = vsub.f32 %v9974_v38, %v9934_v9  ;;  %v13734_v16 = vsub.f32 %v9976_v58, %v9934_v9  ;;  %v3901_v46 = vmul.f32 %v10145_v39, %v3410_v11 }
 0x2ce   : > { %v3432_v60 = vmul.f32 %v10134_v27, %v13731_v34  ;;  %v10296_v18 = vmax.f32 %v5382_v49, %v5383_v5  ;;  %v10298_v6 = vmax.f32 %v5386_v52, %v5387_v61  ;;  %v3902_v63 = vmul.f32 %v10145_v39, %v3411_v51 }
 0x2cf   : > { %v3433_v57 = vmul.f32 %v10134_v27, %v13732_v23  ;;  %v3436_v8 = vmul.f32 %v10134_v27, %v13733_v43  ;;  %v3437_v31 = vmul.f32 %v10134_v27, %v13734_v16  ;;  %v3905_v24 = vmul.f32 %v10145_v39, %v3414_v15 }
 0x2d0   : > { %v3906_v32 = vmul.f32 %v10145_v39, %v3415_v41  ;;  %v3923_v38 = vmul.f32 %v10145_v39, %v3432_v60  ;;  %v8184_v13 = vpack.i.bf16 %v10298_v6, %v10296_v18  ;;  %v4392_v42 = vadd.f32 %v10190_v47, %v3901_v46 }
 0x2d1   : > { %v3924_v53 = vmul.f32 %v10145_v39, %v3433_v57  ;;  %v3927_v58 = vmul.f32 %v10145_v39, %v3436_v8  ;;  %v3928_v54 = vmul.f32 %v10145_v39, %v3437_v31  ;;  %v4393_v44 = vadd.f32 %v10190_v47, %v3902_v63 }
 0x2d2   : > { %v4396_v26 = vadd.f32 %v10190_v47, %v3905_v24  ;;  %v4397_v59 = vadd.f32 %v10190_v47, %v3906_v32  ;;  %v4414_v48 = vadd.f32 %v10190_v47, %v3923_v38  ;;  %8185 = vrot.lane.b32.xlu0 %v8184_v13, %s8620_s12  ;;  %v4876_v3 = vmax.f32 %v4392_v42, 0.0 }
 0x2d3   : > { %v4415_v45 = vadd.f32 %v10190_v47, %v3924_v53  ;;  %v4418_v11 = vadd.f32 %v10190_v47, %v3927_v58  ;;  %v4419_v49 = vadd.f32 %v10190_v47, %v3928_v54  ;;  %v4877_v51 = vmax.f32 %v4393_v44, 0.0 }
 0x2d4   : > { %v4880_v28 = vmax.f32 %v4396_v26, 0.0  ;;  %v4881_v15 = vmax.f32 %v4397_v59, 0.0  ;;  %v4898_v55 = vmax.f32 %v4414_v48, 0.0  ;;  %v13735_v61 = vsub.f32 %v9978_v29, %v9934_v9 }
 0x2d5   : > { %v4899_v41 = vmax.f32 %v4415_v45, 0.0  ;;  %v4902_v5 = vmax.f32 %v4418_v11, 0.0  ;;  %v4903_v52 = vmax.f32 %v4419_v49, 0.0  ;;  %v13736_v60 = vsub.f32 %v9986_v17, %v9934_v9 }
 0x2d6   : > { %v3408_v34 = vmul.f32 %v10134_v27, %v13735_v61  ;;  %v5360_v57 = vmax.f32 %v4876_v3, %v4898_v55  ;;  %v13737_v8 = vsub.f32 %v9988_v14, %v9934_v9  ;;  %v13738_v31 = vsub.f32 %v9990_v12, %v9934_v9 }
 0x2d7   : > { %v3409_v23 = vmul.f32 %v10134_v27, %v13736_v60  ;;  %v5361_v43 = vmax.f32 %v4877_v51, %v4899_v41  ;;  %v5364_v29 = vmax.f32 %v4880_v28, %v4902_v5  ;;  %v5365_v63 = vmax.f32 %v4881_v15, %v4903_v52 }
 0x2d8   : > { %v3412_v16 = vmul.f32 %v10134_v27, %v13737_v8  ;;  %v3413_v46 = vmul.f32 %v10134_v27, %v13738_v31  ;;  %v13739_v24 = vsub.f32 %v10000_v62, %v9934_v9  ;;  %v13740_v32 = vsub.f32 %v10002_v30, %v9934_v9 }
 0x2d9   : > { %v10342_v14 = vmax.f32 %v5360_v57, %v5361_v43  ;;  %v13741_v53 = vsub.f32 %v10004_v25, %v9934_v9  ;;  %v13742_v58 = vsub.f32 %v10014_v21, %v9934_v9  ;;  %v3899_v62 = vmul.f32 %v10145_v39, %v3408_v34 }
 0x2da   : > { %v3430_v17 = vmul.f32 %v10134_v27, %v13739_v24  ;;  %v3431_v38 = vmul.f32 %v10134_v27, %v13740_v32  ;;  %v10353_v54 = vmax.f32 %v5364_v29, %v5365_v63  ;;  %v3900_v30 = vmul.f32 %v10145_v39, %v3409_v23 }
 0x2db   : > { %v3434_v12 = vmul.f32 %v10134_v27, %v13741_v53  ;;  %v3435_v13 = vmul.f32 %v10134_v27, %v13742_v58  ;;  %v3903_v42 = vmul.f32 %v10145_v39, %v3412_v16  ;;  %v3904_v44 = vmul.f32 %v10145_v39, %v3413_v46 }
 0x2dc   : > { %v3921_v26 = vmul.f32 %v10145_v39, %v3430_v17  ;;  %v3922_v25 = vmul.f32 %v10145_v39, %v3431_v38  ;;  %v8199_v48 = vpack.i.bf16 %v10353_v54, %v10342_v14  ;;  %v4390_v45 = vadd.f32 %v10190_v47, %v3899_v62 }
 0x2dd   : > { %v3925_v59 = vmul.f32 %v10145_v39, %v3434_v12  ;;  %v3926_v21 = vmul.f32 %v10145_v39, %v3435_v13  ;;  %v4391_v11 = vadd.f32 %v10190_v47, %v3900_v30  ;;  %v4394_v49 = vadd.f32 %v10190_v47, %v3903_v42 }
 0x2de   : > { %v4395_v3 = vadd.f32 %v10190_v47, %v3904_v44  ;;  %v4412_v51 = vadd.f32 %v10190_v47, %v3921_v26  ;;  %v4413_v28 = vadd.f32 %v10190_v47, %v3922_v25  ;;  %8200 = vrot.lane.b32.xlu1 %v8199_v48, %s8619_s11  ;;  %v4874_v41 = vmax.f32 %v4390_v45, 0.0 }
 0x2df   : > { %v4416_v15 = vadd.f32 %v10190_v47, %v3925_v59  ;;  %v4417_v55 = vadd.f32 %v10190_v47, %v3926_v21  ;;  %v4875_v5 = vmax.f32 %v4391_v11, 0.0  ;;  %v4878_v52 = vmax.f32 %v4394_v49, 0.0 }
 0x2e0   : > { %v4879_v61 = vmax.f32 %v4395_v3, 0.0  ;;  %v4896_v34 = vmax.f32 %v4412_v51, 0.0  ;;  %v4897_v60 = vmax.f32 %v4413_v28, 0.0  ;;  %v13743_v43 = vsub.f32 %v10016_v35, %v9934_v9 }
 0x2e1   : > { %v4900_v23 = vmax.f32 %v4416_v15, 0.0  ;;  %v4901_v57 = vmax.f32 %v4417_v55, 0.0  ;;  %v13744_v16 = vsub.f32 %v10018_v33, %v9934_v9  ;;  %v13745_v46 = vsub.f32 %v10028_v20, %v9934_v9 }
 0x2e2   : > { %v3450_v8 = vmul.f32 %v10134_v27, %v13743_v43  ;;  %v5358_v63 = vmax.f32 %v4874_v41, %v4896_v34  ;;  %v5359_v24 = vmax.f32 %v4875_v5, %v4897_v60  ;;  %v13746_v32 = vsub.f32 %v10030_v40, %v9934_v9 }
 0x2e3   : > { %v3451_v31 = vmul.f32 %v10134_v27, %v13744_v16  ;;  %v3472_v29 = vmul.f32 %v10134_v27, %v13745_v46  ;;  %v5362_v17 = vmax.f32 %v4878_v52, %v4900_v23  ;;  %v5363_v38 = vmax.f32 %v4879_v61, %v4901_v57 }
 0x2e4   : > { %v3473_v35 = vmul.f32 %v10134_v27, %v13746_v32  ;;  %v3941_v53 = vmul.f32 %v10145_v39, %v3450_v8  ;;  %v5599_v58 = vmax.f32 %v5358_v63, %v5359_v24  ;;  %v13747_v13 = vsub.f32 %v10032_v19, %v9934_v9 }
 0x2e5   : > { %v3942_v33 = vmul.f32 %v10145_v39, %v3451_v31  ;;  %v3963_v12 = vmul.f32 %v10145_v39, %v3472_v29  ;;  %v13748_v40 = vsub.f32 %v10042_v50, %v9934_v9  ;;  %v5601_v42 = vmax.f32 %v5362_v17, %v5363_v38 }
 0x2e6   : > { %v3964_v20 = vmul.f32 %v10145_v39, %v3473_v35  ;;  %v3496_v62 = vmul.f32 %v10134_v27, %v13747_v13  ;;  %v4432_v44 = vadd.f32 %v10190_v47, %v3941_v53  ;;  %v13749_v21 = vsub.f32 %v10044_v37, %v9934_v9 }
 0x2e7   : > { %v3497_v30 = vmul.f32 %v10134_v27, %v13748_v40  ;;  %v4433_v26 = vadd.f32 %v10190_v47, %v3942_v33  ;;  %v4454_v25 = vadd.f32 %v10190_v47, %v3963_v12  ;;  %v13750_v48 = vsub.f32 %v10046_v7, %v9934_v9  ;;  %v13755_v40 = vld [vmem:[#allocation27_spill] sm:$0xff] }
 0x2e8   : > { %v4455_v59 = vadd.f32 %v10190_v47, %v3964_v20  ;;  %v3500_v19 = vmul.f32 %v10134_v27, %v13749_v21  ;;  %v13751_v45 = vsub.f32 %v10056_v0, %v9934_v9  ;;  %v8189_v49 = vpack.i.bf16 %v5601_v42, %v5599_v58 }
 0x2e9   : > { %v3501_v50 = vmul.f32 %v10134_v27, %v13750_v48  ;;  %v4916_v3 = vmax.f32 %v4432_v44, 0.0  ;;  %v4917_v51 = vmax.f32 %v4433_v26, 0.0  ;;  %v4938_v28 = vmax.f32 %v4454_v25, 0.0  ;;  %v13757_v44 = vld [vmem:[#allocation28_spill] sm:$0xff]  ;;  %v13759_v25 = vld [vmem:[#allocation29_spill] sm:$0xff] }
 0x2ea   : > { %v3518_v11 = vmul.f32 %v10134_v27, %v13751_v45  ;;  %v4939_v15 = vmax.f32 %v4455_v59, 0.0  ;;  %v13752_v37 = vsub.f32 %v10058_v4, %v9934_v9  ;;  %v13753_v7 = vsub.f32 %v10060_v56, %v9934_v9  ;;  %8190 = vrot.lane.b32.xlu0 %v8189_v49, %s8620_s12 }
 0x2eb   : > { %v13754_v0 = vsub.f32 %v10070_v22, %v9934_v9  ;;  %v5378_v52 = vmax.f32 %v4916_v3, %v4938_v28  ;;  %v3987_v61 = vmul.f32 %v10145_v39, %v3496_v62  ;;  %v3988_v34 = vmul.f32 %v10145_v39, %v3497_v30  ;;  %v13763_v28 = vld [vmem:[#allocation30_spill] sm:$0xff] }
 0x2ec   : > { %v3519_v55 = vmul.f32 %v10134_v27, %v13752_v37  ;;  %v3522_v41 = vmul.f32 %v10134_v27, %v13753_v7  ;;  %v3991_v4 = vmul.f32 %v10145_v39, %v3500_v19  ;;  %v5379_v60 = vmax.f32 %v4917_v51, %v4939_v15 }
 0x2ed   : > { %v3523_v5 = vmul.f32 %v10134_v27, %v13754_v0  ;;  %v3992_v23 = vmul.f32 %v10145_v39, %v3501_v50  ;;  %v4009_v56 = vmul.f32 %v10145_v39, %v3518_v11  ;;  %v4478_v8 = vadd.f32 %v10190_v47, %v3987_v61 }
 0x2ee   : > { %v4010_v57 = vmul.f32 %v10145_v39, %v3519_v55  ;;  %v4013_v22 = vmul.f32 %v10145_v39, %v3522_v41  ;;  %v4479_v16 = vadd.f32 %v10190_v47, %v3988_v34  ;;  %v5609_v31 = vmax.f32 %v5378_v52, %v5379_v60  ;;  %v13765_v55 = vld [vmem:[#allocation31_spill] sm:$0xff]  ;;  %v13767_v41 = vld [vmem:[#allocation32_spill] sm:$0xff] }
 0x2ef   : > { %v4014_v43 = vmul.f32 %v10145_v39, %v3523_v5  ;;  %v4482_v46 = vadd.f32 %v10190_v47, %v3991_v4  ;;  %v4483_v29 = vadd.f32 %v10190_v47, %v3992_v23  ;;  %v4500_v63 = vadd.f32 %v10190_v47, %v4009_v56 }
 0x2f0   : > { %v4501_v24 = vadd.f32 %v10190_v47, %v4010_v57  ;;  %v4504_v17 = vadd.f32 %v10190_v47, %v4013_v22  ;;  %v4962_v35 = vmax.f32 %v4478_v8, 0.0  ;;  %v8209_v38 = vpack.i.bf16 %v10296_v18, %v5609_v31 }
 0x2f1   : > { %v4505_v32 = vadd.f32 %v10190_v47, %v4014_v43  ;;  %v4963_v53 = vmax.f32 %v4479_v16, 0.0  ;;  %v4966_v33 = vmax.f32 %v4482_v46, 0.0  ;;  %v4967_v12 = vmax.f32 %v4483_v29, 0.0 }
 0x2f2   : > { %v4984_v58 = vmax.f32 %v4500_v63, 0.0  ;;  %v4985_v20 = vmax.f32 %v4501_v24, 0.0  ;;  %v4988_v13 = vmax.f32 %v4504_v17, 0.0  ;;  %8210 = vrot.lane.b32.xlu1 %v8209_v38, %s8621_s13  ;;  %v13756_v30 = vsub.f32 %v13755_v40, %v9934_v9  ;;  %v2506_v63 = vld [vmem:[#allocation2 + $0x2a8] sm:$0xff]  ;;  %v2507_v38 = vld [vmem:[#allocation2 + $0x2b0] sm:$0xff] }
 0x2f3   : > { %v4989_v62 = vmax.f32 %v4505_v32, 0.0  ;;  %v13758_v26 = vsub.f32 %v13757_v44, %v9934_v9  ;;  %v13760_v59 = vsub.f32 %v13759_v25, %v9934_v9  ;;  %v13761_v19 = vsub.f32 %v10086_v2, %v9934_v9  ;;  %v13769_v44 = vld [vmem:[#allocation33_spill] sm:$0xff]  ;;  %v13771_v25 = vld [vmem:[#allocation34_spill] sm:$0xff] }
 0x2f4   : > { %v3416_v42 = vmul.f32 %v10134_v27, %v13756_v30  ;;  %v5402_v50 = vmax.f32 %v4962_v35, %v4984_v58  ;;  %v5403_v45 = vmax.f32 %v4963_v53, %v4985_v20  ;;  %v5406_v11 = vmax.f32 %v4966_v33, %v4988_v13 }
 0x2f5   : > { %v3417_v18 = vmul.f32 %v10134_v27, %v13758_v26  ;;  %v3420_v21 = vmul.f32 %v10134_v27, %v13760_v59  ;;  %v3421_v48 = vmul.f32 %v10134_v27, %v13761_v19  ;;  %v5407_v49 = vmax.f32 %v4967_v12, %v4989_v62 }
 0x2f6   : > { %v13762_v3 = vsub.f32 %v10088_v10, %v9934_v9  ;;  %v13764_v15 = vsub.f32 %v13763_v28, %v9934_v9  ;;  %v13766_v7 = vsub.f32 %v13765_v55, %v9934_v9  ;;  %v13768_v0 = vsub.f32 %v13767_v41, %v9934_v9 }
 0x2f7   : > { %v10480_v52 = vmax.f32 %v5402_v50, %v5403_v45  ;;  %v10482_v10 = vmax.f32 %v5406_v11, %v5407_v49  ;;  %v3907_v61 = vmul.f32 %v10145_v39, %v3416_v42  ;;  %v3908_v34 = vmul.f32 %v10145_v39, %v3417_v18  ;;  %v13773_v45 = vld [vmem:[#allocation35_spill] sm:$0xff] }
 0x2f8   : > { %v3438_v51 = vmul.f32 %v10134_v27, %v13762_v3  ;;  %v3439_v37 = vmul.f32 %v10134_v27, %v13764_v15  ;;  %v3442_v2 = vmul.f32 %v10134_v27, %v13766_v7  ;;  %v3443_v5 = vmul.f32 %v10134_v27, %v13768_v0  ;;  %v13775_v3 = vld [vmem:[#allocation36_spill] sm:$0xff]  ;;  %v13777_v15 = vld [vmem:[#allocation37_spill] sm:$0xff]  ;;  %v13779_v7 = vld [vmem:[#allocation38_spill] sm:$0xff] }
 0x2f9   : > { %v3911_v4 = vmul.f32 %v10145_v39, %v3420_v21  ;;  %v3912_v60 = vmul.f32 %v10145_v39, %v3421_v48  ;;  %v8204_v57 = vpack.i.bf16 %v10482_v10, %v10480_v52  ;;  %v4398_v8 = vadd.f32 %v10190_v47, %v3907_v61 }
 0x2fa   : > { %v3929_v23 = vmul.f32 %v10145_v39, %v3438_v51  ;;  %v3930_v56 = vmul.f32 %v10145_v39, %v3439_v37  ;;  %v3933_v22 = vmul.f32 %v10145_v39, %v3442_v2  ;;  %v3934_v43 = vmul.f32 %v10145_v39, %v3443_v5 }
 0x2fb   : > { %v4399_v16 = vadd.f32 %v10190_v47, %v3908_v34  ;;  %v4402_v31 = vadd.f32 %v10190_v47, %v3911_v4  ;;  %v4403_v46 = vadd.f32 %v10190_v47, %v3912_v60  ;;  %8205 = vrot.lane.b32.xlu0 %v8204_v57, %s8621_s13  ;;  %v4882_v35 = vmax.f32 %v4398_v8, 0.0 }
 0x2fc   : > { %v4420_v29 = vadd.f32 %v10190_v47, %v3929_v23  ;;  %v4421_v24 = vadd.f32 %v10190_v47, %v3930_v56  ;;  %v4424_v17 = vadd.f32 %v10190_v47, %v3933_v22  ;;  %v4425_v32 = vadd.f32 %v10190_v47, %v3934_v43 }
 0x2fd   : > { %v4883_v53 = vmax.f32 %v4399_v16, 0.0  ;;  %v4886_v33 = vmax.f32 %v4402_v31, 0.0  ;;  %v4887_v12 = vmax.f32 %v4403_v46, 0.0  ;;  %v2996_v40 = vsub.f32 %v2506_v63, %v9934_v9 }
 0x2fe   : > { %v4904_v58 = vmax.f32 %v4420_v29, 0.0  ;;  %v4905_v20 = vmax.f32 %v4421_v24, 0.0  ;;  %v4908_v13 = vmax.f32 %v4424_v17, 0.0  ;;  %v4909_v62 = vmax.f32 %v4425_v32, 0.0  ;;  %v2436_v24 = vld [vmem:[#allocation2 + $0x60] sm:$0xff] }
 0x2ff   : > { %v2997_v42 = vsub.f32 %v2507_v38, %v9934_v9  ;;  %v13770_v26 = vsub.f32 %v13769_v44, %v9934_v9  ;;  %v13772_v59 = vsub.f32 %v13771_v25, %v9934_v9  ;;  %v13774_v11 = vsub.f32 %v13773_v45, %v9934_v9  ;;  %v2462_v25 = vld [vmem:[#allocation2 + $0x138] sm:$0xff] }
 0x300   : > { %v5366_v30 = vmax.f32 %v4882_v35, %v4904_v58  ;;  %v5367_v19 = vmax.f32 %v4883_v53, %v4905_v20  ;;  %v5370_v48 = vmax.f32 %v4886_v33, %v4908_v13  ;;  %v5371_v50 = vmax.f32 %v4887_v12, %v4909_v62  ;;  %v2437_v53 = vld [vmem:[#allocation2 + $0x68] sm:$0xff]  ;;  %v2440_v33 = vld [vmem:[#allocation2 + $0x80] sm:$0xff] }
 0x301   : > { %v3462_v18 = vmul.f32 %v10134_v27, %v13770_v26  ;;  %v3463_v21 = vmul.f32 %v10134_v27, %v13772_v59  ;;  %v3466_v49 = vmul.f32 %v10134_v27, %v13774_v11  ;;  %v13776_v51 = vsub.f32 %v13775_v3, %v9934_v9  ;;  %v2441_v12 = vld [vmem:[#allocation2 + $0x88] sm:$0xff]  ;;  %v2463_v59 = vld [vmem:[#allocation2 + $0x140] sm:$0xff] }
 0x302   : > { %v13778_v37 = vsub.f32 %v13777_v15, %v9934_v9  ;;  %v13780_v2 = vsub.f32 %v13779_v7, %v9934_v9  ;;  %v3488_v0 = vmul.f32 %v10134_v27, %v2996_v40  ;;  %v5603_v5 = vmax.f32 %v5366_v30, %v5367_v19  ;;  %v2458_v40 = vld [vmem:[#allocation2 + $0x118] sm:$0xff]  ;;  %v2459_v30 = vld [vmem:[#allocation2 + $0x120] sm:$0xff] }
 0x303   : > { %v3467_v28 = vmul.f32 %v10134_v27, %v13776_v51  ;;  %v5605_v61 = vmax.f32 %v5370_v48, %v5371_v50  ;;  %v3489_v34 = vmul.f32 %v10134_v27, %v2997_v42  ;;  %v3953_v4 = vmul.f32 %v10145_v39, %v3462_v18 }
 0x304   : > { %v3484_v55 = vmul.f32 %v10134_v27, %v13778_v37  ;;  %v3485_v41 = vmul.f32 %v10134_v27, %v13780_v2  ;;  %v3954_v60 = vmul.f32 %v10145_v39, %v3463_v21  ;;  %v3957_v23 = vmul.f32 %v10145_v39, %v3466_v49 }
 0x305   : > { %v3958_v56 = vmul.f32 %v10145_v39, %v3467_v28  ;;  %v8219_v22 = vpack.i.bf16 %v5605_v61, %v5603_v5  ;;  %v3979_v8 = vmul.f32 %v10145_v39, %v3488_v0  ;;  %v3980_v16 = vmul.f32 %v10145_v39, %v3489_v34 }
 0x306   : > { %v3975_v57 = vmul.f32 %v10145_v39, %v3484_v55  ;;  %v3976_v43 = vmul.f32 %v10145_v39, %v3485_v41  ;;  %v4444_v31 = vadd.f32 %v10190_v47, %v3953_v4  ;;  %v4445_v46 = vadd.f32 %v10190_v47, %v3954_v60 }
 0x307   : > { %v4448_v29 = vadd.f32 %v10190_v47, %v3957_v23  ;;  %v4449_v63 = vadd.f32 %v10190_v47, %v3958_v56  ;;  %8220 = vrot.lane.b32.xlu1 %v8219_v22, %s8620_s12  ;;  %v4470_v35 = vadd.f32 %v10190_v47, %v3979_v8  ;;  %v4471_v38 = vadd.f32 %v10190_v47, %v3980_v16 }
 0x308   : > { %v4466_v17 = vadd.f32 %v10190_v47, %v3975_v57  ;;  %v4467_v32 = vadd.f32 %v10190_v47, %v3976_v43  ;;  %v4928_v58 = vmax.f32 %v4444_v31, 0.0  ;;  %v4929_v20 = vmax.f32 %v4445_v46, 0.0 }
 0x309   : > { %v4932_v13 = vmax.f32 %v4448_v29, 0.0  ;;  %v4933_v62 = vmax.f32 %v4449_v63, 0.0  ;;  %v4954_v26 = vmax.f32 %v4470_v35, 0.0  ;;  %v4955_v18 = vmax.f32 %v4471_v38, 0.0  ;;  %v2520_v35 = vld [vmem:[#allocation2 + $0x320] sm:$0xff] }
 0x30a   : > { %v4950_v42 = vmax.f32 %v4466_v17, 0.0  ;;  %v4951_v44 = vmax.f32 %v4467_v32, 0.0  ;;  %v2926_v21 = vsub.f32 %v2436_v24, %v9934_v9  ;;  %v2927_v19 = vsub.f32 %v2437_v53, %v9934_v9 }
 0x30b   : > { %v2930_v48 = vsub.f32 %v2440_v33, %v9934_v9  ;;  %v2931_v50 = vsub.f32 %v2441_v12, %v9934_v9  ;;  %v5394_v49 = vmax.f32 %v4932_v13, %v4954_v26  ;;  %v5395_v3 = vmax.f32 %v4933_v62, %v4955_v18  ;;  %v2525_v13 = vld [vmem:[#allocation2 + $0x348] sm:$0xff] }
 0x30c   : > { %v5390_v45 = vmax.f32 %v4928_v58, %v4950_v42  ;;  %v5391_v11 = vmax.f32 %v4929_v20, %v4951_v44  ;;  %v2948_v51 = vsub.f32 %v2458_v40, %v9934_v9  ;;  %v2949_v28 = vsub.f32 %v2459_v30, %v9934_v9  ;;  %v2521_v58 = vld [vmem:[#allocation2 + $0x328] sm:$0xff]  ;;  %v2524_v20 = vld [vmem:[#allocation2 + $0x340] sm:$0xff]  ;;  %v2542_v44 = vld [vmem:[#allocation2 + $0x3d8] sm:$0xff] }
 0x30d   : > { %v2952_v15 = vsub.f32 %v2462_v25, %v9934_v9  ;;  %v2953_v37 = vsub.f32 %v2463_v59, %v9934_v9  ;;  %v10558_v7 = vmax.f32 %v5394_v49, %v5395_v3  ;;  %v3418_v2 = vmul.f32 %v10134_v27, %v2926_v21  ;;  %v2543_v59 = vld [vmem:[#allocation2 + $0x3e0] sm:$0xff]  ;;  %v2546_v21 = vld [vmem:[#allocation2 + $0x3f8] sm:$0xff] }
 0x30e   : > { %v10556_v55 = vmax.f32 %v5390_v45, %v5391_v11  ;;  %v3419_v41 = vmul.f32 %v10134_v27, %v2927_v19  ;;  %v3422_v0 = vmul.f32 %v10134_v27, %v2930_v48  ;;  %v3423_v5 = vmul.f32 %v10134_v27, %v2931_v50  ;;  %v2547_v19 = vld [vmem:[#allocation2 + $0x400] sm:$0xff] }
 0x30f   : > { %v3440_v61 = vmul.f32 %v10134_v27, %v2948_v51  ;;  %v3441_v34 = vmul.f32 %v10134_v27, %v2949_v28  ;;  %v3444_v60 = vmul.f32 %v10134_v27, %v2952_v15  ;;  %v3445_v23 = vmul.f32 %v10134_v27, %v2953_v37 }
 0x310   : > { %v8214_v4 = vpack.i.bf16 %v10558_v7, %v10556_v55  ;;  %v3909_v56 = vmul.f32 %v10145_v39, %v3418_v2  ;;  %v3910_v57 = vmul.f32 %v10145_v39, %v3419_v41  ;;  %v3913_v22 = vmul.f32 %v10145_v39, %v3422_v0 }
 0x311   : > { %v3914_v43 = vmul.f32 %v10145_v39, %v3423_v5  ;;  %v3931_v8 = vmul.f32 %v10145_v39, %v3440_v61  ;;  %v3932_v16 = vmul.f32 %v10145_v39, %v3441_v34  ;;  %v3935_v31 = vmul.f32 %v10145_v39, %v3444_v60 }
 0x312   : > { %8215 = vrot.lane.b32.xlu0 %v8214_v4, %s8620_s12  ;;  %v3936_v46 = vmul.f32 %v10145_v39, %v3445_v23  ;;  %v4400_v29 = vadd.f32 %v10190_v47, %v3909_v56  ;;  %v4401_v63 = vadd.f32 %v10190_v47, %v3910_v57  ;;  %v4404_v24 = vadd.f32 %v10190_v47, %v3913_v22 }
 0x313   : > { %v4405_v17 = vadd.f32 %v10190_v47, %v3914_v43  ;;  %v4422_v32 = vadd.f32 %v10190_v47, %v3931_v8  ;;  %v4423_v38 = vadd.f32 %v10190_v47, %v3932_v16  ;;  %v4426_v53 = vadd.f32 %v10190_v47, %v3935_v31 }
 0x314   : > { %v4427_v33 = vadd.f32 %v10190_v47, %v3936_v46  ;;  %v4884_v12 = vmax.f32 %v4400_v29, 0.0  ;;  %v4885_v62 = vmax.f32 %v4401_v63, 0.0  ;;  %v4888_v40 = vmax.f32 %v4404_v24, 0.0 }
 0x315   : > { %v4889_v30 = vmax.f32 %v4405_v17, 0.0  ;;  %v4906_v42 = vmax.f32 %v4422_v32, 0.0  ;;  %v4907_v26 = vmax.f32 %v4423_v38, 0.0  ;;  %v4910_v18 = vmax.f32 %v4426_v53, 0.0 }
 0x316   : > { %v4911_v25 = vmax.f32 %v4427_v33, 0.0  ;;  %v3010_v48 = vsub.f32 %v2520_v35, %v9934_v9  ;;  %v3011_v45 = vsub.f32 %v2521_v58, %v9934_v9  ;;  %v3014_v11 = vsub.f32 %v2524_v20, %v9934_v9  ;;  %v2522_v58 = vld [vmem:[#allocation2 + $0x330] sm:$0xff] }
 0x317   : > { %v5368_v50 = vmax.f32 %v4884_v12, %v4906_v42  ;;  %v3015_v49 = vsub.f32 %v2525_v13, %v9934_v9  ;;  %v5369_v3 = vmax.f32 %v4885_v62, %v4907_v26  ;;  %v5372_v51 = vmax.f32 %v4888_v40, %v4910_v18 }
 0x318   : > { %v5373_v28 = vmax.f32 %v4889_v30, %v4911_v25  ;;  %v3032_v15 = vsub.f32 %v2542_v44, %v9934_v9  ;;  %v3033_v37 = vsub.f32 %v2543_v59, %v9934_v9  ;;  %v3036_v2 = vsub.f32 %v2546_v21, %v9934_v9  ;;  %v2526_v30 = vld [vmem:[#allocation2 + $0x350] sm:$0xff]  ;;  %v2527_v25 = vld [vmem:[#allocation2 + $0x358] sm:$0xff]  ;;  %v2544_v59 = vld [vmem:[#allocation2 + $0x3e8] sm:$0xff] }
 0x319   : > { %v3037_v41 = vsub.f32 %v2547_v19, %v9934_v9  ;;  %v3502_v0 = vmul.f32 %v10134_v27, %v3010_v48  ;;  %v10596_v5 = vmax.f32 %v5368_v50, %v5369_v3  ;;  %v3503_v34 = vmul.f32 %v10134_v27, %v3011_v45  ;;  %v2545_v50 = vld [vmem:[#allocation2 + $0x3f0] sm:$0xff]  ;;  %v2548_v45 = vld [vmem:[#allocation2 + $0x408] sm:$0xff] }
 0x31a   : > { %v10598_v61 = vmax.f32 %v5372_v51, %v5373_v28  ;;  %v3506_v4 = vmul.f32 %v10134_v27, %v3014_v11  ;;  %v3507_v60 = vmul.f32 %v10134_v27, %v3015_v49  ;;  %v3524_v23 = vmul.f32 %v10134_v27, %v3032_v15  ;;  %v2549_v11 = vld [vmem:[#allocation2 + $0x410] sm:$0xff] }
 0x31b   : > { %v3525_v56 = vmul.f32 %v10134_v27, %v3033_v37  ;;  %v3528_v57 = vmul.f32 %v10134_v27, %v3036_v2  ;;  %v3529_v43 = vmul.f32 %v10134_v27, %v3037_v41  ;;  %v3993_v8 = vmul.f32 %v10145_v39, %v3502_v0 }
 0x31c   : > { %v8229_v22 = vpack.i.bf16 %v10598_v61, %v10596_v5  ;;  %v3994_v16 = vmul.f32 %v10145_v39, %v3503_v34  ;;  %v3997_v31 = vmul.f32 %v10145_v39, %v3506_v4  ;;  %v3998_v46 = vmul.f32 %v10145_v39, %v3507_v60 }
 0x31d   : > { %v4015_v29 = vmul.f32 %v10145_v39, %v3524_v23  ;;  %v4016_v63 = vmul.f32 %v10145_v39, %v3525_v56  ;;  %v4019_v24 = vmul.f32 %v10145_v39, %v3528_v57  ;;  %v4020_v17 = vmul.f32 %v10145_v39, %v3529_v43  ;;  %v2523_v39 = vld [vmem:[#allocation2 + $0x338] sm:$0xff] }
 0x31e   : > { %8230 = vrot.lane.b32.xlu1 %v8229_v22, %s8619_s11  ;;  %v4484_v32 = vadd.f32 %v10190_v47, %v3993_v8  ;;  %v4485_v35 = vadd.f32 %v10190_v47, %v3994_v16  ;;  %v4488_v38 = vadd.f32 %v10190_v47, %v3997_v31  ;;  %v4489_v53 = vadd.f32 %v10190_v47, %v3998_v46  ;;  %v10654_v46 = vld [vmem:[%s13585_s2] ss:$0 sm:$0xff] }
 0x31f   : > { %v4506_v33 = vadd.f32 %v10190_v47, %v4015_v29  ;;  %v4507_v12 = vadd.f32 %v10190_v47, %v4016_v63  ;;  %v4510_v20 = vadd.f32 %v10190_v47, %v4019_v24  ;;  %v4511_v13 = vadd.f32 %v10190_v47, %v4020_v17 }
 0x320   : > { %v4968_v62 = vmax.f32 %v4484_v32, 0.0  ;;  %v4969_v40 = vmax.f32 %v4485_v35, 0.0  ;;  %v4972_v42 = vmax.f32 %v4488_v38, 0.0  ;;  %v4973_v44 = vmax.f32 %v4489_v53, 0.0 }
 0x321   : > { %v4990_v26 = vmax.f32 %v4506_v33, 0.0  ;;  %v4991_v18 = vmax.f32 %v4507_v12, 0.0  ;;  %v4994_v21 = vmax.f32 %v4510_v20, 0.0  ;;  %v4995_v19 = vmax.f32 %v4511_v13, 0.0  ;;  %v10668_v33 = vld [vmem:[%s13586_s3] ss:$0 sm:$0xff] }
 0x322   : > { %v8239_v48 = vpack.i.bf16 %v10556_v55, %v10298_v6  ;;  %v3012_v47 = vsub.f32 %v2522_v58, %v9934_v9  ;;  %v3013_v51 = vsub.f32 %v2523_v39, %v9934_v9  ;;  %v3016_v28 = vsub.f32 %v2526_v30, %v9934_v9  ;;  %v2442_v39 = vld [vmem:[#allocation2 + $0x90] sm:$0xff]  ;;  %v2443_v30 = vld [vmem:[#allocation2 + $0x98] sm:$0xff] }
 0x323   : > { %v5408_v49 = vmax.f32 %v4968_v62, %v4990_v26  ;;  %v5409_v3 = vmax.f32 %v4969_v40, %v4991_v18  ;;  %v5412_v15 = vmax.f32 %v4972_v42, %v4994_v21  ;;  %v5413_v37 = vmax.f32 %v4973_v44, %v4995_v19 }
 0x324   : > { %8240 = vrot.lane.b32.xlu1 %v8239_v48, %s8621_s13  ;;  %v3017_v2 = vsub.f32 %v2527_v25, %v9934_v9  ;;  %v3034_v41 = vsub.f32 %v2544_v59, %v9934_v9  ;;  %v3035_v55 = vsub.f32 %v2545_v50, %v9934_v9  ;;  %v3038_v0 = vsub.f32 %v2548_v45, %v9934_v9  ;;  %v2464_v25 = vld [vmem:[#allocation2 + $0x148] sm:$0xff]  ;;  %v2465_v59 = vld [vmem:[#allocation2 + $0x150] sm:$0xff] }
 0x325   : > { %v10634_v6 = vmax.f32 %v5408_v49, %v5409_v3  ;;  %v3039_v34 = vsub.f32 %v2549_v11, %v9934_v9  ;;  %v10639_v4 = vmax.f32 %v5412_v15, %v5413_v37  ;;  %v3504_v60 = vmul.f32 %v10134_v27, %v3012_v47  ;;  %v2488_v3 = vld [vmem:[#allocation2 + $0x210] sm:$0xff] }
 0x326   : > { %v3505_v23 = vmul.f32 %v10134_v27, %v3013_v51  ;;  %v3508_v56 = vmul.f32 %v10134_v27, %v3016_v28  ;;  %v3509_v57 = vmul.f32 %v10134_v27, %v3017_v2  ;;  %v3526_v22 = vmul.f32 %v10134_v27, %v3034_v41  ;;  %v2489_v2 = vld [vmem:[#allocation2 + $0x218] sm:$0xff] }
 0x327   : > { %v3527_v43 = vmul.f32 %v10134_v27, %v3035_v55  ;;  %v3530_v8 = vmul.f32 %v10134_v27, %v3038_v0  ;;  %v8224_v16 = vpack.i.bf16 %v10639_v4, %v10634_v6  ;;  %v3531_v31 = vmul.f32 %v10134_v27, %v3039_v34 }
 0x328   : > { %v3995_v29 = vmul.f32 %v10654_v46, %v3504_v60  ;;  %v3996_v63 = vmul.f32 %v10654_v46, %v3505_v23  ;;  %v3999_v24 = vmul.f32 %v10654_v46, %v3508_v56  ;;  %v4000_v17 = vmul.f32 %v10654_v46, %v3509_v57  ;;  %v2510_v60 = vld [vmem:[#allocation2 + $0x2c8] sm:$0xff]  ;;  %v2511_v23 = vld [vmem:[#allocation2 + $0x2d0] sm:$0xff] }
 0x329   : > { %v4017_v32 = vmul.f32 %v10654_v46, %v3526_v22  ;;  %v4018_v35 = vmul.f32 %v10654_v46, %v3527_v43  ;;  %8225 = vrot.lane.b32.xlu0 %v8224_v16, %s8619_s11  ;;  %v4021_v38 = vmul.f32 %v10654_v46, %v3530_v8  ;;  %v4022_v53 = vmul.f32 %v10654_v46, %v3531_v31  ;;  %v2560_v43 = vld [vmem:[#allocation2 + $0x470] sm:$0xff] }
 0x32a   : > { %v4486_v12 = vadd.f32 %v10668_v33, %v3995_v29  ;;  %v4487_v58 = vadd.f32 %v10668_v33, %v3996_v63  ;;  %v4490_v20 = vadd.f32 %v10668_v33, %v3999_v24  ;;  %v4491_v13 = vadd.f32 %v10668_v33, %v4000_v17  ;;  %v2561_v63 = vld [vmem:[#allocation2 + $0x478] sm:$0xff]  ;;  %v2582_v24 = vld [vmem:[#allocation2 + $0x528] sm:$0xff] }
 0x32b   : > { %v4508_v62 = vadd.f32 %v10668_v33, %v4017_v32  ;;  %v4509_v40 = vadd.f32 %v10668_v33, %v4018_v35  ;;  %v4512_v42 = vadd.f32 %v10668_v33, %v4021_v38  ;;  %v4513_v44 = vadd.f32 %v10668_v33, %v4022_v53  ;;  %v2583_v38 = vld [vmem:[#allocation2 + $0x530] sm:$0xff] }
 0x32c   : > { %v4970_v26 = vmax.f32 %v4486_v12, 0.0  ;;  %v4971_v18 = vmax.f32 %v4487_v58, 0.0  ;;  %v4974_v21 = vmax.f32 %v4490_v20, 0.0  ;;  %v4975_v19 = vmax.f32 %v4491_v13, 0.0 }
 0x32d   : > { %v4992_v48 = vmax.f32 %v4508_v62, 0.0  ;;  %v4993_v50 = vmax.f32 %v4509_v40, 0.0  ;;  %v4996_v45 = vmax.f32 %v4512_v42, 0.0  ;;  %v4997_v11 = vmax.f32 %v4513_v44, 0.0 }
 0x32e   : > { %v2932_v47 = vsub.f32 %v2442_v39, %v9934_v9  ;;  %v2933_v49 = vsub.f32 %v2443_v30, %v9934_v9  ;;  %v2954_v15 = vsub.f32 %v2464_v25, %v9934_v9  ;;  %v2955_v37 = vsub.f32 %v2465_v59, %v9934_v9 }
 0x32f   : > { %v5410_v51 = vmax.f32 %v4970_v26, %v4992_v48  ;;  %v5411_v28 = vmax.f32 %v4971_v18, %v4993_v50  ;;  %v5414_v41 = vmax.f32 %v4974_v21, %v4996_v45  ;;  %v5415_v55 = vmax.f32 %v4975_v19, %v4997_v11 }
 0x330   : > { %v3424_v0 = vmul.f32 %v10134_v27, %v2932_v47  ;;  %v3425_v34 = vmul.f32 %v10134_v27, %v2933_v49  ;;  %v3446_v57 = vmul.f32 %v10134_v27, %v2954_v15  ;;  %v3447_v22 = vmul.f32 %v10134_v27, %v2955_v37 }
 0x331   : > { %v10684_v56 = vmax.f32 %v5410_v51, %v5411_v28  ;;  %v2978_v8 = vsub.f32 %v2488_v3, %v9934_v9  ;;  %v10689_v16 = vmax.f32 %v5414_v41, %v5415_v55  ;;  %v2979_v17 = vsub.f32 %v2489_v2, %v9934_v9 }
 0x332   : > { %v3915_v31 = vmul.f32 %v10654_v46, %v3424_v0  ;;  %v3916_v29 = vmul.f32 %v10654_v46, %v3425_v34  ;;  %v3937_v32 = vmul.f32 %v10654_v46, %v3446_v57  ;;  %v3938_v35 = vmul.f32 %v10654_v46, %v3447_v22 }
 0x333   : > { %v3000_v53 = vsub.f32 %v2510_v60, %v9934_v9  ;;  %v3001_v12 = vsub.f32 %v2511_v23, %v9934_v9  ;;  %v8234_v58 = vpack.i.bf16 %v10689_v16, %v10684_v56  ;;  %v3050_v62 = vsub.f32 %v2560_v43, %v9934_v9 }
 0x334   : > { %v4406_v20 = vadd.f32 %v10668_v33, %v3915_v31  ;;  %v4407_v13 = vadd.f32 %v10668_v33, %v3916_v29  ;;  %v4428_v40 = vadd.f32 %v10668_v33, %v3937_v32  ;;  %v4429_v39 = vadd.f32 %v10668_v33, %v3938_v35 }
 0x335   : > { %v3051_v30 = vsub.f32 %v2561_v63, %v9934_v9  ;;  %v3072_v42 = vsub.f32 %v2582_v24, %v9934_v9  ;;  %8235 = vrot.lane.b32.xlu0 %v8234_v58, %s8621_s13  ;;  %v3073_v18 = vsub.f32 %v2583_v38, %v9934_v9  ;;  %v3470_v25 = vmul.f32 %v10134_v27, %v2978_v8  ;;  %v2444_v24 = vld [vmem:[#allocation2 + $0xa0] sm:$0xff] }
 0x336   : > { %v4890_v44 = vmax.f32 %v4406_v20, 0.0  ;;  %v4891_v26 = vmax.f32 %v4407_v13, 0.0  ;;  %v4912_v59 = vmax.f32 %v4428_v40, 0.0  ;;  %v4913_v21 = vmax.f32 %v4429_v39, 0.0  ;;  %v2467_v58 = vld [vmem:[#allocation2 + $0x160] sm:$0xff]  ;;  %v2605_v39 = vld [vmem:[#allocation2 + $0x5e8] sm:$0xff] }
 0x337   : > { %v3471_v19 = vmul.f32 %v10134_v27, %v2979_v17  ;;  %v3492_v48 = vmul.f32 %v10134_v27, %v3000_v53  ;;  %v3493_v50 = vmul.f32 %v10134_v27, %v3001_v12  ;;  %v3542_v45 = vmul.f32 %v10134_v27, %v3050_v62  ;;  %v2445_v17 = vld [vmem:[#allocation2 + $0xa8] sm:$0xff]  ;;  %v2466_v12 = vld [vmem:[#allocation2 + $0x158] sm:$0xff]  ;;  %v2604_v20 = vld [vmem:[#allocation2 + $0x5e0] sm:$0xff] }
 0x338   : > { %v3543_v11 = vmul.f32 %v10134_v27, %v3051_v30  ;;  %v3564_v47 = vmul.f32 %v10134_v27, %v3072_v42  ;;  %v5374_v49 = vmax.f32 %v4890_v44, %v4912_v59  ;;  %v5375_v3 = vmax.f32 %v4891_v26, %v4913_v21  ;;  %v2626_v30 = vld [vmem:[#allocation2 + $0x698] sm:$0xff]  ;;  %v2627_v26 = vld [vmem:[#allocation2 + $0x6a0] sm:$0xff] }
 0x339   : > { %v3565_v51 = vmul.f32 %v10134_v27, %v3073_v18  ;;  %v3961_v28 = vmul.f32 %v10654_v46, %v3470_v25  ;;  %v3962_v15 = vmul.f32 %v10654_v46, %v3471_v19  ;;  %v3983_v37 = vmul.f32 %v10654_v46, %v3492_v48 }
 0x33a   : > { %v3984_v2 = vmul.f32 %v10654_v46, %v3493_v50  ;;  %v4033_v41 = vmul.f32 %v10654_v46, %v3542_v45  ;;  %v5607_v55 = vmax.f32 %v5374_v49, %v5375_v3  ;;  %v4034_v0 = vmul.f32 %v10654_v46, %v3543_v11 }
 0x33b   : > { %v4055_v34 = vmul.f32 %v10654_v46, %v3564_v47  ;;  %v4056_v60 = vmul.f32 %v10654_v46, %v3565_v51  ;;  %v4452_v23 = vadd.f32 %v10668_v33, %v3961_v28  ;;  %v4453_v57 = vadd.f32 %v10668_v33, %v3962_v15 }
 0x33c   : > { %v4474_v22 = vadd.f32 %v10668_v33, %v3983_v37  ;;  %v4475_v43 = vadd.f32 %v10668_v33, %v3984_v2  ;;  %v8249_v8 = vpack.i.bf16 %v10480_v52, %v5607_v55  ;;  %v4524_v31 = vadd.f32 %v10668_v33, %v4033_v41 }
 0x33d   : > { %v4525_v29 = vadd.f32 %v10668_v33, %v4034_v0  ;;  %v4546_v63 = vadd.f32 %v10668_v33, %v4055_v34  ;;  %v4547_v32 = vadd.f32 %v10668_v33, %v4056_v60  ;;  %v4936_v35 = vmax.f32 %v4452_v23, 0.0 }
 0x33e   : > { %v4937_v38 = vmax.f32 %v4453_v57, 0.0  ;;  %v4958_v53 = vmax.f32 %v4474_v22, 0.0  ;;  %8250 = vrot.lane.b32.xlu1 %v8249_v8, %s8620_s12  ;;  %v4959_v13 = vmax.f32 %v4475_v43, 0.0  ;;  %v5008_v52 = vmax.f32 %v4524_v31, 0.0 }
 0x33f   : > { %v5009_v62 = vmax.f32 %v4525_v29, 0.0  ;;  %v5030_v40 = vmax.f32 %v4546_v63, 0.0  ;;  %v5031_v42 = vmax.f32 %v4547_v32, 0.0  ;;  %v2934_v18 = vsub.f32 %v2444_v24, %v9934_v9 }
 0x340   : > { %v5398_v44 = vmax.f32 %v4936_v35, %v4958_v53  ;;  %v2935_v25 = vsub.f32 %v2445_v17, %v9934_v9  ;;  %v5399_v59 = vmax.f32 %v4937_v38, %v4959_v13  ;;  %v2956_v19 = vsub.f32 %v2466_v12, %v9934_v9  ;;  %v2529_v13 = vld [vmem:[#allocation2 + $0x368] sm:$0xff] }
 0x341   : > { %v5426_v21 = vmax.f32 %v5008_v52, %v5030_v40  ;;  %v2957_v48 = vsub.f32 %v2467_v58, %v9934_v9  ;;  %v5427_v50 = vmax.f32 %v5009_v62, %v5031_v42  ;;  %v3094_v45 = vsub.f32 %v2604_v20, %v9934_v9  ;;  %v2528_v20 = vld [vmem:[#allocation2 + $0x360] sm:$0xff]  ;;  %v2550_v52 = vld [vmem:[#allocation2 + $0x418] sm:$0xff] }
 0x342   : > { %v3095_v11 = vsub.f32 %v2605_v39, %v9934_v9  ;;  %v3116_v47 = vsub.f32 %v2626_v30, %v9934_v9  ;;  %v5619_v49 = vmax.f32 %v5398_v44, %v5399_v59  ;;  %v3117_v3 = vsub.f32 %v2627_v26, %v9934_v9  ;;  %v2551_v42 = vld [vmem:[#allocation2 + $0x420] sm:$0xff] }
 0x343   : > { %v3426_v51 = vmul.f32 %v10134_v27, %v2934_v18  ;;  %v3427_v28 = vmul.f32 %v10134_v27, %v2935_v25  ;;  %v10745_v15 = vmax.f32 %v5426_v21, %v5427_v50  ;;  %v3448_v37 = vmul.f32 %v10134_v27, %v2956_v19  ;;  %v2600_v44 = vld [vmem:[#allocation2 + $0x5c0] sm:$0xff]  ;;  %v2601_v21 = vld [vmem:[#allocation2 + $0x5c8] sm:$0xff]  ;;  %v2622_v19 = vld [vmem:[#allocation2 + $0x678] sm:$0xff] }
 0x344   : > { %v3449_v2 = vmul.f32 %v10134_v27, %v2957_v48  ;;  %v3586_v41 = vmul.f32 %v10134_v27, %v3094_v45  ;;  %v3587_v55 = vmul.f32 %v10134_v27, %v3095_v11  ;;  %v3608_v0 = vmul.f32 %v10134_v27, %v3116_v47  ;;  %v2623_v45 = vld [vmem:[#allocation2 + $0x680] sm:$0xff] }
 0x345   : > { %v3609_v34 = vmul.f32 %v10134_v27, %v3117_v3  ;;  %v3917_v60 = vmul.f32 %v10654_v46, %v3426_v51  ;;  %v8244_v23 = vpack.i.bf16 %v10745_v15, %v5619_v49  ;;  %v3918_v57 = vmul.f32 %v10654_v46, %v3427_v28 }
 0x346   : > { %v3939_v22 = vmul.f32 %v10654_v46, %v3448_v37  ;;  %v3940_v43 = vmul.f32 %v10654_v46, %v3449_v2  ;;  %v4077_v8 = vmul.f32 %v10654_v46, %v3586_v41  ;;  %v4078_v31 = vmul.f32 %v10654_v46, %v3587_v55 }
 0x347   : > { %v4099_v29 = vmul.f32 %v10654_v46, %v3608_v0  ;;  %v4100_v63 = vmul.f32 %v10654_v46, %v3609_v34  ;;  %8245 = vrot.lane.b32.xlu0 %v8244_v23, %s8620_s12  ;;  %v4408_v24 = vadd.f32 %v10668_v33, %v3917_v60  ;;  %v4409_v17 = vadd.f32 %v10668_v33, %v3918_v57 }
 0x348   : > { %v4430_v32 = vadd.f32 %v10668_v33, %v3939_v22  ;;  %v4431_v35 = vadd.f32 %v10668_v33, %v3940_v43  ;;  %v4568_v38 = vadd.f32 %v10668_v33, %v4077_v8  ;;  %v4569_v53 = vadd.f32 %v10668_v33, %v4078_v31 }
 0x349   : > { %v4590_v12 = vadd.f32 %v10668_v33, %v4099_v29  ;;  %v4591_v58 = vadd.f32 %v10668_v33, %v4100_v63  ;;  %v4892_v62 = vmax.f32 %v4408_v24, 0.0  ;;  %v4893_v40 = vmax.f32 %v4409_v17, 0.0 }
 0x34a   : > { %v4914_v39 = vmax.f32 %v4430_v32, 0.0  ;;  %v4915_v30 = vmax.f32 %v4431_v35, 0.0  ;;  %v5052_v26 = vmax.f32 %v4568_v38, 0.0  ;;  %v5053_v18 = vmax.f32 %v4569_v53, 0.0 }
 0x34b   : > { %v5074_v25 = vmax.f32 %v4590_v12, 0.0  ;;  %v5075_v59 = vmax.f32 %v4591_v58, 0.0  ;;  %v3018_v11 = vsub.f32 %v2528_v20, %v9934_v9  ;;  %v3019_v47 = vsub.f32 %v2529_v13, %v9934_v9 }
 0x34c   : > { %v5376_v48 = vmax.f32 %v4892_v62, %v4914_v39  ;;  %v5377_v50 = vmax.f32 %v4893_v40, %v4915_v30  ;;  %v3040_v51 = vsub.f32 %v2550_v52, %v9934_v9  ;;  %v3041_v28 = vsub.f32 %v2551_v42, %v9934_v9  ;;  %v2556_v39 = vld [vmem:[#allocation2 + $0x450] sm:$0xff] }
 0x34d   : > { %v5448_v49 = vmax.f32 %v5052_v26, %v5074_v25  ;;  %v5449_v3 = vmax.f32 %v5053_v18, %v5075_v59  ;;  %v3090_v2 = vsub.f32 %v2600_v44, %v9934_v9  ;;  %v3091_v41 = vsub.f32 %v2601_v21, %v9934_v9  ;;  %v2557_v18 = vld [vmem:[#allocation2 + $0x458] sm:$0xff]  ;;  %v2578_v25 = vld [vmem:[#allocation2 + $0x508] sm:$0xff] }
 0x34e   : > { %v5608_v37 = vmax.f32 %v5376_v48, %v5377_v50  ;;  %v3112_v55 = vsub.f32 %v2622_v19, %v9934_v9  ;;  %v3113_v34 = vsub.f32 %v2623_v45, %v9934_v9  ;;  %v3510_v60 = vmul.f32 %v10134_v27, %v3018_v11  ;;  %v2579_v50 = vld [vmem:[#allocation2 + $0x510] sm:$0xff] }
 0x34f   : > { %v10778_v0 = vmax.f32 %v5448_v49, %v5449_v3  ;;  %v3511_v23 = vmul.f32 %v10134_v27, %v3019_v47  ;;  %v3532_v57 = vmul.f32 %v10134_v27, %v3040_v51  ;;  %v3533_v22 = vmul.f32 %v10134_v27, %v3041_v28  ;;  %v2530_v3 = vld [vmem:[#allocation2 + $0x370] sm:$0xff] }
 0x350   : > { %v3582_v43 = vmul.f32 %v10134_v27, %v3090_v2  ;;  %v3583_v8 = vmul.f32 %v10134_v27, %v3091_v41  ;;  %v3604_v29 = vmul.f32 %v10134_v27, %v3112_v55  ;;  %v3605_v63 = vmul.f32 %v10134_v27, %v3113_v34  ;;  %v2531_v41 = vld [vmem:[#allocation2 + $0x378] sm:$0xff] }
 0x351   : > { %v8259_v31 = vpack.i.bf16 %v10778_v0, %v5608_v37  ;;  %v4001_v24 = vmul.f32 %v10654_v46, %v3510_v60  ;;  %v4002_v17 = vmul.f32 %v10654_v46, %v3511_v23  ;;  %v4023_v32 = vmul.f32 %v10654_v46, %v3532_v57  ;;  %v2552_v57 = vld [vmem:[#allocation2 + $0x428] sm:$0xff] }
 0x352   : > { %v4024_v35 = vmul.f32 %v10654_v46, %v3533_v22  ;;  %v4073_v38 = vmul.f32 %v10654_v46, %v3582_v43  ;;  %v4074_v53 = vmul.f32 %v10654_v46, %v3583_v8  ;;  %v4095_v12 = vmul.f32 %v10654_v46, %v3604_v29  ;;  %v2553_v22 = vld [vmem:[#allocation2 + $0x430] sm:$0xff] }
 0x353   : > { %8260 = vrot.lane.b32.xlu1 %v8259_v31, %s8619_s11  ;;  %v4096_v58 = vmul.f32 %v10654_v46, %v3605_v63  ;;  %v4492_v20 = vadd.f32 %v10668_v33, %v4001_v24  ;;  %v4493_v13 = vadd.f32 %v10668_v33, %v4002_v17  ;;  %v4514_v52 = vadd.f32 %v10668_v33, %v4023_v32  ;;  %v2602_v29 = vld [vmem:[#allocation2 + $0x5d0] sm:$0xff] }
 0x354   : > { %v4515_v62 = vadd.f32 %v10668_v33, %v4024_v35  ;;  %v4564_v40 = vadd.f32 %v10668_v33, %v4073_v38  ;;  %v4565_v30 = vadd.f32 %v10668_v33, %v4074_v53  ;;  %v4586_v42 = vadd.f32 %v10668_v33, %v4095_v12  ;;  %v2603_v35 = vld [vmem:[#allocation2 + $0x5d8] sm:$0xff]  ;;  %v2624_v38 = vld [vmem:[#allocation2 + $0x688] sm:$0xff] }
 0x355   : > { %v4587_v44 = vadd.f32 %v10668_v33, %v4096_v58  ;;  %v4976_v26 = vmax.f32 %v4492_v20, 0.0  ;;  %v4977_v59 = vmax.f32 %v4493_v13, 0.0  ;;  %v4998_v21 = vmax.f32 %v4514_v52, 0.0  ;;  %v2625_v20 = vld [vmem:[#allocation2 + $0x690] sm:$0xff] }
 0x356   : > { %v4999_v19 = vmax.f32 %v4515_v62, 0.0  ;;  %v5048_v48 = vmax.f32 %v4564_v40, 0.0  ;;  %v5049_v45 = vmax.f32 %v4565_v30, 0.0  ;;  %v5070_v11 = vmax.f32 %v4586_v42, 0.0 }
 0x357   : > { %v5071_v47 = vmax.f32 %v4587_v44, 0.0  ;;  %v3046_v49 = vsub.f32 %v2556_v39, %v9934_v9  ;;  %v5416_v51 = vmax.f32 %v4976_v26, %v4998_v21  ;;  %v3047_v37 = vsub.f32 %v2557_v18, %v9934_v9 }
 0x358   : > { %v5417_v28 = vmax.f32 %v4977_v59, %v4999_v19  ;;  %v3068_v2 = vsub.f32 %v2578_v25, %v9934_v9  ;;  %v5444_v55 = vmax.f32 %v5048_v48, %v5070_v11  ;;  %v3069_v60 = vsub.f32 %v2579_v50, %v9934_v9 }
 0x359   : > { %v5445_v34 = vmax.f32 %v5049_v45, %v5071_v47  ;;  %v3538_v23 = vmul.f32 %v10134_v27, %v3046_v49  ;;  %v3539_v8 = vmul.f32 %v10134_v27, %v3047_v37  ;;  %v3020_v63 = vsub.f32 %v2530_v3, %v9934_v9 }
 0x35a   : > { %v10812_v43 = vmax.f32 %v5416_v51, %v5417_v28  ;;  %v3560_v31 = vmul.f32 %v10134_v27, %v3068_v2  ;;  %v3561_v17 = vmul.f32 %v10134_v27, %v3069_v60  ;;  %v3021_v53 = vsub.f32 %v2531_v41, %v9934_v9 }
 0x35b   : > { %v10817_v24 = vmax.f32 %v5444_v55, %v5445_v34  ;;  %v4029_v32 = vmul.f32 %v10654_v46, %v3538_v23  ;;  %v4030_v12 = vmul.f32 %v10654_v46, %v3539_v8  ;;  %v3042_v13 = vsub.f32 %v2552_v57, %v9934_v9 }
 0x35c   : > { %v4051_v58 = vmul.f32 %v10654_v46, %v3560_v31  ;;  %v3043_v52 = vsub.f32 %v2553_v22, %v9934_v9  ;;  %v4052_v40 = vmul.f32 %v10654_v46, %v3561_v17  ;;  %v3092_v30 = vsub.f32 %v2602_v29, %v9934_v9 }
 0x35d   : > { %v8254_v62 = vpack.i.bf16 %v10817_v24, %v10812_v43  ;;  %v4520_v39 = vadd.f32 %v10668_v33, %v4029_v32  ;;  %v4521_v42 = vadd.f32 %v10668_v33, %v4030_v12  ;;  %v3093_v26 = vsub.f32 %v2603_v35, %v9934_v9 }
 0x35e   : > { %v4542_v44 = vadd.f32 %v10668_v33, %v4051_v58  ;;  %v3114_v18 = vsub.f32 %v2624_v38, %v9934_v9  ;;  %v4543_v25 = vadd.f32 %v10668_v33, %v4052_v40  ;;  %v3115_v21 = vsub.f32 %v2625_v20, %v9934_v9  ;;  %v2564_v58 = vld [vmem:[#allocation2 + $0x490] sm:$0xff]  ;;  %v2565_v40 = vld [vmem:[#allocation2 + $0x498] sm:$0xff] }
 0x35f   : > { %8255 = vrot.lane.b32.xlu0 %v8254_v62, %s8619_s11  ;;  %v5004_v59 = vmax.f32 %v4520_v39, 0.0  ;;  %v3512_v19 = vmul.f32 %v10134_v27, %v3020_v63  ;;  %v5005_v48 = vmax.f32 %v4521_v42, 0.0  ;;  %v3513_v45 = vmul.f32 %v10134_v27, %v3021_v53  ;;  %v2568_v39 = vld [vmem:[#allocation2 + $0x4b0] sm:$0xff] }
 0x360   : > { %v5026_v50 = vmax.f32 %v4542_v44, 0.0  ;;  %v3534_v11 = vmul.f32 %v10134_v27, %v3042_v13  ;;  %v5027_v47 = vmax.f32 %v4543_v25, 0.0  ;;  %v3535_v49 = vmul.f32 %v10134_v27, %v3043_v52  ;;  %v2586_v25 = vld [vmem:[#allocation2 + $0x548] sm:$0xff] }
 0x361   : > { %v3584_v3 = vmul.f32 %v10134_v27, %v3092_v30  ;;  %v3585_v51 = vmul.f32 %v10134_v27, %v3093_v26  ;;  %v3606_v37 = vmul.f32 %v10134_v27, %v3114_v18  ;;  %v3607_v2 = vmul.f32 %v10134_v27, %v3115_v21  ;;  %v2569_v18 = vld [vmem:[#allocation2 + $0x4b8] sm:$0xff] }
 0x362   : > { %v5422_v28 = vmax.f32 %v5004_v59, %v5026_v50  ;;  %v4003_v41 = vmul.f32 %v10654_v46, %v3512_v19  ;;  %v5423_v55 = vmax.f32 %v5005_v48, %v5027_v47  ;;  %v4004_v34 = vmul.f32 %v10654_v46, %v3513_v45  ;;  %v2590_v48 = vld [vmem:[#allocation2 + $0x568] sm:$0xff]  ;;  %v2591_v50 = vld [vmem:[#allocation2 + $0x570] sm:$0xff] }
 0x363   : > { %v4025_v60 = vmul.f32 %v10654_v46, %v3534_v11  ;;  %v4026_v23 = vmul.f32 %v10654_v46, %v3535_v49  ;;  %v4075_v57 = vmul.f32 %v10654_v46, %v3584_v3  ;;  %v4076_v22 = vmul.f32 %v10654_v46, %v3585_v51 }
 0x364   : > { %v4097_v8 = vmul.f32 %v10654_v46, %v3606_v37  ;;  %v4098_v31 = vmul.f32 %v10654_v46, %v3607_v2  ;;  %v5631_v29 = vmax.f32 %v5422_v28, %v5423_v55  ;;  %v4494_v63 = vadd.f32 %v10668_v33, %v4003_v41 }
 0x365   : > { %v4495_v17 = vadd.f32 %v10668_v33, %v4004_v34  ;;  %v4516_v32 = vadd.f32 %v10668_v33, %v4025_v60  ;;  %v4517_v35 = vadd.f32 %v10668_v33, %v4026_v23  ;;  %v4566_v38 = vadd.f32 %v10668_v33, %v4075_v57 }
 0x366   : > { %v4567_v53 = vadd.f32 %v10668_v33, %v4076_v22  ;;  %v4588_v12 = vadd.f32 %v10668_v33, %v4097_v8  ;;  %v8269_v20 = vpack.i.bf16 %v5631_v29, %v10558_v7  ;;  %v4589_v13 = vadd.f32 %v10668_v33, %v4098_v31  ;;  %v2587_v7 = vld [vmem:[#allocation2 + $0x550] sm:$0xff] }
 0x367   : > { %v4978_v52 = vmax.f32 %v4494_v63, 0.0  ;;  %v4979_v62 = vmax.f32 %v4495_v17, 0.0  ;;  %v5000_v30 = vmax.f32 %v4516_v32, 0.0  ;;  %v5001_v42 = vmax.f32 %v4517_v35, 0.0 }
 0x368   : > { %v5050_v44 = vmax.f32 %v4566_v38, 0.0  ;;  %v5051_v26 = vmax.f32 %v4567_v53, 0.0  ;;  %8270 = vrot.lane.b32.xlu1 %v8269_v20, %s8621_s13  ;;  %v5072_v59 = vmax.f32 %v4588_v12, 0.0  ;;  %v5073_v21 = vmax.f32 %v4589_v13, 0.0 }
 0x369   : > { %v8279_v19 = vpack.i.bf16 %v10684_v56, %v10482_v10  ;;  %v3054_v45 = vsub.f32 %v2564_v58, %v9934_v9  ;;  %v5418_v11 = vmax.f32 %v4978_v52, %v5000_v30  ;;  %v5419_v47 = vmax.f32 %v4979_v62, %v5001_v42 }
 0x36a   : > { %v3055_v49 = vsub.f32 %v2565_v40, %v9934_v9  ;;  %v3058_v3 = vsub.f32 %v2568_v39, %v9934_v9  ;;  %v5446_v51 = vmax.f32 %v5050_v44, %v5072_v59  ;;  %v5447_v28 = vmax.f32 %v5051_v26, %v5073_v21  ;;  %v2606_v44 = vld [vmem:[#allocation2 + $0x5f0] sm:$0xff]  ;;  %v2607_v26 = vld [vmem:[#allocation2 + $0x5f8] sm:$0xff] }
 0x36b   : > { %v3059_v37 = vsub.f32 %v2569_v18, %v9934_v9  ;;  %v3076_v2 = vsub.f32 %v2586_v25, %v9934_v9  ;;  %v10871_v41 = vmax.f32 %v5418_v11, %v5419_v47  ;;  %v3077_v10 = vsub.f32 %v2587_v7, %v9934_v9  ;;  %v2611_v7 = vld [vmem:[#allocation2 + $0x618] sm:$0xff]  ;;  %v2628_v47 = vld [vmem:[#allocation2 + $0x6a8] sm:$0xff] }
 0x36c   : > { %v3080_v56 = vsub.f32 %v2590_v48, %v9934_v9  ;;  %v3081_v55 = vsub.f32 %v2591_v50, %v9934_v9  ;;  %v10876_v34 = vmax.f32 %v5446_v51, %v5447_v28  ;;  %8280 = vrot.lane.b32.xlu1 %v8279_v19, %s8620_s12  ;;  %v3546_v60 = vmul.f32 %v10134_v27, %v3054_v45  ;;  %v2610_v19 = vld [vmem:[#allocation2 + $0x610] sm:$0xff]  ;;  %v2632_v28 = vld [vmem:[#allocation2 + $0x6c8] sm:$0xff] }
 0x36d   : > { %v3547_v23 = vmul.f32 %v10134_v27, %v3055_v49  ;;  %v3550_v57 = vmul.f32 %v10134_v27, %v3058_v3  ;;  %v3551_v22 = vmul.f32 %v10134_v27, %v3059_v37  ;;  %v3568_v8 = vmul.f32 %v10134_v27, %v3076_v2  ;;  %v2629_v49 = vld [vmem:[#allocation2 + $0x6b0] sm:$0xff] }
 0x36e   : > { %v3569_v31 = vmul.f32 %v10134_v27, %v3077_v10  ;;  %v3572_v29 = vmul.f32 %v10134_v27, %v3080_v56  ;;  %v8264_v63 = vpack.i.bf16 %v10876_v34, %v10871_v41  ;;  %v3573_v17 = vmul.f32 %v10134_v27, %v3081_v55  ;;  %v2633_v37 = vld [vmem:[#allocation2 + $0x6d0] sm:$0xff] }
 0x36f   : > { %v4037_v32 = vmul.f32 %v10654_v46, %v3546_v60  ;;  %v4038_v35 = vmul.f32 %v10654_v46, %v3547_v23  ;;  %v4041_v38 = vmul.f32 %v10654_v46, %v3550_v57  ;;  %v4042_v53 = vmul.f32 %v10654_v46, %v3551_v22 }
 0x370   : > { %v4059_v12 = vmul.f32 %v10654_v46, %v3568_v8  ;;  %v4060_v58 = vmul.f32 %v10654_v46, %v3569_v31  ;;  %8265 = vrot.lane.b32.xlu0 %v8264_v63, %s8621_s13  ;;  %v4063_v20 = vmul.f32 %v10654_v46, %v3572_v29  ;;  %v4064_v13 = vmul.f32 %v10654_v46, %v3573_v17 }
 0x371   : > { %v4528_v52 = vadd.f32 %v10668_v33, %v4037_v32  ;;  %v4529_v62 = vadd.f32 %v10668_v33, %v4038_v35  ;;  %v4532_v40 = vadd.f32 %v10668_v33, %v4041_v38  ;;  %v4533_v39 = vadd.f32 %v10668_v33, %v4042_v53 }
 0x372   : > { %v4550_v30 = vadd.f32 %v10668_v33, %v4059_v12  ;;  %v4551_v42 = vadd.f32 %v10668_v33, %v4060_v58  ;;  %v4554_v18 = vadd.f32 %v10668_v33, %v4063_v20  ;;  %v4555_v25 = vadd.f32 %v10668_v33, %v4064_v13 }
 0x373   : > { %v5012_v59 = vmax.f32 %v4528_v52, 0.0  ;;  %v5013_v21 = vmax.f32 %v4529_v62, 0.0  ;;  %v5016_v48 = vmax.f32 %v4532_v40, 0.0  ;;  %v5017_v50 = vmax.f32 %v4533_v39, 0.0 }
 0x374   : > { %v5034_v45 = vmax.f32 %v4550_v30, 0.0  ;;  %v5035_v11 = vmax.f32 %v4551_v42, 0.0  ;;  %v5038_v3 = vmax.f32 %v4554_v18, 0.0  ;;  %v5039_v51 = vmax.f32 %v4555_v25, 0.0 }
 0x375   : > { %v3096_v2 = vsub.f32 %v2606_v44, %v9934_v9  ;;  %v3097_v10 = vsub.f32 %v2607_v26, %v9934_v9  ;;  %v3100_v60 = vsub.f32 %v2610_v19, %v9934_v9  ;;  %v3101_v23 = vsub.f32 %v2611_v7, %v9934_v9 }
 0x376   : > { %v5430_v56 = vmax.f32 %v5012_v59, %v5034_v45  ;;  %v5431_v55 = vmax.f32 %v5013_v21, %v5035_v11  ;;  %v5434_v57 = vmax.f32 %v5016_v48, %v5038_v3  ;;  %v5435_v22 = vmax.f32 %v5017_v50, %v5039_v51  ;;  %v2608_v11 = vld [vmem:[#allocation2 + $0x600] sm:$0xff] }
 0x377   : > { %v3118_v8 = vsub.f32 %v2628_v47, %v9934_v9  ;;  %v3119_v31 = vsub.f32 %v2629_v49, %v9934_v9  ;;  %v3122_v63 = vsub.f32 %v2632_v28, %v9934_v9  ;;  %v3123_v17 = vsub.f32 %v2633_v37, %v9934_v9  ;;  %v2609_v47 = vld [vmem:[#allocation2 + $0x608] sm:$0xff]  ;;  %v2612_v49 = vld [vmem:[#allocation2 + $0x620] sm:$0xff] }
 0x378   : > { %v10912_v29 = vmax.f32 %v5430_v56, %v5431_v55  ;;  %v3588_v32 = vmul.f32 %v10134_v27, %v3096_v2  ;;  %v10917_v35 = vmax.f32 %v5434_v57, %v5435_v22  ;;  %v3589_v38 = vmul.f32 %v10134_v27, %v3097_v10  ;;  %v2613_v2 = vld [vmem:[#allocation2 + $0x628] sm:$0xff]  ;;  %v2630_v10 = vld [vmem:[#allocation2 + $0x6b8] sm:$0xff]  ;;  %v2631_v57 = vld [vmem:[#allocation2 + $0x6c0] sm:$0xff] }
 0x379   : > { %v3592_v53 = vmul.f32 %v10134_v27, %v3100_v60  ;;  %v3593_v12 = vmul.f32 %v10134_v27, %v3101_v23  ;;  %v3610_v58 = vmul.f32 %v10134_v27, %v3118_v8  ;;  %v3611_v20 = vmul.f32 %v10134_v27, %v3119_v31  ;;  %v2634_v22 = vld [vmem:[#allocation2 + $0x6d8] sm:$0xff]  ;;  %v2635_v31 = vld [vmem:[#allocation2 + $0x6e0] sm:$0xff] }
 0x37a   : > { %v3614_v13 = vmul.f32 %v10134_v27, %v3122_v63  ;;  %v3615_v52 = vmul.f32 %v10134_v27, %v3123_v17  ;;  %v8274_v62 = vpack.i.bf16 %v10917_v35, %v10912_v29  ;;  %v4079_v40 = vmul.f32 %v10654_v46, %v3588_v32 }
 0x37b   : > { %v4080_v39 = vmul.f32 %v10654_v46, %v3589_v38  ;;  %v4083_v30 = vmul.f32 %v10654_v46, %v3592_v53  ;;  %v4084_v42 = vmul.f32 %v10654_v46, %v3593_v12  ;;  %v4101_v44 = vmul.f32 %v10654_v46, %v3610_v58 }
 0x37c   : > { %v4102_v26 = vmul.f32 %v10654_v46, %v3611_v20  ;;  %v4105_v18 = vmul.f32 %v10654_v46, %v3614_v13  ;;  %8275 = vrot.lane.b32.xlu0 %v8274_v62, %s8620_s12  ;;  %v4106_v25 = vmul.f32 %v10654_v46, %v3615_v52  ;;  %v4570_v59 = vadd.f32 %v10668_v33, %v4079_v40 }
 0x37d   : > { %v4571_v21 = vadd.f32 %v10668_v33, %v4080_v39  ;;  %v4574_v19 = vadd.f32 %v10668_v33, %v4083_v30  ;;  %v4575_v7 = vadd.f32 %v10668_v33, %v4084_v42  ;;  %v4592_v48 = vadd.f32 %v10668_v33, %v4101_v44 }
 0x37e   : > { %v4593_v50 = vadd.f32 %v10668_v33, %v4102_v26  ;;  %v4596_v45 = vadd.f32 %v10668_v33, %v4105_v18  ;;  %v4597_v3 = vadd.f32 %v10668_v33, %v4106_v25  ;;  %v5054_v51 = vmax.f32 %v4570_v59, 0.0 }
 0x37f   : > { %v5055_v28 = vmax.f32 %v4571_v21, 0.0  ;;  %v5058_v37 = vmax.f32 %v4574_v19, 0.0  ;;  %v5059_v56 = vmax.f32 %v4575_v7, 0.0  ;;  %v5076_v55 = vmax.f32 %v4592_v48, 0.0 }
 0x380   : > { %v5077_v60 = vmax.f32 %v4593_v50, 0.0  ;;  %v5080_v23 = vmax.f32 %v4596_v45, 0.0  ;;  %v5081_v8 = vmax.f32 %v4597_v3, 0.0  ;;  %v3098_v63 = vsub.f32 %v2608_v11, %v9934_v9 }
 0x381   : > { %v3099_v17 = vsub.f32 %v2609_v47, %v9934_v9  ;;  %v3102_v32 = vsub.f32 %v2612_v49, %v9934_v9  ;;  %v5450_v38 = vmax.f32 %v5054_v51, %v5076_v55  ;;  %v3103_v58 = vsub.f32 %v2613_v2, %v9934_v9 }
 0x382   : > { %v5451_v53 = vmax.f32 %v5055_v28, %v5077_v60  ;;  %v5454_v12 = vmax.f32 %v5058_v37, %v5080_v23  ;;  %v5455_v20 = vmax.f32 %v5059_v56, %v5081_v8  ;;  %v3120_v13 = vsub.f32 %v2630_v10, %v9934_v9  ;;  %v2572_v56 = vld [vmem:[#allocation2 + $0x4d0] sm:$0xff] }
 0x383   : > { %v3121_v52 = vsub.f32 %v2631_v57, %v9934_v9  ;;  %v3124_v62 = vsub.f32 %v2634_v22, %v9934_v9  ;;  %v3125_v39 = vsub.f32 %v2635_v31, %v9934_v9  ;;  %v3590_v30 = vmul.f32 %v10134_v27, %v3098_v63  ;;  %v2573_v22 = vld [vmem:[#allocation2 + $0x4d8] sm:$0xff]  ;;  %v2576_v8 = vld [vmem:[#allocation2 + $0x4f0] sm:$0xff] }
 0x384   : > { %v10952_v40 = vmax.f32 %v5450_v38, %v5451_v53  ;;  %v3591_v42 = vmul.f32 %v10134_v27, %v3099_v17  ;;  %v10957_v44 = vmax.f32 %v5454_v12, %v5455_v20  ;;  %v3594_v26 = vmul.f32 %v10134_v27, %v3102_v32  ;;  %v2577_v31 = vld [vmem:[#allocation2 + $0x4f8] sm:$0xff]  ;;  %v2594_v53 = vld [vmem:[#allocation2 + $0x588] sm:$0xff]  ;;  %v2595_v12 = vld [vmem:[#allocation2 + $0x590] sm:$0xff] }
 0x385   : > { %v3595_v18 = vmul.f32 %v10134_v27, %v3103_v58  ;;  %v3612_v25 = vmul.f32 %v10134_v27, %v3120_v13  ;;  %v3613_v59 = vmul.f32 %v10134_v27, %v3121_v52  ;;  %v3616_v21 = vmul.f32 %v10134_v27, %v3124_v62  ;;  %v2598_v62 = vld [vmem:[#allocation2 + $0x5a8] sm:$0xff] }
 0x386   : > { %v3617_v19 = vmul.f32 %v10134_v27, %v3125_v39  ;;  %v4081_v7 = vmul.f32 %v10654_v46, %v3590_v30  ;;  %v8289_v48 = vpack.i.bf16 %v10957_v44, %v10952_v40  ;;  %v4082_v50 = vmul.f32 %v10654_v46, %v3591_v42  ;;  %v2599_v39 = vld [vmem:[#allocation2 + $0x5b0] sm:$0xff] }
 0x387   : > { %v4085_v45 = vmul.f32 %v10654_v46, %v3594_v26  ;;  %v4086_v11 = vmul.f32 %v10654_v46, %v3595_v18  ;;  %v4103_v47 = vmul.f32 %v10654_v46, %v3612_v25  ;;  %v4104_v49 = vmul.f32 %v10654_v46, %v3613_v59 }
 0x388   : > { %v4107_v3 = vmul.f32 %v10654_v46, %v3616_v21  ;;  %v4108_v51 = vmul.f32 %v10654_v46, %v3617_v19  ;;  %8290 = vrot.lane.b32.xlu1 %v8289_v48, %s8621_s13  ;;  %v4572_v28 = vadd.f32 %v10668_v33, %v4081_v7  ;;  %v4573_v37 = vadd.f32 %v10668_v33, %v4082_v50 }
 0x389   : > { %v4576_v2 = vadd.f32 %v10668_v33, %v4085_v45  ;;  %v4577_v10 = vadd.f32 %v10668_v33, %v4086_v11  ;;  %v4594_v55 = vadd.f32 %v10668_v33, %v4103_v47  ;;  %v4595_v60 = vadd.f32 %v10668_v33, %v4104_v49 }
 0x38a   : > { %v4598_v23 = vadd.f32 %v10668_v33, %v4107_v3  ;;  %v4599_v57 = vadd.f32 %v10668_v33, %v4108_v51  ;;  %v5056_v63 = vmax.f32 %v4572_v28, 0.0  ;;  %v5057_v17 = vmax.f32 %v4573_v37, 0.0 }
 0x38b   : > { %v5060_v32 = vmax.f32 %v4576_v2, 0.0  ;;  %v5061_v38 = vmax.f32 %v4577_v10, 0.0  ;;  %v5078_v58 = vmax.f32 %v4594_v55, 0.0  ;;  %v5079_v20 = vmax.f32 %v4595_v60, 0.0 }
 0x38c   : > { %v5082_v13 = vmax.f32 %v4598_v23, 0.0  ;;  %v5083_v52 = vmax.f32 %v4599_v57, 0.0  ;;  %v3062_v30 = vsub.f32 %v2572_v56, %v9934_v9  ;;  %v3063_v42 = vsub.f32 %v2573_v22, %v9934_v9 }
 0x38d   : > { %v3066_v26 = vsub.f32 %v2576_v8, %v9934_v9  ;;  %v3067_v18 = vsub.f32 %v2577_v31, %v9934_v9  ;;  %v5452_v25 = vmax.f32 %v5056_v63, %v5078_v58  ;;  %v5453_v59 = vmax.f32 %v5057_v17, %v5079_v20  ;;  %v11013_v8 = vld [vmem:[%s13585_s2] ss:$0 sm:$0xff] }
 0x38e   : > { %v5456_v21 = vmax.f32 %v5060_v32, %v5082_v13  ;;  %v5457_v19 = vmax.f32 %v5061_v38, %v5083_v52  ;;  %v3084_v7 = vsub.f32 %v2594_v53, %v9934_v9  ;;  %v3085_v48 = vsub.f32 %v2595_v12, %v9934_v9  ;;  %v11027_v58 = vld [vmem:[%s13586_s3] ss:$0 sm:$0xff] }
 0x38f   : > { %v3088_v50 = vsub.f32 %v2598_v62, %v9934_v9  ;;  %v3089_v45 = vsub.f32 %v2599_v39, %v9934_v9  ;;  %v10992_v11 = vmax.f32 %v5452_v25, %v5453_v59  ;;  %v3554_v49 = vmul.f32 %v10134_v27, %v3062_v30  ;;  %v2532_v30 = vld [vmem:[#allocation2 + $0x380] sm:$0xff] }
 0x390   : > { %v10994_v47 = vmax.f32 %v5456_v21, %v5457_v19  ;;  %v3555_v3 = vmul.f32 %v10134_v27, %v3063_v42  ;;  %v3558_v51 = vmul.f32 %v10134_v27, %v3066_v26  ;;  %v3559_v28 = vmul.f32 %v10134_v27, %v3067_v18  ;;  %v2533_v42 = vld [vmem:[#allocation2 + $0x388] sm:$0xff]  ;;  %v2554_v26 = vld [vmem:[#allocation2 + $0x438] sm:$0xff]  ;;  %v2555_v21 = vld [vmem:[#allocation2 + $0x440] sm:$0xff] }
 0x391   : > { %v3576_v37 = vmul.f32 %v10134_v27, %v3084_v7  ;;  %v3577_v2 = vmul.f32 %v10134_v27, %v3085_v48  ;;  %v3580_v56 = vmul.f32 %v10134_v27, %v3088_v50  ;;  %v3581_v55 = vmul.f32 %v10134_v27, %v3089_v45  ;;  %v2616_v19 = vld [vmem:[#allocation2 + $0x640] sm:$0xff] }
 0x392   : > { %v8284_v10 = vpack.i.bf16 %v10994_v47, %v10992_v11  ;;  %v4045_v60 = vmul.f32 %v10654_v46, %v3554_v49  ;;  %v4046_v23 = vmul.f32 %v10654_v46, %v3555_v3  ;;  %v4049_v57 = vmul.f32 %v10654_v46, %v3558_v51  ;;  %v2617_v49 = vld [vmem:[#allocation2 + $0x648] sm:$0xff]  ;;  %v2638_v3 = vld [vmem:[#allocation2 + $0x6f8] sm:$0xff]  ;;  %v2639_v51 = vld [vmem:[#allocation2 + $0x700] sm:$0xff] }
 0x393   : > { %v4050_v22 = vmul.f32 %v10654_v46, %v3559_v28  ;;  %v4067_v31 = vmul.f32 %v11013_v8, %v3576_v37  ;;  %v4068_v63 = vmul.f32 %v11013_v8, %v3577_v2  ;;  %v4071_v17 = vmul.f32 %v11013_v8, %v3580_v56 }
 0x394   : > { %8285 = vrot.lane.b32.xlu0 %v8284_v10, %s8619_s11  ;;  %v4072_v32 = vmul.f32 %v11013_v8, %v3581_v55  ;;  %v4536_v38 = vadd.f32 %v10668_v33, %v4045_v60  ;;  %v4537_v53 = vadd.f32 %v10668_v33, %v4046_v23  ;;  %v4540_v46 = vadd.f32 %v10668_v33, %v4049_v57 }
 0x395   : > { %v4541_v12 = vadd.f32 %v10668_v33, %v4050_v22  ;;  %v4558_v20 = vadd.f32 %v11027_v58, %v4067_v31  ;;  %v4559_v13 = vadd.f32 %v11027_v58, %v4068_v63  ;;  %v4562_v52 = vadd.f32 %v11027_v58, %v4071_v17 }
 0x396   : > { %v4563_v62 = vadd.f32 %v11027_v58, %v4072_v32  ;;  %v5020_v39 = vmax.f32 %v4536_v38, 0.0  ;;  %v5021_v18 = vmax.f32 %v4537_v53, 0.0  ;;  %v5024_v25 = vmax.f32 %v4540_v46, 0.0 }
 0x397   : > { %v5025_v33 = vmax.f32 %v4541_v12, 0.0  ;;  %v5042_v59 = vmax.f32 %v4558_v20, 0.0  ;;  %v5043_v7 = vmax.f32 %v4559_v13, 0.0  ;;  %v5046_v48 = vmax.f32 %v4562_v52, 0.0 }
 0x398   : > { %v5047_v50 = vmax.f32 %v4563_v62, 0.0  ;;  %v8294_v45 = vpack.i.bf16 %v10912_v29, %v10745_v15  ;;  %v3022_v37 = vsub.f32 %v2532_v30, %v9934_v9  ;;  %v3023_v2 = vsub.f32 %v2533_v42, %v9934_v9 }
 0x399   : > { %v5438_v28 = vmax.f32 %v5020_v39, %v5042_v59  ;;  %v3044_v10 = vsub.f32 %v2554_v26, %v9934_v9  ;;  %v5439_v56 = vmax.f32 %v5021_v18, %v5043_v7  ;;  %v5442_v55 = vmax.f32 %v5024_v25, %v5046_v48 }
 0x39a   : > { %v5443_v60 = vmax.f32 %v5025_v33, %v5047_v50  ;;  %8295 = vrot.lane.b32.xlu0 %v8294_v45, %s8621_s13  ;;  %v3045_v23 = vsub.f32 %v2555_v21, %v9934_v9  ;;  %v3106_v57 = vsub.f32 %v2616_v19, %v9934_v9  ;;  %v3107_v15 = vsub.f32 %v2617_v49, %v9934_v9 }
 0x39b   : > { %v3128_v29 = vsub.f32 %v2638_v3, %v9934_v9  ;;  %v3129_v22 = vsub.f32 %v2639_v51, %v9934_v9  ;;  %v11044_v31 = vmax.f32 %v5438_v28, %v5439_v56  ;;  %v3514_v17 = vmul.f32 %v10134_v27, %v3022_v37  ;;  %v2614_v51 = vld [vmem:[#allocation2 + $0x630] sm:$0xff]  ;;  %v2615_v56 = vld [vmem:[#allocation2 + $0x638] sm:$0xff] }
 0x39c   : > { %v5641_v63 = vmax.f32 %v5442_v55, %v5443_v60  ;;  %v3515_v32 = vmul.f32 %v10134_v27, %v3023_v2  ;;  %v3536_v38 = vmul.f32 %v10134_v27, %v3044_v10  ;;  %v3537_v53 = vmul.f32 %v10134_v27, %v3045_v23  ;;  %v2618_v55 = vld [vmem:[#allocation2 + $0x650] sm:$0xff] }
 0x39d   : > { %v3598_v46 = vmul.f32 %v10134_v27, %v3106_v57  ;;  %v3599_v12 = vmul.f32 %v10134_v27, %v3107_v15  ;;  %v3620_v13 = vmul.f32 %v10134_v27, %v3128_v29  ;;  %v3621_v52 = vmul.f32 %v10134_v27, %v3129_v22  ;;  %v2619_v29 = vld [vmem:[#allocation2 + $0x658] sm:$0xff]  ;;  %v2636_v22 = vld [vmem:[#allocation2 + $0x6e8] sm:$0xff] }
 0x39e   : > { %v8299_v20 = vpack.i.bf16 %v5641_v63, %v11044_v31  ;;  %v4005_v62 = vmul.f32 %v11013_v8, %v3514_v17  ;;  %v4006_v39 = vmul.f32 %v11013_v8, %v3515_v32  ;;  %v4027_v30 = vmul.f32 %v11013_v8, %v3536_v38  ;;  %v2637_v63 = vld [vmem:[#allocation2 + $0x6f0] sm:$0xff] }
 0x39f   : > { %v4028_v42 = vmul.f32 %v11013_v8, %v3537_v53  ;;  %v4089_v26 = vmul.f32 %v11013_v8, %v3598_v46  ;;  %v4090_v18 = vmul.f32 %v11013_v8, %v3599_v12  ;;  %v4111_v25 = vmul.f32 %v11013_v8, %v3620_v13  ;;  %v2640_v53 = vld [vmem:[#allocation2 + $0x708] sm:$0xff]  ;;  %v2641_v46 = vld [vmem:[#allocation2 + $0x710] sm:$0xff] }
 0x3a0   : > { %8300 = vrot.lane.b32.xlu1 %v8299_v20, %s8620_s12  ;;  %v4112_v33 = vmul.f32 %v11013_v8, %v3621_v52  ;;  %v4496_v59 = vadd.f32 %v11027_v58, %v4005_v62  ;;  %v4497_v21 = vadd.f32 %v11027_v58, %v4006_v39  ;;  %v4518_v19 = vadd.f32 %v11027_v58, %v4027_v30 }
 0x3a1   : > { %v4519_v7 = vadd.f32 %v11027_v58, %v4028_v42  ;;  %v4580_v48 = vadd.f32 %v11027_v58, %v4089_v26  ;;  %v4581_v50 = vadd.f32 %v11027_v58, %v4090_v18  ;;  %v4602_v45 = vadd.f32 %v11027_v58, %v4111_v25 }
 0x3a2   : > { %v4603_v49 = vadd.f32 %v11027_v58, %v4112_v33  ;;  %v4980_v3 = vmax.f32 %v4496_v59, 0.0  ;;  %v4981_v28 = vmax.f32 %v4497_v21, 0.0  ;;  %v5002_v37 = vmax.f32 %v4518_v19, 0.0 }
 0x3a3   : > { %v5003_v2 = vmax.f32 %v4519_v7, 0.0  ;;  %v5064_v10 = vmax.f32 %v4580_v48, 0.0  ;;  %v5065_v60 = vmax.f32 %v4581_v50, 0.0  ;;  %v5086_v23 = vmax.f32 %v4602_v45, 0.0 }
 0x3a4   : > { %v5087_v57 = vmax.f32 %v4603_v49, 0.0  ;;  %v8304_v15 = vpack.i.bf16 %v10871_v41, %v10689_v16  ;;  %v5420_v17 = vmax.f32 %v4980_v3, %v5002_v37  ;;  %v8319_v38 = vpack.i.bf16 %v11044_v31, %v10917_v35 }
 0x3a5   : > { %v5421_v32 = vmax.f32 %v4981_v28, %v5003_v2  ;;  %v3104_v12 = vsub.f32 %v2614_v51, %v9934_v9  ;;  %v5460_v20 = vmax.f32 %v5064_v10, %v5086_v23  ;;  %v3105_v52 = vsub.f32 %v2615_v56, %v9934_v9 }
 0x3a6   : > { %v5461_v13 = vmax.f32 %v5065_v60, %v5087_v57  ;;  %8305 = vrot.lane.b32.xlu0 %v8304_v15, %s8620_s12  ;;  %v3108_v16 = vsub.f32 %v2618_v55, %v9934_v9  ;;  %v3109_v62 = vsub.f32 %v2619_v29, %v9934_v9  ;;  %v3126_v39 = vsub.f32 %v2636_v22, %v9934_v9  ;;  %v2648_v22 = vld [vmem:[#allocation2 + $0x750] sm:$0xff] }
 0x3a7   : > { %v11080_v41 = vmax.f32 %v5420_v17, %v5421_v32  ;;  %v3127_v35 = vsub.f32 %v2637_v63, %v9934_v9  ;;  %v3130_v30 = vsub.f32 %v2640_v53, %v9934_v9  ;;  %v3131_v42 = vsub.f32 %v2641_v46, %v9934_v9  ;;  %v2649_v63 = vld [vmem:[#allocation2 + $0x758] sm:$0xff]  ;;  %v2652_v17 = vld [vmem:[#allocation2 + $0x770] sm:$0xff] }
 0x3a8   : > { %v11085_v31 = vmax.f32 %v5460_v20, %v5461_v13  ;;  %v3596_v26 = vmul.f32 %v10134_v27, %v3104_v12  ;;  %v3597_v18 = vmul.f32 %v10134_v27, %v3105_v52  ;;  %v3600_v25 = vmul.f32 %v10134_v27, %v3108_v16  ;;  %v2653_v20 = vld [vmem:[#allocation2 + $0x778] sm:$0xff]  ;;  %v2670_v13 = vld [vmem:[#allocation2 + $0x808] sm:$0xff] }
 0x3a9   : > { %v3601_v33 = vmul.f32 %v10134_v27, %v3109_v62  ;;  %v3618_v59 = vmul.f32 %v10134_v27, %v3126_v39  ;;  %v3619_v19 = vmul.f32 %v10134_v27, %v3127_v35  ;;  %v3622_v7 = vmul.f32 %v10134_v27, %v3130_v30  ;;  %v2671_v35 = vld [vmem:[#allocation2 + $0x810] sm:$0xff]  ;;  %v2674_v30 = vld [vmem:[#allocation2 + $0x828] sm:$0xff] }
 0x3aa   : > { %v8309_v21 = vpack.i.bf16 %v11080_v41, %v11085_v31  ;;  %v3623_v48 = vmul.f32 %v10134_v27, %v3131_v42  ;;  %v4087_v50 = vmul.f32 %v11013_v8, %v3596_v26  ;;  %v4088_v45 = vmul.f32 %v11013_v8, %v3597_v18  ;;  %v2675_v26 = vld [vmem:[#allocation2 + $0x830] sm:$0xff] }
 0x3ab   : > { %v4091_v49 = vmul.f32 %v11013_v8, %v3600_v25  ;;  %v4092_v3 = vmul.f32 %v11013_v8, %v3601_v33  ;;  %v4109_v51 = vmul.f32 %v11013_v8, %v3618_v59  ;;  %v4110_v28 = vmul.f32 %v11013_v8, %v3619_v19 }
 0x3ac   : > { %8310 = vrot.lane.b32.xlu1 %v8309_v21, %s8619_s11  ;;  %v4113_v37 = vmul.f32 %v11013_v8, %v3622_v7  ;;  %v4114_v2 = vmul.f32 %v11013_v8, %v3623_v48  ;;  %v4578_v10 = vadd.f32 %v11027_v58, %v4087_v50  ;;  %v4579_v56 = vadd.f32 %v11027_v58, %v4088_v45 }
 0x3ad   : > { %v4582_v55 = vadd.f32 %v11027_v58, %v4091_v49  ;;  %v4583_v60 = vadd.f32 %v11027_v58, %v4092_v3  ;;  %v4600_v23 = vadd.f32 %v11027_v58, %v4109_v51  ;;  %v4601_v57 = vadd.f32 %v11027_v58, %v4110_v28 }
 0x3ae   : > { %v4604_v15 = vadd.f32 %v11027_v58, %v4113_v37  ;;  %v4605_v29 = vadd.f32 %v11027_v58, %v4114_v2  ;;  %v5062_v32 = vmax.f32 %v4578_v10, 0.0  ;;  %v5063_v53 = vmax.f32 %v4579_v56, 0.0 }
 0x3af   : > { %v5066_v46 = vmax.f32 %v4582_v55, 0.0  ;;  %v5067_v12 = vmax.f32 %v4583_v60, 0.0  ;;  %v5084_v52 = vmax.f32 %v4600_v23, 0.0  ;;  %v5085_v16 = vmax.f32 %v4601_v57, 0.0 }
 0x3b0   : > { %8320 = vrot.lane.b32.xlu1 %v8319_v38, %s8621_s13  ;;  %v5088_v62 = vmax.f32 %v4604_v15, 0.0  ;;  %v5089_v39 = vmax.f32 %v4605_v29, 0.0  ;;  %v8329_v42 = vpack.i.bf16 %v10952_v40, %v10876_v34  ;;  %v3138_v18 = vsub.f32 %v2648_v22, %v9934_v9 }
 0x3b1   : > { %v3139_v25 = vsub.f32 %v2649_v63, %v9934_v9  ;;  %v3142_v33 = vsub.f32 %v2652_v17, %v9934_v9  ;;  %v5458_v59 = vmax.f32 %v5062_v32, %v5084_v52  ;;  %v5459_v21 = vmax.f32 %v5063_v53, %v5085_v16 }
 0x3b2   : > { %v5462_v19 = vmax.f32 %v5066_v46, %v5088_v62  ;;  %v5463_v38 = vmax.f32 %v5067_v12, %v5089_v39  ;;  %v3143_v7 = vsub.f32 %v2653_v20, %v9934_v9  ;;  %v3160_v48 = vsub.f32 %v2670_v13, %v9934_v9  ;;  %v2690_v13 = vld [vmem:[#allocation2 + $0x8b0] sm:$0xff] }
 0x3b3   : > { %v3161_v50 = vsub.f32 %v2671_v35, %v9934_v9  ;;  %v3164_v45 = vsub.f32 %v2674_v30, %v9934_v9  ;;  %v11126_v34 = vmax.f32 %v5458_v59, %v5459_v21  ;;  %v3165_v49 = vsub.f32 %v2675_v26, %v9934_v9  ;;  %v2691_v35 = vld [vmem:[#allocation2 + $0x8b8] sm:$0xff]  ;;  %v2694_v30 = vld [vmem:[#allocation2 + $0x8d0] sm:$0xff]  ;;  %v2712_v59 = vld [vmem:[#allocation2 + $0x968] sm:$0xff] }
 0x3b4   : > { %v11128_v40 = vmax.f32 %v5462_v19, %v5463_v38  ;;  %8330 = vrot.lane.b32.xlu1 %v8329_v42, %s8620_s12  ;;  %v3630_v3 = vmul.f32 %v10134_v27, %v3138_v18  ;;  %v3631_v51 = vmul.f32 %v10134_v27, %v3139_v25  ;;  %v3634_v28 = vmul.f32 %v10134_v27, %v3142_v33  ;;  %v2695_v42 = vld [vmem:[#allocation2 + $0x8d8] sm:$0xff]  ;;  %v2713_v21 = vld [vmem:[#allocation2 + $0x970] sm:$0xff] }
 0x3b5   : > { %v3635_v37 = vmul.f32 %v10134_v27, %v3143_v7  ;;  %v3652_v2 = vmul.f32 %v10134_v27, %v3160_v48  ;;  %v3653_v56 = vmul.f32 %v10134_v27, %v3161_v50  ;;  %v3656_v55 = vmul.f32 %v10134_v27, %v3164_v45  ;;  %v2716_v50 = vld [vmem:[#allocation2 + $0x988] sm:$0xff]  ;;  %v2717_v45 = vld [vmem:[#allocation2 + $0x990] sm:$0xff] }
 0x3b6   : > { %v8314_v10 = vpack.i.bf16 %v11128_v40, %v11126_v34  ;;  %v3657_v60 = vmul.f32 %v10134_v27, %v3165_v49  ;;  %v4121_v23 = vmul.f32 %v11013_v8, %v3630_v3  ;;  %v4122_v57 = vmul.f32 %v11013_v8, %v3631_v51 }
 0x3b7   : > { %v4125_v15 = vmul.f32 %v11013_v8, %v3634_v28  ;;  %v4126_v29 = vmul.f32 %v11013_v8, %v3635_v37  ;;  %v4143_v22 = vmul.f32 %v11013_v8, %v3652_v2  ;;  %v4144_v63 = vmul.f32 %v11013_v8, %v3653_v56 }
 0x3b8   : > { %8315 = vrot.lane.b32.xlu0 %v8314_v10, %s8621_s13  ;;  %v4147_v17 = vmul.f32 %v11013_v8, %v3656_v55  ;;  %v4148_v32 = vmul.f32 %v11013_v8, %v3657_v60  ;;  %v4612_v53 = vadd.f32 %v11027_v58, %v4121_v23  ;;  %v4613_v46 = vadd.f32 %v11027_v58, %v4122_v57 }
 0x3b9   : > { %v4616_v12 = vadd.f32 %v11027_v58, %v4125_v15  ;;  %v4617_v20 = vadd.f32 %v11027_v58, %v4126_v29  ;;  %v4634_v52 = vadd.f32 %v11027_v58, %v4143_v22  ;;  %v4635_v16 = vadd.f32 %v11027_v58, %v4144_v63 }
 0x3ba   : > { %v4638_v62 = vadd.f32 %v11027_v58, %v4147_v17  ;;  %v4639_v39 = vadd.f32 %v11027_v58, %v4148_v32  ;;  %v5096_v26 = vmax.f32 %v4612_v53, 0.0  ;;  %v5097_v18 = vmax.f32 %v4613_v46, 0.0 }
 0x3bb   : > { %v5100_v25 = vmax.f32 %v4616_v12, 0.0  ;;  %v5101_v33 = vmax.f32 %v4617_v20, 0.0  ;;  %v5118_v19 = vmax.f32 %v4634_v52, 0.0  ;;  %v5119_v38 = vmax.f32 %v4635_v16, 0.0 }
 0x3bc   : > { %v5122_v7 = vmax.f32 %v4638_v62, 0.0  ;;  %v5123_v48 = vmax.f32 %v4639_v39, 0.0  ;;  %v3180_v49 = vsub.f32 %v2690_v13, %v9934_v9  ;;  %v3181_v3 = vsub.f32 %v2691_v35, %v9934_v9 }
 0x3bd   : > { %v3184_v51 = vsub.f32 %v2694_v30, %v9934_v9  ;;  %v3185_v28 = vsub.f32 %v2695_v42, %v9934_v9  ;;  %v5470_v37 = vmax.f32 %v5096_v26, %v5118_v19  ;;  %v5471_v2 = vmax.f32 %v5097_v18, %v5119_v38  ;;  %v2688_v19 = vld [vmem:[#allocation2 + $0x8a0] sm:$0xff] }
 0x3be   : > { %v5474_v10 = vmax.f32 %v5100_v25, %v5122_v7  ;;  %v5475_v56 = vmax.f32 %v5101_v33, %v5123_v48  ;;  %v3202_v55 = vsub.f32 %v2712_v59, %v9934_v9  ;;  %v3203_v60 = vsub.f32 %v2713_v21, %v9934_v9 }
 0x3bf   : > { %v3206_v23 = vsub.f32 %v2716_v50, %v9934_v9  ;;  %v3207_v57 = vsub.f32 %v2717_v45, %v9934_v9  ;;  %v11167_v15 = vmax.f32 %v5470_v37, %v5471_v2  ;;  %v3672_v22 = vmul.f32 %v10134_v27, %v3180_v49  ;;  %v2689_v45 = vld [vmem:[#allocation2 + $0x8a8] sm:$0xff]  ;;  %v2692_v49 = vld [vmem:[#allocation2 + $0x8c0] sm:$0xff] }
 0x3c0   : > { %v11169_v29 = vmax.f32 %v5474_v10, %v5475_v56  ;;  %v3673_v63 = vmul.f32 %v10134_v27, %v3181_v3  ;;  %v3676_v17 = vmul.f32 %v10134_v27, %v3184_v51  ;;  %v3677_v32 = vmul.f32 %v10134_v27, %v3185_v28  ;;  %v2693_v3 = vld [vmem:[#allocation2 + $0x8c8] sm:$0xff]  ;;  %v2710_v10 = vld [vmem:[#allocation2 + $0x958] sm:$0xff] }
 0x3c1   : > { %v3694_v53 = vmul.f32 %v10134_v27, %v3202_v55  ;;  %v3695_v46 = vmul.f32 %v10134_v27, %v3203_v60  ;;  %v3698_v20 = vmul.f32 %v10134_v27, %v3206_v23  ;;  %v3699_v13 = vmul.f32 %v10134_v27, %v3207_v57  ;;  %v2711_v23 = vld [vmem:[#allocation2 + $0x960] sm:$0xff]  ;;  %v2714_v57 = vld [vmem:[#allocation2 + $0x978] sm:$0xff] }
 0x3c2   : > { %v8324_v12 = vpack.i.bf16 %v11169_v29, %v11167_v15  ;;  %v4163_v52 = vmul.f32 %v11013_v8, %v3672_v22  ;;  %v4164_v16 = vmul.f32 %v11013_v8, %v3673_v63  ;;  %v4167_v62 = vmul.f32 %v11013_v8, %v3676_v17  ;;  %v2715_v22 = vld [vmem:[#allocation2 + $0x980] sm:$0xff] }
 0x3c3   : > { %v4168_v39 = vmul.f32 %v11013_v8, %v3677_v32  ;;  %v4185_v35 = vmul.f32 %v11013_v8, %v3694_v53  ;;  %v4186_v30 = vmul.f32 %v11013_v8, %v3695_v46  ;;  %v4189_v42 = vmul.f32 %v11013_v8, %v3698_v20 }
 0x3c4   : > { %8325 = vrot.lane.b32.xlu0 %v8324_v12, %s8620_s12  ;;  %v4190_v26 = vmul.f32 %v11013_v8, %v3699_v13  ;;  %v4654_v18 = vadd.f32 %v11027_v58, %v4163_v52  ;;  %v4655_v25 = vadd.f32 %v11027_v58, %v4164_v16  ;;  %v4658_v33 = vadd.f32 %v11027_v58, %v4167_v62 }
 0x3c5   : > { %v4659_v59 = vadd.f32 %v11027_v58, %v4168_v39  ;;  %v4676_v21 = vadd.f32 %v11027_v58, %v4185_v35  ;;  %v4677_v38 = vadd.f32 %v11027_v58, %v4186_v30  ;;  %v4680_v7 = vadd.f32 %v11027_v58, %v4189_v42 }
 0x3c6   : > { %v4681_v48 = vadd.f32 %v11027_v58, %v4190_v26  ;;  %v5138_v50 = vmax.f32 %v4654_v18, 0.0  ;;  %v5139_v51 = vmax.f32 %v4655_v25, 0.0  ;;  %v5142_v28 = vmax.f32 %v4658_v33, 0.0 }
 0x3c7   : > { %v5143_v37 = vmax.f32 %v4659_v59, 0.0  ;;  %v5160_v2 = vmax.f32 %v4676_v21, 0.0  ;;  %v5161_v56 = vmax.f32 %v4677_v38, 0.0  ;;  %v5164_v55 = vmax.f32 %v4680_v7, 0.0 }
 0x3c8   : > { %v5165_v60 = vmax.f32 %v4681_v48, 0.0  ;;  %v3178_v63 = vsub.f32 %v2688_v19, %v9934_v9  ;;  %v3179_v32 = vsub.f32 %v2689_v45, %v9934_v9  ;;  %v3182_v53 = vsub.f32 %v2692_v49, %v9934_v9 }
 0x3c9   : > { %v5490_v17 = vmax.f32 %v5138_v50, %v5160_v2  ;;  %v3183_v46 = vsub.f32 %v2693_v3, %v9934_v9  ;;  %v5491_v12 = vmax.f32 %v5139_v51, %v5161_v56  ;;  %v5494_v20 = vmax.f32 %v5142_v28, %v5164_v55 }
 0x3ca   : > { %v5495_v13 = vmax.f32 %v5143_v37, %v5165_v60  ;;  %v3200_v52 = vsub.f32 %v2710_v10, %v9934_v9  ;;  %v3201_v16 = vsub.f32 %v2711_v23, %v9934_v9  ;;  %v3204_v62 = vsub.f32 %v2714_v57, %v9934_v9  ;;  %v2656_v23 = vld [vmem:[#allocation2 + $0x790] sm:$0xff]  ;;  %v2657_v57 = vld [vmem:[#allocation2 + $0x798] sm:$0xff] }
 0x3cb   : > { %v3205_v39 = vsub.f32 %v2715_v22, %v9934_v9  ;;  %v3670_v35 = vmul.f32 %v10134_v27, %v3178_v63  ;;  %v11207_v30 = vmax.f32 %v5490_v17, %v5491_v12  ;;  %v3671_v26 = vmul.f32 %v10134_v27, %v3179_v32 }
 0x3cc   : > { %v11209_v42 = vmax.f32 %v5494_v20, %v5495_v13  ;;  %v3674_v18 = vmul.f32 %v10134_v27, %v3182_v53  ;;  %v3675_v25 = vmul.f32 %v10134_v27, %v3183_v46  ;;  %v3692_v33 = vmul.f32 %v10134_v27, %v3200_v52  ;;  %v2660_v53 = vld [vmem:[#allocation2 + $0x7b0] sm:$0xff]  ;;  %v2661_v46 = vld [vmem:[#allocation2 + $0x7b8] sm:$0xff] }
 0x3cd   : > { %v3693_v59 = vmul.f32 %v10134_v27, %v3201_v16  ;;  %v3696_v21 = vmul.f32 %v10134_v27, %v3204_v62  ;;  %v3697_v38 = vmul.f32 %v10134_v27, %v3205_v39  ;;  %v4161_v7 = vmul.f32 %v11013_v8, %v3670_v35  ;;  %v2678_v16 = vld [vmem:[#allocation2 + $0x848] sm:$0xff]  ;;  %v2679_v62 = vld [vmem:[#allocation2 + $0x850] sm:$0xff] }
 0x3ce   : > { %v8339_v19 = vpack.i.bf16 %v11209_v42, %v11207_v30  ;;  %v4162_v48 = vmul.f32 %v11013_v8, %v3671_v26  ;;  %v4165_v50 = vmul.f32 %v11013_v8, %v3674_v18  ;;  %v4166_v45 = vmul.f32 %v11013_v8, %v3675_v25  ;;  %v2682_v26 = vld [vmem:[#allocation2 + $0x868] sm:$0xff]  ;;  %v2683_v18 = vld [vmem:[#allocation2 + $0x870] sm:$0xff] }
 0x3cf   : > { %v4183_v49 = vmul.f32 %v11013_v8, %v3692_v33  ;;  %v4184_v3 = vmul.f32 %v11013_v8, %v3693_v59  ;;  %v4187_v51 = vmul.f32 %v11013_v8, %v3696_v21  ;;  %v4188_v28 = vmul.f32 %v11013_v8, %v3697_v38 }
 0x3d0   : > { %8340 = vrot.lane.b32.xlu1 %v8339_v19, %s8621_s13  ;;  %v4652_v37 = vadd.f32 %v11027_v58, %v4161_v7  ;;  %v4653_v2 = vadd.f32 %v11027_v58, %v4162_v48  ;;  %v4656_v10 = vadd.f32 %v11027_v58, %v4165_v50  ;;  %v4657_v56 = vadd.f32 %v11027_v58, %v4166_v45 }
 0x3d1   : > { %v4674_v55 = vadd.f32 %v11027_v58, %v4183_v49  ;;  %v4675_v60 = vadd.f32 %v11027_v58, %v4184_v3  ;;  %v4678_v22 = vadd.f32 %v11027_v58, %v4187_v51  ;;  %v4679_v63 = vadd.f32 %v11027_v58, %v4188_v28 }
 0x3d2   : > { %v5136_v17 = vmax.f32 %v4652_v37, 0.0  ;;  %v5137_v32 = vmax.f32 %v4653_v2, 0.0  ;;  %v5140_v12 = vmax.f32 %v4656_v10, 0.0  ;;  %v5141_v20 = vmax.f32 %v4657_v56, 0.0 }
 0x3d3   : > { %v5158_v13 = vmax.f32 %v4674_v55, 0.0  ;;  %v5159_v52 = vmax.f32 %v4675_v60, 0.0  ;;  %v5162_v39 = vmax.f32 %v4678_v22, 0.0  ;;  %v5163_v35 = vmax.f32 %v4679_v63, 0.0 }
 0x3d4   : > { %v3146_v25 = vsub.f32 %v2656_v23, %v9934_v9  ;;  %v3147_v33 = vsub.f32 %v2657_v57, %v9934_v9  ;;  %v3150_v19 = vsub.f32 %v2660_v53, %v9934_v9  ;;  %v3151_v38 = vsub.f32 %v2661_v46, %v9934_v9 }
 0x3d5   : > { %v5488_v59 = vmax.f32 %v5136_v17, %v5158_v13  ;;  %v5489_v21 = vmax.f32 %v5137_v32, %v5159_v52  ;;  %v5492_v7 = vmax.f32 %v5140_v12, %v5162_v39  ;;  %v5493_v48 = vmax.f32 %v5141_v20, %v5163_v35 }
 0x3d6   : > { %v3168_v50 = vsub.f32 %v2678_v16, %v9934_v9  ;;  %v3169_v45 = vsub.f32 %v2679_v62, %v9934_v9  ;;  %v3172_v3 = vsub.f32 %v2682_v26, %v9934_v9  ;;  %v3173_v51 = vsub.f32 %v2683_v18, %v9934_v9 }
 0x3d7   : > { %v11243_v49 = vmax.f32 %v5488_v59, %v5489_v21  ;;  %v3638_v28 = vmul.f32 %v10134_v27, %v3146_v25  ;;  %v11248_v37 = vmax.f32 %v5492_v7, %v5493_v48  ;;  %v3639_v2 = vmul.f32 %v10134_v27, %v3147_v33  ;;  %v2644_v25 = vld [vmem:[#allocation2 + $0x730] sm:$0xff]  ;;  %v2645_v33 = vld [vmem:[#allocation2 + $0x738] sm:$0xff]  ;;  %v2666_v59 = vld [vmem:[#allocation2 + $0x7e8] sm:$0xff] }
 0x3d8   : > { %v3642_v10 = vmul.f32 %v10134_v27, %v3150_v19  ;;  %v3643_v56 = vmul.f32 %v10134_v27, %v3151_v38  ;;  %v3660_v55 = vmul.f32 %v10134_v27, %v3168_v50  ;;  %v3661_v60 = vmul.f32 %v10134_v27, %v3169_v45  ;;  %v2667_v48 = vld [vmem:[#allocation2 + $0x7f0] sm:$0xff] }
 0x3d9   : > { %v3664_v23 = vmul.f32 %v10134_v27, %v3172_v3  ;;  %v3665_v57 = vmul.f32 %v10134_v27, %v3173_v51  ;;  %v8334_v22 = vpack.i.bf16 %v11243_v49, %v11248_v37  ;;  %v4129_v63 = vmul.f32 %v11013_v8, %v3638_v28 }
 0x3da   : > { %v4130_v17 = vmul.f32 %v11013_v8, %v3639_v2  ;;  %v4133_v32 = vmul.f32 %v11013_v8, %v3642_v10  ;;  %v4134_v53 = vmul.f32 %v11013_v8, %v3643_v56  ;;  %v4151_v46 = vmul.f32 %v11013_v8, %v3660_v55  ;;  %v2696_v55 = vld [vmem:[#allocation2 + $0x8e0] sm:$0xff] }
 0x3db   : > { %v4152_v12 = vmul.f32 %v11013_v8, %v3661_v60  ;;  %v4155_v20 = vmul.f32 %v11013_v8, %v3664_v23  ;;  %8335 = vrot.lane.b32.xlu0 %v8334_v22, %s8619_s11  ;;  %v4156_v13 = vmul.f32 %v11013_v8, %v3665_v57  ;;  %v4620_v52 = vadd.f32 %v11027_v58, %v4129_v63  ;;  %v2697_v60 = vld [vmem:[#allocation2 + $0x8e8] sm:$0xff] }
 0x3dc   : > { %v4621_v16 = vadd.f32 %v11027_v58, %v4130_v17  ;;  %v4624_v62 = vadd.f32 %v11027_v58, %v4133_v32  ;;  %v4625_v39 = vadd.f32 %v11027_v58, %v4134_v53  ;;  %v4642_v35 = vadd.f32 %v11027_v58, %v4151_v46 }
 0x3dd   : > { %v4643_v26 = vadd.f32 %v11027_v58, %v4152_v12  ;;  %v4646_v18 = vadd.f32 %v11027_v58, %v4155_v20  ;;  %v4647_v21 = vadd.f32 %v11027_v58, %v4156_v13  ;;  %v5104_v19 = vmax.f32 %v4620_v52, 0.0  ;;  %v2700_v12 = vld [vmem:[#allocation2 + $0x900] sm:$0xff]  ;;  %v2701_v20 = vld [vmem:[#allocation2 + $0x908] sm:$0xff]  ;;  %v2718_v13 = vld [vmem:[#allocation2 + $0x998] sm:$0xff] }
 0x3de   : > { %v5105_v38 = vmax.f32 %v4621_v16, 0.0  ;;  %v5108_v7 = vmax.f32 %v4624_v62, 0.0  ;;  %v5109_v50 = vmax.f32 %v4625_v39, 0.0  ;;  %v5126_v45 = vmax.f32 %v4642_v35, 0.0 }
 0x3df   : > { %v5127_v3 = vmax.f32 %v4643_v26, 0.0  ;;  %v5130_v51 = vmax.f32 %v4646_v18, 0.0  ;;  %v5131_v28 = vmax.f32 %v4647_v21, 0.0  ;;  %v3134_v2 = vsub.f32 %v2644_v25, %v9934_v9  ;;  %v2723_v21 = vld [vmem:[#allocation2 + $0x9c0] sm:$0xff] }
 0x3e0   : > { %v3135_v10 = vsub.f32 %v2645_v33, %v9934_v9  ;;  %v3156_v56 = vsub.f32 %v2666_v59, %v9934_v9  ;;  %v5478_v23 = vmax.f32 %v5104_v19, %v5126_v45  ;;  %v3157_v63 = vsub.f32 %v2667_v48, %v9934_v9  ;;  %v2719_v33 = vld [vmem:[#allocation2 + $0x9a0] sm:$0xff]  ;;  %v2722_v59 = vld [vmem:[#allocation2 + $0x9b8] sm:$0xff] }
 0x3e1   : > { %v5479_v57 = vmax.f32 %v5105_v38, %v5127_v3  ;;  %v5482_v22 = vmax.f32 %v5108_v7, %v5130_v51  ;;  %v5483_v17 = vmax.f32 %v5109_v50, %v5131_v28  ;;  %v3626_v32 = vmul.f32 %v10134_v27, %v3134_v2 }
 0x3e2   : > { %v3627_v53 = vmul.f32 %v10134_v27, %v3135_v10  ;;  %v3648_v46 = vmul.f32 %v10134_v27, %v3156_v56  ;;  %v3649_v16 = vmul.f32 %v10134_v27, %v3157_v63  ;;  %v3186_v62 = vsub.f32 %v2696_v55, %v9934_v9 }
 0x3e3   : > { %v11283_v52 = vmax.f32 %v5478_v23, %v5479_v57  ;;  %v3187_v39 = vsub.f32 %v2697_v60, %v9934_v9  ;;  %v11288_v35 = vmax.f32 %v5482_v22, %v5483_v17  ;;  %v4117_v26 = vmul.f32 %v11013_v8, %v3626_v32 }
 0x3e4   : > { %v4118_v18 = vmul.f32 %v11013_v8, %v3627_v53  ;;  %v4139_v25 = vmul.f32 %v11013_v8, %v3648_v46  ;;  %v4140_v19 = vmul.f32 %v11013_v8, %v3649_v16  ;;  %v3190_v38 = vsub.f32 %v2700_v12, %v9934_v9  ;;  %v8524_v53 = vld [vmem:[%s13587_s4 + $0x40] sm:$0xff]  }
 0x3e5   : > { %v3191_v7 = vsub.f32 %v2701_v20, %v9934_v9  ;;  %v3208_v48 = vsub.f32 %v2718_v13, %v9934_v9  ;;  %v8349_v50 = vpack.i.bf16 %v11288_v35, %v11283_v52  ;;  %v4608_v45 = vadd.f32 %v11027_v58, %v4117_v26  ;;  %v8525_v16 = vld [vmem:[%s13587_s4] sm:$0xff]   ;;  %7618 = vmatprep.subr.bf16.mxu0 %v8524_v53 }
 0x3e6   : > { %v4609_v3 = vadd.f32 %v11027_v58, %v4118_v18  ;;  %v4630_v51 = vadd.f32 %v11027_v58, %v4139_v25  ;;  %v4631_v28 = vadd.f32 %v11027_v58, %v4140_v19  ;;  %v3209_v2 = vsub.f32 %v2719_v33, %v9934_v9  ;;  %7619 = vmatpush3.bf16.msra.mxu0 %v8525_v16 }
 0x3e7   : > { %v3212_v10 = vsub.f32 %v2722_v59, %v9934_v9  ;;  %v3213_v56 = vsub.f32 %v2723_v21, %v9934_v9  ;;  %8350 = vrot.lane.b32.xlu1 %v8349_v50, %s8620_s12  ;;  %v5092_v55 = vmax.f32 %v4608_v45, 0.0  ;;  %v3678_v57 = vmul.f32 %v10134_v27, %v3186_v62 }
 0x3e8   : > { %v5093_v60 = vmax.f32 %v4609_v3, 0.0  ;;  %v5114_v23 = vmax.f32 %v4630_v51, 0.0  ;;  %v5115_v22 = vmax.f32 %v4631_v28, 0.0  ;;  %v3679_v63 = vmul.f32 %v10134_v27, %v3187_v39 }
 0x3e9   : > { %v3682_v17 = vmul.f32 %v10134_v27, %v3190_v38  ;;  %v3683_v32 = vmul.f32 %v10134_v27, %v3191_v7  ;;  %v3700_v12 = vmul.f32 %v10134_v27, %v3208_v48  ;;  %v3701_v20 = vmul.f32 %v10134_v27, %v3209_v2 }
 0x3ea   : > { %v5466_v46 = vmax.f32 %v5092_v55, %v5114_v23  ;;  %v3704_v13 = vmul.f32 %v10134_v27, %v3212_v10  ;;  %v5467_v62 = vmax.f32 %v5093_v60, %v5115_v22  ;;  %v3705_v39 = vmul.f32 %v10134_v27, %v3213_v56  ;;  %v2698_v55 = vld [vmem:[#allocation2 + $0x8f0] sm:$0xff]  ;;  %v2699_v60 = vld [vmem:[#allocation2 + $0x8f8] sm:$0xff] }
 0x3eb   : > { %v4169_v26 = vmul.f32 %v11013_v8, %v3678_v57  ;;  %v4170_v18 = vmul.f32 %v11013_v8, %v3679_v63  ;;  %v4173_v25 = vmul.f32 %v11013_v8, %v3682_v17  ;;  %v4174_v33 = vmul.f32 %v11013_v8, %v3683_v32  ;;  %v2702_v17 = vld [vmem:[#allocation2 + $0x910] sm:$0xff]  ;;  %v2703_v32 = vld [vmem:[#allocation2 + $0x918] sm:$0xff] }
 0x3ec   : > { %v4191_v59 = vmul.f32 %v11013_v8, %v3700_v12  ;;  %v4192_v21 = vmul.f32 %v11013_v8, %v3701_v20  ;;  %v5653_v19 = vmax.f32 %v5466_v46, %v5467_v62  ;;  %v4195_v38 = vmul.f32 %v11013_v8, %v3704_v13  ;;  %v2720_v20 = vld [vmem:[#allocation2 + $0x9a8] sm:$0xff]  ;;  %v2721_v13 = vld [vmem:[#allocation2 + $0x9b0] sm:$0xff] }
 0x3ed   : > { %v4196_v7 = vmul.f32 %v11013_v8, %v3705_v39  ;;  %v4660_v48 = vadd.f32 %v11027_v58, %v4169_v26  ;;  %v4661_v50 = vadd.f32 %v11027_v58, %v4170_v18  ;;  %v4664_v45 = vadd.f32 %v11027_v58, %v4173_v25  ;;  %v2724_v39 = vld [vmem:[#allocation2 + $0x9c8] sm:$0xff]  ;;  %v2725_v26 = vld [vmem:[#allocation2 + $0x9d0] sm:$0xff] }
 0x3ee   : > { %v4665_v3 = vadd.f32 %v11027_v58, %v4174_v33  ;;  %v4682_v51 = vadd.f32 %v11027_v58, %v4191_v59  ;;  %v8344_v28 = vpack.i.bf16 %v11167_v15, %v5653_v19  ;;  %v4683_v2 = vadd.f32 %v11027_v58, %v4192_v21 }
 0x3ef   : > { %v4686_v10 = vadd.f32 %v11027_v58, %v4195_v38  ;;  %v4687_v56 = vadd.f32 %v11027_v58, %v4196_v7  ;;  %v5144_v23 = vmax.f32 %v4660_v48, 0.0  ;;  %v5145_v57 = vmax.f32 %v4661_v50, 0.0 }
 0x3f0   : > { %v5148_v22 = vmax.f32 %v4664_v45, 0.0  ;;  %v5149_v63 = vmax.f32 %v4665_v3, 0.0  ;;  %8345 = vrot.lane.b32.xlu0 %v8344_v28, %s8621_s13  ;;  %v5166_v53 = vmax.f32 %v4682_v51, 0.0  ;;  %v5167_v46 = vmax.f32 %v4683_v2, 0.0  ;;  %v8526_v45 = vld [vmem:[%s13587_s4 + $0x48] sm:$0xff]  }
 0x3f1   : > { %v5170_v12 = vmax.f32 %v4686_v10, 0.0  ;;  %v5171_v15 = vmax.f32 %v4687_v56, 0.0  ;;  %v8354_v16 = vpack.i.bf16 %v11126_v34, %v10957_v44  ;;  %v8369_v62 = vpack.i.bf16 %v11283_v52, %v11169_v29  ;;  %v8527_v10 = vld [vmem:[%s13587_s4 + $0x8] sm:$0xff]   ;;  %7620 = vmatprep.subr.bf16.mxu0 %v8526_v45 }
 0x3f2   : > { %v3188_v18 = vsub.f32 %v2698_v55, %v9934_v9  ;;  %v3189_v25 = vsub.f32 %v2699_v60, %v9934_v9  ;;  %v5496_v33 = vmax.f32 %v5144_v23, %v5166_v53  ;;  %v5497_v59 = vmax.f32 %v5145_v57, %v5167_v46  ;;  %7621 = vmatpush3.bf16.msra.mxu0 %v8527_v10  ;;  %v2758_v10 = vld [vmem:[#allocation2 + $0xae8] sm:$0xff] }
 0x3f3   : > { %v5500_v21 = vmax.f32 %v5148_v22, %v5170_v12  ;;  %v5501_v19 = vmax.f32 %v5149_v63, %v5171_v15  ;;  %v3192_v38 = vsub.f32 %v2702_v17, %v9934_v9  ;;  %v3193_v7 = vsub.f32 %v2703_v32, %v9934_v9 }
 0x3f4   : > { %v3210_v48 = vsub.f32 %v2720_v20, %v9934_v9  ;;  %v3211_v44 = vsub.f32 %v2721_v13, %v9934_v9  ;;  %v11349_v34 = vmax.f32 %v5496_v33, %v5497_v59  ;;  %8355 = vrot.lane.b32.xlu0 %v8354_v16, %s8620_s12  ;;  %v3214_v52 = vsub.f32 %v2724_v39, %v9934_v9  ;;  %v2664_v33 = vld [vmem:[#allocation2 + $0x7d0] sm:$0xff]  ;;  %v2665_v59 = vld [vmem:[#allocation2 + $0x7d8] sm:$0xff] }
 0x3f5   : > { %v11351_v29 = vmax.f32 %v5500_v21, %v5501_v19  ;;  %v3215_v50 = vsub.f32 %v2725_v26, %v9934_v9  ;;  %v3680_v3 = vmul.f32 %v10134_v27, %v3188_v18  ;;  %v3681_v51 = vmul.f32 %v10134_v27, %v3189_v25 }
 0x3f6   : > { %v3684_v28 = vmul.f32 %v10134_v27, %v3192_v38  ;;  %v3685_v2 = vmul.f32 %v10134_v27, %v3193_v7  ;;  %v3702_v55 = vmul.f32 %v10134_v27, %v3210_v48  ;;  %v3703_v60 = vmul.f32 %v10134_v27, %v3211_v44  ;;  %v2686_v7 = vld [vmem:[#allocation2 + $0x888] sm:$0xff]  ;;  %v2687_v48 = vld [vmem:[#allocation2 + $0x890] sm:$0xff] }
 0x3f7   : > { %v8359_v56 = vpack.i.bf16 %v11351_v29, %v11349_v34  ;;  %v3706_v23 = vmul.f32 %v10134_v27, %v3214_v52  ;;  %v3707_v57 = vmul.f32 %v10134_v27, %v3215_v50  ;;  %v4171_v22 = vmul.f32 %v11013_v8, %v3680_v3  ;;  %v2736_v3 = vld [vmem:[#allocation2 + $0xa30] sm:$0xff] }
 0x3f8   : > { %v4172_v63 = vmul.f32 %v11013_v8, %v3681_v51  ;;  %v4175_v17 = vmul.f32 %v11013_v8, %v3684_v28  ;;  %v4176_v32 = vmul.f32 %v11013_v8, %v3685_v2  ;;  %v4193_v53 = vmul.f32 %v11013_v8, %v3702_v55  ;;  %v2737_v51 = vld [vmem:[#allocation2 + $0xa38] sm:$0xff] }
 0x3f9   : > { %8360 = vrot.lane.b32.xlu1 %v8359_v56, %s8619_s11  ;;  %v4194_v46 = vmul.f32 %v11013_v8, %v3703_v60  ;;  %v4197_v12 = vmul.f32 %v11013_v8, %v3706_v23  ;;  %v4198_v15 = vmul.f32 %v11013_v8, %v3707_v57  ;;  %v4662_v20 = vadd.f32 %v11027_v58, %v4171_v22  ;;  %v2759_v56 = vld [vmem:[#allocation2 + $0xaf0] sm:$0xff] }
 0x3fa   : > { %v4663_v13 = vadd.f32 %v11027_v58, %v4172_v63  ;;  %v4666_v16 = vadd.f32 %v11027_v58, %v4175_v17  ;;  %v4667_v39 = vadd.f32 %v11027_v58, %v4176_v32  ;;  %v4684_v26 = vadd.f32 %v11027_v58, %v4193_v53 }
 0x3fb   : > { %v4685_v18 = vadd.f32 %v11027_v58, %v4194_v46  ;;  %v4688_v25 = vadd.f32 %v11027_v58, %v4197_v12  ;;  %v4689_v21 = vadd.f32 %v11027_v58, %v4198_v15  ;;  %v5146_v19 = vmax.f32 %v4662_v20, 0.0  ;;  %v8528_v12 = vld [vmem:[%s13587_s4 + $0x50] sm:$0xff]  }
 0x3fc   : > { %v5147_v8 = vmax.f32 %v4663_v13, 0.0  ;;  %v5150_v38 = vmax.f32 %v4666_v16, 0.0  ;;  %v5151_v44 = vmax.f32 %v4667_v39, 0.0  ;;  %v5168_v52 = vmax.f32 %v4684_v26, 0.0  ;;  %v8529_v39 = vld [vmem:[%s13587_s4 + $0x10] sm:$0xff]   ;;  %7622 = vmatprep.subr.bf16.mxu0 %v8528_v12 }
 0x3fd   : > { %8370 = vrot.lane.b32.xlu1 %v8369_v62, %s8621_s13  ;;  %v5169_v50 = vmax.f32 %v4685_v18, 0.0  ;;  %v5172_v45 = vmax.f32 %v4688_v25, 0.0  ;;  %v5173_v28 = vmax.f32 %v4689_v21, 0.0  ;;  %v8379_v2 = vpack.i.bf16 %v11207_v30, %v11128_v40  ;;  %v11424_v21 = vld [vmem:[%s13585_s2] ss:$0 sm:$0xff]  ;;  %7623 = vmatpush3.bf16.msra.mxu0 %v8529_v39 }
 0x3fe   : > { %v3154_v58 = vsub.f32 %v2664_v33, %v9934_v9  ;;  %v3155_v55 = vsub.f32 %v2665_v59, %v9934_v9  ;;  %v5498_v60 = vmax.f32 %v5146_v19, %v5168_v52  ;;  %v3176_v62 = vsub.f32 %v2686_v7, %v9934_v9 }
 0x3ff   : > { %v5499_v23 = vmax.f32 %v5147_v8, %v5169_v50  ;;  %v5502_v57 = vmax.f32 %v5150_v38, %v5172_v45  ;;  %v5503_v22 = vmax.f32 %v5151_v44, %v5173_v28  ;;  %v3177_v63 = vsub.f32 %v2687_v48, %v9934_v9  ;;  %v11438_v45 = vld [vmem:[%s13586_s3] ss:$0 sm:$0xff] }
 0x400   : > { %v3226_v17 = vsub.f32 %v2736_v3, %v9934_v9  ;;  %v3227_v32 = vsub.f32 %v2737_v51, %v9934_v9  ;;  %v3248_v40 = vsub.f32 %v2758_v10, %v9934_v9  ;;  %v3249_v30 = vsub.f32 %v2759_v56, %v9934_v9 }
 0x401   : > { %v11398_v53 = vmax.f32 %v5498_v60, %v5499_v23  ;;  %8380 = vrot.lane.b32.xlu1 %v8379_v2, %s8620_s12  ;;  %v3646_v46 = vmul.f32 %v10134_v27, %v3154_v58  ;;  %v11407_v15 = vmax.f32 %v5502_v57, %v5503_v22  ;;  %v3647_v20 = vmul.f32 %v10134_v27, %v3155_v55  ;;  %v2620_v55 = vld [vmem:[#allocation2 + $0x660] sm:$0xff]  ;;  %v2621_v60 = vld [vmem:[#allocation2 + $0x668] sm:$0xff] }
 0x402   : > { %v3668_v13 = vmul.f32 %v10134_v27, %v3176_v62  ;;  %v3669_v16 = vmul.f32 %v10134_v27, %v3177_v63  ;;  %v3718_v26 = vmul.f32 %v10134_v27, %v3226_v17  ;;  %v3719_v18 = vmul.f32 %v10134_v27, %v3227_v32  ;;  %v2642_v63 = vld [vmem:[#allocation2 + $0x718] sm:$0xff]  ;;  %v2643_v17 = vld [vmem:[#allocation2 + $0x720] sm:$0xff] }
 0x403   : > { %v3740_v25 = vmul.f32 %v10134_v27, %v3248_v40  ;;  %v3741_v33 = vmul.f32 %v10134_v27, %v3249_v30  ;;  %v8364_v59 = vpack.i.bf16 %v11407_v15, %v11398_v53  ;;  %v4137_v19 = vmul.f32 %v11424_v21, %v3646_v46  ;;  %v2780_v32 = vld [vmem:[#allocation2 + $0xba0] sm:$0xff] }
 0x404   : > { %v4138_v8 = vmul.f32 %v11424_v21, %v3647_v20  ;;  %v4159_v38 = vmul.f32 %v11424_v21, %v3668_v13  ;;  %v4160_v7 = vmul.f32 %v11424_v21, %v3669_v16  ;;  %v4209_v48 = vmul.f32 %v11424_v21, %v3718_v26  ;;  %v2781_v20 = vld [vmem:[#allocation2 + $0xba8] sm:$0xff]  ;;  %v2802_v13 = vld [vmem:[#allocation2 + $0xc58] sm:$0xff]  ;;  %v2803_v26 = vld [vmem:[#allocation2 + $0xc60] sm:$0xff] }
 0x405   : > { %v4210_v44 = vmul.f32 %v11424_v21, %v3719_v18  ;;  %v4231_v52 = vmul.f32 %v11424_v21, %v3740_v25  ;;  %8365 = vrot.lane.b32.xlu0 %v8364_v59, %s8621_s13  ;;  %v4232_v50 = vmul.f32 %v11424_v21, %v3741_v33  ;;  %v4628_v3 = vadd.f32 %v11438_v45, %v4137_v19 }
 0x406   : > { %v4629_v51 = vadd.f32 %v11438_v45, %v4138_v8  ;;  %v4650_v28 = vadd.f32 %v11438_v45, %v4159_v38  ;;  %v4651_v2 = vadd.f32 %v11438_v45, %v4160_v7  ;;  %v4700_v10 = vadd.f32 %v11438_v45, %v4209_v48 }
 0x407   : > { %v4701_v56 = vadd.f32 %v11438_v45, %v4210_v44  ;;  %v4722_v58 = vadd.f32 %v11438_v45, %v4231_v52  ;;  %v4723_v23 = vadd.f32 %v11438_v45, %v4232_v50  ;;  %v5112_v57 = vmax.f32 %v4628_v3, 0.0 }
 0x408   : > { %v5113_v62 = vmax.f32 %v4629_v51, 0.0  ;;  %v5134_v22 = vmax.f32 %v4650_v28, 0.0  ;;  %v5135_v40 = vmax.f32 %v4651_v2, 0.0  ;;  %v5184_v30 = vmax.f32 %v4700_v10, 0.0  ;;  %v8530_v28 = vld [vmem:[%s13587_s4 + $0x58] sm:$0xff]  }
 0x409   : > { %v5185_v46 = vmax.f32 %v4701_v56, 0.0  ;;  %v5206_v12 = vmax.f32 %v4722_v58, 0.0  ;;  %v5207_v16 = vmax.f32 %v4723_v23, 0.0  ;;  %v3110_v18 = vsub.f32 %v2620_v55, %v9934_v9  ;;  %v8531_v55 = vld [vmem:[%s13587_s4 + $0x18] sm:$0xff]   ;;  %7624 = vmatprep.subr.bf16.mxu0 %v8530_v28 }
 0x40a   : > { %v5486_v39 = vmax.f32 %v5112_v57, %v5134_v22  ;;  %v3111_v25 = vsub.f32 %v2621_v60, %v9934_v9  ;;  %v5487_v33 = vmax.f32 %v5113_v62, %v5135_v40  ;;  %v3132_v19 = vsub.f32 %v2642_v63, %v9934_v9  ;;  %7625 = vmatpush3.bf16.msra.mxu0 %v8531_v55 }
 0x40b   : > { %v5514_v59 = vmax.f32 %v5184_v30, %v5206_v12  ;;  %v3133_v8 = vsub.f32 %v2643_v17, %v9934_v9  ;;  %v5515_v38 = vmax.f32 %v5185_v46, %v5207_v16  ;;  %v3270_v7 = vsub.f32 %v2780_v32, %v9934_v9 }
 0x40c   : > { %v3271_v48 = vsub.f32 %v2781_v20, %v9934_v9  ;;  %v3292_v44 = vsub.f32 %v2802_v13, %v9934_v9  ;;  %v5663_v52 = vmax.f32 %v5486_v39, %v5487_v33  ;;  %v3293_v50 = vsub.f32 %v2803_v26, %v9934_v9 }
 0x40d   : > { %v3602_v3 = vmul.f32 %v10134_v27, %v3110_v18  ;;  %v3603_v51 = vmul.f32 %v10134_v27, %v3111_v25  ;;  %v11461_v2 = vmax.f32 %v5514_v59, %v5515_v38  ;;  %v3624_v10 = vmul.f32 %v10134_v27, %v3132_v19  ;;  %v2704_v59 = vld [vmem:[#allocation2 + $0x920] sm:$0xff]  ;;  %v2705_v19 = vld [vmem:[#allocation2 + $0x928] sm:$0xff] }
 0x40e   : > { %v3625_v56 = vmul.f32 %v10134_v27, %v3133_v8  ;;  %v3762_v58 = vmul.f32 %v10134_v27, %v3270_v7  ;;  %v3763_v60 = vmul.f32 %v10134_v27, %v3271_v48  ;;  %v3784_v23 = vmul.f32 %v10134_v27, %v3292_v44  ;;  %v2726_v8 = vld [vmem:[#allocation2 + $0x9d8] sm:$0xff] }
 0x40f   : > { %v3785_v57 = vmul.f32 %v10134_v27, %v3293_v50  ;;  %v4093_v62 = vmul.f32 %v11424_v21, %v3602_v3  ;;  %v8374_v22 = vpack.i.bf16 %v11461_v2, %v5663_v52  ;;  %v4094_v63 = vmul.f32 %v11424_v21, %v3603_v51  ;;  %v2727_v52 = vld [vmem:[#allocation2 + $0x9e0] sm:$0xff] }
 0x410   : > { %v4115_v17 = vmul.f32 %v11424_v21, %v3624_v10  ;;  %v4116_v32 = vmul.f32 %v11424_v21, %v3625_v56  ;;  %v4253_v40 = vmul.f32 %v11424_v21, %v3762_v58  ;;  %v4254_v30 = vmul.f32 %v11424_v21, %v3763_v60  ;;  %v2776_v50 = vld [vmem:[#allocation2 + $0xb80] sm:$0xff]  ;;  %v2777_v56 = vld [vmem:[#allocation2 + $0xb88] sm:$0xff]  ;;  %v2798_v58 = vld [vmem:[#allocation2 + $0xc38] sm:$0xff] }
 0x411   : > { %v4275_v46 = vmul.f32 %v11424_v21, %v3784_v23  ;;  %v4276_v12 = vmul.f32 %v11424_v21, %v3785_v57  ;;  %8375 = vrot.lane.b32.xlu0 %v8374_v22, %s8620_s12  ;;  %v4584_v20 = vadd.f32 %v11438_v45, %v4093_v62  ;;  %v4585_v13 = vadd.f32 %v11438_v45, %v4094_v63  ;;  %v2799_v23 = vld [vmem:[#allocation2 + $0xc40] sm:$0xff] }
 0x412   : > { %v4606_v16 = vadd.f32 %v11438_v45, %v4115_v17  ;;  %v4607_v39 = vadd.f32 %v11438_v45, %v4116_v32  ;;  %v4744_v26 = vadd.f32 %v11438_v45, %v4253_v40  ;;  %v4745_v18 = vadd.f32 %v11438_v45, %v4254_v30 }
 0x413   : > { %v4766_v25 = vadd.f32 %v11438_v45, %v4275_v46  ;;  %v4767_v33 = vadd.f32 %v11438_v45, %v4276_v12  ;;  %v5068_v38 = vmax.f32 %v4584_v20, 0.0  ;;  %v5069_v7 = vmax.f32 %v4585_v13, 0.0 }
 0x414   : > { %v5090_v48 = vmax.f32 %v4606_v16, 0.0  ;;  %v5091_v44 = vmax.f32 %v4607_v39, 0.0  ;;  %v5228_v3 = vmax.f32 %v4744_v26, 0.0  ;;  %v5229_v51 = vmax.f32 %v4745_v18, 0.0 }
 0x415   : > { %v5250_v28 = vmax.f32 %v4766_v25, 0.0  ;;  %v5251_v10 = vmax.f32 %v4767_v33, 0.0  ;;  %v3194_v57 = vsub.f32 %v2704_v59, %v9934_v9  ;;  %v3195_v62 = vsub.f32 %v2705_v19, %v9934_v9 }
 0x416   : > { %v5464_v55 = vmax.f32 %v5068_v38, %v5090_v48  ;;  %v5465_v60 = vmax.f32 %v5069_v7, %v5091_v44  ;;  %v3216_v17 = vsub.f32 %v2726_v8, %v9934_v9  ;;  %v3217_v32 = vsub.f32 %v2727_v52, %v9934_v9 }
 0x417   : > { %v5536_v22 = vmax.f32 %v5228_v3, %v5250_v28  ;;  %v5537_v63 = vmax.f32 %v5229_v51, %v5251_v10  ;;  %v3266_v30 = vsub.f32 %v2776_v50, %v9934_v9  ;;  %v3267_v46 = vsub.f32 %v2777_v56, %v9934_v9 }
 0x418   : > { %v11494_v40 = vmax.f32 %v5464_v55, %v5465_v60  ;;  %v3288_v12 = vsub.f32 %v2798_v58, %v9934_v9  ;;  %v3289_v13 = vsub.f32 %v2799_v23, %v9934_v9  ;;  %v3686_v16 = vmul.f32 %v10134_v27, %v3194_v57  ;;  %v2732_v60 = vld [vmem:[#allocation2 + $0xa10] sm:$0xff] }
 0x419   : > { %v11499_v20 = vmax.f32 %v5536_v22, %v5537_v63  ;;  %v3687_v39 = vmul.f32 %v10134_v27, %v3195_v62  ;;  %v3708_v26 = vmul.f32 %v10134_v27, %v3216_v17  ;;  %v3709_v18 = vmul.f32 %v10134_v27, %v3217_v32  ;;  %v2733_v63 = vld [vmem:[#allocation2 + $0xa18] sm:$0xff]  ;;  %v2754_v17 = vld [vmem:[#allocation2 + $0xac8] sm:$0xff] }
 0x41a   : > { %v3758_v25 = vmul.f32 %v10134_v27, %v3266_v30  ;;  %v3759_v33 = vmul.f32 %v10134_v27, %v3267_v46  ;;  %v3780_v19 = vmul.f32 %v10134_v27, %v3288_v12  ;;  %v3781_v8 = vmul.f32 %v10134_v27, %v3289_v13  ;;  %v2755_v13 = vld [vmem:[#allocation2 + $0xad0] sm:$0xff] }
 0x41b   : > { %13781 = vst [vmem:[#allocation27_spill] sm:$0xff] %v11499_v20  ;;  %v8389_v59 = vpack.i.bf16 %v11499_v20, %v11494_v40  ;;  %v4177_v38 = vmul.f32 %v11424_v21, %v3686_v16  ;;  %v4178_v7 = vmul.f32 %v11424_v21, %v3687_v39  ;;  %v4199_v48 = vmul.f32 %v11424_v21, %v3708_v26 }
 0x41c   : > { %v4200_v44 = vmul.f32 %v11424_v21, %v3709_v18  ;;  %v4249_v52 = vmul.f32 %v11424_v21, %v3758_v25  ;;  %v4250_v50 = vmul.f32 %v11424_v21, %v3759_v33  ;;  %v4271_v3 = vmul.f32 %v11424_v21, %v3780_v19  ;;  %v2706_v25 = vld [vmem:[#allocation2 + $0x930] sm:$0xff] }
 0x41d   : > { %8390 = vrot.lane.b32.xlu1 %v8389_v59, %s8619_s11  ;;  %v4272_v51 = vmul.f32 %v11424_v21, %v3781_v8  ;;  %v4668_v28 = vadd.f32 %v11438_v45, %v4177_v38  ;;  %v4669_v10 = vadd.f32 %v11438_v45, %v4178_v7  ;;  %v4690_v56 = vadd.f32 %v11438_v45, %v4199_v48  ;;  %v2707_v38 = vld [vmem:[#allocation2 + $0x938] sm:$0xff] }
 0x41e   : > { %v4691_v58 = vadd.f32 %v11438_v45, %v4200_v44  ;;  %v4740_v55 = vadd.f32 %v11438_v45, %v4249_v52  ;;  %v4741_v23 = vadd.f32 %v11438_v45, %v4250_v50  ;;  %v4762_v57 = vadd.f32 %v11438_v45, %v4271_v3  ;;  %v2728_v50 = vld [vmem:[#allocation2 + $0x9e8] sm:$0xff]  ;;  %v2729_v3 = vld [vmem:[#allocation2 + $0x9f0] sm:$0xff] }
 0x41f   : > { %v4763_v62 = vadd.f32 %v11438_v45, %v4272_v51  ;;  %v5152_v22 = vmax.f32 %v4668_v28, 0.0  ;;  %v5153_v32 = vmax.f32 %v4669_v10, 0.0  ;;  %v5174_v30 = vmax.f32 %v4690_v56, 0.0  ;;  %v2778_v56 = vld [vmem:[#allocation2 + $0xb90] sm:$0xff] }
 0x420   : > { %v5175_v46 = vmax.f32 %v4691_v58, 0.0  ;;  %v5224_v12 = vmax.f32 %v4740_v55, 0.0  ;;  %v5225_v16 = vmax.f32 %v4741_v23, 0.0  ;;  %v5246_v39 = vmax.f32 %v4762_v57, 0.0  ;;  %v2779_v57 = vld [vmem:[#allocation2 + $0xb98] sm:$0xff] }
 0x421   : > { %v5247_v26 = vmax.f32 %v4763_v62, 0.0  ;;  %v3222_v18 = vsub.f32 %v2732_v60, %v9934_v9  ;;  %v5504_v33 = vmax.f32 %v5152_v22, %v5174_v30  ;;  %v3223_v19 = vsub.f32 %v2733_v63, %v9934_v9  ;;  %v2800_v62 = vld [vmem:[#allocation2 + $0xc48] sm:$0xff]  ;;  %v8532_v63 = vld [vmem:[%s13587_s4 + $0x60] sm:$0xff]   ;;  %v2801_v30 = vld [vmem:[#allocation2 + $0xc50] sm:$0xff] }
 0x422   : > { %v5505_v59 = vmax.f32 %v5153_v32, %v5175_v46  ;;  %v3244_v8 = vsub.f32 %v2754_v17, %v9934_v9  ;;  %v5532_v7 = vmax.f32 %v5224_v12, %v5246_v39  ;;  %v3245_v44 = vsub.f32 %v2755_v13, %v9934_v9  ;;  %v8533_v13 = vld [vmem:[%s13587_s4 + $0x20] sm:$0xff]   ;;  %7626 = vmatprep.subr.bf16.mxu0 %v8532_v63 }
 0x423   : > { %v5533_v48 = vmax.f32 %v5225_v16, %v5247_v26  ;;  %v3714_v52 = vmul.f32 %v10134_v27, %v3222_v18  ;;  %v3715_v28 = vmul.f32 %v10134_v27, %v3223_v19  ;;  %v3196_v58 = vsub.f32 %v2706_v25, %v9934_v9  ;;  %7627 = vmatpush3.bf16.msra.mxu0 %v8533_v13 }
 0x424   : > { %v11534_v51 = vmax.f32 %v5504_v33, %v5505_v59  ;;  %v3736_v10 = vmul.f32 %v10134_v27, %v3244_v8  ;;  %v3737_v60 = vmul.f32 %v10134_v27, %v3245_v44  ;;  %v3197_v22 = vsub.f32 %v2707_v38, %v9934_v9 }
 0x425   : > { %v11539_v55 = vmax.f32 %v5532_v7, %v5533_v48  ;;  %v4205_v23 = vmul.f32 %v11424_v21, %v3714_v52  ;;  %v4206_v17 = vmul.f32 %v11424_v21, %v3715_v28  ;;  %v3218_v46 = vsub.f32 %v2728_v50, %v9934_v9 }
 0x426   : > { %v4227_v32 = vmul.f32 %v11424_v21, %v3736_v10  ;;  %v3219_v12 = vsub.f32 %v2729_v3, %v9934_v9  ;;  %v4228_v39 = vmul.f32 %v11424_v21, %v3737_v60  ;;  %v3268_v18 = vsub.f32 %v2778_v56, %v9934_v9 }
 0x427   : > { %13782 = vst [vmem:[#allocation28_spill] sm:$0xff] %v11539_v55  ;;  %v8384_v16 = vpack.i.bf16 %v11539_v55, %v11534_v51  ;;  %v4696_v26 = vadd.f32 %v11438_v45, %v4205_v23  ;;  %v4697_v25 = vadd.f32 %v11438_v45, %v4206_v17  ;;  %v3269_v59 = vsub.f32 %v2779_v57, %v9934_v9 }
 0x428   : > { %v4718_v33 = vadd.f32 %v11438_v45, %v4227_v32  ;;  %v3290_v19 = vsub.f32 %v2800_v62, %v9934_v9  ;;  %v4719_v8 = vadd.f32 %v11438_v45, %v4228_v39  ;;  %v3291_v7 = vsub.f32 %v2801_v30, %v9934_v9 }
 0x429   : > { %8385 = vrot.lane.b32.xlu0 %v8384_v16, %s8619_s11  ;;  %v5180_v38 = vmax.f32 %v4696_v26, 0.0  ;;  %v3688_v48 = vmul.f32 %v10134_v27, %v3196_v58  ;;  %v5181_v44 = vmax.f32 %v4697_v25, 0.0  ;;  %v3689_v50 = vmul.f32 %v10134_v27, %v3197_v22 }
 0x42a   : > { %v5202_v52 = vmax.f32 %v4718_v33, 0.0  ;;  %v3710_v3 = vmul.f32 %v10134_v27, %v3218_v46  ;;  %v5203_v28 = vmax.f32 %v4719_v8, 0.0  ;;  %v3711_v10 = vmul.f32 %v10134_v27, %v3219_v12  ;;  %v2740_v8 = vld [vmem:[#allocation2 + $0xa50] sm:$0xff] }
 0x42b   : > { %v3760_v56 = vmul.f32 %v10134_v27, %v3268_v18  ;;  %v3761_v60 = vmul.f32 %v10134_v27, %v3269_v59  ;;  %v3782_v57 = vmul.f32 %v10134_v27, %v3290_v19  ;;  %v3783_v62 = vmul.f32 %v10134_v27, %v3291_v7 }
 0x42c   : > { %v5510_v23 = vmax.f32 %v5180_v38, %v5202_v52  ;;  %v4179_v58 = vmul.f32 %v11424_v21, %v3688_v48  ;;  %v5511_v63 = vmax.f32 %v5181_v44, %v5203_v28  ;;  %v4180_v17 = vmul.f32 %v11424_v21, %v3689_v50  ;;  %v2741_v52 = vld [vmem:[#allocation2 + $0xa58] sm:$0xff]  ;;  %v2744_v50 = vld [vmem:[#allocation2 + $0xa70] sm:$0xff] }
 0x42d   : > { %v4201_v22 = vmul.f32 %v11424_v21, %v3710_v3  ;;  %v4202_v32 = vmul.f32 %v11424_v21, %v3711_v10  ;;  %v4251_v30 = vmul.f32 %v11424_v21, %v3760_v56  ;;  %v4252_v46 = vmul.f32 %v11424_v21, %v3761_v60  ;;  %v2745_v60 = vld [vmem:[#allocation2 + $0xa78] sm:$0xff] }
 0x42e   : > { %v4273_v12 = vmul.f32 %v11424_v21, %v3782_v57  ;;  %v4274_v13 = vmul.f32 %v11424_v21, %v3783_v62  ;;  %v5675_v16 = vmax.f32 %v5510_v23, %v5511_v63  ;;  %v4670_v39 = vadd.f32 %v11438_v45, %v4179_v58  ;;  %v2762_v23 = vld [vmem:[#allocation2 + $0xb08] sm:$0xff] }
 0x42f   : > { %v4671_v26 = vadd.f32 %v11438_v45, %v4180_v17  ;;  %v4692_v18 = vadd.f32 %v11438_v45, %v4201_v22  ;;  %v4693_v25 = vadd.f32 %v11438_v45, %v4202_v32  ;;  %v4742_v33 = vadd.f32 %v11438_v45, %v4251_v30  ;;  %v2766_v63 = vld [vmem:[#allocation2 + $0xb28] sm:$0xff]  ;;  %v2767_v17 = vld [vmem:[#allocation2 + $0xb30] sm:$0xff] }
 0x430   : > { %v4743_v59 = vadd.f32 %v11438_v45, %v4252_v46  ;;  %v4764_v19 = vadd.f32 %v11438_v45, %v4273_v12  ;;  %v8399_v38 = vpack.i.bf16 %v5675_v16, %v11288_v35  ;;  %v4765_v7 = vadd.f32 %v11438_v45, %v4274_v13  ;;  %v2763_v35 = vld [vmem:[#allocation2 + $0xb10] sm:$0xff] }
 0x431   : > { %v5154_v48 = vmax.f32 %v4670_v39, 0.0  ;;  %v5155_v44 = vmax.f32 %v4671_v26, 0.0  ;;  %v5176_v3 = vmax.f32 %v4692_v18, 0.0  ;;  %v5177_v28 = vmax.f32 %v4693_v25, 0.0 }
 0x432   : > { %v5226_v10 = vmax.f32 %v4742_v33, 0.0  ;;  %v5227_v56 = vmax.f32 %v4743_v59, 0.0  ;;  %8400 = vrot.lane.b32.xlu1 %v8399_v38, %s8621_s13  ;;  %v5248_v57 = vmax.f32 %v4764_v19, 0.0  ;;  %v5249_v62 = vmax.f32 %v4765_v7, 0.0 }
 0x433   : > { %v8409_v58 = vpack.i.bf16 %v11398_v53, %v11209_v42  ;;  %v3230_v22 = vsub.f32 %v2740_v8, %v9934_v9  ;;  %v5506_v32 = vmax.f32 %v5154_v48, %v5176_v3  ;;  %v5507_v30 = vmax.f32 %v5155_v44, %v5177_v28 }
 0x434   : > { %v3231_v46 = vsub.f32 %v2741_v52, %v9934_v9  ;;  %v3234_v12 = vsub.f32 %v2744_v50, %v9934_v9  ;;  %v5534_v13 = vmax.f32 %v5226_v10, %v5248_v57  ;;  %v5535_v16 = vmax.f32 %v5227_v56, %v5249_v62 }
 0x435   : > { %v3235_v39 = vsub.f32 %v2745_v60, %v9934_v9  ;;  %v3252_v26 = vsub.f32 %v2762_v23, %v9934_v9  ;;  %v11599_v18 = vmax.f32 %v5506_v32, %v5507_v30  ;;  %v3253_v42 = vsub.f32 %v2763_v35, %v9934_v9  ;;  %v2782_v30 = vld [vmem:[#allocation2 + $0xbb0] sm:$0xff] }
 0x436   : > { %v3256_v53 = vsub.f32 %v2766_v63, %v9934_v9  ;;  %v3257_v25 = vsub.f32 %v2767_v17, %v9934_v9  ;;  %v11604_v33 = vmax.f32 %v5534_v13, %v5535_v16  ;;  %8410 = vrot.lane.b32.xlu1 %v8409_v58, %s8620_s12  ;;  %v3722_v59 = vmul.f32 %v10134_v27, %v3230_v22 }
 0x437   : > { %v3723_v19 = vmul.f32 %v10134_v27, %v3231_v46  ;;  %v3726_v8 = vmul.f32 %v10134_v27, %v3234_v12  ;;  %v3727_v38 = vmul.f32 %v10134_v27, %v3235_v39  ;;  %v3744_v7 = vmul.f32 %v10134_v27, %v3252_v26  ;;  %v2783_v46 = vld [vmem:[#allocation2 + $0xbb8] sm:$0xff]  ;;  %v2786_v26 = vld [vmem:[#allocation2 + $0xbd0] sm:$0xff] }
 0x438   : > { %v3745_v48 = vmul.f32 %v10134_v27, %v3253_v42  ;;  %v3748_v44 = vmul.f32 %v10134_v27, %v3256_v53  ;;  %v8394_v52 = vpack.i.bf16 %v11604_v33, %v11599_v18  ;;  %v3749_v50 = vmul.f32 %v10134_v27, %v3257_v25  ;;  %v2787_v42 = vld [vmem:[#allocation2 + $0xbd8] sm:$0xff] }
 0x439   : > { %v4213_v3 = vmul.f32 %v11424_v21, %v3722_v59  ;;  %v4214_v28 = vmul.f32 %v11424_v21, %v3723_v19  ;;  %v4217_v10 = vmul.f32 %v11424_v21, %v3726_v8  ;;  %v4218_v56 = vmul.f32 %v11424_v21, %v3727_v38  ;;  %v2804_v8 = vld [vmem:[#allocation2 + $0xc68] sm:$0xff]  ;;  %v2805_v38 = vld [vmem:[#allocation2 + $0xc70] sm:$0xff] }
 0x43a   : > { %v4235_v60 = vmul.f32 %v11424_v21, %v3744_v7  ;;  %v4236_v23 = vmul.f32 %v11424_v21, %v3745_v48  ;;  %8395 = vrot.lane.b32.xlu0 %v8394_v52, %s8621_s13  ;;  %v4239_v57 = vmul.f32 %v11424_v21, %v3748_v44  ;;  %v4240_v62 = vmul.f32 %v11424_v21, %v3749_v50  ;;  %v2808_v44 = vld [vmem:[#allocation2 + $0xc88] sm:$0xff]  ;;  %v2809_v52 = vld [vmem:[#allocation2 + $0xc90] sm:$0xff] }
 0x43b   : > { %v4704_v58 = vadd.f32 %v11438_v45, %v4213_v3  ;;  %v4705_v35 = vadd.f32 %v11438_v45, %v4214_v28  ;;  %v4708_v63 = vadd.f32 %v11438_v45, %v4217_v10  ;;  %v4709_v17 = vadd.f32 %v11438_v45, %v4218_v56 }
 0x43c   : > { %v4726_v22 = vadd.f32 %v11438_v45, %v4235_v60  ;;  %v4727_v32 = vadd.f32 %v11438_v45, %v4236_v23  ;;  %v4730_v12 = vadd.f32 %v11438_v45, %v4239_v57  ;;  %v4731_v13 = vadd.f32 %v11438_v45, %v4240_v62 }
 0x43d   : > { %v5188_v16 = vmax.f32 %v4704_v58, 0.0  ;;  %v5189_v39 = vmax.f32 %v4705_v35, 0.0  ;;  %v5192_v53 = vmax.f32 %v4708_v63, 0.0  ;;  %v5193_v25 = vmax.f32 %v4709_v17, 0.0 }
 0x43e   : > { %v5210_v59 = vmax.f32 %v4726_v22, 0.0  ;;  %v5211_v19 = vmax.f32 %v4727_v32, 0.0  ;;  %v5214_v7 = vmax.f32 %v4730_v12, 0.0  ;;  %v5215_v48 = vmax.f32 %v4731_v13, 0.0 }
 0x43f   : > { %v3272_v50 = vsub.f32 %v2782_v30, %v9934_v9  ;;  %v3273_v3 = vsub.f32 %v2783_v46, %v9934_v9  ;;  %v3276_v56 = vsub.f32 %v2786_v26, %v9934_v9  ;;  %v3277_v60 = vsub.f32 %v2787_v42, %v9934_v9 }
 0x440   : > { %v5518_v28 = vmax.f32 %v5188_v16, %v5210_v59  ;;  %v5519_v10 = vmax.f32 %v5189_v39, %v5211_v19  ;;  %v5522_v23 = vmax.f32 %v5192_v53, %v5214_v7  ;;  %v5523_v57 = vmax.f32 %v5193_v25, %v5215_v48 }
 0x441   : > { %v3294_v62 = vsub.f32 %v2804_v8, %v9934_v9  ;;  %v3295_v58 = vsub.f32 %v2805_v38, %v9934_v9  ;;  %v3298_v63 = vsub.f32 %v2808_v44, %v9934_v9  ;;  %v3299_v17 = vsub.f32 %v2809_v52, %v9934_v9 }
 0x442   : > { %v11640_v35 = vmax.f32 %v5518_v28, %v5519_v10  ;;  %v3764_v22 = vmul.f32 %v10134_v27, %v3272_v50  ;;  %v11645_v32 = vmax.f32 %v5522_v23, %v5523_v57  ;;  %v3765_v30 = vmul.f32 %v10134_v27, %v3273_v3  ;;  %v2784_v3 = vld [vmem:[#allocation2 + $0xbc0] sm:$0xff]  ;;  %v8534_v28 = vld [vmem:[%s13587_s4 + $0x68] sm:$0xff]  }
 0x443   : > { %v3768_v46 = vmul.f32 %v10134_v27, %v3276_v56  ;;  %v3769_v12 = vmul.f32 %v10134_v27, %v3277_v60  ;;  %v3786_v13 = vmul.f32 %v10134_v27, %v3294_v62  ;;  %v3787_v16 = vmul.f32 %v10134_v27, %v3295_v58  ;;  %v2785_v57 = vld [vmem:[#allocation2 + $0xbc8] sm:$0xff]  ;;  %v2788_v62 = vld [vmem:[#allocation2 + $0xbe0] sm:$0xff]  ;;  %7628 = vmatprep.subr.bf16.mxu0 %v8534_v28 }
 0x444   : > { %v3790_v39 = vmul.f32 %v10134_v27, %v3298_v63  ;;  %v3791_v26 = vmul.f32 %v10134_v27, %v3299_v17  ;;  %v8404_v42 = vpack.i.bf16 %v11645_v32, %v11640_v35  ;;  %v4255_v53 = vmul.f32 %v11424_v21, %v3764_v22  ;;  %v8535_v58 = vld [vmem:[%s13587_s4 + $0x28] sm:$0xff]  }
 0x445   : > { %v4256_v25 = vmul.f32 %v11424_v21, %v3765_v30  ;;  %v4259_v59 = vmul.f32 %v11424_v21, %v3768_v46  ;;  %v4260_v19 = vmul.f32 %v11424_v21, %v3769_v12  ;;  %v4277_v8 = vmul.f32 %v11424_v21, %v3786_v13  ;;  %v2789_v46 = vld [vmem:[#allocation2 + $0xbe8] sm:$0xff]  ;;  %v2806_v12 = vld [vmem:[#allocation2 + $0xc78] sm:$0xff]  ;;  %7629 = vmatpush3.bf16.msra.mxu0 %v8535_v58 }
 0x446   : > { %v4278_v38 = vmul.f32 %v11424_v21, %v3787_v16  ;;  %v4281_v7 = vmul.f32 %v11424_v21, %v3790_v39  ;;  %8405 = vrot.lane.b32.xlu0 %v8404_v42, %s8620_s12  ;;  %v4282_v48 = vmul.f32 %v11424_v21, %v3791_v26  ;;  %v4746_v44 = vadd.f32 %v11438_v45, %v4255_v53  ;;  %v2807_v42 = vld [vmem:[#allocation2 + $0xc80] sm:$0xff]  ;;  %v2810_v53 = vld [vmem:[#allocation2 + $0xc98] sm:$0xff] }
 0x447   : > { %v4747_v52 = vadd.f32 %v11438_v45, %v4256_v25  ;;  %v4750_v50 = vadd.f32 %v11438_v45, %v4259_v59  ;;  %v4751_v10 = vadd.f32 %v11438_v45, %v4260_v19  ;;  %v4768_v56 = vadd.f32 %v11438_v45, %v4277_v8  ;;  %v2811_v59 = vld [vmem:[#allocation2 + $0xca0] sm:$0xff] }
 0x448   : > { %v4769_v60 = vadd.f32 %v11438_v45, %v4278_v38  ;;  %v4772_v23 = vadd.f32 %v11438_v45, %v4281_v7  ;;  %v4773_v63 = vadd.f32 %v11438_v45, %v4282_v48  ;;  %v5230_v17 = vmax.f32 %v4746_v44, 0.0 }
 0x449   : > { %v5231_v22 = vmax.f32 %v4747_v52, 0.0  ;;  %v5234_v30 = vmax.f32 %v4750_v50, 0.0  ;;  %v5235_v13 = vmax.f32 %v4751_v10, 0.0  ;;  %v5252_v16 = vmax.f32 %v4768_v56, 0.0 }
 0x44a   : > { %v5253_v39 = vmax.f32 %v4769_v60, 0.0  ;;  %v5256_v26 = vmax.f32 %v4772_v23, 0.0  ;;  %v5257_v25 = vmax.f32 %v4773_v63, 0.0  ;;  %v3274_v19 = vsub.f32 %v2784_v3, %v9934_v9 }
 0x44b   : > { %v3275_v8 = vsub.f32 %v2785_v57, %v9934_v9  ;;  %v3278_v38 = vsub.f32 %v2788_v62, %v9934_v9  ;;  %v5538_v7 = vmax.f32 %v5230_v17, %v5252_v16  ;;  %v3279_v52 = vsub.f32 %v2789_v46, %v9934_v9 }
 0x44c   : > { %v5539_v48 = vmax.f32 %v5231_v22, %v5253_v39  ;;  %v5542_v44 = vmax.f32 %v5234_v30, %v5256_v26  ;;  %v5543_v50 = vmax.f32 %v5235_v13, %v5257_v25  ;;  %v3296_v28 = vsub.f32 %v2806_v12, %v9934_v9 }
 0x44d   : > { %v3297_v10 = vsub.f32 %v2807_v42, %v9934_v9  ;;  %v3300_v56 = vsub.f32 %v2810_v53, %v9934_v9  ;;  %v3301_v3 = vsub.f32 %v2811_v59, %v9934_v9  ;;  %v3766_v23 = vmul.f32 %v10134_v27, %v3274_v19 }
 0x44e   : > { %v11686_v60 = vmax.f32 %v5538_v7, %v5539_v48  ;;  %v3767_v57 = vmul.f32 %v10134_v27, %v3275_v8  ;;  %v11691_v62 = vmax.f32 %v5542_v44, %v5543_v50  ;;  %v3770_v58 = vmul.f32 %v10134_v27, %v3278_v38  ;;  %v2748_v48 = vld [vmem:[#allocation2 + $0xa90] sm:$0xff] }
 0x44f   : > { %v3771_v63 = vmul.f32 %v10134_v27, %v3279_v52  ;;  %v3788_v17 = vmul.f32 %v10134_v27, %v3296_v28  ;;  %v3789_v22 = vmul.f32 %v10134_v27, %v3297_v10  ;;  %v3792_v30 = vmul.f32 %v10134_v27, %v3300_v56  ;;  %v2749_v10 = vld [vmem:[#allocation2 + $0xa98] sm:$0xff]  ;;  %v2752_v56 = vld [vmem:[#allocation2 + $0xab0] sm:$0xff] }
 0x450   : > { %v3793_v46 = vmul.f32 %v10134_v27, %v3301_v3  ;;  %v4257_v12 = vmul.f32 %v11424_v21, %v3766_v23  ;;  %v8419_v13 = vpack.i.bf16 %v11691_v62, %v11686_v60  ;;  %v4258_v16 = vmul.f32 %v11424_v21, %v3767_v57  ;;  %v2753_v3 = vld [vmem:[#allocation2 + $0xab8] sm:$0xff] }
 0x451   : > { %v4261_v39 = vmul.f32 %v11424_v21, %v3770_v58  ;;  %v4262_v26 = vmul.f32 %v11424_v21, %v3771_v63  ;;  %v4279_v42 = vmul.f32 %v11424_v21, %v3788_v17  ;;  %v4280_v53 = vmul.f32 %v11424_v21, %v3789_v22  ;;  %v2770_v17 = vld [vmem:[#allocation2 + $0xb48] sm:$0xff]  ;;  %v2771_v22 = vld [vmem:[#allocation2 + $0xb50] sm:$0xff] }
 0x452   : > { %v4283_v25 = vmul.f32 %v11424_v21, %v3792_v30  ;;  %v4284_v59 = vmul.f32 %v11424_v21, %v3793_v46  ;;  %8420 = vrot.lane.b32.xlu1 %v8419_v13, %s8621_s13  ;;  %v4748_v19 = vadd.f32 %v11438_v45, %v4257_v12  ;;  %v4749_v8 = vadd.f32 %v11438_v45, %v4258_v16  ;;  %v2774_v16 = vld [vmem:[#allocation2 + $0xb68] sm:$0xff] }
 0x453   : > { %v4752_v38 = vadd.f32 %v11438_v45, %v4261_v39  ;;  %v4753_v7 = vadd.f32 %v11438_v45, %v4262_v26  ;;  %v4770_v44 = vadd.f32 %v11438_v45, %v4279_v42  ;;  %v4771_v52 = vadd.f32 %v11438_v45, %v4280_v53  ;;  %v2775_v39 = vld [vmem:[#allocation2 + $0xb70] sm:$0xff] }
 0x454   : > { %v4774_v50 = vadd.f32 %v11438_v45, %v4283_v25  ;;  %v4775_v28 = vadd.f32 %v11438_v45, %v4284_v59  ;;  %v5232_v23 = vmax.f32 %v4748_v19, 0.0  ;;  %v5233_v57 = vmax.f32 %v4749_v8, 0.0  ;;  %v8536_v59 = vld [vmem:[%s13587_s4 + $0x70] sm:$0xff]  }
 0x455   : > { %v5236_v58 = vmax.f32 %v4752_v38, 0.0  ;;  %v5237_v63 = vmax.f32 %v4753_v7, 0.0  ;;  %v5254_v30 = vmax.f32 %v4770_v44, 0.0  ;;  %v5255_v46 = vmax.f32 %v4771_v52, 0.0  ;;  %v8537_v44 = vld [vmem:[%s13587_s4 + $0x30] sm:$0xff]   ;;  %7630 = vmatprep.subr.bf16.mxu0 %v8536_v59 }
 0x456   : > { %v5258_v12 = vmax.f32 %v4774_v50, 0.0  ;;  %v5259_v13 = vmax.f32 %v4775_v28, 0.0  ;;  %v3238_v26 = vsub.f32 %v2748_v48, %v9934_v9  ;;  %v3239_v42 = vsub.f32 %v2749_v10, %v9934_v9  ;;  %7631 = vmatpush3.bf16.msra.mxu0 %v8537_v44 }
 0x457   : > { %v3242_v53 = vsub.f32 %v2752_v56, %v9934_v9  ;;  %v3243_v25 = vsub.f32 %v2753_v3, %v9934_v9  ;;  %v5540_v19 = vmax.f32 %v5232_v23, %v5254_v30  ;;  %v5541_v8 = vmax.f32 %v5233_v57, %v5255_v46 }
 0x458   : > { %v5544_v38 = vmax.f32 %v5236_v58, %v5258_v12  ;;  %v5545_v7 = vmax.f32 %v5237_v63, %v5259_v13  ;;  %v3260_v48 = vsub.f32 %v2770_v17, %v9934_v9  ;;  %v3261_v52 = vsub.f32 %v2771_v22, %v9934_v9 }
 0x459   : > { %v3264_v50 = vsub.f32 %v2774_v16, %v9934_v9  ;;  %v3265_v28 = vsub.f32 %v2775_v39, %v9934_v9  ;;  %v11732_v10 = vmax.f32 %v5540_v19, %v5541_v8  ;;  %v3730_v3 = vmul.f32 %v10134_v27, %v3238_v26 }
 0x45a   : > { %v11734_v56 = vmax.f32 %v5544_v38, %v5545_v7  ;;  %v3731_v23 = vmul.f32 %v10134_v27, %v3239_v42  ;;  %v3734_v57 = vmul.f32 %v10134_v27, %v3242_v53  ;;  %v3735_v58 = vmul.f32 %v10134_v27, %v3243_v25 }
 0x45b   : > { %13783 = vst [vmem:[#allocation29_spill] sm:$0xff] %v11732_v10  ;;  %v3752_v63 = vmul.f32 %v10134_v27, %v3260_v48  ;;  %v3753_v17 = vmul.f32 %v10134_v27, %v3261_v52  ;;  %v3756_v30 = vmul.f32 %v10134_v27, %v3264_v50  ;;  %v3757_v46 = vmul.f32 %v10134_v27, %v3265_v28  ;;  %v2708_v28 = vld [vmem:[#allocation2 + $0x940] sm:$0xff] }
 0x45c   : > { %13784 = vst [vmem:[#allocation30_spill] sm:$0xff] %v11734_v56  ;;  %v8414_v22 = vpack.i.bf16 %v11734_v56, %v11732_v10  ;;  %v4221_v12 = vmul.f32 %v11424_v21, %v3730_v3  ;;  %v4222_v13 = vmul.f32 %v11424_v21, %v3731_v23  ;;  %v4225_v16 = vmul.f32 %v11424_v21, %v3734_v57  ;;  %v2709_v3 = vld [vmem:[#allocation2 + $0x948] sm:$0xff]  ;;  %v2730_v23 = vld [vmem:[#allocation2 + $0x9f8] sm:$0xff] }
 0x45d   : > { %v4226_v39 = vmul.f32 %v11424_v21, %v3735_v58  ;;  %v4243_v26 = vmul.f32 %v11424_v21, %v3752_v63  ;;  %v4244_v42 = vmul.f32 %v11424_v21, %v3753_v17  ;;  %v4247_v53 = vmul.f32 %v11424_v21, %v3756_v30  ;;  %v2792_v30 = vld [vmem:[#allocation2 + $0xc00] sm:$0xff] }
 0x45e   : > { %8415 = vrot.lane.b32.xlu0 %v8414_v22, %s8619_s11  ;;  %v4248_v25 = vmul.f32 %v11424_v21, %v3757_v46  ;;  %v4712_v59 = vadd.f32 %v11438_v45, %v4221_v12  ;;  %v4713_v19 = vadd.f32 %v11438_v45, %v4222_v13  ;;  %v4716_v8 = vadd.f32 %v11438_v45, %v4225_v16  ;;  %v2731_v22 = vld [vmem:[#allocation2 + $0xa00] sm:$0xff] }
 0x45f   : > { %v4717_v38 = vadd.f32 %v11438_v45, %v4226_v39  ;;  %v4734_v7 = vadd.f32 %v11438_v45, %v4243_v26  ;;  %v4735_v44 = vadd.f32 %v11438_v45, %v4244_v42  ;;  %v4738_v48 = vadd.f32 %v11438_v45, %v4247_v53  ;;  %v2793_v39 = vld [vmem:[#allocation2 + $0xc08] sm:$0xff]  ;;  %v2814_v26 = vld [vmem:[#allocation2 + $0xcb8] sm:$0xff]  ;;  %v2815_v42 = vld [vmem:[#allocation2 + $0xcc0] sm:$0xff] }
 0x460   : > { %v4739_v52 = vadd.f32 %v11438_v45, %v4248_v25  ;;  %v5196_v50 = vmax.f32 %v4712_v59, 0.0  ;;  %v5197_v57 = vmax.f32 %v4713_v19, 0.0  ;;  %v5200_v58 = vmax.f32 %v4716_v8, 0.0 }
 0x461   : > { %v5201_v63 = vmax.f32 %v4717_v38, 0.0  ;;  %v5218_v17 = vmax.f32 %v4734_v7, 0.0  ;;  %v5219_v46 = vmax.f32 %v4735_v44, 0.0  ;;  %v5222_v12 = vmax.f32 %v4738_v48, 0.0 }
 0x462   : > { %v5223_v13 = vmax.f32 %v4739_v52, 0.0  ;;  %v8424_v16 = vpack.i.bf16 %v11640_v35, %v11461_v2  ;;  %v3198_v25 = vsub.f32 %v2708_v28, %v9934_v9  ;;  %v3199_v59 = vsub.f32 %v2709_v3, %v9934_v9 }
 0x463   : > { %v5526_v53 = vmax.f32 %v5196_v50, %v5218_v17  ;;  %v3220_v19 = vsub.f32 %v2730_v23, %v9934_v9  ;;  %v5527_v8 = vmax.f32 %v5197_v57, %v5219_v46  ;;  %v5530_v38 = vmax.f32 %v5200_v58, %v5222_v12  ;;  %v8538_v50 = vld [vmem:[%s13587_s4 + $0x78] sm:$0xff]  }
 0x464   : > { %v5531_v7 = vmax.f32 %v5201_v63, %v5223_v13  ;;  %8425 = vrot.lane.b32.xlu0 %v8424_v16, %s8621_s13  ;;  %v3221_v44 = vsub.f32 %v2731_v22, %v9934_v9  ;;  %v3282_v48 = vsub.f32 %v2792_v30, %v9934_v9  ;;  %v3283_v2 = vsub.f32 %v2793_v39, %v9934_v9  ;;  %v8540_v58 = vld [vmem:[%s13587_s4 + $0x38] sm:$0xff]  }
 0x465   : > { %v3304_v35 = vsub.f32 %v2814_v26, %v9934_v9  ;;  %v3305_v52 = vsub.f32 %v2815_v42, %v9934_v9  ;;  %v11777_v28 = vmax.f32 %v5526_v53, %v5527_v8  ;;  %v3690_v23 = vmul.f32 %v10134_v27, %v3198_v25  ;;  %7632 = vmatprep.subr.bf16.mxu0 %v8538_v50 }
 0x466   : > { %v5685_v3 = vmax.f32 %v5530_v38, %v5531_v7  ;;  %v3691_v57 = vmul.f32 %v10134_v27, %v3199_v59  ;;  %v3712_v63 = vmul.f32 %v10134_v27, %v3220_v19  ;;  %v3713_v17 = vmul.f32 %v10134_v27, %v3221_v44  ;;  %7633 = vmatpush3.bf16.msra.mxu0 %v8540_v58 }
 0x467   : > { %v3774_v22 = vmul.f32 %v10134_v27, %v3282_v48  ;;  %v3775_v30 = vmul.f32 %v10134_v27, %v3283_v2  ;;  %v3796_v12 = vmul.f32 %v10134_v27, %v3304_v35  ;;  %v3797_v13 = vmul.f32 %v10134_v27, %v3305_v52 }
 0x468   : > { %v8429_v46 = vpack.i.bf16 %v5685_v3, %v11777_v28  ;;  %v4181_v16 = vmul.f32 %v11424_v21, %v3690_v23  ;;  %v4182_v39 = vmul.f32 %v11424_v21, %v3691_v57  ;;  %v4203_v26 = vmul.f32 %v11424_v21, %v3712_v63  ;;  %v2790_v3 = vld [vmem:[#allocation2 + $0xbf0] sm:$0xff]  ;;  %v2791_v63 = vld [vmem:[#allocation2 + $0xbf8] sm:$0xff] }
 0x469   : > { %v4204_v42 = vmul.f32 %v11424_v21, %v3713_v17  ;;  %v4265_v53 = vmul.f32 %v11424_v21, %v3774_v22  ;;  %v4266_v25 = vmul.f32 %v11424_v21, %v3775_v30  ;;  %v4287_v59 = vmul.f32 %v11424_v21, %v3796_v12  ;;  %v2794_v17 = vld [vmem:[#allocation2 + $0xc10] sm:$0xff] }
 0x46a   : > { %8430 = vrot.lane.b32.xlu1 %v8429_v46, %s8620_s12  ;;  %v4288_v19 = vmul.f32 %v11424_v21, %v3797_v13  ;;  %v4672_v8 = vadd.f32 %v11438_v45, %v4181_v16  ;;  %v4673_v38 = vadd.f32 %v11438_v45, %v4182_v39  ;;  %v4694_v7 = vadd.f32 %v11438_v45, %v4203_v26  ;;  %v2795_v13 = vld [vmem:[#allocation2 + $0xc18] sm:$0xff]  ;;  %v2812_v16 = vld [vmem:[#allocation2 + $0xca8] sm:$0xff]  ;;  %v2813_v39 = vld [vmem:[#allocation2 + $0xcb0] sm:$0xff] }
 0x46b   : > { %v4695_v44 = vadd.f32 %v11438_v45, %v4204_v42  ;;  %v4756_v48 = vadd.f32 %v11438_v45, %v4265_v53  ;;  %v4757_v2 = vadd.f32 %v11438_v45, %v4266_v25  ;;  %v4778_v35 = vadd.f32 %v11438_v45, %v4287_v59  ;;  %v2816_v53 = vld [vmem:[#allocation2 + $0xcc8] sm:$0xff]  ;;  %v2817_v25 = vld [vmem:[#allocation2 + $0xcd0] sm:$0xff] }
 0x46c   : > { %v4779_v52 = vadd.f32 %v11438_v45, %v4288_v19  ;;  %v5156_v50 = vmax.f32 %v4672_v8, 0.0  ;;  %v5157_v23 = vmax.f32 %v4673_v38, 0.0  ;;  %v5178_v21 = vmax.f32 %v4694_v7, 0.0 }
 0x46d   : > { %v5179_v57 = vmax.f32 %v4695_v44, 0.0  ;;  %v5240_v58 = vmax.f32 %v4756_v48, 0.0  ;;  %v5241_v22 = vmax.f32 %v4757_v2, 0.0  ;;  %v5262_v30 = vmax.f32 %v4778_v35, 0.0 }
 0x46e   : > { %v5263_v46 = vmax.f32 %v4779_v52, 0.0  ;;  %v8434_v12 = vpack.i.bf16 %v11599_v18, %v11407_v15  ;;  %v5508_v26 = vmax.f32 %v5156_v50, %v5178_v21  ;;  %v8449_v45 = vpack.i.bf16 %v11777_v28, %v11645_v32 }
 0x46f   : > { %v5509_v42 = vmax.f32 %v5157_v23, %v5179_v57  ;;  %v3280_v59 = vsub.f32 %v2790_v3, %v9934_v9  ;;  %v5548_v19 = vmax.f32 %v5240_v58, %v5262_v30  ;;  %v3281_v38 = vsub.f32 %v2791_v63, %v9934_v9 }
 0x470   : > { %v5549_v8 = vmax.f32 %v5241_v22, %v5263_v46  ;;  %8435 = vrot.lane.b32.xlu0 %v8434_v12, %s8620_s12  ;;  %v3284_v15 = vsub.f32 %v2794_v17, %v9934_v9  ;;  %v3285_v7 = vsub.f32 %v2795_v13, %v9934_v9  ;;  %v3302_v44 = vsub.f32 %v2812_v16, %v9934_v9  ;;  %v11838_v17 = vld [vmem:[%s13585_s2] ss:$0 sm:$0xff] }
 0x471   : > { %v11816_v18 = vmax.f32 %v5508_v26, %v5509_v42  ;;  %v3303_v32 = vsub.f32 %v2813_v39, %v9934_v9  ;;  %v3306_v48 = vsub.f32 %v2816_v53, %v9934_v9  ;;  %v3307_v2 = vsub.f32 %v2817_v25, %v9934_v9  ;;  %v11852_v42 = vld [vmem:[%s13586_s3] ss:$0 sm:$0xff] }
 0x472   : > { %v11821_v28 = vmax.f32 %v5548_v19, %v5549_v8  ;;  %v3772_v35 = vmul.f32 %v10134_v27, %v3280_v59  ;;  %v3773_v52 = vmul.f32 %v10134_v27, %v3281_v38  ;;  %v3776_v50 = vmul.f32 %v10134_v27, %v3284_v15 }
 0x473   : > { %v3777_v3 = vmul.f32 %v10134_v27, %v3285_v7  ;;  %v3794_v23 = vmul.f32 %v10134_v27, %v3302_v44  ;;  %v3795_v57 = vmul.f32 %v10134_v27, %v3303_v32  ;;  %v3798_v58 = vmul.f32 %v10134_v27, %v3306_v48  ;;  %v2824_v44 = vld [vmem:[#allocation2 + $0xd10] sm:$0xff]  ;;  %v2825_v32 = vld [vmem:[#allocation2 + $0xd18] sm:$0xff] }
 0x474   : > { %13785 = vst [vmem:[#allocation31_spill] sm:$0xff] %v11821_v28  ;;  %v8439_v21 = vpack.i.bf16 %v11816_v18, %v11821_v28  ;;  %v3799_v63 = vmul.f32 %v10134_v27, %v3307_v2  ;;  %v4263_v22 = vmul.f32 %v11838_v17, %v3772_v35  ;;  %v4264_v30 = vmul.f32 %v11838_v17, %v3773_v52  ;;  %v2828_v48 = vld [vmem:[#allocation2 + $0xd30] sm:$0xff] }
 0x475   : > { %v4267_v46 = vmul.f32 %v11838_v17, %v3776_v50  ;;  %v4268_v12 = vmul.f32 %v11838_v17, %v3777_v3  ;;  %v4285_v13 = vmul.f32 %v11838_v17, %v3794_v23  ;;  %v4286_v16 = vmul.f32 %v11838_v17, %v3795_v57  ;;  %v2829_v3 = vld [vmem:[#allocation2 + $0xd38] sm:$0xff]  ;;  %v2846_v23 = vld [vmem:[#allocation2 + $0xdc8] sm:$0xff] }
 0x476   : > { %8440 = vrot.lane.b32.xlu1 %v8439_v21, %s8619_s11  ;;  %v4289_v39 = vmul.f32 %v11838_v17, %v3798_v58  ;;  %v4290_v26 = vmul.f32 %v11838_v17, %v3799_v63  ;;  %v4754_v53 = vadd.f32 %v11852_v42, %v4263_v22  ;;  %v4755_v25 = vadd.f32 %v11852_v42, %v4264_v30  ;;  %v2847_v22 = vld [vmem:[#allocation2 + $0xdd0] sm:$0xff]  ;;  %v2850_v30 = vld [vmem:[#allocation2 + $0xde8] sm:$0xff] }
 0x477   : > { %v4758_v59 = vadd.f32 %v11852_v42, %v4267_v46  ;;  %v4759_v19 = vadd.f32 %v11852_v42, %v4268_v12  ;;  %v4776_v8 = vadd.f32 %v11852_v42, %v4285_v13  ;;  %v4777_v38 = vadd.f32 %v11852_v42, %v4286_v16  ;;  %v2851_v12 = vld [vmem:[#allocation2 + $0xdf0] sm:$0xff] }
 0x478   : > { %v4780_v15 = vadd.f32 %v11852_v42, %v4289_v39  ;;  %v4781_v7 = vadd.f32 %v11852_v42, %v4290_v26  ;;  %v5238_v2 = vmax.f32 %v4754_v53, 0.0  ;;  %v5239_v35 = vmax.f32 %v4755_v25, 0.0 }
 0x479   : > { %v5242_v52 = vmax.f32 %v4758_v59, 0.0  ;;  %v5243_v50 = vmax.f32 %v4759_v19, 0.0  ;;  %v5260_v21 = vmax.f32 %v4776_v8, 0.0  ;;  %v5261_v57 = vmax.f32 %v4777_v38, 0.0 }
 0x47a   : > { %8450 = vrot.lane.b32.xlu1 %v8449_v45, %s8621_s13  ;;  %v5264_v58 = vmax.f32 %v4780_v15, 0.0  ;;  %v5265_v63 = vmax.f32 %v4781_v7, 0.0  ;;  %v8459_v46 = vpack.i.bf16 %v11686_v60, %v11604_v33  ;;  %v3314_v13 = vsub.f32 %v2824_v44, %v9934_v9 }
 0x47b   : > { %v3315_v16 = vsub.f32 %v2825_v32, %v9934_v9  ;;  %v3318_v39 = vsub.f32 %v2828_v48, %v9934_v9  ;;  %v5546_v26 = vmax.f32 %v5238_v2, %v5260_v21  ;;  %v5547_v53 = vmax.f32 %v5239_v35, %v5261_v57 }
 0x47c   : > { %v5550_v25 = vmax.f32 %v5242_v52, %v5264_v58  ;;  %v5551_v45 = vmax.f32 %v5243_v50, %v5265_v63  ;;  %v3319_v59 = vsub.f32 %v2829_v3, %v9934_v9  ;;  %v3336_v19 = vsub.f32 %v2846_v23, %v9934_v9 }
 0x47d   : > { %v3337_v8 = vsub.f32 %v2847_v22, %v9934_v9  ;;  %v3340_v38 = vsub.f32 %v2850_v30, %v9934_v9  ;;  %v11872_v33 = vmax.f32 %v5546_v26, %v5547_v53  ;;  %v3341_v15 = vsub.f32 %v2851_v12, %v9934_v9  ;;  %v2866_v26 = vld [vmem:[#allocation2 + $0xe70] sm:$0xff] }
 0x47e   : > { %v11874_v60 = vmax.f32 %v5550_v25, %v5551_v45  ;;  %8460 = vrot.lane.b32.xlu1 %v8459_v46, %s8620_s12  ;;  %v3806_v7 = vmul.f32 %v10134_v27, %v3314_v13  ;;  %v3807_v44 = vmul.f32 %v10134_v27, %v3315_v16  ;;  %v3810_v32 = vmul.f32 %v10134_v27, %v3318_v39 }
 0x47f   : > { %v3811_v48 = vmul.f32 %v10134_v27, %v3319_v59  ;;  %v3828_v2 = vmul.f32 %v10134_v27, %v3336_v19  ;;  %v3829_v52 = vmul.f32 %v10134_v27, %v3337_v8  ;;  %v3832_v50 = vmul.f32 %v10134_v27, %v3340_v38  ;;  %v2867_v19 = vld [vmem:[#allocation2 + $0xe78] sm:$0xff]  ;;  %v2870_v8 = vld [vmem:[#allocation2 + $0xe90] sm:$0xff] }
 0x480   : > { %v8444_v35 = vpack.i.bf16 %v11874_v60, %v11872_v33  ;;  %v3833_v3 = vmul.f32 %v10134_v27, %v3341_v15  ;;  %v4297_v23 = vmul.f32 %v11838_v17, %v3806_v7  ;;  %v4298_v21 = vmul.f32 %v11838_v17, %v3807_v44  ;;  %v2871_v38 = vld [vmem:[#allocation2 + $0xe98] sm:$0xff] }
 0x481   : > { %v4301_v57 = vmul.f32 %v11838_v17, %v3810_v32  ;;  %v4302_v58 = vmul.f32 %v11838_v17, %v3811_v48  ;;  %v4319_v63 = vmul.f32 %v11838_v17, %v3828_v2  ;;  %v4320_v22 = vmul.f32 %v11838_v17, %v3829_v52  ;;  %v2888_v48 = vld [vmem:[#allocation2 + $0xf28] sm:$0xff]  ;;  %v2889_v2 = vld [vmem:[#allocation2 + $0xf30] sm:$0xff] }
 0x482   : > { %8445 = vrot.lane.b32.xlu0 %v8444_v35, %s8621_s13  ;;  %v4323_v30 = vmul.f32 %v11838_v17, %v3832_v50  ;;  %v4324_v46 = vmul.f32 %v11838_v17, %v3833_v3  ;;  %v4788_v12 = vadd.f32 %v11852_v42, %v4297_v23  ;;  %v4789_v13 = vadd.f32 %v11852_v42, %v4298_v21  ;;  %v2892_v23 = vld [vmem:[#allocation2 + $0xf48] sm:$0xff]  ;;  %v2893_v21 = vld [vmem:[#allocation2 + $0xf50] sm:$0xff] }
 0x483   : > { %v4792_v16 = vadd.f32 %v11852_v42, %v4301_v57  ;;  %v4793_v39 = vadd.f32 %v11852_v42, %v4302_v58  ;;  %v4810_v53 = vadd.f32 %v11852_v42, %v4319_v63  ;;  %v4811_v25 = vadd.f32 %v11852_v42, %v4320_v22 }
 0x484   : > { %v4814_v45 = vadd.f32 %v11852_v42, %v4323_v30  ;;  %v4815_v59 = vadd.f32 %v11852_v42, %v4324_v46  ;;  %v5272_v15 = vmax.f32 %v4788_v12, 0.0  ;;  %v5273_v7 = vmax.f32 %v4789_v13, 0.0 }
 0x485   : > { %v5276_v44 = vmax.f32 %v4792_v16, 0.0  ;;  %v5277_v32 = vmax.f32 %v4793_v39, 0.0  ;;  %v5294_v35 = vmax.f32 %v4810_v53, 0.0  ;;  %v5295_v52 = vmax.f32 %v4811_v25, 0.0 }
 0x486   : > { %v5298_v50 = vmax.f32 %v4814_v45, 0.0  ;;  %v5299_v3 = vmax.f32 %v4815_v59, 0.0  ;;  %v3356_v57 = vsub.f32 %v2866_v26, %v9934_v9  ;;  %v3357_v58 = vsub.f32 %v2867_v19, %v9934_v9 }
 0x487   : > { %v3360_v63 = vsub.f32 %v2870_v8, %v9934_v9  ;;  %v3361_v22 = vsub.f32 %v2871_v38, %v9934_v9  ;;  %v5558_v30 = vmax.f32 %v5272_v15, %v5294_v35  ;;  %v5559_v46 = vmax.f32 %v5273_v7, %v5295_v52 }
 0x488   : > { %v5562_v12 = vmax.f32 %v5276_v44, %v5298_v50  ;;  %v5563_v13 = vmax.f32 %v5277_v32, %v5299_v3  ;;  %v3378_v16 = vsub.f32 %v2888_v48, %v9934_v9  ;;  %v3379_v39 = vsub.f32 %v2889_v2, %v9934_v9 }
 0x489   : > { %v3382_v53 = vsub.f32 %v2892_v23, %v9934_v9  ;;  %v3383_v25 = vsub.f32 %v2893_v21, %v9934_v9  ;;  %v11913_v45 = vmax.f32 %v5558_v30, %v5559_v46  ;;  %v3848_v59 = vmul.f32 %v10134_v27, %v3356_v57 }
 0x48a   : > { %v11915_v26 = vmax.f32 %v5562_v12, %v5563_v13  ;;  %v3849_v19 = vmul.f32 %v10134_v27, %v3357_v58  ;;  %v3852_v8 = vmul.f32 %v10134_v27, %v3360_v63  ;;  %v3853_v38 = vmul.f32 %v10134_v27, %v3361_v22  ;;  %v2864_v12 = vld [vmem:[#allocation2 + $0xe60] sm:$0xff] }
 0x48b   : > { %v3870_v15 = vmul.f32 %v10134_v27, %v3378_v16  ;;  %v3871_v7 = vmul.f32 %v10134_v27, %v3379_v39  ;;  %v3874_v32 = vmul.f32 %v10134_v27, %v3382_v53  ;;  %v3875_v48 = vmul.f32 %v10134_v27, %v3383_v25  ;;  %v2865_v25 = vld [vmem:[#allocation2 + $0xe68] sm:$0xff] }
 0x48c   : > { %v8454_v44 = vpack.i.bf16 %v11915_v26, %v11913_v45  ;;  %v4339_v2 = vmul.f32 %v11838_v17, %v3848_v59  ;;  %v4340_v35 = vmul.f32 %v11838_v17, %v3849_v19  ;;  %v4343_v52 = vmul.f32 %v11838_v17, %v3852_v8  ;;  %v2868_v59 = vld [vmem:[#allocation2 + $0xe80] sm:$0xff]  ;;  %v2869_v19 = vld [vmem:[#allocation2 + $0xe88] sm:$0xff] }
 0x48d   : > { %v4344_v50 = vmul.f32 %v11838_v17, %v3853_v38  ;;  %v4361_v3 = vmul.f32 %v11838_v17, %v3870_v15  ;;  %v4362_v23 = vmul.f32 %v11838_v17, %v3871_v7  ;;  %v4365_v21 = vmul.f32 %v11838_v17, %v3874_v32 }
 0x48e   : > { %8455 = vrot.lane.b32.xlu0 %v8454_v44, %s8620_s12  ;;  %v4366_v57 = vmul.f32 %v11838_v17, %v3875_v48  ;;  %v4830_v58 = vadd.f32 %v11852_v42, %v4339_v2  ;;  %v4831_v63 = vadd.f32 %v11852_v42, %v4340_v35  ;;  %v4834_v22 = vadd.f32 %v11852_v42, %v4343_v52  ;;  %v2886_v44 = vld [vmem:[#allocation2 + $0xf18] sm:$0xff]  ;;  %v2887_v35 = vld [vmem:[#allocation2 + $0xf20] sm:$0xff] }
 0x48f   : > { %v4835_v30 = vadd.f32 %v11852_v42, %v4344_v50  ;;  %v4852_v46 = vadd.f32 %v11852_v42, %v4361_v3  ;;  %v4853_v13 = vadd.f32 %v11852_v42, %v4362_v23  ;;  %v4856_v16 = vadd.f32 %v11852_v42, %v4365_v21  ;;  %v2890_v52 = vld [vmem:[#allocation2 + $0xf38] sm:$0xff]  ;;  %v2891_v50 = vld [vmem:[#allocation2 + $0xf40] sm:$0xff] }
 0x490   : > { %v4857_v39 = vadd.f32 %v11852_v42, %v4366_v57  ;;  %v5314_v53 = vmax.f32 %v4830_v58, 0.0  ;;  %v5315_v8 = vmax.f32 %v4831_v63, 0.0  ;;  %v5318_v38 = vmax.f32 %v4834_v22, 0.0 }
 0x491   : > { %v5319_v15 = vmax.f32 %v4835_v30, 0.0  ;;  %v5336_v7 = vmax.f32 %v4852_v46, 0.0  ;;  %v5337_v32 = vmax.f32 %v4853_v13, 0.0  ;;  %v5340_v48 = vmax.f32 %v4856_v16, 0.0 }
 0x492   : > { %v5341_v2 = vmax.f32 %v4857_v39, 0.0  ;;  %v3354_v3 = vsub.f32 %v2864_v12, %v9934_v9  ;;  %v3355_v21 = vsub.f32 %v2865_v25, %v9934_v9  ;;  %v3358_v57 = vsub.f32 %v2868_v59, %v9934_v9 }
 0x493   : > { %v5578_v23 = vmax.f32 %v5314_v53, %v5336_v7  ;;  %v3359_v58 = vsub.f32 %v2869_v19, %v9934_v9  ;;  %v5579_v63 = vmax.f32 %v5315_v8, %v5337_v32  ;;  %v5582_v22 = vmax.f32 %v5318_v38, %v5340_v48 }
 0x494   : > { %v5583_v30 = vmax.f32 %v5319_v15, %v5341_v2  ;;  %v3376_v46 = vsub.f32 %v2886_v44, %v9934_v9  ;;  %v3377_v13 = vsub.f32 %v2887_v35, %v9934_v9  ;;  %v3380_v16 = vsub.f32 %v2890_v52, %v9934_v9 }
 0x495   : > { %v3381_v39 = vsub.f32 %v2891_v50, %v9934_v9  ;;  %v3846_v12 = vmul.f32 %v10134_v27, %v3354_v3  ;;  %v5709_v53 = vmax.f32 %v5578_v23, %v5579_v63  ;;  %v3847_v25 = vmul.f32 %v10134_v27, %v3355_v21 }
 0x496   : > { %v5711_v7 = vmax.f32 %v5582_v22, %v5583_v30  ;;  %v3850_v59 = vmul.f32 %v10134_v27, %v3358_v57  ;;  %v3851_v19 = vmul.f32 %v10134_v27, %v3359_v58  ;;  %v3868_v8 = vmul.f32 %v10134_v27, %v3376_v46 }
 0x497   : > { %v3869_v38 = vmul.f32 %v10134_v27, %v3377_v13  ;;  %v3872_v15 = vmul.f32 %v10134_v27, %v3380_v16  ;;  %v3873_v32 = vmul.f32 %v10134_v27, %v3381_v39  ;;  %v4337_v48 = vmul.f32 %v11838_v17, %v3846_v12  ;;  %v11975_v13 = vpop.permute.xlu1 %8195 }
 0x498   : > { %v8469_v44 = vpack.i.bf16 %v5711_v7, %v5709_v53  ;;  %v4338_v2 = vmul.f32 %v11838_v17, %v3847_v25  ;;  %v4341_v35 = vmul.f32 %v11838_v17, %v3850_v59  ;;  %v4342_v52 = vmul.f32 %v11838_v17, %v3851_v19  ;;  %v2470_v7 = vld [vmem:[#allocation2 + $0x180] sm:$0xff]  ;;  %v2471_v25 = vld [vmem:[#allocation2 + $0x188] sm:$0xff] }
 0x499   : > { %v4359_v50 = vmul.f32 %v11838_v17, %v3868_v8  ;;  %v4360_v3 = vmul.f32 %v11838_v17, %v3869_v38  ;;  %v4363_v23 = vmul.f32 %v11838_v17, %v3872_v15  ;;  %v4364_v21 = vmul.f32 %v11838_v17, %v3873_v32  ;;  %v2474_v15 = vld [vmem:[#allocation2 + $0x1a0] sm:$0xff] }
 0x49a   : > { %8470 = vrot.lane.b32.xlu1 %v8469_v44, %s8621_s13  ;;  %v4828_v57 = vadd.f32 %v11852_v42, %v4337_v48  ;;  %v4829_v58 = vadd.f32 %v11852_v42, %v4338_v2  ;;  %v4832_v63 = vadd.f32 %v11852_v42, %v4341_v35  ;;  %v4833_v22 = vadd.f32 %v11852_v42, %v4342_v52  ;;  %v2475_v44 = vld [vmem:[#allocation2 + $0x1a8] sm:$0xff]  ;;  %v2492_v52 = vld [vmem:[#allocation2 + $0x238] sm:$0xff] }
 0x49b   : > { %v4850_v30 = vadd.f32 %v11852_v42, %v4359_v50  ;;  %v4851_v46 = vadd.f32 %v11852_v42, %v4360_v3  ;;  %v4854_v16 = vadd.f32 %v11852_v42, %v4363_v23  ;;  %v4855_v39 = vadd.f32 %v11852_v42, %v4364_v21  ;;  %v2493_v50 = vld [vmem:[#allocation2 + $0x240] sm:$0xff]  ;;  %v2496_v3 = vld [vmem:[#allocation2 + $0x258] sm:$0xff] }
 0x49c   : > { %v5312_v12 = vmax.f32 %v4828_v57, 0.0  ;;  %v5313_v53 = vmax.f32 %v4829_v58, 0.0  ;;  %v5316_v59 = vmax.f32 %v4832_v63, 0.0  ;;  %v5317_v19 = vmax.f32 %v4833_v22, 0.0  ;;  %v2497_v57 = vld [vmem:[#allocation2 + $0x260] sm:$0xff] }
 0x49d   : > { %v5334_v8 = vmax.f32 %v4850_v30, 0.0  ;;  %v5335_v38 = vmax.f32 %v4851_v46, 0.0  ;;  %v5338_v32 = vmax.f32 %v4854_v16, 0.0  ;;  %v5339_v48 = vmax.f32 %v4855_v39, 0.0  ;;  %v11985_v39 = vpop.permute.xlu0 %8185 }
 0x49e   : > { %v2960_v58 = vsub.f32 %v2470_v7, %v9934_v9  ;;  %v2961_v63 = vsub.f32 %v2471_v25, %v9934_v9  ;;  %v2964_v46 = vsub.f32 %v2474_v15, %v9934_v9  ;;  %v2965_v16 = vsub.f32 %v2475_v44, %v9934_v9 }
 0x49f   : > { %v5576_v23 = vmax.f32 %v5312_v12, %v5334_v8  ;;  %v5577_v21 = vmax.f32 %v5313_v53, %v5335_v38  ;;  %v5580_v22 = vmax.f32 %v5316_v59, %v5338_v32  ;;  %v5581_v30 = vmax.f32 %v5317_v19, %v5339_v48 }
 0x4a0   : > { %v2982_v35 = vsub.f32 %v2492_v52, %v9934_v9  ;;  %v2983_v28 = vsub.f32 %v2493_v50, %v9934_v9  ;;  %v2986_v12 = vsub.f32 %v2496_v3, %v9934_v9  ;;  %v2987_v7 = vsub.f32 %v2497_v57, %v9934_v9 }
 0x4a1   : > { %v5708_v2 = vmax.f32 %v5576_v23, %v5577_v21  ;;  %v11990_v53 = vmax.f32 %v5580_v22, %v5581_v30  ;;  %v3456_v25 = vmul.f32 %v10134_v27, %v2964_v46  ;;  %v3457_v59 = vmul.f32 %v10134_v27, %v2965_v16 }
 0x4a2   : > { %v3474_v19 = vmul.f32 %v10134_v27, %v2982_v35  ;;  %v3475_v8 = vmul.f32 %v10134_v27, %v2983_v28  ;;  %v3478_v38 = vmul.f32 %v10134_v27, %v2986_v12  ;;  %v8188_v15 = vunpack.i.h.bf16 %v11985_v39  ;;  %v2832_v12 = vld [vmem:[#allocation2 + $0xd50] sm:$0xff]  ;;  %v2858_v28 = vld [vmem:[#allocation2 + $0xe28] sm:$0xff] }
 0x4a3   : > { %13786 = vst [vmem:[#allocation32_spill] sm:$0xff] %v11990_v53  ;;  %v8464_v44 = vpack.i.bf16 %v11990_v53, %v5708_v2  ;;  %v3479_v32 = vmul.f32 %v10134_v27, %v2987_v7  ;;  %v3947_v48 = vmul.f32 %v11838_v17, %v3456_v25  ;;  %v3948_v52 = vmul.f32 %v11838_v17, %v3457_v59  ;;  %v2833_v7 = vld [vmem:[#allocation2 + $0xd58] sm:$0xff]  ;;  %v2859_v53 = vld [vmem:[#allocation2 + $0xe30] sm:$0xff] }
 0x4a4   : > { %v3965_v50 = vmul.f32 %v11838_v17, %v3474_v19  ;;  %v3966_v3 = vmul.f32 %v11838_v17, %v3475_v8  ;;  %v3969_v35 = vmul.f32 %v11838_v17, %v3478_v38  ;;  %v3452_v57 = vmul.f32 %v10134_v27, %v2960_v58  ;;  %v2836_v38 = vld [vmem:[#allocation2 + $0xd70] sm:$0xff] }
 0x4a5   : > { %8465 = vrot.lane.b32.xlu0 %v8464_v44, %s8619_s11  ;;  %v3970_v23 = vmul.f32 %v11838_v17, %v3479_v32  ;;  %v4438_v2 = vadd.f32 %v11852_v42, %v3947_v48  ;;  %v4439_v21 = vadd.f32 %v11852_v42, %v3948_v52  ;;  %v3453_v16 = vmul.f32 %v10134_v27, %v2961_v63  ;;  %v2837_v44 = vld [vmem:[#allocation2 + $0xd78] sm:$0xff] }
 0x4a6   : > { %v4456_v22 = vadd.f32 %v11852_v42, %v3965_v50  ;;  %v4457_v30 = vadd.f32 %v11852_v42, %v3966_v3  ;;  %v4460_v46 = vadd.f32 %v11852_v42, %v3969_v35  ;;  %v3943_v8 = vmul.f32 %v11838_v17, %v3452_v57  ;;  %v2854_v50 = vld [vmem:[#allocation2 + $0xe08] sm:$0xff]  ;;  %v2855_v3 = vld [vmem:[#allocation2 + $0xe10] sm:$0xff] }
 0x4a7   : > { %v4461_v25 = vadd.f32 %v11852_v42, %v3970_v23  ;;  %v4922_v59 = vmax.f32 %v4438_v2, 0.0  ;;  %v4923_v19 = vmax.f32 %v4439_v21, 0.0  ;;  %v3944_v52 = vmul.f32 %v11838_v17, %v3453_v16 }
 0x4a8   : > { %v4940_v32 = vmax.f32 %v4456_v22, 0.0  ;;  %v4941_v58 = vmax.f32 %v4457_v30, 0.0  ;;  %v4944_v48 = vmax.f32 %v4460_v46, 0.0  ;;  %v4434_v63 = vadd.f32 %v11852_v42, %v3943_v8 }
 0x4a9   : > { %v4945_v35 = vmax.f32 %v4461_v25, 0.0  ;;  %v3322_v23 = vsub.f32 %v2832_v12, %v9934_v9  ;;  %v3323_v2 = vsub.f32 %v2833_v7, %v9934_v9  ;;  %v4435_v57 = vadd.f32 %v11852_v42, %v3944_v52 }
 0x4aa   : > { %v5384_v21 = vmax.f32 %v4922_v59, %v4944_v48  ;;  %v3326_v22 = vsub.f32 %v2836_v38, %v9934_v9  ;;  %v3327_v30 = vsub.f32 %v2837_v44, %v9934_v9  ;;  %v4918_v16 = vmax.f32 %v4434_v63, 0.0 }
 0x4ab   : > { %v5385_v46 = vmax.f32 %v4923_v19, %v4945_v35  ;;  %v3344_v55 = vsub.f32 %v2854_v50, %v9934_v9  ;;  %v3345_v25 = vsub.f32 %v2855_v3, %v9934_v9  ;;  %v4919_v8 = vmax.f32 %v4435_v57, 0.0 }
 0x4ac   : > { %v3348_v56 = vsub.f32 %v2858_v28, %v9934_v9  ;;  %v3349_v12 = vsub.f32 %v2859_v53, %v9934_v9  ;;  %v3814_v7 = vmul.f32 %v10134_v27, %v3322_v23  ;;  %v5380_v48 = vmax.f32 %v4918_v16, %v4940_v32 }
 0x4ad   : > { %v5612_v59 = vmax.f32 %v5384_v21, %v5385_v46  ;;  %v3815_v52 = vmul.f32 %v10134_v27, %v3323_v2  ;;  %v3818_v38 = vmul.f32 %v10134_v27, %v3326_v22  ;;  %v5381_v44 = vmax.f32 %v4919_v8, %v4941_v58 }
 0x4ae   : > { %v3819_v19 = vmul.f32 %v10134_v27, %v3327_v30  ;;  %v3836_v50 = vmul.f32 %v10134_v27, %v3344_v55  ;;  %v3837_v3 = vmul.f32 %v10134_v27, %v3345_v25  ;;  %v3840_v53 = vmul.f32 %v10134_v27, %v3348_v56 }
 0x4af   : > { %v12036_v35 = vsel %vm1597_vm3, %v5612_v59, %v8188_v15  ;;  %v3841_v28 = vmul.f32 %v10134_v27, %v3349_v12  ;;  %v4305_v32 = vmul.f32 %v11838_v17, %v3814_v7  ;;  %v5610_v63 = vmax.f32 %v5380_v48, %v5381_v44  ;;  %v2820_v59 = vld [vmem:[#allocation2 + $0xcf0] sm:$0xff]  ;;  %v2821_v48 = vld [vmem:[#allocation2 + $0xcf8] sm:$0xff] }
 0x4b0   : > { %v4306_v23 = vmul.f32 %v11838_v17, %v3815_v52  ;;  %v4309_v58 = vmul.f32 %v11838_v17, %v3818_v38  ;;  %v4310_v2 = vmul.f32 %v11838_v17, %v3819_v19  ;;  %v4327_v55 = vmul.f32 %v11838_v17, %v3836_v50  ;;  %v2843_v50 = vld [vmem:[#allocation2 + $0xdb0] sm:$0xff] }
 0x4b1   : > { %v4328_v21 = vmul.f32 %v11838_v17, %v3837_v3  ;;  %v4331_v15 = vmul.f32 %v11838_v17, %v3840_v53  ;;  %v4332_v57 = vmul.f32 %v11838_v17, %v3841_v28  ;;  %v13787_v56 = vunpack.i.l.bf16 %v11985_v39  ;;  %v2842_v39 = vld [vmem:[#allocation2 + $0xda8] sm:$0xff] }
 0x4b2   : > { %v4796_v30 = vadd.f32 %v11852_v42, %v4305_v32  ;;  %v4797_v46 = vadd.f32 %v11852_v42, %v4306_v23  ;;  %v4800_v16 = vadd.f32 %v11852_v42, %v4309_v58  ;;  %v4801_v25 = vadd.f32 %v11852_v42, %v4310_v2 }
 0x4b3   : > { %v12051_v22 = vsel %vm1597_vm3, %v5610_v63, %v13787_v56  ;;  %v4818_v8 = vadd.f32 %v11852_v42, %v4327_v55  ;;  %v4819_v12 = vadd.f32 %v11852_v42, %v4328_v21  ;;  %v4822_v7 = vadd.f32 %v11852_v42, %v4331_v15  ;;  %v12064_v55 = vpop.permute.xlu1 %8200 }
 0x4b4   : > { %v4823_v52 = vadd.f32 %v11852_v42, %v4332_v57  ;;  %v5280_v38 = vmax.f32 %v4796_v30, 0.0  ;;  %v5281_v44 = vmax.f32 %v4797_v46, 0.0  ;;  %v5284_v19 = vmax.f32 %v4800_v16, 0.0 }
 0x4b5   : > { %v5285_v3 = vmax.f32 %v4801_v25, 0.0  ;;  %v5302_v53 = vmax.f32 %v4818_v8, 0.0  ;;  %v5303_v28 = vmax.f32 %v4819_v12, 0.0  ;;  %v5306_v32 = vmax.f32 %v4822_v7, 0.0  ;;  %v2424_v8 = vld [vmem:[#allocation2] sm:$0xff]  ;;  %v2425_v12 = vld [vmem:[#allocation2 + $0x8] sm:$0xff] }
 0x4b6   : > { %v5307_v63 = vmax.f32 %v4823_v52, 0.0  ;;  %v3310_v23 = vsub.f32 %v2820_v59, %v9934_v9  ;;  %v3311_v58 = vsub.f32 %v2821_v48, %v9934_v9  ;;  %v3332_v2 = vsub.f32 %v2842_v39, %v9934_v9  ;;  %v2446_v7 = vld [vmem:[#allocation2 + $0xb8] sm:$0xff] }
 0x4b7   : > { %v5566_v21 = vmax.f32 %v5280_v38, %v5302_v53  ;;  %v5567_v15 = vmax.f32 %v5281_v44, %v5303_v28  ;;  %v5570_v57 = vmax.f32 %v5284_v19, %v5306_v32  ;;  %v3333_v56 = vsub.f32 %v2843_v50, %v9934_v9  ;;  %v12080_v53 = vpop.permute.xlu0 %8190 }
 0x4b8   : > { %v5571_v30 = vmax.f32 %v5285_v3, %v5307_v63  ;;  %v3802_v46 = vmul.f32 %v10134_v27, %v3310_v23  ;;  %v3803_v16 = vmul.f32 %v10134_v27, %v3311_v58  ;;  %v3824_v25 = vmul.f32 %v10134_v27, %v3332_v2  ;;  %v2447_v3 = vld [vmem:[#allocation2 + $0xc0] sm:$0xff] }
 0x4b9   : > { %v12070_v59 = vmax.f32 %v5566_v21, %v5567_v15  ;;  %v3825_v48 = vmul.f32 %v10134_v27, %v3333_v56  ;;  %v8203_v39 = vunpack.i.h.bf16 %v12064_v55  ;;  %v2914_v32 = vsub.f32 %v2424_v8, %v9934_v9 }
 0x4ba   : > { %v12075_v38 = vmax.f32 %v5570_v57, %v5571_v30  ;;  %v4293_v44 = vmul.f32 %v11838_v17, %v3802_v46  ;;  %v4294_v19 = vmul.f32 %v11838_v17, %v3803_v16  ;;  %v4315_v50 = vmul.f32 %v11838_v17, %v3824_v25 }
 0x4bb   : > { %v4316_v28 = vmul.f32 %v11838_v17, %v3825_v48  ;;  %v2915_v63 = vsub.f32 %v2425_v12, %v9934_v9  ;;  %v2936_v23 = vsub.f32 %v2446_v7, %v9934_v9  ;;  %v2937_v56 = vsub.f32 %v2447_v3, %v9934_v9  ;;  %v2872_v7 = vld [vmem:[#allocation2 + $0xea0] sm:$0xff]  ;;  %v2873_v3 = vld [vmem:[#allocation2 + $0xea8] sm:$0xff] }
 0x4bc   : > { %v8479_v58 = vpack.i.bf16 %v12075_v38, %v12070_v59  ;;  %v4784_v2 = vadd.f32 %v11852_v42, %v4293_v44  ;;  %v4785_v21 = vadd.f32 %v11852_v42, %v4294_v19  ;;  %v4806_v15 = vadd.f32 %v11852_v42, %v4315_v50  ;;  %v2895_v12 = vld [vmem:[#allocation2 + $0xf60] sm:$0xff] }
 0x4bd   : > { %v4807_v57 = vadd.f32 %v11852_v42, %v4316_v28  ;;  %v3428_v30 = vmul.f32 %v10134_v27, %v2936_v23  ;;  %v8193_v46 = vunpack.i.h.bf16 %v12080_v53  ;;  %v3429_v44 = vmul.f32 %v10134_v27, %v2937_v56  ;;  %v2876_v28 = vld [vmem:[#allocation2 + $0xec0] sm:$0xff] }
 0x4be   : > { %8480 = vrot.lane.b32.xlu1 %v8479_v58, %s8620_s12  ;;  %v5268_v16 = vmax.f32 %v4784_v2, 0.0  ;;  %v5269_v25 = vmax.f32 %v4785_v21, 0.0  ;;  %v5290_v8 = vmax.f32 %v4806_v15, 0.0  ;;  %v3406_v58 = vmul.f32 %v10134_v27, %v2914_v32  ;;  %v2877_v21 = vld [vmem:[#allocation2 + $0xec8] sm:$0xff] }
 0x4bf   : > { %v5291_v48 = vmax.f32 %v4807_v57, 0.0  ;;  %v3919_v19 = vmul.f32 %v11838_v17, %v3428_v30  ;;  %v6216_v50 = vsel %vm1597_vm3, %v10342_v14, %v8193_v46  ;;  %v3407_v2 = vmul.f32 %v10134_v27, %v2915_v63  ;;  %v2894_v30 = vld [vmem:[#allocation2 + $0xf58] sm:$0xff] }
 0x4c0   : > { %v5554_v23 = vmax.f32 %v5268_v16, %v5290_v8  ;;  %v12102_v52 = vsel %vm825_vm2, %v6216_v50, %v8203_v39  ;;  %v3920_v57 = vmul.f32 %v11838_v17, %v3429_v44  ;;  %v3362_v14 = vsub.f32 %v2872_v7, %v9934_v9  ;;  %v2898_v39 = vld [vmem:[#allocation2 + $0xf78] sm:$0xff]  ;;  %v2899_v8 = vld [vmem:[#allocation2 + $0xf80] sm:$0xff] }
 0x4c1   : > { %v5555_v15 = vmax.f32 %v5269_v25, %v5291_v48  ;;  %v4410_v56 = vadd.f32 %v11852_v42, %v3919_v19  ;;  %v3897_v46 = vmul.f32 %v11838_v17, %v3406_v58  ;;  %v3898_v16 = vmul.f32 %v11838_v17, %v3407_v2 }
 0x4c2   : > { %v3363_v32 = vsub.f32 %v2873_v3, %v9934_v9  ;;  %v3366_v63 = vsub.f32 %v2876_v28, %v9934_v9  ;;  %v4411_v25 = vadd.f32 %v11852_v42, %v3920_v57  ;;  %v3367_v44 = vsub.f32 %v2877_v21, %v9934_v9 }
 0x4c3   : > { %v5697_v50 = vmax.f32 %v5554_v23, %v5555_v15  ;;  %v4894_v48 = vmax.f32 %v4410_v56, 0.0  ;;  %v4388_v19 = vadd.f32 %v11852_v42, %v3897_v46  ;;  %v4389_v7 = vadd.f32 %v11852_v42, %v3898_v16 }
 0x4c4   : > { %v3384_v58 = vsub.f32 %v2894_v30, %v9934_v9  ;;  %v3385_v2 = vsub.f32 %v2895_v12, %v9934_v9  ;;  %v4895_v20 = vmax.f32 %v4411_v25, 0.0  ;;  %v3388_v3 = vsub.f32 %v2898_v39, %v9934_v9 }
 0x4c5   : > { %v8474_v10 = vpack.i.bf16 %v11913_v45, %v5697_v50  ;;  %v3389_v28 = vsub.f32 %v2899_v8, %v9934_v9  ;;  %v4872_v23 = vmax.f32 %v4388_v19, 0.0  ;;  %v4873_v15 = vmax.f32 %v4389_v7, 0.0 }
 0x4c6   : > { %v3854_v57 = vmul.f32 %v10134_v27, %v3362_v14  ;;  %v3855_v21 = vmul.f32 %v10134_v27, %v3363_v32  ;;  %v3858_v56 = vmul.f32 %v10134_v27, %v3366_v63  ;;  %v3859_v30 = vmul.f32 %v10134_v27, %v3367_v44 }
 0x4c7   : > { %8475 = vrot.lane.b32.xlu0 %v8474_v10, %s8621_s13  ;;  %v3876_v12 = vmul.f32 %v10134_v27, %v3384_v58  ;;  %v3877_v45 = vmul.f32 %v10134_v27, %v3385_v2  ;;  %v5356_v46 = vmax.f32 %v4872_v23, %v4894_v48  ;;  %v5357_v16 = vmax.f32 %v4873_v15, %v4895_v20 }
 0x4c8   : > { %v3880_v39 = vmul.f32 %v10134_v27, %v3388_v3  ;;  %v3881_v8 = vmul.f32 %v10134_v27, %v3389_v28  ;;  %v4345_v14 = vmul.f32 %v11838_v17, %v3854_v57  ;;  %v4346_v32 = vmul.f32 %v11838_v17, %v3855_v21 }
 0x4c9   : > { %v4349_v10 = vmul.f32 %v11838_v17, %v3858_v56  ;;  %v4350_v63 = vmul.f32 %v11838_v17, %v3859_v30  ;;  %v5598_v50 = vmax.f32 %v5356_v46, %v5357_v16  ;;  %v4367_v25 = vmul.f32 %v11838_v17, %v3876_v12 }
 0x4ca   : > { %v4368_v44 = vmul.f32 %v11838_v17, %v3877_v45  ;;  %v4371_v48 = vmul.f32 %v11838_v17, %v3880_v39  ;;  %v4372_v20 = vmul.f32 %v11838_v17, %v3881_v8  ;;  %v4836_v19 = vadd.f32 %v11852_v42, %v4345_v14  ;;  %v12155_v45 = vpop.permute.xlu1 %8210 }
 0x4cb   : > { %v4837_v7 = vadd.f32 %v11852_v42, %v4346_v32  ;;  %v4840_v58 = vadd.f32 %v11852_v42, %v4349_v10  ;;  %v13788_v2 = vunpack.i.l.bf16 %v12080_v53  ;;  %v4841_v28 = vadd.f32 %v11852_v42, %v4350_v63  ;;  %v12157_v53 = vpop.permute.xlu0 %8205  ;;  %v2874_v63 = vld [vmem:[#allocation2 + $0xeb0] sm:$0xff] }
 0x4cc   : > { %v4858_v23 = vadd.f32 %v11852_v42, %v4367_v25  ;;  %v4859_v15 = vadd.f32 %v11852_v42, %v4368_v44  ;;  %v13789_v57 = vunpack.i.l.bf16 %v12064_v55  ;;  %v4862_v56 = vadd.f32 %v11852_v42, %v4371_v48  ;;  %v2878_v25 = vld [vmem:[#allocation2 + $0xed0] sm:$0xff] }
 0x4cd   : > { %v6215_v3 = vsel %vm1597_vm3, %v5598_v50, %v13788_v2  ;;  %v4863_v30 = vadd.f32 %v11852_v42, %v4372_v20  ;;  %v5320_v12 = vmax.f32 %v4836_v19, 0.0  ;;  %v5321_v46 = vmax.f32 %v4837_v7, 0.0  ;;  %v2875_v50 = vld [vmem:[#allocation2 + $0xeb8] sm:$0xff]  ;;  %v8539_v2 = vld [vmem:[%s13587_s4 + $0x80] sm:$0xff]  }
 0x4ce   : > { %v12151_v21 = vsel %vm825_vm2, %v6215_v3, %v13789_v57  ;;  %v5324_v16 = vmax.f32 %v4840_v58, 0.0  ;;  %v5325_v39 = vmax.f32 %v4841_v28, 0.0  ;;  %v5342_v8 = vmax.f32 %v4858_v23, 0.0  ;;  %v2879_v7 = vld [vmem:[#allocation2 + $0xed8] sm:$0xff]  ;;  %v2896_v58 = vld [vmem:[#allocation2 + $0xf68] sm:$0xff]  ;;  %v2901_v57 = vld [vmem:[#allocation2 + $0xf90] sm:$0xff] }
 0x4cf   : > { %v5343_v14 = vmax.f32 %v4859_v15, 0.0  ;;  %v5346_v32 = vmax.f32 %v4862_v56, 0.0  ;;  %v5347_v10 = vmax.f32 %v4863_v30, 0.0  ;;  %v8484_v55 = vpack.i.bf16 %v11872_v33, %v11691_v62  ;;  %v2897_v33 = vld [vmem:[#allocation2 + $0xf70] sm:$0xff]  ;;  %v2900_v15 = vld [vmem:[#allocation2 + $0xf88] sm:$0xff]  ;;  %v2501_v20 = vld [vmem:[#allocation2 + $0x280] sm:$0xff] }
 0x4d0   : > { %v5584_v44 = vmax.f32 %v5320_v12, %v5342_v8  ;;  %v8499_v56 = vpack.i.bf16 %v12070_v59, %v11915_v26  ;;  %v3364_v30 = vsub.f32 %v2874_v63, %v9934_v9  ;;  %v3365_v12 = vsub.f32 %v2875_v50, %v9934_v9 }
 0x4d1   : > { %v5585_v3 = vmax.f32 %v5321_v46, %v5343_v14  ;;  %v5588_v28 = vmax.f32 %v5324_v16, %v5346_v32  ;;  %v5589_v23 = vmax.f32 %v5325_v39, %v5347_v10  ;;  %8485 = vrot.lane.b32.xlu0 %v8484_v55, %s8620_s12  ;;  %v13654_v46 = vmov 0.0   ;;  %v8541_v10 = vld [vmem:[%s13587_s4 + $0x88] sm:$0xff]  }
 0x4d2   : > { %8025 = vmatprep.subr.bf16.mxu1 %v13654_v46  ;;  %v3368_v16 = vsub.f32 %v2878_v25, %v9934_v9  ;;  %v3369_v39 = vsub.f32 %v2879_v7, %v9934_v9  ;;  %v3386_v14 = vsub.f32 %v2896_v58, %v9934_v9  ;;  %v3387_v32 = vsub.f32 %v2897_v33, %v9934_v9 }
 0x4d3   : > { %v12173_v8 = vmax.f32 %v5584_v44, %v5585_v3  ;;  %v12175_v48 = vmax.f32 %v5588_v28, %v5589_v23  ;;  %v3390_v26 = vsub.f32 %v2900_v15, %v9934_v9  ;;  %v3391_v59 = vsub.f32 %v2901_v57, %v9934_v9  ;;  %8026 = vmatpush3.bf16.msra.mxu1 %v8539_v2 }
 0x4d4   : > { %v3856_v63 = vmul.f32 %v10134_v27, %v3364_v30  ;;  %v3857_v50 = vmul.f32 %v10134_v27, %v3365_v12  ;;  %v3860_v25 = vmul.f32 %v10134_v27, %v3368_v16  ;;  %8027 = vmatprep.subr.bf16.mxu1 %v13654_v46  ;;  %v3861_v44 = vmul.f32 %v10134_v27, %v3369_v39  ;;  %v2483_v46 = vld [vmem:[#allocation2 + $0x1e8] sm:$0xff] }
 0x4d5   : > { %13790 = vst [vmem:[#allocation33_spill] sm:$0xff] %v12175_v48  ;;  %v8489_v55 = vpack.i.bf16 %v12175_v48, %v12173_v8  ;;  %v3878_v7 = vmul.f32 %v10134_v27, %v3386_v14  ;;  %v3879_v58 = vmul.f32 %v10134_v27, %v3387_v32  ;;  %v3882_v2 = vmul.f32 %v10134_v27, %v3390_v26 }
 0x4d6   : > { %v3883_v3 = vmul.f32 %v10134_v27, %v3391_v59  ;;  %v4347_v28 = vmul.f32 %v11838_v17, %v3856_v63  ;;  %v4348_v23 = vmul.f32 %v11838_v17, %v3857_v50  ;;  %v4351_v33 = vmul.f32 %v11838_v17, %v3860_v25  ;;  %v8221_v50 = vpop.permute.xlu1 %8220  ;;  %v2478_v25 = vld [vmem:[#allocation2 + $0x1c0] sm:$0xff] }
 0x4d7   : > { %8490 = vrot.lane.b32.xlu1 %v8489_v55, %s8619_s11  ;;  %v4352_v15 = vmul.f32 %v11838_v17, %v3861_v44  ;;  %v4369_v57 = vmul.f32 %v11838_v17, %v3878_v7  ;;  %v4370_v30 = vmul.f32 %v11838_v17, %v3879_v58  ;;  %v4373_v12 = vmul.f32 %v11838_v17, %v3882_v2  ;;  %v2479_v58 = vld [vmem:[#allocation2 + $0x1c8] sm:$0xff] }
 0x4d8   : > { %8028 = vmatpush3.bf16.msra.mxu1 %v8541_v10  ;;  %v4374_v16 = vmul.f32 %v11838_v17, %v3883_v3  ;;  %v4838_v39 = vadd.f32 %v11852_v42, %v4347_v28  ;;  %v4839_v14 = vadd.f32 %v11852_v42, %v4348_v23  ;;  %v4842_v32 = vadd.f32 %v11852_v42, %v4351_v33  ;;  %v2482_v33 = vld [vmem:[#allocation2 + $0x1e0] sm:$0xff] }
 0x4d9   : > { %v4843_v26 = vadd.f32 %v11852_v42, %v4352_v15  ;;  %v4860_v59 = vadd.f32 %v11852_v42, %v4369_v57  ;;  %v4861_v55 = vadd.f32 %v11852_v42, %v4370_v30  ;;  %v4864_v63 = vadd.f32 %v11852_v42, %v4373_v12  ;;  %v2500_v12 = vld [vmem:[#allocation2 + $0x278] sm:$0xff] }
 0x4da   : > { %v4865_v17 = vadd.f32 %v11852_v42, %v4374_v16  ;;  %v5322_v10 = vmax.f32 %v4838_v39, 0.0  ;;  %v5323_v44 = vmax.f32 %v4839_v14, 0.0  ;;  %v5326_v7 = vmax.f32 %v4842_v32, 0.0  ;;  %v2504_v16 = vld [vmem:[#allocation2 + $0x298] sm:$0xff]  ;;  %v2505_v39 = vld [vmem:[#allocation2 + $0x2a0] sm:$0xff] }
 0x4db   : > { %8500 = vrot.lane.b32.xlu1 %v8499_v56, %s8621_s13  ;;  %v5327_v2 = vmax.f32 %v4843_v26, 0.0  ;;  %v5344_v3 = vmax.f32 %v4860_v59, 0.0  ;;  %v5345_v28 = vmax.f32 %v4861_v55, 0.0  ;;  %v5348_v23 = vmax.f32 %v4864_v63, 0.0 }
 0x4dc   : > { %v5349_v15 = vmax.f32 %v4865_v17, 0.0  ;;  %v8223_v57 = vunpack.i.h.bf16 %v8221_v50  ;;  %v8222_v30 = vunpack.i.l.bf16 %v8221_v50  ;;  %v2968_v19 = vsub.f32 %v2478_v25, %v9934_v9 }
 0x4dd   : > { %v5586_v56 = vmax.f32 %v5322_v10, %v5344_v3  ;;  %v5587_v62 = vmax.f32 %v5323_v44, %v5345_v28  ;;  %v5590_v42 = vmax.f32 %v5326_v7, %v5348_v23  ;;  %v2969_v14 = vsub.f32 %v2479_v58, %v9934_v9  ;;  %v12243_v23 = vld [vmem:[%s13585_s2] ss:$0 sm:$0xff] }
 0x4de   : > { %v5591_v32 = vmax.f32 %v5327_v2, %v5349_v15  ;;  %v12220_v26 = vsel %vm1597_vm3, %v10596_v5, %v8223_v57  ;;  %v12224_v59 = vsel %vm1597_vm3, %v10353_v54, %v8222_v30  ;;  %v2972_v55 = vsub.f32 %v2482_v33, %v9934_v9 }
 0x4df   : > { %v5713_v63 = vmax.f32 %v5586_v56, %v5587_v62  ;;  %v2973_v50 = vsub.f32 %v2483_v46, %v9934_v9  ;;  %v2990_v25 = vsub.f32 %v2500_v12, %v9934_v9  ;;  %v2991_v17 = vsub.f32 %v2501_v20, %v9934_v9 }
 0x4e0   : > { %v5715_v10 = vmax.f32 %v5590_v42, %v5591_v32  ;;  %v2994_v44 = vsub.f32 %v2504_v16, %v9934_v9  ;;  %v2995_v7 = vsub.f32 %v2505_v39, %v9934_v9  ;;  %v3460_v5 = vmul.f32 %v10134_v27, %v2968_v19  ;;  %v12257_v16 = vld [vmem:[%s13586_s3] ss:$0 sm:$0xff] }
 0x4e1   : > { %v3461_v58 = vmul.f32 %v10134_v27, %v2969_v14  ;;  %v3464_v54 = vmul.f32 %v10134_v27, %v2972_v55  ;;  %v3465_v2 = vmul.f32 %v10134_v27, %v2973_v50  ;;  %v3482_v62 = vmul.f32 %v10134_v27, %v2990_v25 }
 0x4e2   : > { %v8494_v46 = vpack.i.bf16 %v5715_v10, %v5713_v63  ;;  %v3483_v3 = vmul.f32 %v10134_v27, %v2991_v17  ;;  %v3486_v20 = vmul.f32 %v10134_v27, %v2994_v44  ;;  %v3487_v28 = vmul.f32 %v10134_v27, %v2995_v7  ;;  %v8216_v10 = vpop.permute.xlu0 %8215  ;;  %v2840_v44 = vld [vmem:[#allocation2 + $0xd90] sm:$0xff]  ;;  %v2841_v7 = vld [vmem:[#allocation2 + $0xd98] sm:$0xff] }
 0x4e3   : > { %v3951_v19 = vmul.f32 %v12243_v23, %v3460_v5  ;;  %v3952_v33 = vmul.f32 %v12243_v23, %v3461_v58  ;;  %v3955_v15 = vmul.f32 %v12243_v23, %v3464_v54  ;;  %v3956_v57 = vmul.f32 %v12243_v23, %v3465_v2 }
 0x4e4   : > { %8495 = vrot.lane.b32.xlu0 %v8494_v46, %s8621_s13  ;;  %v3973_v30 = vmul.f32 %v12243_v23, %v3482_v62  ;;  %v3974_v12 = vmul.f32 %v12243_v23, %v3483_v3  ;;  %v3977_v56 = vmul.f32 %v12243_v23, %v3486_v20  ;;  %v3978_v42 = vmul.f32 %v12243_v23, %v3487_v28  ;;  %v2862_v28 = vld [vmem:[#allocation2 + $0xe48] sm:$0xff] }
 0x4e5   : > { %v4442_v39 = vadd.f32 %v12257_v16, %v3951_v19  ;;  %v4443_v14 = vadd.f32 %v12257_v16, %v3952_v33  ;;  %v4446_v32 = vadd.f32 %v12257_v16, %v3955_v15  ;;  %v4447_v55 = vadd.f32 %v12257_v16, %v3956_v57  ;;  %v2863_v19 = vld [vmem:[#allocation2 + $0xe50] sm:$0xff] }
 0x4e6   : > { %v4464_v63 = vadd.f32 %v12257_v16, %v3973_v30  ;;  %v4465_v50 = vadd.f32 %v12257_v16, %v3974_v12  ;;  %v4468_v25 = vadd.f32 %v12257_v16, %v3977_v56  ;;  %v4469_v17 = vadd.f32 %v12257_v16, %v3978_v42 }
 0x4e7   : > { %v4926_v5 = vmax.f32 %v4442_v39, 0.0  ;;  %v4927_v58 = vmax.f32 %v4443_v14, 0.0  ;;  %v4930_v54 = vmax.f32 %v4446_v32, 0.0  ;;  %v4931_v2 = vmax.f32 %v4447_v55, 0.0 }
 0x4e8   : > { %v4948_v62 = vmax.f32 %v4464_v63, 0.0  ;;  %v4949_v46 = vmax.f32 %v4465_v50, 0.0  ;;  %v4952_v3 = vmax.f32 %v4468_v25, 0.0  ;;  %v4953_v20 = vmax.f32 %v4469_v17, 0.0 }
 0x4e9   : > { %v8218_v33 = vunpack.i.h.bf16 %v8216_v10  ;;  %v8217_v15 = vunpack.i.l.bf16 %v8216_v10  ;;  %v3330_v57 = vsub.f32 %v2840_v44, %v9934_v9  ;;  %v3331_v30 = vsub.f32 %v2841_v7, %v9934_v9 }
 0x4ea   : > { %v5388_v12 = vmax.f32 %v4926_v5, %v4948_v62  ;;  %v5389_v56 = vmax.f32 %v4927_v58, %v4949_v46  ;;  %v5392_v42 = vmax.f32 %v4930_v54, %v4952_v3  ;;  %v5393_v48 = vmax.f32 %v4931_v2, %v4953_v20  ;;  %v2796_v58 = vld [vmem:[#allocation2 + $0xc20] sm:$0xff]  ;;  %v2797_v54 = vld [vmem:[#allocation2 + $0xc28] sm:$0xff]  ;;  %v2818_v2 = vld [vmem:[#allocation2 + $0xcd8] sm:$0xff] }
 0x4eb   : > { %v3352_v39 = vsub.f32 %v2862_v28, %v9934_v9  ;;  %v3353_v14 = vsub.f32 %v2863_v19, %v9934_v9  ;;  %v3822_v32 = vmul.f32 %v10134_v27, %v3330_v57  ;;  %v3823_v55 = vmul.f32 %v10134_v27, %v3331_v30  ;;  %v2819_v30 = vld [vmem:[#allocation2 + $0xce0] sm:$0xff] }
 0x4ec   : > { %v5614_v63 = vmax.f32 %v5388_v12, %v5389_v56  ;;  %v5616_v50 = vmax.f32 %v5392_v42, %v5393_v48  ;;  %v13791_v25 = vunpack.i.h.bf16 %v11975_v13  ;;  %v13792_v46 = vunpack.i.l.bf16 %v11975_v13  ;;  %v2881_v12 = vld [vmem:[#allocation2 + $0xee8] sm:$0xff] }
 0x4ed   : > { %v3844_v10 = vmul.f32 %v10134_v27, %v3352_v39  ;;  %v3845_v44 = vmul.f32 %v10134_v27, %v3353_v14  ;;  %v4313_v7 = vmul.f32 %v12243_v23, %v3822_v32  ;;  %v4314_v5 = vmul.f32 %v12243_v23, %v3823_v55  ;;  %v2903_v39 = vld [vmem:[#allocation2 + $0xfa0] sm:$0xff] }
 0x4ee   : > { %v6316_v17 = vsel %vm825_vm2, %v12051_v22, %v13791_v25  ;;  %v12282_v62 = vsel %vm1597_vm3, %v5616_v50, %v8218_v33  ;;  %v12285_v48 = vsel %vm1597_vm3, %v5614_v63, %v8217_v15  ;;  %v6317_v22 = vsel %vm825_vm2, %v12036_v35, %v13792_v46  ;;  %v2880_v15 = vld [vmem:[#allocation2 + $0xee0] sm:$0xff]  ;;  %v2902_v35 = vld [vmem:[#allocation2 + $0xf98] sm:$0xff] }
 0x4ef   : > { %v13793_v3 = vunpack.i.l.bf16 %v12157_v53  ;;  %v4335_v28 = vmul.f32 %v12243_v23, %v3844_v10  ;;  %v4336_v19 = vmul.f32 %v12243_v23, %v3845_v44  ;;  %v4804_v57 = vadd.f32 %v12257_v16, %v4313_v7 }
 0x4f0   : > { %v4805_v33 = vadd.f32 %v12257_v16, %v4314_v5  ;;  %v13794_v56 = vunpack.i.h.bf16 %v12157_v53  ;;  %v3286_v14 = vsub.f32 %v2796_v58, %v9934_v9  ;;  %v3287_v32 = vsub.f32 %v2797_v54, %v9934_v9 }
 0x4f1   : > { %v6341_v20 = vsel %vm6265_vm5, %v6316_v17, %v13793_v3  ;;  %v3308_v55 = vsub.f32 %v2818_v2, %v9934_v9  ;;  %v4826_v63 = vadd.f32 %v12257_v16, %v4335_v28  ;;  %v4827_v50 = vadd.f32 %v12257_v16, %v4336_v19 }
 0x4f2   : > { %v6342_v42 = vsel %vm6265_vm5, %v6317_v22, %v13794_v56  ;;  %v5288_v25 = vmax.f32 %v4804_v57, 0.0  ;;  %v5289_v17 = vmax.f32 %v4805_v33, 0.0  ;;  %v3309_v44 = vsub.f32 %v2819_v30, %v9934_v9 }
 0x4f3   : > { %v6367_v10 = vpack.c.bf16 %v6342_v42, %v6341_v20  ;;  %v3370_v53 = vsub.f32 %v2880_v15, %v9934_v9  ;;  %v3371_v7 = vsub.f32 %v2881_v12, %v9934_v9  ;;  %v5310_v5 = vmax.f32 %v4826_v63, 0.0  ;;  %v8231_v42 = vpop.permute.xlu1 %8230 }
 0x4f4   : > { %v5311_v46 = vmax.f32 %v4827_v50, 0.0  ;;  %v3392_v58 = vsub.f32 %v2902_v35, %v9934_v9  ;;  %v3393_v54 = vsub.f32 %v2903_v39, %v9934_v9  ;;  %v3778_v2 = vmul.f32 %v10134_v27, %v3286_v14 }
 0x4f5   : > { %6620 = vmatprep.mubr.bf16.mxu0 %v6367_v10  ;;  %v3779_v22 = vmul.f32 %v10134_v27, %v3287_v32  ;;  %v3800_v3 = vmul.f32 %v10134_v27, %v3308_v55  ;;  %v3801_v20 = vmul.f32 %v10134_v27, %v3309_v44  ;;  %v5574_v28 = vmax.f32 %v5288_v25, %v5310_v5 }
 0x4f6   : > { %v5575_v19 = vmax.f32 %v5289_v17, %v5311_v46  ;;  %v3862_v57 = vmul.f32 %v10134_v27, %v3370_v53  ;;  %v3863_v33 = vmul.f32 %v10134_v27, %v3371_v7  ;;  %v3884_v30 = vmul.f32 %v10134_v27, %v3392_v58 }
 0x4f7   : > { %v3885_v15 = vmul.f32 %v10134_v27, %v3393_v54  ;;  %v4269_v12 = vmul.f32 %v12243_v23, %v3778_v2  ;;  %v4270_v56 = vmul.f32 %v12243_v23, %v3779_v22  ;;  %v4291_v39 = vmul.f32 %v12243_v23, %v3800_v3  ;;  %v12336_v54 = vpop.permute.xlu0 %8225 }
 0x4f8   : > { %v5707_v35 = vmax.f32 %v5574_v28, %v5575_v19  ;;  %v4292_v14 = vmul.f32 %v12243_v23, %v3801_v20  ;;  %v4353_v32 = vmul.f32 %v12243_v23, %v3862_v57  ;;  %v4354_v55 = vmul.f32 %v12243_v23, %v3863_v33  ;;  %v12339_v33 = vpop.permute.xlu1 %8240 }
 0x4f9   : > { %v4375_v63 = vmul.f32 %v12243_v23, %v3884_v30  ;;  %v4376_v50 = vmul.f32 %v12243_v23, %v3885_v15  ;;  %v4760_v25 = vadd.f32 %v12257_v16, %v4269_v12  ;;  %v4761_v10 = vadd.f32 %v12257_v16, %v4270_v56 }
 0x4fa   : > { %v8504_v17 = vpack.i.bf16 %v11874_v60, %v5707_v35  ;;  %v4782_v44 = vadd.f32 %v12257_v16, %v4291_v39  ;;  %v4783_v53 = vadd.f32 %v12257_v16, %v4292_v14  ;;  %v4844_v7 = vadd.f32 %v12257_v16, %v4353_v32 }
 0x4fb   : > { %v4845_v5 = vadd.f32 %v12257_v16, %v4354_v55  ;;  %v4866_v46 = vadd.f32 %v12257_v16, %v4375_v63  ;;  %v4867_v58 = vadd.f32 %v12257_v16, %v4376_v50  ;;  %v5244_v2 = vmax.f32 %v4760_v25, 0.0  ;;  %v2882_v50 = vld [vmem:[#allocation2 + $0xef0] sm:$0xff] }
 0x4fc   : > { %8505 = vrot.lane.b32.xlu0 %v8504_v17, %s8620_s12  ;;  %v5245_v60 = vmax.f32 %v4761_v10, 0.0  ;;  %v5266_v22 = vmax.f32 %v4782_v44, 0.0  ;;  %v5267_v3 = vmax.f32 %v4783_v53, 0.0  ;;  %v5328_v20 = vmax.f32 %v4844_v7, 0.0  ;;  %v2883_v53 = vld [vmem:[#allocation2 + $0xef8] sm:$0xff]  ;;  %v2904_v7 = vld [vmem:[#allocation2 + $0xfa8] sm:$0xff] }
 0x4fd   : > { %v5329_v28 = vmax.f32 %v4845_v5, 0.0  ;;  %v5350_v19 = vmax.f32 %v4866_v46, 0.0  ;;  %v5351_v57 = vmax.f32 %v4867_v58, 0.0  ;;  %v13795_v12 = vunpack.i.l.bf16 %v12155_v45  ;;  %v12361_v46 = vpop.permute.xlu0 %8235 }
 0x4fe   : > { %v5552_v30 = vmax.f32 %v5244_v2, %v5266_v22  ;;  %v5553_v15 = vmax.f32 %v5245_v60, %v5267_v3  ;;  %v13796_v35 = vunpack.i.h.bf16 %v12155_v45  ;;  %v8233_v63 = vunpack.i.h.bf16 %v8231_v42 }
 0x4ff   : > { %v6266_v56 = vsel %vm6265_vm5, %v12151_v21, %v13795_v12  ;;  %v5592_v14 = vmax.f32 %v5328_v20, %v5350_v19  ;;  %v5593_v32 = vmax.f32 %v5329_v28, %v5351_v57  ;;  %v8232_v17 = vunpack.i.l.bf16 %v8231_v42  ;;  %v2905_v21 = vld [vmem:[#allocation2 + $0xfb0] sm:$0xff]  ;;  %v8251_v20 = vpop.permute.xlu1 %8250 }
 0x500   : > { %v6267_v39 = vsel %vm6265_vm5, %v12102_v52, %v13796_v35  ;;  %v12349_v25 = vmax.f32 %v5552_v30, %v5553_v15  ;;  %v13657_v10 = vunpack.i.h.bf16 %v12336_v54  ;;  %v13658_v44 = vunpack.i.l.bf16 %v12336_v54  ;;  %v2487_v15 = vld [vmem:[#allocation2 + $0x208] sm:$0xff] }
 0x501   : > { %v6366_v55 = vpack.c.bf16 %v6267_v39, %v6266_v56  ;;  %v12353_v5 = vmax.f32 %v5592_v14, %v5593_v32  ;;  %v12357_v52 = vsel %vm825_vm2, %v12220_v26, %v8233_v63  ;;  %v6368_v45 = vpack.c.bf16 %v10634_v6, %v10242_v36  ;;  %v2508_v14 = vld [vmem:[#allocation2 + $0x2b8] sm:$0xff] }
 0x502   : > { %v12365_v42 = vsel %vm825_vm2, %v12224_v59, %v8232_v17  ;;  %v12371_v58 = vsel %vm825_vm2, %v12285_v48, %v13658_v44  ;;  %v12377_v26 = vsel %vm825_vm2, %v12282_v62, %v13657_v10  ;;  %v13797_v2 = vmov 0.0   ;;  %v2486_v62 = vld [vmem:[#allocation2 + $0x200] sm:$0xff] }
 0x503   : > { %6621 = vmatmul.mubr.bf16.vlgmr.msra.gmra.mrb[0].mxu0 %v6366_v55  ;;  %8029 = vmatprep.mubr.msk.bf16.mxu1 %vm8623_vm6, %v13797_v2  ;;  %v3372_v60 = vsub.f32 %v2882_v50, %v9934_v9  ;;  %v8509_v59 = vpack.i.bf16 %v12349_v25, %v12353_v5  ;;  %v3373_v48 = vsub.f32 %v2883_v53, %v9934_v9  ;;  %v8242_v57 = vunpack.i.l.bf16 %v12339_v33 }
 0x504   : > { %8030 = vmatmul.mubr.msk.bf16.vlgmr.msra.gmra.mrb[0].mxu1 %vm1597_vm3, %v6368_v45  ;;  %v3394_v22 = vsub.f32 %v2904_v7, %v9934_v9  ;;  %v3395_v3 = vsub.f32 %v2905_v21, %v9934_v9  ;;  %v8238_v30 = vunpack.i.h.bf16 %v12361_v46  ;;  %v8237_v39 = vunpack.i.l.bf16 %v12361_v46  ;;  %v2509_v21 = vld [vmem:[#allocation2 + $0x2c0] sm:$0xff] }
 0x505   : > { %v3864_v28 = vmul.f32 %v10134_v27, %v3372_v60  ;;  %8033 = vmatprep.mubr.msk.bf16.mxu1 %vm8623_vm6, %v13797_v2  ;;  %8510 = vrot.lane.b32.xlu1 %v8509_v59, %s8619_s11  ;;  %v3865_v12 = vmul.f32 %v10134_v27, %v3373_v48  ;;  %v8253_v55 = vunpack.i.h.bf16 %v8251_v20  ;;  %v8252_v63 = vunpack.i.l.bf16 %v8251_v20  ;;  %v2558_v45 = vld [vmem:[#allocation2 + $0x460] sm:$0xff]  ;;  %v2559_v60 = vld [vmem:[#allocation2 + $0x468] sm:$0xff]  ;;  %v2580_v20 = vld [vmem:[#allocation2 + $0x518] sm:$0xff] }
 0x506   : > { %v3886_v56 = vmul.f32 %v10134_v27, %v3394_v22  ;;  %v3887_v35 = vmul.f32 %v10134_v27, %v3395_v3  ;;  %v2976_v50 = vsub.f32 %v2486_v62, %v9934_v9  ;;  %v2977_v59 = vsub.f32 %v2487_v15, %v9934_v9 }
 0x507   : > { %v4355_v32 = vmul.f32 %v12243_v23, %v3864_v28  ;;  %v4356_v17 = vmul.f32 %v12243_v23, %v3865_v12  ;;  %v6220_v22 = vsel %vm1597_vm3, %v10240_v1, %v8253_v55  ;;  %v12410_v3 = vsel %vm1597_vm3, %v10598_v61, %v8252_v63 }
 0x508   : > { %v4377_v53 = vmul.f32 %v12243_v23, %v3886_v56  ;;  %v4378_v7 = vmul.f32 %v12243_v23, %v3887_v35  ;;  %v2998_v62 = vsub.f32 %v2508_v14, %v9934_v9  ;;  %v13798_v15 = vunpack.i.l.bf16 %v11975_v13 }
 0x509   : > { %v4846_v48 = vadd.f32 %v12257_v16, %v4355_v32  ;;  %v4847_v28 = vadd.f32 %v12257_v16, %v4356_v17  ;;  %v2581_v32 = vld [vmem:[#allocation2 + $0x520] sm:$0xff]  ;;  %v2999_v55 = vsub.f32 %v2509_v21, %v9934_v9  ;;  %v3048_v61 = vsub.f32 %v2558_v45, %v9934_v9 }
 0x50a   : > { %v4868_v12 = vadd.f32 %v12257_v16, %v4377_v53  ;;  %v4869_v56 = vadd.f32 %v12257_v16, %v4378_v7  ;;  %v12419_v35 = vsel %vm825_vm2, %v6220_v22, %v13798_v15  ;;  %v3049_v63 = vsub.f32 %v2559_v60, %v9934_v9 }
 0x50b   : > { %v5330_v1 = vmax.f32 %v4846_v48, 0.0  ;;  %v5331_v14 = vmax.f32 %v4847_v28, 0.0  ;;  %v3070_v53 = vsub.f32 %v2580_v20, %v9934_v9  ;;  %v3071_v7 = vsub.f32 %v2581_v32, %v9934_v9  ;;  %v12429_v48 = vpop.permute.xlu0 %8245  ;;  %v12433_v28 = vpop.permute.xlu1 %8260 }
 0x50c   : > { %v5352_v10 = vmax.f32 %v4868_v12, 0.0  ;;  %v5353_v17 = vmax.f32 %v4869_v56, 0.0  ;;  %v3468_v13 = vmul.f32 %v10134_v27, %v2976_v50  ;;  %v3469_v22 = vmul.f32 %v10134_v27, %v2977_v59 }
 0x50d   : > { %v3490_v15 = vmul.f32 %v10134_v27, %v2998_v62  ;;  %v3491_v45 = vmul.f32 %v10134_v27, %v2999_v55  ;;  %v3540_v60 = vmul.f32 %v10134_v27, %v3048_v61  ;;  %v3541_v20 = vmul.f32 %v10134_v27, %v3049_v63 }
 0x50e   : > { %v5594_v21 = vmax.f32 %v5330_v1, %v5352_v10  ;;  %v5595_v44 = vmax.f32 %v5331_v14, %v5353_v17  ;;  %v3562_v12 = vmul.f32 %v10134_v27, %v3070_v53  ;;  %v3563_v50 = vmul.f32 %v10134_v27, %v3071_v7 }
 0x50f   : > { %v3959_v59 = vmul.f32 %v12243_v23, %v3468_v13  ;;  %v3960_v62 = vmul.f32 %v12243_v23, %v3469_v22  ;;  %v3981_v10 = vmul.f32 %v12243_v23, %v3490_v15  ;;  %v3982_v32 = vmul.f32 %v12243_v23, %v3491_v45 }
 0x510   : > { %v5717_v56 = vmax.f32 %v5594_v21, %v5595_v44  ;;  %v4031_v1 = vmul.f32 %v12243_v23, %v3540_v60  ;;  %v4032_v55 = vmul.f32 %v12243_v23, %v3541_v20  ;;  %v4053_v61 = vmul.f32 %v12243_v23, %v3562_v12  ;;  %v12454_v21 = vpop.permute.xlu0 %8255  ;;  %v12458_v12 = vpop.permute.xlu1 %8270 }
 0x511   : > { %v4054_v63 = vmul.f32 %v12243_v23, %v3563_v50  ;;  %v4450_v17 = vadd.f32 %v12257_v16, %v3959_v59  ;;  %v4451_v44 = vadd.f32 %v12257_v16, %v3960_v62  ;;  %v4472_v53 = vadd.f32 %v12257_v16, %v3981_v10 }
 0x512   : > { %v8514_v14 = vpack.i.bf16 %v12075_v38, %v5717_v56  ;;  %v4473_v7 = vadd.f32 %v12257_v16, %v3982_v32  ;;  %v4522_v13 = vadd.f32 %v12257_v16, %v4031_v1  ;;  %v4523_v22 = vadd.f32 %v12257_v16, %v4032_v55 }
 0x513   : > { %v4544_v15 = vadd.f32 %v12257_v16, %v4053_v61  ;;  %v4545_v38 = vadd.f32 %v12257_v16, %v4054_v63  ;;  %v4934_v45 = vmax.f32 %v4450_v17, 0.0  ;;  %v4935_v60 = vmax.f32 %v4451_v44, 0.0 }
 0x514   : > { %8515 = vrot.lane.b32.xlu0 %v8514_v14, %s8621_s13  ;;  %v4956_v20 = vmax.f32 %v4472_v53, 0.0  ;;  %v4957_v50 = vmax.f32 %v4473_v7, 0.0  ;;  %v5006_v59 = vmax.f32 %v4522_v13, 0.0  ;;  %v5007_v56 = vmax.f32 %v4523_v22, 0.0 }
 0x515   : > { %v5028_v62 = vmax.f32 %v4544_v15, 0.0  ;;  %v5029_v10 = vmax.f32 %v4545_v38, 0.0  ;;  %v8248_v1 = vunpack.i.h.bf16 %v12429_v48  ;;  %v8247_v55 = vunpack.i.l.bf16 %v12429_v48 }
 0x516   : > { %v5396_v32 = vmax.f32 %v4934_v45, %v4956_v20  ;;  %v5397_v61 = vmax.f32 %v4935_v60, %v4957_v50  ;;  %v6343_v63 = vsel %vm6265_vm5, %v12371_v58, %v8237_v39  ;;  %v6344_v14 = vsel %vm6265_vm5, %v12377_v26, %v8238_v30  ;;  %v12480_v39 = vpop.permute.xlu0 %8265  ;;  %v2566_v20 = vld [vmem:[#allocation2 + $0x4a0] sm:$0xff]  ;;  %v2567_v50 = vld [vmem:[#allocation2 + $0x4a8] sm:$0xff] }
 0x517   : > { %v5424_v19 = vmax.f32 %v5006_v59, %v5028_v62  ;;  %v5425_v17 = vmax.f32 %v5007_v56, %v5029_v10  ;;  %v6370_v44 = vpack.c.bf16 %v6344_v14, %v6343_v63  ;;  %v6268_v53 = vsel %vm6265_vm5, %v12365_v42, %v8242_v57  ;;  %v8281_v42 = vpop.permute.xlu1 %8280  ;;  %v2562_v57 = vld [vmem:[#allocation2 + $0x480] sm:$0xff]  ;;  %v2584_v59 = vld [vmem:[#allocation2 + $0x538] sm:$0xff] }
 0x518   : > { %v13799_v48 = vunpack.i.h.bf16 %v12339_v33  ;;  %v5618_v13 = vmax.f32 %v5396_v32, %v5397_v61  ;;  %v8263_v58 = vunpack.i.h.bf16 %v12433_v28  ;;  %v8262_v46 = vunpack.i.l.bf16 %v12433_v28  ;;  %v2585_v32 = vld [vmem:[#allocation2 + $0x540] sm:$0xff] }
 0x519   : > { %v5632_v26 = vmax.f32 %v5424_v19, %v5425_v17  ;;  %6628 = vmatprep.mubr.bf16.mxu0 %v6370_v44  ;;  %v8258_v30 = vunpack.i.h.bf16 %v12454_v21  ;;  %v13659_v15 = vunpack.i.l.bf16 %v12454_v21  ;;  %v6371_v33 = vpack.c.bf16 %v10812_v43, %v10639_v4  ;;  %v2589_v17 = vld [vmem:[#allocation2 + $0x560] sm:$0xff] }
 0x51a   : > { %v6269_v7 = vsel %vm6265_vm5, %v12357_v52, %v13799_v48  ;;  %v2563_v52 = vld [vmem:[#allocation2 + $0x488] sm:$0xff]  ;;  %v6295_v38 = vsel %vm1597_vm3, %v5618_v13, %v8247_v55  ;;  %v12489_v45 = vsel %vm825_vm2, %v12410_v3, %v8262_v46  ;;  %v8273_v19 = vunpack.i.h.bf16 %v12458_v12  ;;  %v2588_v55 = vld [vmem:[#allocation2 + $0x558] sm:$0xff] }
 0x51b   : > { %v6369_v22 = vpack.c.bf16 %v6269_v7, %v6268_v53  ;;  %v8272_v60 = vunpack.i.l.bf16 %v12458_v12  ;;  %v6296_v56 = vsel %vm1597_vm3, %v5632_v26, %v8248_v1  ;;  %v6320_v62 = vsel %vm825_vm2, %v6295_v38, %v13659_v15  ;;  %8034 = vmatmul.mubr.msk.bf16.gmra.mrb[4].mxu1 %vm1597_vm3, %v6371_v33 }
 0x51c   : > { %v8268_v10 = vunpack.i.h.bf16 %v12480_v39  ;;  %v8267_v3 = vunpack.i.l.bf16 %v12480_v39  ;;  %v6321_v61 = vsel %vm825_vm2, %v6296_v56, %v8258_v30  ;;  %v8283_v63 = vunpack.i.h.bf16 %v8281_v42  ;;  %8037 = vmatprep.mubr.msk.bf16.mxu1 %vm8623_vm6, %v13797_v2 }
 0x51d   : > { %6629 = vmatmul.mubr.bf16.gmra.mrb[4].mxu0 %v6369_v22  ;;  %v8282_v14 = vunpack.i.l.bf16 %v8281_v42  ;;  %v3052_v44 = vsub.f32 %v2562_v57, %v9934_v9  ;;  %v3053_v1 = vsub.f32 %v2563_v52, %v9934_v9  ;;  %v3056_v53 = vsub.f32 %v2566_v20, %v9934_v9 }
 0x51e   : > { %v3057_v48 = vsub.f32 %v2567_v50, %v9934_v9  ;;  %v3074_v7 = vsub.f32 %v2584_v59, %v9934_v9  ;;  %v6222_v13 = vsel %vm1597_vm3, %v10634_v6, %v8283_v63  ;;  %v3075_v46 = vsub.f32 %v2585_v32, %v9934_v9 }
 0x51f   : > { %v6221_v22 = vsel %vm1597_vm3, %v10242_v36, %v8282_v14  ;;  %v3078_v39 = vsub.f32 %v2588_v55, %v9934_v9  ;;  %v13800_v26 = vunpack.i.l.bf16 %v12336_v54  ;;  %v13801_v33 = vunpack.i.h.bf16 %v12336_v54 }
 0x520   : > { %v3079_v57 = vsub.f32 %v2589_v17, %v9934_v9  ;;  %v3544_v6 = vmul.f32 %v10134_v27, %v3052_v44  ;;  %v3545_v36 = vmul.f32 %v10134_v27, %v3053_v1  ;;  %v3548_v52 = vmul.f32 %v10134_v27, %v3056_v53  ;;  %v8276_v17 = vpop.permute.xlu0 %8275 }
 0x521   : > { %v12517_v30 = vsel %vm825_vm2, %v6221_v22, %v13800_v26  ;;  %v12522_v42 = vsel %vm825_vm2, %v6222_v13, %v13801_v33  ;;  %v3549_v38 = vmul.f32 %v10134_v27, %v3057_v48  ;;  %v3566_v20 = vmul.f32 %v10134_v27, %v3074_v7 }
 0x522   : > { %v3567_v50 = vmul.f32 %v10134_v27, %v3075_v46  ;;  %v3570_v59 = vmul.f32 %v10134_v27, %v3078_v39  ;;  %v3571_v54 = vmul.f32 %v10134_v27, %v3079_v57  ;;  %v4035_v56 = vmul.f32 %v12243_v23, %v3544_v6  ;;  %v12546_v39 = vpop.permute.xlu1 %8290 }
 0x523   : > { %v4036_v32 = vmul.f32 %v12243_v23, %v3545_v36  ;;  %v4039_v55 = vmul.f32 %v12243_v23, %v3548_v52  ;;  %v4040_v63 = vmul.f32 %v12243_v23, %v3549_v38  ;;  %v4057_v14 = vmul.f32 %v12243_v23, %v3566_v20 }
 0x524   : > { %v4058_v44 = vmul.f32 %v12243_v23, %v3567_v50  ;;  %v4061_v1 = vmul.f32 %v12243_v23, %v3570_v59  ;;  %v4062_v53 = vmul.f32 %v12243_v23, %v3571_v54  ;;  %v4526_v48 = vadd.f32 %v12257_v16, %v4035_v56 }
 0x525   : > { %v4527_v7 = vadd.f32 %v12257_v16, %v4036_v32  ;;  %v4530_v13 = vadd.f32 %v12257_v16, %v4039_v55  ;;  %v4531_v22 = vadd.f32 %v12257_v16, %v4040_v63  ;;  %v4548_v46 = vadd.f32 %v12257_v16, %v4057_v14 }
 0x526   : > { %v4549_v26 = vadd.f32 %v12257_v16, %v4058_v44  ;;  %v4552_v33 = vadd.f32 %v12257_v16, %v4061_v1  ;;  %v4553_v57 = vadd.f32 %v12257_v16, %v4062_v53  ;;  %v5010_v6 = vmax.f32 %v4526_v48, 0.0  ;;  %v12553_v44 = vpop.permute.xlu0 %8285 }
 0x527   : > { %v5011_v36 = vmax.f32 %v4527_v7, 0.0  ;;  %v5014_v52 = vmax.f32 %v4530_v13, 0.0  ;;  %v5015_v38 = vmax.f32 %v4531_v22, 0.0  ;;  %v5032_v20 = vmax.f32 %v4548_v46, 0.0  ;;  %v2570_v7 = vld [vmem:[#allocation2 + $0x4c0] sm:$0xff]  ;;  %v2571_v13 = vld [vmem:[#allocation2 + $0x4c8] sm:$0xff]  ;;  %v12565_v46 = vpop.permute.xlu1 %8300 }
 0x528   : > { %v5033_v50 = vmax.f32 %v4549_v26, 0.0  ;;  %v5036_v59 = vmax.f32 %v4552_v33, 0.0  ;;  %v5037_v54 = vmax.f32 %v4553_v57, 0.0  ;;  %v8278_v56 = vunpack.i.h.bf16 %v8276_v17 }
 0x529   : > { %v5428_v32 = vmax.f32 %v5010_v6, %v5032_v20  ;;  %v8277_v55 = vunpack.i.l.bf16 %v8276_v17  ;;  %v6345_v63 = vsel %vm6265_vm5, %v6320_v62, %v8267_v3  ;;  %v6346_v14 = vsel %vm6265_vm5, %v6321_v61, %v8268_v10  ;;  %v2574_v61 = vld [vmem:[#allocation2 + $0x4e0] sm:$0xff]  ;;  %v2575_v17 = vld [vmem:[#allocation2 + $0x4e8] sm:$0xff] }
 0x52a   : > { %v5429_v1 = vmax.f32 %v5011_v36, %v5033_v50  ;;  %v5432_v15 = vmax.f32 %v5014_v52, %v5036_v59  ;;  %v5433_v53 = vmax.f32 %v5015_v38, %v5037_v54  ;;  %v6373_v48 = vpack.c.bf16 %v6346_v14, %v6345_v63  ;;  %v2597_v36 = vld [vmem:[#allocation2 + $0x5a0] sm:$0xff] }
 0x52b   : > { %v6270_v22 = vsel %vm6265_vm5, %v12489_v45, %v8272_v60  ;;  %v6271_v62 = vsel %vm6265_vm5, %v12419_v35, %v8273_v19  ;;  %v8293_v10 = vunpack.i.h.bf16 %v12546_v39  ;;  %v8292_v3 = vunpack.i.l.bf16 %v12546_v39  ;;  %v2592_v45 = vld [vmem:[#allocation2 + $0x578] sm:$0xff]  ;;  %v2593_v60 = vld [vmem:[#allocation2 + $0x580] sm:$0xff] }
 0x52c   : > { %v5634_v26 = vmax.f32 %v5428_v32, %v5429_v1  ;;  %v5636_v33 = vmax.f32 %v5432_v15, %v5433_v53  ;;  %6636 = vmatprep.mubr.bf16.mxu0 %v6373_v48  ;;  %v6372_v57 = vpack.c.bf16 %v6271_v62, %v6270_v22  ;;  %v8288_v6 = vunpack.i.h.bf16 %v12553_v44  ;;  %v2596_v19 = vld [vmem:[#allocation2 + $0x598] sm:$0xff]  ;;  %v8296_v22 = vpop.permute.xlu0 %8295  ;;  %v12596_v62 = vpop.permute.xlu1 %8310 }
 0x52d   : > { %v8287_v12 = vunpack.i.l.bf16 %v12553_v44  ;;  %v6374_v35 = vpack.c.bf16 %v10778_v0, %v11080_v41  ;;  %v3060_v52 = vsub.f32 %v2570_v7, %v9934_v9  ;;  %v3061_v38 = vsub.f32 %v2571_v13, %v9934_v9 }
 0x52e   : > { %v6298_v20 = vsel %vm1597_vm3, %v5636_v33, %v8278_v56  ;;  %v6297_v15 = vsel %vm1597_vm3, %v5634_v26, %v8277_v55  ;;  %6637 = vmatmul.mubr.bf16.gmra.mrb[8].mxu0 %v6372_v57  ;;  %v3064_v50 = vsub.f32 %v2574_v61, %v9934_v9  ;;  %v3065_v59 = vsub.f32 %v2575_v17, %v9934_v9 }
 0x52f   : > { %v6322_v54 = vsel %vm825_vm2, %v6297_v15, %v8263_v58  ;;  %v6323_v41 = vsel %vm825_vm2, %v6298_v20, %v8287_v12  ;;  %8038 = vmatmul.mubr.msk.bf16.gmra.mrb[8].mxu1 %vm1597_vm3, %v6374_v35  ;;  %v3082_v32 = vsub.f32 %v2592_v45, %v9934_v9  ;;  %v3083_v56 = vsub.f32 %v2593_v60, %v9934_v9 }
 0x530   : > { %v3086_v55 = vsub.f32 %v2596_v19, %v9934_v9  ;;  %v3087_v63 = vsub.f32 %v2597_v36, %v9934_v9  ;;  %v3552_v14 = vmul.f32 %v10134_v27, %v3060_v52  ;;  %v3553_v1 = vmul.f32 %v10134_v27, %v3061_v38  ;;  %8041 = vmatprep.mubr.msk.bf16.mxu1 %vm8623_vm6, %v13797_v2 }
 0x531   : > { %v3556_v53 = vmul.f32 %v10134_v27, %v3064_v50  ;;  %v3557_v48 = vmul.f32 %v10134_v27, %v3065_v59  ;;  %v3574_v7 = vmul.f32 %v10134_v27, %v3082_v32  ;;  %v3575_v13 = vmul.f32 %v10134_v27, %v3083_v56 }
 0x532   : > { %v3578_v61 = vmul.f32 %v10134_v27, %v3086_v55  ;;  %v3579_v17 = vmul.f32 %v10134_v27, %v3087_v63  ;;  %v4043_v26 = vmul.f32 %v12243_v23, %v3552_v14  ;;  %v4044_v33 = vmul.f32 %v12243_v23, %v3553_v1 }
 0x533   : > { %v4047_v57 = vmul.f32 %v12243_v23, %v3556_v53  ;;  %v4048_v45 = vmul.f32 %v12243_v23, %v3557_v48  ;;  %v4065_v60 = vmul.f32 %v12243_v23, %v3574_v7  ;;  %v4066_v35 = vmul.f32 %v12243_v23, %v3575_v13  ;;  %v8306_v7 = vpop.permute.xlu0 %8305  ;;  %v12616_v13 = vpop.permute.xlu1 %8320 }
 0x534   : > { %v4069_v19 = vmul.f32 %v12243_v23, %v3578_v61  ;;  %v4070_v36 = vmul.f32 %v12243_v23, %v3579_v17  ;;  %v4534_v52 = vadd.f32 %v12257_v16, %v4043_v26  ;;  %v4535_v38 = vadd.f32 %v12257_v16, %v4044_v33 }
 0x535   : > { %v4538_v20 = vadd.f32 %v12257_v16, %v4047_v57  ;;  %v4539_v15 = vadd.f32 %v12257_v16, %v4048_v45  ;;  %v4556_v50 = vadd.f32 %v12257_v16, %v4065_v60  ;;  %v4557_v59 = vadd.f32 %v12257_v16, %v4066_v35 }
 0x536   : > { %v4560_v32 = vadd.f32 %v12257_v16, %v4069_v19  ;;  %v4561_v56 = vadd.f32 %v12257_v16, %v4070_v36  ;;  %v5018_v55 = vmax.f32 %v4534_v52, 0.0  ;;  %v5019_v63 = vmax.f32 %v4535_v38, 0.0 }
 0x537   : > { %v5022_v14 = vmax.f32 %v4538_v20, 0.0  ;;  %v5023_v1 = vmax.f32 %v4539_v15, 0.0  ;;  %v5040_v53 = vmax.f32 %v4556_v50, 0.0  ;;  %v5041_v48 = vmax.f32 %v4557_v59, 0.0 }
 0x538   : > { %v5044_v61 = vmax.f32 %v4560_v32, 0.0  ;;  %v5045_v17 = vmax.f32 %v4561_v56, 0.0  ;;  %v8303_v26 = vunpack.i.h.bf16 %v12565_v46  ;;  %v8302_v33 = vunpack.i.l.bf16 %v12565_v46 }
 0x539   : > { %v5436_v57 = vmax.f32 %v5018_v55, %v5040_v53  ;;  %v5437_v45 = vmax.f32 %v5019_v63, %v5041_v48  ;;  %v8298_v60 = vunpack.i.h.bf16 %v8296_v22  ;;  %v8297_v35 = vunpack.i.l.bf16 %v8296_v22  ;;  %v2647_v53 = vld [vmem:[#allocation2 + $0x748] sm:$0xff]  ;;  %v2650_v48 = vld [vmem:[#allocation2 + $0x760] sm:$0xff] }
 0x53a   : > { %v5440_v19 = vmax.f32 %v5022_v14, %v5044_v61  ;;  %v5441_v36 = vmax.f32 %v5023_v1, %v5045_v17  ;;  %v6347_v52 = vsel %vm6265_vm5, %v6322_v54, %v8292_v3  ;;  %v6348_v38 = vsel %vm6265_vm5, %v6323_v41, %v8293_v10  ;;  %v12635_v54 = vpop.permute.xlu0 %8315  ;;  %v8331_v41 = vpop.permute.xlu1 %8330  ;;  %v2646_v1 = vld [vmem:[#allocation2 + $0x740] sm:$0xff] }
 0x53b   : > { %v5638_v20 = vmax.f32 %v5436_v57, %v5437_v45  ;;  %v6376_v15 = vpack.c.bf16 %v6348_v38, %v6347_v52  ;;  %v8313_v50 = vunpack.i.h.bf16 %v12596_v62  ;;  %v8312_v46 = vunpack.i.l.bf16 %v12596_v62  ;;  %v2668_v57 = vld [vmem:[#allocation2 + $0x7f8] sm:$0xff]  ;;  %v2673_v52 = vld [vmem:[#allocation2 + $0x820] sm:$0xff] }
 0x53c   : > { %v5640_v59 = vmax.f32 %v5440_v19, %v5441_v36  ;;  %v8308_v32 = vunpack.i.h.bf16 %v8306_v7  ;;  %v8307_v56 = vunpack.i.l.bf16 %v8306_v7  ;;  %v6272_v22 = vsel %vm6265_vm5, %v12517_v30, %v8297_v35  ;;  %v2672_v36 = vld [vmem:[#allocation2 + $0x818] sm:$0xff] }
 0x53d   : > { %v6299_v55 = vsel %vm1597_vm3, %v5638_v20, %v8302_v33  ;;  %6644 = vmatprep.mubr.bf16.mxu0 %v6376_v15  ;;  %v6273_v39 = vsel %vm6265_vm5, %v12522_v42, %v8298_v60  ;;  %v8323_v10 = vunpack.i.h.bf16 %v12616_v13  ;;  %v8322_v3 = vunpack.i.l.bf16 %v12616_v13  ;;  %v2651_v33 = vld [vmem:[#allocation2 + $0x768] sm:$0xff] }
 0x53e   : > { %v6300_v63 = vsel %vm1597_vm3, %v5640_v59, %v8303_v26  ;;  %v12641_v14 = vsel %vm825_vm2, %v6299_v55, %v8288_v6  ;;  %v6224_v30 = vsel %vm1597_vm3, %v10812_v43, %v8308_v32  ;;  %v6223_v42 = vsel %vm1597_vm3, %v10639_v4, %v8307_v56  ;;  %v2669_v4 = vld [vmem:[#allocation2 + $0x800] sm:$0xff] }
 0x53f   : > { %v12650_v7 = vsel %vm825_vm2, %v6300_v63, %v8312_v46  ;;  %v12653_v61 = vsel %vm825_vm2, %v6224_v30, %v8313_v50  ;;  %v13802_v17 = vunpack.i.l.bf16 %v12454_v21  ;;  %v6375_v43 = vpack.c.bf16 %v6273_v39, %v6272_v22 }
 0x540   : > { %v8318_v45 = vunpack.i.h.bf16 %v12635_v54  ;;  %v8317_v60 = vunpack.i.l.bf16 %v12635_v54  ;;  %v6377_v35 = vpack.c.bf16 %v10994_v47, %v10992_v11  ;;  %v8333_v19 = vunpack.i.h.bf16 %v8331_v41  ;;  %v2658_v54 = vld [vmem:[#allocation2 + $0x7a0] sm:$0xff] }
 0x541   : > { %v12658_v26 = vsel %vm825_vm2, %v6223_v42, %v13802_v17  ;;  %6645 = vmatmul.mubr.bf16.gmra.mrb[12].mxu0 %v6375_v43  ;;  %v8332_v38 = vunpack.i.l.bf16 %v8331_v41  ;;  %v3136_v21 = vsub.f32 %v2646_v1, %v9934_v9  ;;  %v3137_v20 = vsub.f32 %v2647_v53, %v9934_v9 }
 0x542   : > { %v3140_v15 = vsub.f32 %v2650_v48, %v9934_v9  ;;  %8042 = vmatmul.mubr.msk.bf16.gmra.mrb[12].mxu1 %vm1597_vm3, %v6377_v35  ;;  %v6226_v50 = vsel %vm1597_vm3, %v10778_v0, %v8333_v19  ;;  %v3141_v59 = vsub.f32 %v2651_v33, %v9934_v9  ;;  %v3158_v32 = vsub.f32 %v2668_v57, %v9934_v9  ;;  %v8326_v35 = vpop.permute.xlu0 %8325 }
 0x543   : > { %v3159_v56 = vsub.f32 %v2669_v4, %v9934_v9  ;;  %v6225_v22 = vsel %vm1597_vm3, %v10817_v24, %v8332_v38  ;;  %v12678_v55 = vsel %vm825_vm2, %v6226_v50, %v8287_v12  ;;  %v3162_v39 = vsub.f32 %v2672_v36, %v9934_v9  ;;  %8045 = vmatprep.mubr.msk.bf16.mxu1 %vm8623_vm6, %v13797_v2 }
 0x544   : > { %v3163_v41 = vsub.f32 %v2673_v52, %v9934_v9  ;;  %v12687_v0 = vsel %vm825_vm2, %v6225_v22, %v8263_v58  ;;  %v3628_v63 = vmul.f32 %v10134_v27, %v3136_v21  ;;  %v3629_v24 = vmul.f32 %v10134_v27, %v3137_v20 }
 0x545   : > { %v3632_v30 = vmul.f32 %v10134_v27, %v3140_v15  ;;  %v3633_v12 = vmul.f32 %v10134_v27, %v3141_v59  ;;  %v3650_v42 = vmul.f32 %v10134_v27, %v3158_v32  ;;  %v3651_v1 = vmul.f32 %v10134_v27, %v3159_v56  ;;  %v12712_v59 = vpop.permute.xlu1 %8340 }
 0x546   : > { %v3654_v53 = vmul.f32 %v10134_v27, %v3162_v39  ;;  %v3655_v48 = vmul.f32 %v10134_v27, %v3163_v41  ;;  %v4119_v28 = vmul.f32 %v12243_v23, %v3628_v63  ;;  %v4120_v58 = vmul.f32 %v12243_v23, %v3629_v24 }
 0x547   : > { %v4123_v17 = vmul.f32 %v12243_v23, %v3632_v30  ;;  %v4124_v43 = vmul.f32 %v12243_v23, %v3633_v12  ;;  %v4141_v33 = vmul.f32 %v12243_v23, %v3650_v42  ;;  %v4142_v57 = vmul.f32 %v12243_v23, %v3651_v1 }
 0x548   : > { %v4145_v4 = vmul.f32 %v12243_v23, %v3654_v53  ;;  %v4146_v19 = vmul.f32 %v12243_v23, %v3655_v48  ;;  %v4610_v36 = vadd.f32 %v12257_v16, %v4119_v28  ;;  %v4611_v52 = vadd.f32 %v12257_v16, %v4120_v58  ;;  %v12721_v58 = vpop.permute.xlu0 %8335 }
 0x549   : > { %v4614_v38 = vadd.f32 %v12257_v16, %v4123_v17  ;;  %v4615_v21 = vadd.f32 %v12257_v16, %v4124_v43  ;;  %v4632_v20 = vadd.f32 %v12257_v16, %v4141_v33  ;;  %v4633_v15 = vadd.f32 %v12257_v16, %v4142_v57  ;;  %v2655_v57 = vld [vmem:[#allocation2 + $0x788] sm:$0xff] }
 0x54a   : > { %v4636_v50 = vadd.f32 %v12257_v16, %v4145_v4  ;;  %v4637_v32 = vadd.f32 %v12257_v16, %v4146_v19  ;;  %v5094_v56 = vmax.f32 %v4610_v36, 0.0  ;;  %v5095_v23 = vmax.f32 %v4611_v52, 0.0  ;;  %v2659_v19 = vld [vmem:[#allocation2 + $0x7a8] sm:$0xff]  ;;  %v2676_v36 = vld [vmem:[#allocation2 + $0x838] sm:$0xff]  ;;  %v12733_v52 = vpop.permute.xlu1 %8350 }
 0x54b   : > { %v5098_v22 = vmax.f32 %v4614_v38, 0.0  ;;  %v5099_v39 = vmax.f32 %v4615_v21, 0.0  ;;  %v5116_v41 = vmax.f32 %v4632_v20, 0.0  ;;  %v5117_v63 = vmax.f32 %v4633_v15, 0.0  ;;  %v2681_v21 = vld [vmem:[#allocation2 + $0x860] sm:$0xff] }
 0x54c   : > { %v5120_v24 = vmax.f32 %v4636_v50, 0.0  ;;  %v5121_v30 = vmax.f32 %v4637_v32, 0.0  ;;  %v8328_v12 = vunpack.i.h.bf16 %v8326_v35  ;;  %v8327_v42 = vunpack.i.l.bf16 %v8326_v35 }
 0x54d   : > { %v6349_v1 = vsel %vm6265_vm5, %v12641_v14, %v8317_v60  ;;  %v5468_v53 = vmax.f32 %v5094_v56, %v5116_v41  ;;  %v5469_v48 = vmax.f32 %v5095_v23, %v5117_v63  ;;  %v6350_v16 = vsel %vm6265_vm5, %v12650_v7, %v8318_v45  ;;  %v2654_v60 = vld [vmem:[#allocation2 + $0x780] sm:$0xff] }
 0x54e   : > { %v5472_v28 = vmax.f32 %v5098_v22, %v5120_v24  ;;  %v5473_v17 = vmax.f32 %v5099_v39, %v5121_v30  ;;  %v6379_v43 = vpack.c.bf16 %v6350_v16, %v6349_v1  ;;  %v6274_v33 = vsel %vm6265_vm5, %v12658_v26, %v8322_v3  ;;  %v2680_v26 = vld [vmem:[#allocation2 + $0x858] sm:$0xff] }
 0x54f   : > { %v6275_v14 = vsel %vm6265_vm5, %v12653_v61, %v8323_v10  ;;  %v5654_v4 = vmax.f32 %v5468_v53, %v5469_v48  ;;  %v8343_v7 = vunpack.i.h.bf16 %v12712_v59  ;;  %v8342_v45 = vunpack.i.l.bf16 %v12712_v59  ;;  %v2677_v61 = vld [vmem:[#allocation2 + $0x840] sm:$0xff]  ;;  %v8346_v53 = vpop.permute.xlu0 %8345 }
 0x550   : > { %v6378_v35 = vpack.c.bf16 %v6275_v14, %v6274_v33  ;;  %v5656_v38 = vmax.f32 %v5472_v28, %v5473_v17  ;;  %6652 = vmatprep.mubr.bf16.mxu0 %v6379_v43  ;;  %v8338_v13 = vunpack.i.h.bf16 %v12721_v58  ;;  %v8337_v3 = vunpack.i.l.bf16 %v12721_v58  ;;  %v12764_v43 = vpop.permute.xlu1 %8360  ;;  %v12769_v33 = vld [vmem:[%s13585_s2] ss:$0 sm:$0xff] }
 0x551   : > { %v6380_v10 = vpack.c.bf16 %v11494_v40, %v11085_v31  ;;  %v6301_v20 = vsel %vm1597_vm3, %v5654_v4, %v8327_v42  ;;  %v3144_v15 = vsub.f32 %v2654_v60, %v9934_v9  ;;  %v3145_v50 = vsub.f32 %v2655_v57, %v9934_v9 }
 0x552   : > { %6653 = vmatmul.mubr.bf16.gmra.mrb[16].mxu0 %v6378_v35  ;;  %v3148_v32 = vsub.f32 %v2658_v54, %v9934_v9  ;;  %v6302_v56 = vsel %vm1597_vm3, %v5656_v38, %v8328_v12  ;;  %v6326_v23 = vsel %vm825_vm2, %v6301_v20, %v8338_v13  ;;  %v3149_v40 = vsub.f32 %v2659_v19, %v9934_v9  ;;  %v12782_v38 = vld [vmem:[%s13586_s3] ss:$0 sm:$0xff] }
 0x553   : > { %8046 = vmatmul.mubr.msk.bf16.gmra.mrb[16].mxu1 %vm1597_vm3, %v6380_v10  ;;  %v3166_v22 = vsub.f32 %v2676_v36, %v9934_v9  ;;  %v6327_v39 = vsel %vm825_vm2, %v6302_v56, %v8337_v3  ;;  %v3167_v41 = vsub.f32 %v2677_v61, %v9934_v9  ;;  %v3170_v63 = vsub.f32 %v2680_v26, %v9934_v9 }
 0x554   : > { %v3171_v24 = vsub.f32 %v2681_v21, %v9934_v9  ;;  %8049 = vmatprep.mubr.msk.bf16.mxu1 %vm8623_vm6, %v13797_v2  ;;  %v3636_v30 = vmul.f32 %v10134_v27, %v3144_v15  ;;  %v3637_v12 = vmul.f32 %v10134_v27, %v3145_v50  ;;  %v3640_v42 = vmul.f32 %v10134_v27, %v3148_v32 }
 0x555   : > { %v3641_v1 = vmul.f32 %v10134_v27, %v3149_v40  ;;  %v3658_v48 = vmul.f32 %v10134_v27, %v3166_v22  ;;  %v3659_v28 = vmul.f32 %v10134_v27, %v3167_v41  ;;  %v3662_v16 = vmul.f32 %v10134_v27, %v3170_v63  ;;  %v8356_v41 = vpop.permute.xlu0 %8355 }
 0x556   : > { %v3663_v17 = vmul.f32 %v10134_v27, %v3171_v24  ;;  %v4127_v14 = vmul.f32 %v12769_v33, %v3636_v30  ;;  %v4128_v60 = vmul.f32 %v12769_v33, %v3637_v12  ;;  %v4131_v57 = vmul.f32 %v12769_v33, %v3640_v42  ;;  %v12792_v42 = vpop.permute.xlu1 %8370 }
 0x557   : > { %v4132_v54 = vmul.f32 %v12769_v33, %v3641_v1  ;;  %v4149_v4 = vmul.f32 %v12769_v33, %v3658_v48  ;;  %v4150_v35 = vmul.f32 %v12769_v33, %v3659_v28  ;;  %v4153_v19 = vmul.f32 %v12769_v33, %v3662_v16 }
 0x558   : > { %v4154_v36 = vmul.f32 %v12769_v33, %v3663_v17  ;;  %v4618_v13 = vadd.f32 %v12782_v38, %v4127_v14  ;;  %v4619_v10 = vadd.f32 %v12782_v38, %v4128_v60  ;;  %v4622_v61 = vadd.f32 %v12782_v38, %v4131_v57 }
 0x559   : > { %v4623_v26 = vadd.f32 %v12782_v38, %v4132_v54  ;;  %v4640_v21 = vadd.f32 %v12782_v38, %v4149_v4  ;;  %v4641_v20 = vadd.f32 %v12782_v38, %v4150_v35  ;;  %v4644_v15 = vadd.f32 %v12782_v38, %v4153_v19 }
 0x55a   : > { %v4645_v50 = vadd.f32 %v12782_v38, %v4154_v36  ;;  %v5102_v32 = vmax.f32 %v4618_v13, 0.0  ;;  %v5103_v56 = vmax.f32 %v4619_v10, 0.0  ;;  %v5106_v40 = vmax.f32 %v4622_v61, 0.0 }
 0x55b   : > { %v5107_v22 = vmax.f32 %v4623_v26, 0.0  ;;  %v5124_v63 = vmax.f32 %v4640_v21, 0.0  ;;  %v5125_v24 = vmax.f32 %v4641_v20, 0.0  ;;  %v5128_v30 = vmax.f32 %v4644_v15, 0.0  ;;  %v8381_v21 = vpop.permute.xlu1 %8380  ;;  %v2662_v20 = vld [vmem:[#allocation2 + $0x7c0] sm:$0xff]  ;;  %v2663_v15 = vld [vmem:[#allocation2 + $0x7c8] sm:$0xff] }
 0x55c   : > { %v5129_v12 = vmax.f32 %v4645_v50, 0.0  ;;  %v8353_v1 = vunpack.i.h.bf16 %v12733_v52  ;;  %v8352_v48 = vunpack.i.l.bf16 %v12733_v52  ;;  %v8348_v28 = vunpack.i.h.bf16 %v8346_v53 }
 0x55d   : > { %v8347_v16 = vunpack.i.l.bf16 %v8346_v53  ;;  %v5476_v17 = vmax.f32 %v5102_v32, %v5124_v63  ;;  %v5477_v14 = vmax.f32 %v5103_v56, %v5125_v24  ;;  %v5480_v60 = vmax.f32 %v5106_v40, %v5128_v30  ;;  %v2685_v56 = vld [vmem:[#allocation2 + $0x880] sm:$0xff]  ;;  %v2735_v24 = vld [vmem:[#allocation2 + $0xa28] sm:$0xff]  ;;  %v2756_v30 = vld [vmem:[#allocation2 + $0xad8] sm:$0xff] }
 0x55e   : > { %v5481_v57 = vmax.f32 %v5107_v22, %v5129_v12  ;;  %v6351_v54 = vsel %vm6265_vm5, %v6326_v23, %v8342_v45  ;;  %v6352_v4 = vsel %vm6265_vm5, %v6327_v39, %v8343_v7  ;;  %v8363_v35 = vunpack.i.h.bf16 %v12764_v43  ;;  %v12808_v45 = vpop.permute.xlu0 %8365  ;;  %v2734_v40 = vld [vmem:[#allocation2 + $0xa20] sm:$0xff] }
 0x55f   : > { %v8362_v19 = vunpack.i.l.bf16 %v12764_v43  ;;  %v5658_v36 = vmax.f32 %v5476_v17, %v5477_v14  ;;  %v6382_v13 = vpack.c.bf16 %v6352_v4, %v6351_v54  ;;  %v8358_v53 = vunpack.i.h.bf16 %v8356_v41 }
 0x560   : > { %v5660_v52 = vmax.f32 %v5480_v60, %v5481_v57  ;;  %v8357_v10 = vunpack.i.l.bf16 %v8356_v41  ;;  %v6276_v61 = vsel %vm6265_vm5, %v12687_v0, %v8347_v16  ;;  %v6277_v26 = vsel %vm6265_vm5, %v12678_v55, %v8348_v28 }
 0x561   : > { %v6303_v7 = vsel %vm1597_vm3, %v5658_v36, %v8352_v48  ;;  %6660 = vmatprep.mubr.bf16.mxu0 %v6382_v13  ;;  %v6228_v23 = vsel %vm1597_vm3, %v10994_v47, %v8358_v53  ;;  %v6381_v39 = vpack.c.bf16 %v6277_v26, %v6276_v61  ;;  %v8373_v32 = vunpack.i.h.bf16 %v12792_v42  ;;  %v2684_v47 = vld [vmem:[#allocation2 + $0x878] sm:$0xff]  ;;  %v2757_v48 = vld [vmem:[#allocation2 + $0xae0] sm:$0xff]  ;;  %v12861_v53 = vpop.permute.xlu1 %8390 }
 0x562   : > { %v6304_v59 = vsel %vm1597_vm3, %v5660_v52, %v8353_v1  ;;  %v12817_v0 = vsel %vm825_vm2, %v6303_v7, %v8362_v19  ;;  %v6227_v50 = vsel %vm1597_vm3, %v10992_v11, %v8357_v10  ;;  %v12830_v22 = vsel %vm825_vm2, %v6228_v23, %v8312_v46  ;;  %v12859_v13 = vpop.permute.xlu0 %8375 }
 0x563   : > { %v12822_v55 = vsel %vm825_vm2, %v6304_v59, %v8363_v35  ;;  %v12835_v41 = vsel %vm825_vm2, %v6227_v50, %v8288_v6  ;;  %6661 = vmatmul.mubr.bf16.gmra.mrb[20].mxu0 %v6381_v39  ;;  %v8372_v63 = vunpack.i.l.bf16 %v12792_v42  ;;  %v8368_v11 = vunpack.i.h.bf16 %v12808_v45 }
 0x564   : > { %v6383_v12 = vpack.c.bf16 %v11349_v34, %v11248_v37  ;;  %v8383_v1 = vunpack.i.h.bf16 %v8381_v21  ;;  %v8382_v62 = vunpack.i.l.bf16 %v8381_v21  ;;  %v3152_v46 = vsub.f32 %v2662_v20, %v9934_v9 }
 0x565   : > { %v3153_v44 = vsub.f32 %v2663_v15, %v9934_v9  ;;  %v3174_v6 = vsub.f32 %v2684_v47, %v9934_v9  ;;  %v3175_v28 = vsub.f32 %v2685_v56, %v9934_v9  ;;  %v3224_v16 = vsub.f32 %v2734_v40, %v9934_v9 }
 0x566   : > { %v8367_v17 = vunpack.i.l.bf16 %v12808_v45  ;;  %8050 = vmatmul.mubr.msk.bf16.gmra.mrb[20].mxu1 %vm1597_vm3, %v6383_v12  ;;  %v6230_v14 = vsel %vm1597_vm3, %v11243_v49, %v8383_v1  ;;  %v3225_v60 = vsub.f32 %v2735_v24, %v9934_v9  ;;  %v3246_v57 = vsub.f32 %v2756_v30, %v9934_v9 }
 0x567   : > { %v12854_v54 = vsel %vm1597_vm3, %v11085_v31, %v8382_v62  ;;  %v3247_v4 = vsub.f32 %v2757_v48, %v9934_v9  ;;  %v3644_v36 = vmul.f32 %v10134_v27, %v3152_v46  ;;  %v3645_v52 = vmul.f32 %v10134_v27, %v3153_v44  ;;  %8053 = vmatprep.mubr.msk.bf16.mxu1 %vm8623_vm6, %v13797_v2  ;;  %v12887_v44 = vpop.permute.xlu0 %8385 }
 0x568   : > { %v3666_v49 = vmul.f32 %v10134_v27, %v3174_v6  ;;  %v3667_v10 = vmul.f32 %v10134_v27, %v3175_v28  ;;  %v3716_v31 = vmul.f32 %v10134_v27, %v3224_v16  ;;  %v3717_v61 = vmul.f32 %v10134_v27, %v3225_v60  ;;  %v12889_v6 = vpop.permute.xlu1 %8400 }
 0x569   : > { %v3738_v26 = vmul.f32 %v10134_v27, %v3246_v57  ;;  %v3739_v45 = vmul.f32 %v10134_v27, %v3247_v4  ;;  %v4135_v59 = vmul.f32 %v12769_v33, %v3644_v36  ;;  %v4136_v7 = vmul.f32 %v12769_v33, %v3645_v52 }
 0x56a   : > { %v4157_v23 = vmul.f32 %v12769_v33, %v3666_v49  ;;  %v4158_v39 = vmul.f32 %v12769_v33, %v3667_v10  ;;  %v4207_v21 = vmul.f32 %v12769_v33, %v3716_v31  ;;  %v4208_v20 = vmul.f32 %v12769_v33, %v3717_v61 }
 0x56b   : > { %v4229_v15 = vmul.f32 %v12769_v33, %v3738_v26  ;;  %v4230_v50 = vmul.f32 %v12769_v33, %v3739_v45  ;;  %v4626_v47 = vadd.f32 %v12782_v38, %v4135_v59  ;;  %v4627_v56 = vadd.f32 %v12782_v38, %v4136_v7 }
 0x56c   : > { %v4648_v40 = vadd.f32 %v12782_v38, %v4157_v23  ;;  %v4649_v24 = vadd.f32 %v12782_v38, %v4158_v39  ;;  %v4698_v30 = vadd.f32 %v12782_v38, %v4207_v21  ;;  %v4699_v12 = vadd.f32 %v12782_v38, %v4208_v20  ;;  %v8411_v58 = vpop.permute.xlu1 %8410  ;;  %v2739_v20 = vld [vmem:[#allocation2 + $0xa48] sm:$0xff] }
 0x56d   : > { %v4720_v1 = vadd.f32 %v12782_v38, %v4229_v15  ;;  %v4721_v62 = vadd.f32 %v12782_v38, %v4230_v50  ;;  %v5110_v48 = vmax.f32 %v4626_v47, 0.0  ;;  %v5111_v46 = vmax.f32 %v4627_v56, 0.0  ;;  %v2742_v15 = vld [vmem:[#allocation2 + $0xa60] sm:$0xff]  ;;  %v2743_v50 = vld [vmem:[#allocation2 + $0xa68] sm:$0xff] }
 0x56e   : > { %v5132_v28 = vmax.f32 %v4648_v40, 0.0  ;;  %v5133_v16 = vmax.f32 %v4649_v24, 0.0  ;;  %v5182_v60 = vmax.f32 %v4698_v30, 0.0  ;;  %v5183_v57 = vmax.f32 %v4699_v12, 0.0  ;;  %v2760_v30 = vld [vmem:[#allocation2 + $0xaf8] sm:$0xff] }
 0x56f   : > { %v5204_v4 = vmax.f32 %v4720_v1, 0.0  ;;  %v5205_v36 = vmax.f32 %v4721_v62, 0.0  ;;  %v8378_v52 = vunpack.i.h.bf16 %v12859_v13  ;;  %v8377_v49 = vunpack.i.l.bf16 %v12859_v13 }
 0x570   : > { %v5484_v10 = vmax.f32 %v5110_v48, %v5132_v28  ;;  %v5485_v31 = vmax.f32 %v5111_v46, %v5133_v16  ;;  %v6353_v61 = vsel %vm6265_vm5, %v12817_v0, %v8367_v17  ;;  %v6354_v26 = vsel %vm6265_vm5, %v12822_v55, %v8368_v11  ;;  %v2764_v46 = vld [vmem:[#allocation2 + $0xb18] sm:$0xff]  ;;  %v2765_v28 = vld [vmem:[#allocation2 + $0xb20] sm:$0xff] }
 0x571   : > { %v5512_v45 = vmax.f32 %v5182_v60, %v5204_v4  ;;  %v5513_v59 = vmax.f32 %v5183_v57, %v5205_v36  ;;  %v6385_v7 = vpack.c.bf16 %v6354_v26, %v6353_v61  ;;  %v6278_v23 = vsel %vm6265_vm5, %v12835_v41, %v8372_v63  ;;  %v12913_v63 = vpop.permute.xlu0 %8395 }
 0x572   : > { %v12904_v13 = vsel %vm825_vm2, %v6230_v14, %v8337_v3  ;;  %v5662_v39 = vmax.f32 %v5484_v10, %v5485_v31  ;;  %v6279_v0 = vsel %vm6265_vm5, %v12830_v22, %v8373_v32  ;;  %v8392_v55 = vunpack.i.l.bf16 %v12861_v53  ;;  %v2738_v3 = vld [vmem:[#allocation2 + $0xa40] sm:$0xff] }
 0x573   : > { %v5676_v11 = vmax.f32 %v5512_v45, %v5513_v59  ;;  %6668 = vmatprep.mubr.bf16.mxu0 %v6385_v7  ;;  %v6384_v17 = vpack.c.bf16 %v6279_v0, %v6278_v23  ;;  %v8388_v21 = vunpack.i.h.bf16 %v12887_v44  ;;  %v8387_v41 = vunpack.i.l.bf16 %v12887_v44 }
 0x574   : > { %v6305_v14 = vsel %vm1597_vm3, %v5662_v39, %v8377_v49  ;;  %v8393_v42 = vunpack.i.h.bf16 %v12861_v53  ;;  %v12919_v32 = vsel %vm825_vm2, %v12854_v54, %v8392_v55  ;;  %v6386_v22 = vpack.c.bf16 %v11534_v51, %v11351_v29  ;;  %v2761_v54 = vld [vmem:[#allocation2 + $0xb00] sm:$0xff] }
 0x575   : > { %v6306_v47 = vsel %vm1597_vm3, %v5676_v11, %v8378_v52  ;;  %6669 = vmatmul.mubr.bf16.gmra.mrb[24].mxu0 %v6384_v17  ;;  %v6330_v56 = vsel %vm825_vm2, %v6305_v14, %v8387_v41  ;;  %v8403_v40 = vunpack.i.h.bf16 %v12889_v6  ;;  %v8402_v24 = vunpack.i.l.bf16 %v12889_v6  ;;  %v13803_v6 = vld [vmem:[#allocation27_spill] sm:$0xff] }
 0x576   : > { %v6331_v12 = vsel %vm825_vm2, %v6306_v47, %v8388_v21  ;;  %8054 = vmatmul.mubr.msk.bf16.gmra.mrb[24].mxu1 %vm1597_vm3, %v6386_v22  ;;  %v8398_v1 = vunpack.i.h.bf16 %v12913_v63  ;;  %v8413_v62 = vunpack.i.h.bf16 %v8411_v58  ;;  %v8412_v48 = vunpack.i.l.bf16 %v8411_v58  ;;  %v8406_v22 = vpop.permute.xlu0 %8405 }
 0x577   : > { %v3228_v16 = vsub.f32 %v2738_v3, %v9934_v9  ;;  %v3229_v60 = vsub.f32 %v2739_v20, %v9934_v9  ;;  %v3232_v57 = vsub.f32 %v2742_v15, %v9934_v9  ;;  %v3233_v4 = vsub.f32 %v2743_v50, %v9934_v9  ;;  %8057 = vmatprep.mubr.msk.bf16.mxu1 %vm8623_vm6, %v13797_v2 }
 0x578   : > { %v8397_v36 = vunpack.i.l.bf16 %v12913_v63  ;;  %v6231_v52 = vsel %vm1597_vm3, %v11248_v37, %v8412_v48  ;;  %v3250_v49 = vsub.f32 %v2760_v30, %v9934_v9  ;;  %v3251_v10 = vsub.f32 %v2761_v54, %v9934_v9 }
 0x579   : > { %v6232_v31 = vsel %vm1597_vm3, %v11349_v34, %v8413_v62  ;;  %v12948_v61 = vsel %vm825_vm2, %v6231_v52, %v8362_v19  ;;  %v3254_v26 = vsub.f32 %v2764_v46, %v9934_v9  ;;  %v3255_v45 = vsub.f32 %v2765_v28, %v9934_v9  ;;  %v12976_v46 = vpop.permute.xlu1 %8420 }
 0x57a   : > { %v3720_v59 = vmul.f32 %v10134_v27, %v3228_v16  ;;  %v3721_v37 = vmul.f32 %v10134_v27, %v3229_v60  ;;  %v3724_v7 = vmul.f32 %v10134_v27, %v3232_v57  ;;  %v3725_v23 = vmul.f32 %v10134_v27, %v3233_v4 }
 0x57b   : > { %v3742_v39 = vmul.f32 %v10134_v27, %v3250_v49  ;;  %v3743_v34 = vmul.f32 %v10134_v27, %v3251_v10  ;;  %v3746_v0 = vmul.f32 %v10134_v27, %v3254_v26  ;;  %v3747_v19 = vmul.f32 %v10134_v27, %v3255_v45 }
 0x57c   : > { %v4211_v55 = vmul.f32 %v12769_v33, %v3720_v59  ;;  %v4212_v11 = vmul.f32 %v12769_v33, %v3721_v37  ;;  %v4215_v17 = vmul.f32 %v12769_v33, %v3724_v7  ;;  %v4216_v21 = vmul.f32 %v12769_v33, %v3725_v23 }
 0x57d   : > { %v4233_v63 = vmul.f32 %v12769_v33, %v3742_v39  ;;  %v4234_v58 = vmul.f32 %v12769_v33, %v3743_v34  ;;  %v4237_v3 = vmul.f32 %v12769_v33, %v3746_v0  ;;  %v4238_v14 = vmul.f32 %v12769_v33, %v3747_v19  ;;  %v12980_v0 = vpop.permute.xlu0 %8415  ;;  %v2746_v19 = vld [vmem:[#allocation2 + $0xa80] sm:$0xff] }
 0x57e   : > { %v4702_v20 = vadd.f32 %v12782_v38, %v4211_v55  ;;  %v4703_v15 = vadd.f32 %v12782_v38, %v4212_v11  ;;  %v4706_v50 = vadd.f32 %v12782_v38, %v4215_v17  ;;  %v4707_v47 = vadd.f32 %v12782_v38, %v4216_v21 }
 0x57f   : > { %v4724_v30 = vadd.f32 %v12782_v38, %v4233_v63  ;;  %v4725_v54 = vadd.f32 %v12782_v38, %v4234_v58  ;;  %v4728_v62 = vadd.f32 %v12782_v38, %v4237_v3  ;;  %v4729_v48 = vadd.f32 %v12782_v38, %v4238_v14  ;;  %v12996_v58 = vpop.permute.xlu1 %8430  ;;  %v2773_v14 = vld [vmem:[#allocation2 + $0xb60] sm:$0xff] }
 0x580   : > { %v5186_v28 = vmax.f32 %v4702_v20, 0.0  ;;  %v5187_v16 = vmax.f32 %v4703_v15, 0.0  ;;  %v5190_v60 = vmax.f32 %v4706_v50, 0.0  ;;  %v5191_v57 = vmax.f32 %v4707_v47, 0.0 }
 0x581   : > { %v5208_v4 = vmax.f32 %v4724_v30, 0.0  ;;  %v5209_v52 = vmax.f32 %v4725_v54, 0.0  ;;  %v5212_v49 = vmax.f32 %v4728_v62, 0.0  ;;  %v5213_v10 = vmax.f32 %v4729_v48, 0.0 }
 0x582   : > { %v8408_v26 = vunpack.i.h.bf16 %v8406_v22  ;;  %v8407_v45 = vunpack.i.l.bf16 %v8406_v22  ;;  %v6355_v59 = vsel %vm6265_vm5, %v6330_v56, %v8397_v36  ;;  %v6356_v37 = vsel %vm6265_vm5, %v6331_v12, %v8398_v1  ;;  %v2747_v1 = vld [vmem:[#allocation2 + $0xa88] sm:$0xff]  ;;  %v2750_v36 = vld [vmem:[#allocation2 + $0xaa0] sm:$0xff] }
 0x583   : > { %v5516_v7 = vmax.f32 %v5186_v28, %v5208_v4  ;;  %v5517_v23 = vmax.f32 %v5187_v16, %v5209_v52  ;;  %v5520_v39 = vmax.f32 %v5190_v60, %v5212_v49  ;;  %v5521_v34 = vmax.f32 %v5191_v57, %v5213_v10  ;;  %v8426_v10 = vpop.permute.xlu0 %8425 }
 0x584   : > { %v12985_v55 = vsel %vm825_vm2, %v6232_v31, %v8363_v35  ;;  %v6388_v11 = vpack.c.bf16 %v6356_v37, %v6355_v59  ;;  %v6280_v56 = vsel %vm6265_vm5, %v12919_v32, %v8402_v24  ;;  %v6281_v12 = vsel %vm6265_vm5, %v12904_v13, %v8403_v40  ;;  %v2751_v35 = vld [vmem:[#allocation2 + $0xaa8] sm:$0xff]  ;;  %v2768_v31 = vld [vmem:[#allocation2 + $0xb38] sm:$0xff]  ;;  %v2769_v13 = vld [vmem:[#allocation2 + $0xb40] sm:$0xff] }
 0x585   : > { %v5678_v17 = vmax.f32 %v5516_v7, %v5517_v23  ;;  %v5680_v21 = vmax.f32 %v5520_v39, %v5521_v34  ;;  %v6387_v63 = vpack.c.bf16 %v6281_v12, %v6280_v56  ;;  %v8423_v43 = vunpack.i.h.bf16 %v12976_v46  ;;  %v2772_v40 = vld [vmem:[#allocation2 + $0xb58] sm:$0xff]  ;;  %v13030_v7 = vpop.permute.xlu1 %8440 }
 0x586   : > { %6676 = vmatprep.mubr.bf16.mxu0 %v6388_v11  ;;  %v8422_v3 = vunpack.i.l.bf16 %v12976_v46  ;;  %v8417_v32 = vunpack.i.l.bf16 %v12980_v0  ;;  %v6389_v24 = vpack.c.bf16 %v13803_v6, %v11816_v18  ;;  %v3236_v22 = vsub.f32 %v2746_v19, %v9934_v9 }
 0x587   : > { %v6308_v20 = vsel %vm1597_vm3, %v5680_v21, %v8408_v26  ;;  %v6307_v15 = vsel %vm1597_vm3, %v5678_v17, %v8407_v45  ;;  %6677 = vmatmul.mubr.bf16.gmra.mrb[28].mxu0 %v6387_v63  ;;  %v3237_v50 = vsub.f32 %v2747_v1, %v9934_v9  ;;  %v3240_v47 = vsub.f32 %v2750_v36, %v9934_v9 }
 0x588   : > { %v6332_v30 = vsel %vm825_vm2, %v6307_v15, %v8393_v42  ;;  %v6333_v18 = vsel %vm825_vm2, %v6308_v20, %v8417_v32  ;;  %8058 = vmatmul.mubr.msk.bf16.gmra.mrb[28].mxu1 %vm1597_vm3, %v6389_v24  ;;  %v3241_v54 = vsub.f32 %v2751_v35, %v9934_v9  ;;  %v3258_v62 = vsub.f32 %v2768_v31, %v9934_v9  ;;  %v8436_v15 = vpop.permute.xlu0 %8435 }
 0x589   : > { %v3259_v48 = vsub.f32 %v2769_v13, %v9934_v9  ;;  %v3262_v28 = vsub.f32 %v2772_v40, %v9934_v9  ;;  %v3263_v16 = vsub.f32 %v2773_v14, %v9934_v9  ;;  %v3728_v60 = vmul.f32 %v10134_v27, %v3236_v22  ;;  %8061 = vmatprep.mubr.msk.bf16.mxu1 %vm8623_vm6, %v13797_v2 }
 0x58a   : > { %v3729_v57 = vmul.f32 %v10134_v27, %v3237_v50  ;;  %v3732_v4 = vmul.f32 %v10134_v27, %v3240_v47  ;;  %v3733_v52 = vmul.f32 %v10134_v27, %v3241_v54  ;;  %v3750_v49 = vmul.f32 %v10134_v27, %v3258_v62 }
 0x58b   : > { %v3751_v26 = vmul.f32 %v10134_v27, %v3259_v48  ;;  %v3754_v45 = vmul.f32 %v10134_v27, %v3262_v28  ;;  %v3755_v59 = vmul.f32 %v10134_v27, %v3263_v16  ;;  %v4219_v37 = vmul.f32 %v12769_v33, %v3728_v60  ;;  %v13048_v48 = vpop.permute.xlu1 %8450 }
 0x58c   : > { %v4220_v23 = vmul.f32 %v12769_v33, %v3729_v57  ;;  %v4223_v39 = vmul.f32 %v12769_v33, %v3732_v4  ;;  %v4224_v34 = vmul.f32 %v12769_v33, %v3733_v52  ;;  %v4241_v19 = vmul.f32 %v12769_v33, %v3750_v49 }
 0x58d   : > { %v4242_v11 = vmul.f32 %v12769_v33, %v3751_v26  ;;  %v4245_v56 = vmul.f32 %v12769_v33, %v3754_v45  ;;  %v4246_v12 = vmul.f32 %v12769_v33, %v3755_v59  ;;  %v4710_v1 = vadd.f32 %v12782_v38, %v4219_v37 }
 0x58e   : > { %v4711_v36 = vadd.f32 %v12782_v38, %v4220_v23  ;;  %v4714_v17 = vadd.f32 %v12782_v38, %v4223_v39  ;;  %v4715_v21 = vadd.f32 %v12782_v38, %v4224_v34  ;;  %v4732_v63 = vadd.f32 %v12782_v38, %v4241_v19 }
 0x58f   : > { %v4733_v35 = vadd.f32 %v12782_v38, %v4242_v11  ;;  %v4736_v31 = vadd.f32 %v12782_v38, %v4245_v56  ;;  %v4737_v24 = vadd.f32 %v12782_v38, %v4246_v12  ;;  %v5194_v13 = vmax.f32 %v4710_v1, 0.0  ;;  %v8461_v1 = vpop.permute.xlu1 %8460 }
 0x590   : > { %v5195_v40 = vmax.f32 %v4711_v36, 0.0  ;;  %v5198_v14 = vmax.f32 %v4714_v17, 0.0  ;;  %v5199_v22 = vmax.f32 %v4715_v21, 0.0  ;;  %v5216_v20 = vmax.f32 %v4732_v63, 0.0  ;;  %v2823_v36 = vld [vmem:[#allocation2 + $0xd08] sm:$0xff]  ;;  %v2826_v17 = vld [vmem:[#allocation2 + $0xd20] sm:$0xff] }
 0x591   : > { %v5217_v50 = vmax.f32 %v4733_v35, 0.0  ;;  %v5220_v47 = vmax.f32 %v4736_v31, 0.0  ;;  %v5221_v54 = vmax.f32 %v4737_v24, 0.0  ;;  %v8433_v62 = vunpack.i.h.bf16 %v12996_v58  ;;  %v2827_v63 = vld [vmem:[#allocation2 + $0xd28] sm:$0xff]  ;;  %v2844_v35 = vld [vmem:[#allocation2 + $0xdb8] sm:$0xff]  ;;  %v2845_v31 = vld [vmem:[#allocation2 + $0xdc0] sm:$0xff] }
 0x592   : > { %v5524_v28 = vmax.f32 %v5194_v13, %v5216_v20  ;;  %v8432_v16 = vunpack.i.l.bf16 %v12996_v58  ;;  %v8428_v60 = vunpack.i.h.bf16 %v8426_v10  ;;  %v8427_v57 = vunpack.i.l.bf16 %v8426_v10 }
 0x593   : > { %v5525_v4 = vmax.f32 %v5195_v40, %v5217_v50  ;;  %v5528_v52 = vmax.f32 %v5198_v14, %v5220_v47  ;;  %v5529_v49 = vmax.f32 %v5199_v22, %v5221_v54  ;;  %v6357_v26 = vsel %vm6265_vm5, %v6332_v30, %v8422_v3  ;;  %v13804_v14 = vld [vmem:[#allocation29_spill] sm:$0xff]  ;;  %v13805_v22 = vld [vmem:[#allocation30_spill] sm:$0xff] }
 0x594   : > { %v6358_v45 = vsel %vm6265_vm5, %v6333_v18, %v8423_v43  ;;  %v8443_v59 = vunpack.i.h.bf16 %v13030_v7  ;;  %v8442_v37 = vunpack.i.l.bf16 %v13030_v7  ;;  %v8438_v23 = vunpack.i.h.bf16 %v8436_v15  ;;  %v13066_v43 = vpop.permute.xlu0 %8445  ;;  %v2849_v50 = vld [vmem:[#allocation2 + $0xde0] sm:$0xff] }
 0x595   : > { %v5682_v39 = vmax.f32 %v5524_v28, %v5525_v4  ;;  %v5684_v58 = vmax.f32 %v5528_v52, %v5529_v49  ;;  %v6391_v34 = vpack.c.bf16 %v6358_v45, %v6357_v26  ;;  %v8437_v10 = vunpack.i.l.bf16 %v8436_v15  ;;  %v2848_v15 = vld [vmem:[#allocation2 + $0xdd8] sm:$0xff]  ;;  %v13806_v4 = vld [vmem:[#allocation28_spill] sm:$0xff] }
 0x596   : > { %v8418_v19 = vunpack.i.h.bf16 %v12980_v0  ;;  %v6234_v11 = vsel %vm1597_vm3, %v11534_v51, %v8438_v23  ;;  %v6282_v3 = vsel %vm6265_vm5, %v12948_v61, %v8427_v57  ;;  %v6283_v46 = vsel %vm6265_vm5, %v12985_v55, %v8428_v60  ;;  %v2822_v51 = vld [vmem:[#allocation2 + $0xd00] sm:$0xff] }
 0x597   : > { %v6310_v30 = vsel %vm1597_vm3, %v5684_v58, %v8433_v62  ;;  %v6309_v18 = vsel %vm1597_vm3, %v5682_v39, %v8432_v16  ;;  %6684 = vmatprep.mubr.bf16.mxu0 %v6391_v34  ;;  %v6233_v56 = vsel %vm1597_vm3, %v11351_v29, %v8437_v10  ;;  %v8453_v12 = vunpack.i.h.bf16 %v13048_v48 }
 0x598   : > { %v13076_v61 = vsel %vm825_vm2, %v6309_v18, %v8418_v19  ;;  %v13081_v55 = vsel %vm825_vm2, %v6310_v30, %v8442_v37  ;;  %v13084_v21 = vsel %vm825_vm2, %v6234_v11, %v8443_v59  ;;  %v6390_v29 = vpack.c.bf16 %v6283_v46, %v6282_v3 }
 0x599   : > { %v13089_v24 = vsel %vm825_vm2, %v6233_v56, %v8387_v41  ;;  %v8452_v13 = vunpack.i.l.bf16 %v13048_v48  ;;  %v8448_v40 = vunpack.i.h.bf16 %v13066_v43  ;;  %v6392_v20 = vpack.c.bf16 %v13805_v22, %v13804_v14  ;;  %v8456_v56 = vpop.permute.xlu0 %8455  ;;  %v13807_v48 = vld [vmem:[#allocation31_spill] sm:$0xff] }
 0x59a   : > { %6685 = vmatmul.mubr.bf16.gmra.mrb[32].mxu0 %v6390_v29  ;;  %v8463_v47 = vunpack.i.h.bf16 %v8461_v1  ;;  %v8462_v54 = vunpack.i.l.bf16 %v8461_v1  ;;  %v3312_v62 = vsub.f32 %v2822_v51, %v9934_v9  ;;  %v3313_v28 = vsub.f32 %v2823_v36, %v9934_v9 }
 0x59b   : > { %8062 = vmatmul.mubr.msk.bf16.gmra.mrb[32].mxu1 %vm1597_vm3, %v6392_v20  ;;  %v3316_v44 = vsub.f32 %v2826_v17, %v9934_v9  ;;  %v3317_v41 = vsub.f32 %v2827_v63, %v9934_v9  ;;  %v3334_v16 = vsub.f32 %v2844_v35, %v9934_v9  ;;  %v3335_v60 = vsub.f32 %v2845_v31, %v9934_v9 }
 0x59c   : > { %v8447_v57 = vunpack.i.l.bf16 %v13066_v43  ;;  %v6235_v52 = vsel %vm1597_vm3, %v13806_v4, %v8462_v54  ;;  %v3338_v49 = vsub.f32 %v2848_v15, %v9934_v9  ;;  %v3339_v26 = vsub.f32 %v2849_v50, %v9934_v9  ;;  %8065 = vmatprep.mubr.msk.bf16.mxu1 %vm8623_vm6, %v13797_v2 }
 0x59d   : > { %v13111_v45 = vsel %vm1597_vm3, %v13803_v6, %v8463_v47  ;;  %v13116_v59 = vsel %vm825_vm2, %v6235_v52, %v8393_v42  ;;  %v3804_v23 = vmul.f32 %v10134_v27, %v3312_v62  ;;  %v3805_v39 = vmul.f32 %v10134_v27, %v3313_v28  ;;  %v13142_v52 = vpop.permute.xlu1 %8470 }
 0x59e   : > { %v3808_v58 = vmul.f32 %v10134_v27, %v3316_v44  ;;  %v3809_v34 = vmul.f32 %v10134_v27, %v3317_v41  ;;  %v3826_v10 = vmul.f32 %v10134_v27, %v3334_v16  ;;  %v3827_v11 = vmul.f32 %v10134_v27, %v3335_v60 }
 0x59f   : > { %v3830_v6 = vmul.f32 %v10134_v27, %v3338_v49  ;;  %v3831_v3 = vmul.f32 %v10134_v27, %v3339_v26  ;;  %v4295_v53 = vmul.f32 %v12769_v33, %v3804_v23  ;;  %v4296_v42 = vmul.f32 %v12769_v33, %v3805_v39 }
 0x5a0   : > { %v4299_v46 = vmul.f32 %v12769_v33, %v3808_v58  ;;  %v4300_v43 = vmul.f32 %v12769_v33, %v3809_v34  ;;  %v4317_v30 = vmul.f32 %v12769_v33, %v3826_v10  ;;  %v4318_v18 = vmul.f32 %v12769_v33, %v3827_v11  ;;  %v8466_v58 = vpop.permute.xlu0 %8465 }
 0x5a1   : > { %v4321_v1 = vmul.f32 %v12769_v33, %v3830_v6  ;;  %v4322_v51 = vmul.f32 %v12769_v33, %v3831_v3  ;;  %v4786_v36 = vadd.f32 %v12782_v38, %v4295_v53  ;;  %v4787_v17 = vadd.f32 %v12782_v38, %v4296_v42  ;;  %v2830_v3 = vld [vmem:[#allocation2 + $0xd40] sm:$0xff]  ;;  %v2831_v53 = vld [vmem:[#allocation2 + $0xd48] sm:$0xff] }
 0x5a2   : > { %v4790_v29 = vadd.f32 %v12782_v38, %v4299_v46  ;;  %v4791_v63 = vadd.f32 %v12782_v38, %v4300_v43  ;;  %v4808_v35 = vadd.f32 %v12782_v38, %v4317_v30  ;;  %v4809_v31 = vadd.f32 %v12782_v38, %v4318_v18  ;;  %v2835_v46 = vld [vmem:[#allocation2 + $0xd68] sm:$0xff] }
 0x5a3   : > { %v4812_v20 = vadd.f32 %v12782_v38, %v4321_v1  ;;  %v4813_v15 = vadd.f32 %v12782_v38, %v4322_v51  ;;  %v5270_v50 = vmax.f32 %v4786_v36, 0.0  ;;  %v5271_v47 = vmax.f32 %v4787_v17, 0.0  ;;  %v2856_v1 = vld [vmem:[#allocation2 + $0xe18] sm:$0xff] }
 0x5a4   : > { %v5274_v54 = vmax.f32 %v4790_v29, 0.0  ;;  %v5275_v62 = vmax.f32 %v4791_v63, 0.0  ;;  %v5292_v28 = vmax.f32 %v4808_v35, 0.0  ;;  %v5293_v44 = vmax.f32 %v4809_v31, 0.0 }
 0x5a5   : > { %v5296_v41 = vmax.f32 %v4812_v20, 0.0  ;;  %v5297_v16 = vmax.f32 %v4813_v15, 0.0  ;;  %v8458_v60 = vunpack.i.h.bf16 %v8456_v56  ;;  %v8457_v4 = vunpack.i.l.bf16 %v8456_v56 }
 0x5a6   : > { %v5556_v49 = vmax.f32 %v5270_v50, %v5292_v28  ;;  %v5557_v26 = vmax.f32 %v5271_v47, %v5293_v44  ;;  %v6359_v23 = vsel %vm6265_vm5, %v13076_v61, %v8447_v57  ;;  %v6360_v39 = vsel %vm6265_vm5, %v13081_v55, %v8448_v40  ;;  %v2834_v40 = vld [vmem:[#allocation2 + $0xd60] sm:$0xff]  ;;  %v8476_v47 = vpop.permute.xlu0 %8475 }
 0x5a7   : > { %v5560_v34 = vmax.f32 %v5274_v54, %v5296_v41  ;;  %v5561_v10 = vmax.f32 %v5275_v62, %v5297_v16  ;;  %v6394_v11 = vpack.c.bf16 %v6360_v39, %v6359_v23  ;;  %v6284_v6 = vsel %vm6265_vm5, %v13089_v24, %v8452_v13  ;;  %v2852_v24 = vld [vmem:[#allocation2 + $0xdf8] sm:$0xff]  ;;  %v2853_v13 = vld [vmem:[#allocation2 + $0xe00] sm:$0xff] }
 0x5a8   : > { %v5698_v42 = vmax.f32 %v5556_v49, %v5557_v26  ;;  %v6285_v61 = vsel %vm6265_vm5, %v13084_v21, %v8453_v12  ;;  %v8473_v57 = vunpack.i.h.bf16 %v13142_v52  ;;  %v8472_v55 = vunpack.i.l.bf16 %v13142_v52  ;;  %v2857_v12 = vld [vmem:[#allocation2 + $0xe20] sm:$0xff] }
 0x5a9   : > { %v5700_v43 = vmax.f32 %v5560_v34, %v5561_v10  ;;  %6692 = vmatprep.mubr.bf16.mxu0 %v6394_v11  ;;  %v6393_v30 = vpack.c.bf16 %v6285_v61, %v6284_v6  ;;  %v8468_v18 = vunpack.i.h.bf16 %v8466_v58  ;;  %v8467_v56 = vunpack.i.l.bf16 %v8466_v58  ;;  %v8481_v58 = vpop.permute.xlu1 %8480  ;;  %v2838_v52 = vld [vmem:[#allocation2 + $0xd80] sm:$0xff] }
 0x5aa   : > { %v6311_v51 = vsel %vm1597_vm3, %v5698_v42, %v8457_v4  ;;  %v6395_v36 = vpack.c.bf16 %v12349_v25, %v13807_v48  ;;  %v3320_v21 = vsub.f32 %v2830_v3, %v9934_v9  ;;  %v3321_v17 = vsub.f32 %v2831_v53, %v9934_v9 }
 0x5ab   : > { %v6312_v29 = vsel %vm1597_vm3, %v5700_v43, %v8458_v60  ;;  %6693 = vmatmul.mubr.bf16.gmra.mrb[36].mxu0 %v6393_v30  ;;  %v6336_v63 = vsel %vm825_vm2, %v6311_v51, %v8467_v56  ;;  %v3324_v35 = vsub.f32 %v2834_v40, %v9934_v9  ;;  %v3325_v31 = vsub.f32 %v2835_v46, %v9934_v9 }
 0x5ac   : > { %v6337_v20 = vsel %vm825_vm2, %v6312_v29, %v8468_v18  ;;  %8066 = vmatmul.mubr.msk.bf16.gmra.mrb[36].mxu1 %vm1597_vm3, %v6395_v36  ;;  %v3342_v25 = vsub.f32 %v2852_v24, %v9934_v9  ;;  %v3343_v15 = vsub.f32 %v2853_v13, %v9934_v9  ;;  %v3346_v50 = vsub.f32 %v2856_v1, %v9934_v9  ;;  %v8486_v18 = vpop.permute.xlu0 %8485 }
 0x5ad   : > { %v3347_v54 = vsub.f32 %v2857_v12, %v9934_v9  ;;  %v3812_v62 = vmul.f32 %v10134_v27, %v3320_v21  ;;  %v3813_v28 = vmul.f32 %v10134_v27, %v3321_v17  ;;  %v3816_v44 = vmul.f32 %v10134_v27, %v3324_v35  ;;  %8069 = vmatprep.mubr.msk.bf16.mxu1 %vm8623_vm6, %v13797_v2 }
 0x5ae   : > { %v3817_v41 = vmul.f32 %v10134_v27, %v3325_v31  ;;  %v3834_v16 = vmul.f32 %v10134_v27, %v3342_v25  ;;  %v3835_v60 = vmul.f32 %v10134_v27, %v3343_v15  ;;  %v3838_v4 = vmul.f32 %v10134_v27, %v3346_v50  ;;  %v8491_v31 = vpop.permute.xlu1 %8490 }
 0x5af   : > { %v3839_v49 = vmul.f32 %v10134_v27, %v3347_v54  ;;  %v4303_v26 = vmul.f32 %v12769_v33, %v3812_v62  ;;  %v4304_v23 = vmul.f32 %v12769_v33, %v3813_v28  ;;  %v4307_v39 = vmul.f32 %v12769_v33, %v3816_v44 }
 0x5b0   : > { %v4308_v34 = vmul.f32 %v12769_v33, %v3817_v41  ;;  %v4325_v10 = vmul.f32 %v12769_v33, %v3834_v16  ;;  %v4326_v11 = vmul.f32 %v12769_v33, %v3835_v60  ;;  %v4329_v6 = vmul.f32 %v12769_v33, %v3838_v4  ;;  %v8496_v60 = vpop.permute.xlu0 %8495 }
 0x5b1   : > { %v4330_v3 = vmul.f32 %v12769_v33, %v3839_v49  ;;  %v4794_v53 = vadd.f32 %v12782_v38, %v4303_v26  ;;  %v4795_v42 = vadd.f32 %v12782_v38, %v4304_v23  ;;  %v4798_v61 = vadd.f32 %v12782_v38, %v4307_v39  ;;  %v13808_v39 = vld [vmem:[#allocation32_spill] sm:$0xff] }
 0x5b2   : > { %v4799_v40 = vadd.f32 %v12782_v38, %v4308_v34  ;;  %v4816_v46 = vadd.f32 %v12782_v38, %v4325_v10  ;;  %v4817_v43 = vadd.f32 %v12782_v38, %v4326_v11  ;;  %v4820_v30 = vadd.f32 %v12782_v38, %v4329_v6  ;;  %v8501_v34 = vpop.permute.xlu1 %8500  ;;  %v2860_v10 = vld [vmem:[#allocation2 + $0xe38] sm:$0xff]  ;;  %v2861_v11 = vld [vmem:[#allocation2 + $0xe40] sm:$0xff] }
 0x5b3   : > { %v4821_v56 = vadd.f32 %v12782_v38, %v4330_v3  ;;  %v5278_v24 = vmax.f32 %v4794_v53, 0.0  ;;  %v5279_v13 = vmax.f32 %v4795_v42, 0.0  ;;  %v5282_v33 = vmax.f32 %v4798_v61, 0.0 }
 0x5b4   : > { %v5283_v1 = vmax.f32 %v4799_v40, 0.0  ;;  %v5300_v51 = vmax.f32 %v4816_v46, 0.0  ;;  %v5301_v36 = vmax.f32 %v4817_v43, 0.0  ;;  %v5304_v12 = vmax.f32 %v4820_v30, 0.0  ;;  %v13231_v43 = vpop.permute.xlu0 %8505 }
 0x5b5   : > { %v6261_v21 = vsel %vm825_vm2, %v13111_v45, %v8417_v32  ;;  %v5305_v17 = vmax.f32 %v4821_v56, 0.0  ;;  %v8483_v29 = vunpack.i.h.bf16 %v8481_v58  ;;  %v8478_v35 = vunpack.i.h.bf16 %v8476_v47 }
 0x5b6   : > { %v5564_v25 = vmax.f32 %v5278_v24, %v5300_v51  ;;  %v5565_v15 = vmax.f32 %v5279_v13, %v5301_v36  ;;  %v5568_v50 = vmax.f32 %v5282_v33, %v5304_v12  ;;  %v8477_v38 = vunpack.i.l.bf16 %v8476_v47 }
 0x5b7   : > { %v5569_v54 = vmax.f32 %v5283_v1, %v5305_v17  ;;  %v8482_v62 = vunpack.i.l.bf16 %v8481_v58  ;;  %v6361_v28 = vsel %vm6265_vm5, %v6336_v63, %v8472_v55  ;;  %v6362_v44 = vsel %vm6265_vm5, %v6337_v20, %v8473_v57  ;;  %v2839_v63 = vld [vmem:[#allocation2 + $0xd88] sm:$0xff]  ;;  %v8576_v1 = vld [vmem:[%s13585_s2] ss:$0 sm:$0xff] }
 0x5b8   : > { %v5702_v41 = vmax.f32 %v5564_v25, %v5565_v15  ;;  %v6397_v32 = vpack.c.bf16 %v6362_v44, %v6361_v28  ;;  %v8492_v45 = vunpack.i.l.bf16 %v8491_v31  ;;  %v8488_v16 = vunpack.i.h.bf16 %v8486_v18  ;;  %v8577_v25 = vld [vmem:[%s13586_s3] ss:$0 sm:$0xff]  ;;  %v2885_v28 = vld [vmem:[#allocation2 + $0xf08] sm:$0xff] }
 0x5b9   : > { %v5704_v4 = vmax.f32 %v5568_v50, %v5569_v54  ;;  %v8487_v49 = vunpack.i.l.bf16 %v8486_v18  ;;  %v6286_v47 = vsel %vm6265_vm5, %v13116_v59, %v8477_v38  ;;  %v6287_v26 = vsel %vm6265_vm5, %v6261_v21, %v8478_v35  ;;  %v13809_v54 = vld [vmem:[#allocation33_spill] sm:$0xff] }
 0x5ba   : > { %6700 = vmatprep.mubr.bf16.mxu0 %v6397_v32  ;;  %v6396_v23 = vpack.c.bf16 %v6287_v26, %v6286_v47  ;;  %v6398_v55 = vpack.c.bf16 %v12173_v8, %v13808_v39  ;;  %v6313_v57 = vsel %vm1597_vm3, %v5702_v41, %v8482_v62  ;;  %v8493_v20 = vunpack.i.h.bf16 %v8491_v31  ;;  %v2884_v31 = vld [vmem:[#allocation2 + $0xf00] sm:$0xff] }
 0x5bb   : > { %v6238_v58 = vsel %vm1597_vm3, %v13805_v22, %v8488_v16  ;;  %v6314_v59 = vsel %vm1597_vm3, %v5704_v4, %v8483_v29  ;;  %v6338_v6 = vsel %vm825_vm2, %v6313_v57, %v8492_v45  ;;  %v6237_v3 = vsel %vm1597_vm3, %v13804_v14, %v8487_v49  ;;  %v8511_v29 = vpop.permute.xlu1 %8510  ;;  %v8516_v45 = vpop.permute.xlu0 %8515  ;;  %v2906_v16 = vld [vmem:[#allocation2 + $0xfb8] sm:$0xff] }
 0x5bc   : > { %6701 = vmatmul.mubr.bf16.gmra.mrb[40].mxu0 %v6396_v23  ;;  %8070 = vmatmul.mubr.msk.bf16.gmra.mrb[40].mxu1 %vm1597_vm3, %v6398_v55  ;;  %v8498_v8 = vunpack.i.h.bf16 %v8496_v60  ;;  %v8497_v53 = vunpack.i.l.bf16 %v8496_v60  ;;  %v3328_v42 = vsub.f32 %v2838_v52, %v9934_v9  ;;  %v3329_v61 = vsub.f32 %v2839_v63, %v9934_v9  ;;  %v2907_v60 = vld [vmem:[#allocation2 + $0xfc0] sm:$0xff] }
 0x5bd   : > { %8073 = vmatprep.mubr.msk.bf16.mxu1 %vm8623_vm6, %v13797_v2  ;;  %v6263_v22 = vsel %vm825_vm2, %v6238_v58, %v8442_v37  ;;  %v8502_v40 = vunpack.i.l.bf16 %v8501_v34  ;;  %v3350_v46 = vsub.f32 %v2860_v10, %v9934_v9  ;;  %v3351_v14 = vsub.f32 %v2861_v11, %v9934_v9 }
 0x5be   : > { %v6339_v30 = vsel %vm825_vm2, %v6314_v59, %v8493_v20  ;;  %v8503_v18 = vunpack.i.h.bf16 %v8501_v34  ;;  %v3820_v56 = vmul.f32 %v10134_v27, %v3328_v42  ;;  %v3821_v24 = vmul.f32 %v10134_v27, %v3329_v61 }
 0x5bf   : > { %v6262_v7 = vsel %vm825_vm2, %v6237_v3, %v8418_v19  ;;  %v3842_v37 = vmul.f32 %v10134_v27, %v3350_v46  ;;  %v3843_v13 = vmul.f32 %v10134_v27, %v3351_v14  ;;  %v6363_v33 = vsel %vm6265_vm5, %v6338_v6, %v8497_v53 }
 0x5c0   : > { %v4311_v51 = vmul.f32 %v8576_v1, %v3820_v56  ;;  %v4312_v36 = vmul.f32 %v8576_v1, %v3821_v24  ;;  %v8508_v12 = vunpack.i.h.bf16 %v13231_v43  ;;  %v6364_v21 = vsel %vm6265_vm5, %v6339_v30, %v8498_v8 }
 0x5c1   : > { %v4333_v17 = vmul.f32 %v8576_v1, %v3842_v37  ;;  %v4334_v0 = vmul.f32 %v8576_v1, %v3843_v13  ;;  %v6400_v19 = vpack.c.bf16 %v6364_v21, %v6363_v33  ;;  %v6288_v35 = vsel %vm6265_vm5, %v6262_v7, %v8502_v40 }
 0x5c2   : > { %v4802_v15 = vadd.f32 %v8577_v25, %v4311_v51  ;;  %v4803_v50 = vadd.f32 %v8577_v25, %v4312_v36  ;;  %v6289_v38 = vsel %vm6265_vm5, %v6263_v22, %v8503_v18  ;;  %v6401_v62 = vpack.c.bf16 %v12353_v5, %v13809_v54 }
 0x5c3   : > { %v4824_v44 = vadd.f32 %v8577_v25, %v4333_v17  ;;  %v4825_v41 = vadd.f32 %v8577_v25, %v4334_v0  ;;  %6708 = vmatprep.mubr.bf16.mxu0 %v6400_v19  ;;  %v6399_v32 = vpack.c.bf16 %v6289_v38, %v6288_v35  ;;  %v8513_v47 = vunpack.i.h.bf16 %v8511_v29 }
 0x5c4   : > { %v5286_v4 = vmax.f32 %v4802_v15, 0.0  ;;  %v5287_v49 = vmax.f32 %v4803_v50, 0.0  ;;  %8074 = vmatmul.mubr.msk.bf16.gmra.mrb[44].mxu1 %vm1597_vm3, %v6401_v62  ;;  %v3374_v26 = vsub.f32 %v2884_v31, %v9934_v9  ;;  %v6239_v5 = vsel %vm1597_vm3, %v13807_v48, %v8508_v12 }
 0x5c5   : > { %v5308_v23 = vmax.f32 %v4824_v44, 0.0  ;;  %v5309_v39 = vmax.f32 %v4825_v41, 0.0  ;;  %6709 = vmatmul.mubr.bf16.gmra.mrb[44].mxu0 %v6399_v32  ;;  %8077 = vmatprep.mubr.msk.bf16.mxu1 %vm8623_vm6, %v13797_v2  ;;  %v3375_v55 = vsub.f32 %v2885_v28, %v9934_v9  ;;  %v8518_v52 = vunpack.i.h.bf16 %v8516_v45 }
 0x5c6   : > { %v3396_v63 = vsub.f32 %v2906_v16, %v9934_v9  ;;  %v3397_v57 = vsub.f32 %v2907_v60, %v9934_v9  ;;  %v3866_v20 = vmul.f32 %v10134_v27, %v3374_v26  ;;  %v8507_v10 = vunpack.i.l.bf16 %v13231_v43 }
 0x5c7   : > { %v5572_v58 = vmax.f32 %v5286_v4, %v5308_v23  ;;  %v5573_v34 = vmax.f32 %v5287_v49, %v5309_v39  ;;  %v3867_v11 = vmul.f32 %v10134_v27, %v3375_v55  ;;  %v8512_v48 = vunpack.i.l.bf16 %v8511_v29 }
 0x5c8   : > { %v3888_v59 = vmul.f32 %v10134_v27, %v3396_v63  ;;  %v3889_v2 = vmul.f32 %v10134_v27, %v3397_v57  ;;  %v4357_v6 = vmul.f32 %v8576_v1, %v3866_v20  ;;  %v6264_v8 = vsel %vm825_vm2, %v6239_v5, %v8513_v47 }
 0x5c9   : > { %v5706_v3 = vmax.f32 %v5572_v58, %v5573_v34  ;;  %v8517_v53 = vunpack.i.l.bf16 %v8516_v45  ;;  %v4358_v42 = vmul.f32 %v8576_v1, %v3867_v11  ;;  %v6290_v9 = vsel %vm6265_vm5, %v6264_v8, %v8518_v52 }
 0x5ca   : > { %v4379_v61 = vmul.f32 %v8576_v1, %v3888_v59  ;;  %v4380_v22 = vmul.f32 %v8576_v1, %v3889_v2  ;;  %v4848_v40 = vadd.f32 %v8577_v25, %v4357_v6  ;;  %v6402_v24 = vpack.c.bf16 %v6290_v9, %v6290_v9 }
 0x5cb   : > { %v6315_v46 = vsel %vm1597_vm3, %v5706_v3, %v8507_v10  ;;  %v4849_v14 = vadd.f32 %v8577_v25, %v4358_v42 }
 0x5cc   : > { %v6340_v43 = vsel %vm825_vm2, %v6315_v46, %v8512_v48  ;;  %v4870_v30 = vadd.f32 %v8577_v25, %v4379_v61  ;;  %v4871_v18 = vadd.f32 %v8577_v25, %v4380_v22  ;;  %v5332_v56 = vmax.f32 %v4848_v40, 0.0 }
 0x5cd   : > { %v6365_v27 = vsel %vm6265_vm5, %v6340_v43, %v8517_v53  ;;  %v5333_v7 = vmax.f32 %v4849_v14, 0.0 }
 0x5ce   : > { %v6403_v37 = vpack.c.bf16 %v6365_v27, %v6365_v27  ;;  %v5354_v13 = vmax.f32 %v4870_v30, 0.0  ;;  %v5355_v33 = vmax.f32 %v4871_v18, 0.0 }
 0x5d0   : > { %6716 = vmatprep.mubr.bf16.mxu0 %v6403_v37  ;;  %v5596_v51 = vmax.f32 %v5332_v56, %v5354_v13  ;;  %v5597_v36 = vmax.f32 %v5333_v7, %v5355_v33 }
 0x5d1   : > { %6717 = vmatmul.mubr.bf16.gmra.mrb[48].mxu0 %v6402_v24 }
 0x5d2   : > { %v5718_v1 = vmax.f32 %v5596_v51, %v5597_v36 }
 0x5d4   : > { %v6404_v12 = vpack.c.bf16 %v5718_v1, %v5718_v1 }
 0x5d6   : > { %v7634_v21 = vpop.f32.mrb[0].mxu0  ;;  %8078 = vmatmul.mubr.msk.bf16.gmra.mrb[48].mxu1 %vm1597_vm3, %v6404_v12 }
 0x5d7   : > { %v7635_v17 = vpop.f32.mrb[1].mxu0  ;;  %v6758_v19 = vpop.f32.mrb[0].mxu1 }
 0x5d8   : > { %v7636_v0 = vadd.f32 %v7635_v17, %v7634_v21  ;;  %v7637_v29 = vpop.f32.mrb[2].mxu0  ;;  %v8031_v31 = vpop.f32.mrb[1].mxu1 }
 0x5d9   : > { %v7638_v35 = vpop.f32.mrb[3].mxu0  ;;  %v6761_v50 = vpop.f32.mrb[2].mxu1 }
 0x5da   : > { %v7639_v25 = vadd.f32 %v7638_v35, %v7637_v29  ;;  %v13274_v15 = vadd.f32 %v7636_v0, %v6758_v19  ;;  %v8032_v38 = vpop.f32.mrb[3].mxu1 }
 0x5dc   : > { %v13276_v54 = vadd.f32 %v7639_v25, %v6761_v50  ;;  %v6919_v59 = vmul.f32 %v13274_v15, %v13274_v15  ;;  %v6862_v42 = vsel %vm825_vm2, %v13274_v15, 0.0 }
 0x5de   : > { %v6920_v48 = vmul.f32 %v13276_v54, %v13276_v54  ;;  %v6863_v2 = vsel %vm825_vm2, %v13276_v54, 0.0  ;;  %v6944_v14 = vsel %vm825_vm2, %v6919_v59, 0.0 }
 0x5df   : > { %v6864_v43 = vadd.f32 %v6863_v2, %v6862_v42 }
 0x5e0   : > { %v6945_v9 = vsel %vm825_vm2, %v6920_v48, 0.0 }
 0x5e1   : > { %v6946_v13 = vadd.f32 %v6945_v9, %v6944_v14 }
 0x5ee   : > { %v6766_v44 = vpop.f32.mrb[4].mxu1 }
 0x5ef   : > { %v8035_v45 = vpop.f32.mrb[5].mxu1 }
 0x5f0   : > { %v7640_v62 = vpop.f32.mrb[4].mxu0  ;;  %v6769_v60 = vpop.f32.mrb[6].mxu1 }
 0x5f1   : > { %v7641_v28 = vpop.f32.mrb[5].mxu0  ;;  %v8036_v47 = vpop.f32.mrb[7].mxu1 }
 0x5f2   : > { %v7642_v41 = vadd.f32 %v7641_v28, %v7640_v62  ;;  %v7643_v32 = vpop.f32.mrb[6].mxu0 }
 0x5f3   : > { %v7644_v16 = vpop.f32.mrb[7].mxu0 }
 0x5f4   : > { %v7645_v4 = vadd.f32 %v7644_v16, %v7643_v32  ;;  %v13278_v49 = vadd.f32 %v7642_v41, %v6766_v44 }
 0x5f6   : > { %v13280_v26 = vadd.f32 %v7645_v4, %v6769_v60  ;;  %v6921_v6 = vmul.f32 %v13278_v49, %v13278_v49  ;;  %v6865_v61 = vsel %vm825_vm2, %v13278_v49, 0.0 }
 0x5f7   : > { %v6866_v33 = vadd.f32 %v6865_v61, %v6864_v43 }
 0x5f8   : > { %v6947_v56 = vsel %vm825_vm2, %v6921_v6, 0.0  ;;  %v6922_v27 = vmul.f32 %v13280_v26, %v13280_v26  ;;  %v6867_v51 = vsel %vm825_vm2, %v13280_v26, 0.0 }
 0x5f9   : > { %v6948_v12 = vadd.f32 %v6947_v56, %v6946_v13  ;;  %v6868_v0 = vadd.f32 %v6867_v51, %v6866_v33 }
 0x5fa   : > { %v6949_v21 = vsel %vm825_vm2, %v6922_v27, 0.0 }
 0x5fb   : > { %v6950_v31 = vadd.f32 %v6949_v21, %v6948_v12 }
 0x601   : > { %v7646_v23 = vpop.f32.mrb[8].mxu0 }
 0x602   : > { %v7647_v39 = vpop.f32.mrb[9].mxu0  ;;  %v6774_v5 = vpop.f32.mrb[8].mxu1 }
 0x603   : > { %v7648_v55 = vadd.f32 %v7647_v39, %v7646_v23  ;;  %v7649_v52 = vpop.f32.mrb[10].mxu0  ;;  %v8039_v63 = vpop.f32.mrb[9].mxu1 }
 0x604   : > { %v7650_v57 = vpop.f32.mrb[11].mxu0  ;;  %v6777_v20 = vpop.f32.mrb[10].mxu1 }
 0x605   : > { %v7651_v58 = vadd.f32 %v7650_v57, %v7649_v52  ;;  %v6775_v34 = vadd.f32 %v7648_v55, %v6774_v5  ;;  %v8040_v10 = vpop.f32.mrb[11].mxu1 }
 0x607   : > { %v13282_v11 = vadd.f32 %v7651_v58, %v6777_v20  ;;  %v6923_v36 = vmul.f32 %v6775_v34, %v6775_v34  ;;  %v6869_v17 = vsel %vm825_vm2, %v6775_v34, 0.0 }
 0x608   : > { %v6870_v35 = vadd.f32 %v6869_v17, %v6868_v0 }
 0x609   : > { %v6951_v29 = vsel %vm825_vm2, %v6923_v36, 0.0  ;;  %v6924_v19 = vmul.f32 %v13282_v11, %v13282_v11  ;;  %v6871_v25 = vsel %vm825_vm2, %v13282_v11, 0.0 }
 0x60a   : > { %v6952_v38 = vadd.f32 %v6951_v29, %v6950_v31  ;;  %v6872_v44 = vadd.f32 %v6871_v25, %v6870_v35 }
 0x60b   : > { %v6953_v62 = vsel %vm825_vm2, %v6924_v19, 0.0 }
 0x60c   : > { %v6954_v16 = vadd.f32 %v6953_v62, %v6952_v38 }
 0x614   : > { %v7652_v3 = vpop.f32.mrb[12].mxu0 }
 0x615   : > { %v7653_v8 = vpop.f32.mrb[13].mxu0  ;;  %v6782_v53 = vpop.f32.mrb[12].mxu1 }
 0x616   : > { %v7654_v22 = vadd.f32 %v7653_v8, %v7652_v3  ;;  %v7655_v40 = vpop.f32.mrb[14].mxu0  ;;  %v8043_v46 = vpop.f32.mrb[13].mxu1 }
 0x617   : > { %v7656_v30 = vpop.f32.mrb[15].mxu0  ;;  %v6785_v18 = vpop.f32.mrb[14].mxu1 }
 0x618   : > { %v7657_v24 = vadd.f32 %v7656_v30, %v7655_v40  ;;  %v13301_v7 = vadd.f32 %v7654_v22, %v6782_v53  ;;  %v8044_v37 = vpop.f32.mrb[15].mxu1 }
 0x61a   : > { %v13305_v1 = vadd.f32 %v7657_v24, %v6785_v18  ;;  %v6925_v50 = vmul.f32 %v13301_v7, %v13301_v7  ;;  %v6873_v28 = vsel %vm825_vm2, %v13301_v7, 0.0 }
 0x61b   : > { %v6874_v60 = vadd.f32 %v6873_v28, %v6872_v44 }
 0x61c   : > { %v6955_v41 = vsel %vm825_vm2, %v6925_v50, 0.0  ;;  %v6926_v32 = vmul.f32 %v13305_v1, %v13305_v1  ;;  %v6875_v23 = vsel %vm825_vm2, %v13305_v1, 0.0 }
 0x61d   : > { %v6956_v52 = vadd.f32 %v6955_v41, %v6954_v16  ;;  %v6876_v48 = vadd.f32 %v6875_v23, %v6874_v60 }
 0x61e   : > { %v6957_v20 = vsel %vm825_vm2, %v6926_v32, 0.0 }
 0x61f   : > { %v6958_v3 = vadd.f32 %v6957_v20, %v6956_v52 }
 0x625   : > { %v7658_v45 = vpop.f32.mrb[16].mxu0 }
 0x626   : > { %v7659_v4 = vpop.f32.mrb[17].mxu0  ;;  %v6790_v47 = vpop.f32.mrb[16].mxu1 }
 0x627   : > { %v7660_v39 = vadd.f32 %v7659_v4, %v7658_v45  ;;  %v7661_v5 = vpop.f32.mrb[18].mxu0  ;;  %v8047_v55 = vpop.f32.mrb[17].mxu1 }
 0x628   : > { %v7662_v63 = vpop.f32.mrb[19].mxu0  ;;  %v6793_v57 = vpop.f32.mrb[18].mxu1 }
 0x629   : > { %v7663_v58 = vadd.f32 %v7662_v63, %v7661_v5  ;;  %v13325_v34 = vadd.f32 %v7660_v39, %v6790_v47  ;;  %v8048_v10 = vpop.f32.mrb[19].mxu1 }
 0x62b   : > { %v6877_v59 = vsel %vm825_vm2, %v13325_v34, 0.0  ;;  %v6927_v2 = vmul.f32 %v13325_v34, %v13325_v34  ;;  %v6794_v6 = vadd.f32 %v7663_v58, %v6793_v57 }
 0x62c   : > { %v6878_v8 = vadd.f32 %v6877_v59, %v6876_v48 }
 0x62d   : > { %v6959_v53 = vsel %vm825_vm2, %v6927_v2, 0.0  ;;  %v6879_v42 = vsel %vm825_vm2, %v6794_v6, 0.0  ;;  %v6928_v9 = vmul.f32 %v6794_v6, %v6794_v6 }
 0x62e   : > { %v6880_v61 = vadd.f32 %v6879_v42, %v6878_v8  ;;  %v6960_v22 = vadd.f32 %v6959_v53, %v6958_v3 }
 0x62f   : > { %v6961_v40 = vsel %vm825_vm2, %v6928_v9, 0.0 }
 0x630   : > { %v6962_v46 = vadd.f32 %v6961_v40, %v6960_v22 }
 0x636   : > { %v7664_v14 = vpop.f32.mrb[20].mxu0 }
 0x637   : > { %v7665_v43 = vpop.f32.mrb[21].mxu0 }
 0x638   : > { %v7666_v30 = vadd.f32 %v7665_v43, %v7664_v14  ;;  %v7667_v18 = vpop.f32.mrb[22].mxu0  ;;  %v8543_v14 = vld [vmem:[%s13590_s7] sm:$0xff]   ;;  %v8544_v43 = vld [vmem:[%s13590_s7 + $0x48] sm:$0xff]  }
 0x639   : > { %v7668_v56 = vpop.f32.mrb[23].mxu0  ;;  %v6798_v27 = vpop.f32.mrb[20].mxu1 }
 0x63a   : > { %v7669_v24 = vadd.f32 %v7668_v56, %v7667_v18  ;;  %v13334_v37 = vadd.f32 %v7666_v30, %v6798_v27  ;;  %v8051_v13 = vpop.f32.mrb[21].mxu1 }
 0x63b   : > { %v6801_v33 = vpop.f32.mrb[22].mxu1 }
 0x63c   : > { %v13336_v51 = vadd.f32 %v7669_v24, %v6801_v33  ;;  %v8052_v36 = vpop.f32.mrb[23].mxu1  ;;  %v6929_v12 = vmul.f32 %v13334_v37, %v13334_v37  ;;  %v6881_v21 = vsel %vm825_vm2, %v13334_v37, 0.0  ;;  %v8545_v24 = vld [vmem:[%s13590_s7 + $0x8] sm:$0xff]   ;;  %v8546_v33 = vld [vmem:[%s13590_s7 + $0x50] sm:$0xff]  }
 0x63d   : > { %v6882_v19 = vadd.f32 %v6881_v21, %v6880_v61  ;;  %v8548_v21 = vld [vmem:[%s13590_s7 + $0x58] sm:$0xff]  }
 0x63e   : > { %v6963_v17 = vsel %vm825_vm2, %v6929_v12, 0.0  ;;  %v6930_v0 = vmul.f32 %v13336_v51, %v13336_v51  ;;  %v6883_v25 = vsel %vm825_vm2, %v13336_v51, 0.0  ;;  %v8547_v12 = vld [vmem:[%s13590_s7 + $0x10] sm:$0xff]  }
 0x63f   : > { %v6964_v28 = vadd.f32 %v6963_v17, %v6962_v46  ;;  %v6884_v4 = vadd.f32 %v6883_v25, %v6882_v19  ;;  %v8542_v46 = vld [vmem:[%s13590_s7 + $0x40] sm:$0xff]   ;;  %v8549_v17 = vld [vmem:[%s13590_s7 + $0x18] sm:$0xff]  }
 0x640   : > { %v6965_v32 = vsel %vm825_vm2, %v6930_v0, 0.0  ;;  %7727 = vmatprep.subr.bf16.mxu1 %v8542_v46  ;;  %v8550_v0 = vld [vmem:[%s13590_s7 + $0x60] sm:$0xff]  }
 0x641   : > { %v6966_v5 = vadd.f32 %v6965_v32, %v6964_v28  ;;  %7728 = vmatpush3.bf16.msra.mxu1 %v8543_v14 }
 0x642   : > { %7729 = vmatprep.subr.bf16.mxu1 %v8544_v43 }
 0x645   : > { %7730 = vmatpush3.bf16.msra.mxu1 %v8545_v24 }
 0x646   : > { %7731 = vmatprep.subr.bf16.mxu1 %v8546_v33 }
 0x648   : > { %v7670_v29 = vpop.f32.mrb[24].mxu0 }
 0x649   : > { %v7671_v35 = vpop.f32.mrb[25].mxu0  ;;  %v6806_v31 = vpop.f32.mrb[24].mxu1  ;;  %7732 = vmatpush3.bf16.msra.mxu1 %v8547_v12 }
 0x64a   : > { %v7672_v50 = vadd.f32 %v7671_v35, %v7670_v29  ;;  %v7673_v38 = vpop.f32.mrb[26].mxu0  ;;  %v8055_v62 = vpop.f32.mrb[25].mxu1  ;;  %7733 = vmatprep.subr.bf16.mxu1 %v8548_v21  ;;  %v8551_v35 = vld [vmem:[%s13590_s7 + $0x20] sm:$0xff]  }
 0x64b   : > { %v7674_v44 = vpop.f32.mrb[27].mxu0  ;;  %v6809_v41 = vpop.f32.mrb[26].mxu1 }
 0x64c   : > { %v7675_v45 = vadd.f32 %v7674_v44, %v7673_v38  ;;  %v13348_v16 = vadd.f32 %v7672_v50, %v6806_v31  ;;  %v8056_v60 = vpop.f32.mrb[27].mxu1  ;;  %v8552_v50 = vld [vmem:[%s13590_s7 + $0x68] sm:$0xff]  }
 0x64d   : > { %7734 = vmatpush3.bf16.msra.mxu1 %v8549_v17 }
 0x64e   : > { %v6885_v47 = vsel %vm825_vm2, %v13348_v16, 0.0  ;;  %v6931_v23 = vmul.f32 %v13348_v16, %v13348_v16  ;;  %v13354_v39 = vadd.f32 %v7675_v45, %v6809_v41  ;;  %7735 = vmatprep.subr.bf16.mxu1 %v8550_v0 }
 0x64f   : > { %v6886_v55 = vadd.f32 %v6885_v47, %v6884_v4 }
 0x650   : > { %v6967_v52 = vsel %vm825_vm2, %v6931_v23, 0.0  ;;  %v6887_v63 = vsel %vm825_vm2, %v13354_v39, 0.0  ;;  %v6932_v57 = vmul.f32 %v13354_v39, %v13354_v39  ;;  %v8553_v23 = vld [vmem:[%s13590_s7 + $0x28] sm:$0xff]  }
 0x651   : > { %v6968_v20 = vadd.f32 %v6967_v52, %v6966_v5  ;;  %v6888_v58 = vadd.f32 %v6887_v63, %v6886_v55  ;;  %7736 = vmatpush3.bf16.msra.mxu1 %v8551_v35  ;;  %v8554_v55 = vld [vmem:[%s13590_s7 + $0x70] sm:$0xff]  }
 0x652   : > { %v6969_v10 = vsel %vm825_vm2, %v6932_v57, 0.0  ;;  %7737 = vmatprep.subr.bf16.mxu1 %v8552_v50 }
 0x653   : > { %v6970_v48 = vadd.f32 %v6969_v10, %v6968_v20 }
 0x655   : > { %7738 = vmatpush3.bf16.msra.mxu1 %v8553_v23 }
 0x656   : > { %7739 = vmatprep.subr.bf16.mxu1 %v8554_v55 }
 0x65a   : > { %v7676_v59 = vpop.f32.mrb[28].mxu0 }
 0x65b   : > { %v7677_v2 = vpop.f32.mrb[29].mxu0  ;;  %v6814_v6 = vpop.f32.mrb[28].mxu1 }
 0x65c   : > { %v7678_v3 = vadd.f32 %v7677_v2, %v7676_v59  ;;  %v7679_v8 = vpop.f32.mrb[30].mxu0  ;;  %v8059_v53 = vpop.f32.mrb[29].mxu1  ;;  %v8555_v2 = vld [vmem:[%s13590_s7 + $0x30] sm:$0xff]  }
 0x65d   : > { %v7680_v42 = vpop.f32.mrb[31].mxu0  ;;  %v6817_v9 = vpop.f32.mrb[30].mxu1  ;;  %7740 = vmatpush3.bf16.msra.mxu1 %v8555_v2 }
 0x65e   : > { %v7681_v61 = vadd.f32 %v7680_v42, %v7679_v8  ;;  %v6815_v22 = vadd.f32 %v7678_v3, %v6814_v6  ;;  %v8060_v40 = vpop.f32.mrb[31].mxu1  ;;  %v8556_v8 = vld [vmem:[%s13590_s7 + $0x78] sm:$0xff]  }
 0x65f   : > { %7741 = vmatprep.subr.bf16.mxu1 %v8556_v8 }
 0x660   : > { %v6889_v30 = vsel %vm825_vm2, %v6815_v22, 0.0  ;;  %v6933_v18 = vmul.f32 %v6815_v22, %v6815_v22  ;;  %v13372_v56 = vadd.f32 %v7681_v61, %v6817_v9  ;;  %v8557_v9 = vld [vmem:[%s13590_s7 + $0x38] sm:$0xff]  }
 0x661   : > { %v6890_v27 = vadd.f32 %v6889_v30, %v6888_v58  ;;  %7742 = vmatpush3.bf16.msra.mxu1 %v8557_v9 }
 0x662   : > { %v6971_v13 = vsel %vm825_vm2, %v6933_v18, 0.0  ;;  %v6934_v29 = vmul.f32 %v13372_v56, %v13372_v56  ;;  %v6891_v38 = vsel %vm825_vm2, %v13372_v56, 0.0 }
 0x663   : > { %v6972_v36 = vadd.f32 %v6971_v13, %v6970_v48  ;;  %v6892_v5 = vadd.f32 %v6891_v38, %v6890_v27 }
 0x664   : > { %v6973_v45 = vsel %vm825_vm2, %v6934_v29, 0.0 }
 0x665   : > { %v6974_v20 = vadd.f32 %v6973_v45, %v6972_v36 }
 0x66d   : > { %v7682_v19 = vpop.f32.mrb[32].mxu0 }
 0x66e   : > { %v7683_v31 = vpop.f32.mrb[33].mxu0  ;;  %v6822_v25 = vpop.f32.mrb[32].mxu1 }
 0x66f   : > { %v7684_v62 = vadd.f32 %v7683_v31, %v7682_v19  ;;  %v7685_v28 = vpop.f32.mrb[34].mxu0  ;;  %v8063_v44 = vpop.f32.mrb[33].mxu1 }
 0x670   : > { %v7686_v41 = vpop.f32.mrb[35].mxu0  ;;  %v6825_v32 = vpop.f32.mrb[34].mxu1 }
 0x671   : > { %v7687_v60 = vadd.f32 %v7686_v41, %v7685_v28  ;;  %v13404_v4 = vadd.f32 %v7684_v62, %v6822_v25  ;;  %v8064_v47 = vpop.f32.mrb[35].mxu1 }
 0x673   : > { %v6893_v52 = vsel %vm825_vm2, %v13404_v4, 0.0  ;;  %v6935_v63 = vmul.f32 %v13404_v4, %v13404_v4  ;;  %v13416_v57 = vadd.f32 %v7687_v60, %v6825_v32 }
 0x674   : > { %v6894_v58 = vadd.f32 %v6893_v52, %v6892_v5 }
 0x675   : > { %v6975_v10 = vsel %vm825_vm2, %v6935_v63, 0.0  ;;  %v6895_v48 = vsel %vm825_vm2, %v13416_v57, 0.0  ;;  %v6936_v59 = vmul.f32 %v13416_v57, %v13416_v57 }
 0x676   : > { %v6976_v6 = vadd.f32 %v6975_v10, %v6974_v20  ;;  %v6896_v3 = vadd.f32 %v6895_v48, %v6894_v58 }
 0x677   : > { %v6977_v53 = vsel %vm825_vm2, %v6936_v59, 0.0 }
 0x678   : > { %v6978_v42 = vadd.f32 %v6977_v53, %v6976_v6 }
 0x67e   : > { %v7688_v61 = vpop.f32.mrb[36].mxu0 }
 0x67f   : > { %v7689_v22 = vpop.f32.mrb[37].mxu0  ;;  %v6830_v40 = vpop.f32.mrb[36].mxu1 }
 0x680   : > { %v7690_v46 = vadd.f32 %v7689_v22, %v7688_v61  ;;  %v7691_v14 = vpop.f32.mrb[38].mxu0  ;;  %v8067_v43 = vpop.f32.mrb[37].mxu1 }
 0x681   : > { %v7692_v30 = vpop.f32.mrb[39].mxu0  ;;  %v6833_v18 = vpop.f32.mrb[38].mxu1 }
 0x682   : > { %v7693_v27 = vadd.f32 %v7692_v30, %v7691_v14  ;;  %v13433_v24 = vadd.f32 %v7690_v46, %v6830_v40  ;;  %v8068_v13 = vpop.f32.mrb[39].mxu1 }
 0x684   : > { %v6897_v33 = vsel %vm825_vm2, %v13433_v24, 0.0  ;;  %v6937_v36 = vmul.f32 %v13433_v24, %v13433_v24  ;;  %v6834_v12 = vadd.f32 %v7693_v27, %v6833_v18 }
 0x685   : > { %v6898_v21 = vadd.f32 %v6897_v33, %v6896_v3 }
 0x686   : > { %v6979_v17 = vsel %vm825_vm2, %v6937_v36, 0.0  ;;  %v6899_v0 = vsel %vm825_vm2, %v6834_v12, 0.0  ;;  %v6938_v29 = vmul.f32 %v6834_v12, %v6834_v12 }
 0x687   : > { %v6900_v19 = vadd.f32 %v6899_v0, %v6898_v21  ;;  %v6980_v35 = vadd.f32 %v6979_v17, %v6978_v42 }
 0x688   : > { %v6981_v31 = vsel %vm825_vm2, %v6938_v29, 0.0 }
 0x689   : > { %v6982_v25 = vadd.f32 %v6981_v31, %v6980_v35 }
 0x68f   : > { %v7694_v50 = vpop.f32.mrb[40].mxu0  ;;  %v6838_v38 = vpop.f32.mrb[40].mxu1 }
 0x690   : > { %v7695_v62 = vpop.f32.mrb[41].mxu0  ;;  %v8071_v28 = vpop.f32.mrb[41].mxu1 }
 0x691   : > { %v7696_v44 = vadd.f32 %v7695_v62, %v7694_v50  ;;  %v7697_v41 = vpop.f32.mrb[42].mxu0  ;;  %v6841_v32 = vpop.f32.mrb[42].mxu1 }
 0x692   : > { %v7698_v45 = vpop.f32.mrb[43].mxu0  ;;  %v8072_v60 = vpop.f32.mrb[43].mxu1 }
 0x693   : > { %v6839_v47 = vadd.f32 %v7696_v44, %v6838_v38  ;;  %v7699_v23 = vadd.f32 %v7698_v45, %v7697_v41 }
 0x695   : > { %v6901_v5 = vsel %vm825_vm2, %v6839_v47, 0.0  ;;  %v6939_v55 = vmul.f32 %v6839_v47, %v6839_v47  ;;  %v6842_v52 = vadd.f32 %v7699_v23, %v6841_v32 }
 0x696   : > { %v6902_v63 = vadd.f32 %v6901_v5, %v6900_v19 }
 0x697   : > { %v6983_v20 = vsel %vm825_vm2, %v6939_v55, 0.0  ;;  %v6903_v58 = vsel %vm825_vm2, %v6842_v52, 0.0  ;;  %v6940_v10 = vmul.f32 %v6842_v52, %v6842_v52  ;;  %v6846_v2 = vpop.f32.mrb[44].mxu1 }
 0x698   : > { %v6984_v48 = vadd.f32 %v6983_v20, %v6982_v25  ;;  %v6904_v59 = vadd.f32 %v6903_v58, %v6902_v63  ;;  %v7700_v3 = vpop.f32.mrb[44].mxu0  ;;  %v8075_v8 = vpop.f32.mrb[45].mxu1 }
 0x699   : > { %v6985_v6 = vsel %vm825_vm2, %v6940_v10, 0.0  ;;  %v7701_v42 = vpop.f32.mrb[45].mxu0  ;;  %v6849_v9 = vpop.f32.mrb[46].mxu1 }
 0x69a   : > { %v6986_v53 = vadd.f32 %v6985_v6, %v6984_v48  ;;  %v7702_v61 = vadd.f32 %v7701_v42, %v7700_v3  ;;  %v7703_v22 = vpop.f32.mrb[46].mxu0  ;;  %v8076_v40 = vpop.f32.mrb[47].mxu1 }
 0x69b   : > { %v7704_v46 = vpop.f32.mrb[47].mxu0 }
 0x69c   : > { %v6847_v14 = vadd.f32 %v7702_v61, %v6846_v2  ;;  %v7705_v43 = vadd.f32 %v7704_v46, %v7703_v22 }
 0x69e   : > { %v6905_v30 = vsel %vm825_vm2, %v6847_v14, 0.0  ;;  %v6941_v18 = vmul.f32 %v6847_v14, %v6847_v14  ;;  %v6850_v27 = vadd.f32 %v7705_v43, %v6849_v9 }
 0x69f   : > { %v6906_v13 = vadd.f32 %v6905_v30, %v6904_v59 }
 0x6a0   : > { %v6987_v33 = vsel %vm825_vm2, %v6941_v18, 0.0  ;;  %v6907_v36 = vsel %vm825_vm2, %v6850_v27, 0.0  ;;  %v6942_v12 = vmul.f32 %v6850_v27, %v6850_v27 }
 0x6a1   : > { %v6988_v21 = vadd.f32 %v6987_v33, %v6986_v53  ;;  %v6908_v17 = vadd.f32 %v6907_v36, %v6906_v13 }
 0x6a2   : > { %v6989_v0 = vsel %vm825_vm2, %v6942_v12, 0.0 }
 0x6a3   : > { %v6990_v29 = vadd.f32 %v6989_v0, %v6988_v21 }
 0x6a4   : > { %v7706_v19 = vpop.f32.mrb[48].mxu0 }
 0x6a5   : > { %v7707_v35 = vpop.f32.mrb[49].mxu0 }
 0x6a6   : > { %v7708_v31 = vadd.f32 %v7707_v35, %v7706_v19  ;;  %v7709_v25 = vpop.f32.mrb[50].mxu0 }
 0x6a7   : > { %v7710_v50 = vpop.f32.mrb[51].mxu0 }
 0x6a9   : > { %v6854_v38 = vpop.f32.mrb[48].mxu1 }
 0x6aa   : > { %v6855_v62 = vadd.f32 %v7708_v31, %v6854_v38  ;;  %v8079_v28 = vpop.f32.mrb[49].mxu1 }
 0x6ab   : > { %v6857_v44 = vpop.f32.mrb[50].mxu1 }
 0x6ac   : > { %v6909_v41 = vsel %vm825_vm2, %v6855_v62, 0.0  ;;  %v6943_v32 = vmul.f32 %v6855_v62, %v6855_v62  ;;  %v8080_v45 = vpop.f32.mrb[51].mxu1 }
 0x6ad   : > { %v6910_v60 = vadd.f32 %v6909_v41, %v6908_v17 }
 0x6ae   : > { %v6991_v47 = vsel %vm825_vm2, %v6943_v32, 0.0 }
 0x6af   : > { %v6911_v23 = vrot.slane %v6910_v60, 4  ;;  %v6992_v5 = vadd.f32 %v6991_v47, %v6990_v29 }
 0x6b1   : > { %v6912_v55 = vadd.f32 %v6911_v23, %v6910_v60  ;;  %v6993_v52 = vrot.slane %v6992_v5, 4 }
 0x6b3   : > { %v6913_v63 = vrot.slane %v6912_v55, 2  ;;  %v6994_v20 = vadd.f32 %v6993_v52, %v6992_v5 }
 0x6b5   : > { %v6914_v58 = vadd.f32 %v6913_v63, %v6912_v55  ;;  %v6995_v10 = vrot.slane %v6994_v20, 2 }
 0x6b7   : > { %v6915_v48 = vrot.slane %v6914_v58, 1  ;;  %v6996_v59 = vadd.f32 %v6995_v10, %v6994_v20 }
 0x6b9   : > { %v6916_v2 = vadd.f32 %v6915_v48, %v6914_v58  ;;  %v6997_v6 = vrot.slane %v6996_v59, 1 }
 0x6bb   : > { %v13452_v3 = vmul.f32 0.005, %v6916_v2  ;;  %v6998_v8 = vadd.f32 %v6997_v6, %v6996_v59 }
 0x6bd   : > { %v6999_v53 = vmul.f32 0.005, %v6998_v8  ;;  %v7000_v42 = vmul.f32 %v13452_v3, %v13452_v3  ;;  %v7009_v9 = vsub.f32 %v13325_v34, %v13452_v3  ;;  %v7012_v61 = vsub.f32 %v13348_v16, %v13452_v3 }
 0x6be   : > { %v7013_v22 = vsub.f32 %v13354_v39, %v13452_v3  ;;  %v7016_v46 = vsub.f32 %v13416_v57, %v13452_v3  ;;  %v7017_v14 = vsub.f32 %v13433_v24, %v13452_v3  ;;  %v7004_v30 = vsub.f32 %v13278_v49, %v13452_v3  ;;  %v13485_v49 = vld [vmem:[%s13588_s5] ss:$0 sm:$0xff] }
 0x6bf   : > { %v7001_v40 = vsub.f32 %v6999_v53, %v7000_v42  ;;  %v7005_v34 = vsub.f32 %v13280_v26, %v13452_v3  ;;  %v7008_v16 = vsub.f32 %v13305_v1, %v13452_v3  ;;  %v7002_v39 = vsub.f32 %v13274_v15, %v13452_v3 }
 0x6c0   : > { %v7003_v57 = vsub.f32 %v13276_v54, %v13452_v3  ;;  %v7006_v24 = vsub.f32 %v13282_v11, %v13452_v3  ;;  %v7007_v18 = vsub.f32 %v13301_v7, %v13452_v3  ;;  %v7010_v26 = vsub.f32 %v13334_v37, %v13452_v3  ;;  %v13502_v37 = vld [vmem:[%s13589_s6] ss:$0 sm:$0xff] }
 0x6c1   : > { %v7018_v43 = vadd.f32 1e-05, %v7001_v40  ;;  %v7011_v15 = vsub.f32 %v13336_v51, %v13452_v3  ;;  %v7014_v1 = vsub.f32 %v13372_v56, %v13452_v3  ;;  %v7015_v11 = vsub.f32 %v13404_v4, %v13452_v3 }
 0x6c3   : > { %8560 = vrsqrt.f32 %v7018_v43 }
 0x6cd   : > { %v13480_v27 = vpop.eup %8560 }
 0x6ce   : > { %v7022_v7 = vmul.f32 %v13480_v27, %v7004_v30  ;;  %v7023_v13 = vmul.f32 %v13480_v27, %v7005_v34  ;;  %v7026_v33 = vmul.f32 %v13480_v27, %v7008_v16  ;;  %v7027_v36 = vmul.f32 %v13480_v27, %v7009_v9 }
 0x6cf   : > { %v7030_v51 = vmul.f32 %v13480_v27, %v7012_v61  ;;  %v7031_v56 = vmul.f32 %v13480_v27, %v7013_v22  ;;  %v7034_v12 = vmul.f32 %v13480_v27, %v7016_v46  ;;  %v7035_v4 = vmul.f32 %v13480_v27, %v7017_v14 }
 0x6d0   : > { %v7044_v21 = vmul.f32 %v13485_v49, %v7022_v7  ;;  %v7045_v17 = vmul.f32 %v13485_v49, %v7023_v13  ;;  %v7048_v0 = vmul.f32 %v13485_v49, %v7026_v33  ;;  %v7049_v29 = vmul.f32 %v13485_v49, %v7027_v36 }
 0x6d1   : > { %v7052_v19 = vmul.f32 %v13485_v49, %v7030_v51  ;;  %v7053_v35 = vmul.f32 %v13485_v49, %v7031_v56  ;;  %v7056_v31 = vmul.f32 %v13485_v49, %v7034_v12  ;;  %v7057_v25 = vmul.f32 %v13485_v49, %v7035_v4 }
 0x6d2   : > { %v7066_v50 = vadd.f32 %v13502_v37, %v7044_v21  ;;  %v7067_v38 = vadd.f32 %v13502_v37, %v7045_v17  ;;  %v7070_v62 = vadd.f32 %v13502_v37, %v7048_v0  ;;  %v7071_v28 = vadd.f32 %v13502_v37, %v7049_v29 }
 0x6d3   : > { %v7074_v44 = vadd.f32 %v13502_v37, %v7052_v19  ;;  %v7075_v41 = vadd.f32 %v13502_v37, %v7053_v35  ;;  %v7078_v32 = vadd.f32 %v13502_v37, %v7056_v31  ;;  %v7079_v45 = vadd.f32 %v13502_v37, %v7057_v25 }
 0x6d4   : > { %v7082_v60 = vmax.f32 %v7066_v50, 0.0  ;;  %v7083_v47 = vmax.f32 %v7067_v38, 0.0  ;;  %v7086_v23 = vmax.f32 %v7070_v62, 0.0  ;;  %v7087_v5 = vmax.f32 %v7071_v28, 0.0 }
 0x6d5   : > { %v7090_v55 = vmax.f32 %v7074_v44, 0.0  ;;  %v7091_v52 = vmax.f32 %v7075_v41, 0.0  ;;  %v7094_v63 = vmax.f32 %v7078_v32, 0.0  ;;  %v7095_v20 = vmax.f32 %v7079_v45, 0.0 }
 0x6d6   : > { %v7098_v58 = vmax.f32 %v7082_v60, %v7086_v23  ;;  %v7099_v10 = vmax.f32 %v7083_v47, %v7087_v5  ;;  %v7024_v48 = vmul.f32 %v13480_v27, %v7006_v24  ;;  %v7025_v59 = vmul.f32 %v13480_v27, %v7007_v18 }
 0x6d7   : > { %v7102_v2 = vmax.f32 %v7090_v55, %v7094_v63  ;;  %v7103_v6 = vmax.f32 %v7091_v52, %v7095_v20  ;;  %v7028_v8 = vmul.f32 %v13480_v27, %v7010_v26  ;;  %v7029_v53 = vmul.f32 %v13480_v27, %v7011_v15 }
 0x6d8   : > { %v7105_v42 = vmax.f32 %v7098_v58, %v7099_v10  ;;  %v7032_v9 = vmul.f32 %v13480_v27, %v7014_v1  ;;  %v7033_v61 = vmul.f32 %v13480_v27, %v7015_v11  ;;  %v7046_v22 = vmul.f32 %v13485_v49, %v7024_v48 }
 0x6d9   : > { %v7107_v40 = vmax.f32 %v7102_v2, %v7103_v6  ;;  %v7047_v46 = vmul.f32 %v13485_v49, %v7025_v59  ;;  %v7050_v14 = vmul.f32 %v13485_v49, %v7028_v8  ;;  %v7051_v43 = vmul.f32 %v13485_v49, %v7029_v53 }
 0x6da   : > { %v7054_v30 = vmul.f32 %v13485_v49, %v7032_v9  ;;  %v7055_v34 = vmul.f32 %v13485_v49, %v7033_v61  ;;  %v7068_v16 = vadd.f32 %v13502_v37, %v7046_v22  ;;  %v7020_v24 = vmul.f32 %v13480_v27, %v7002_v39 }
 0x6db   : > { %v8519_v18 = vpack.i.bf16 %v7105_v42, %v7107_v40  ;;  %v7069_v26 = vadd.f32 %v13502_v37, %v7047_v46  ;;  %v7072_v15 = vadd.f32 %v13502_v37, %v7050_v14  ;;  %v7073_v1 = vadd.f32 %v13502_v37, %v7051_v43 }
 0x6dc   : > { %v7076_v11 = vadd.f32 %v13502_v37, %v7054_v30  ;;  %v7077_v7 = vadd.f32 %v13502_v37, %v7055_v34  ;;  %v7021_v13 = vmul.f32 %v13480_v27, %v7003_v57  ;;  %v7042_v36 = vmul.f32 %v13485_v49, %v7020_v24 }
 0x6dd   : > { %8520 = vrot.lane.b32.xlu1 %v8519_v18, %s8619_s11  ;;  %v7088_v33 = vmax.f32 %v7072_v15, 0.0  ;;  %v7089_v39 = vmax.f32 %v7073_v1, 0.0  ;;  %v7084_v4 = vmax.f32 %v7068_v16, 0.0  ;;  %v7085_v17 = vmax.f32 %v7069_v26, 0.0 }
 0x6de   : > { %v7092_v51 = vmax.f32 %v7076_v11, 0.0  ;;  %v7093_v56 = vmax.f32 %v7077_v7, 0.0  ;;  %v7043_v12 = vmul.f32 %v13485_v49, %v7021_v13  ;;  %v7064_v21 = vadd.f32 %v13502_v37, %v7042_v36 }
 0x6e0   : > { %v7100_v0 = vmax.f32 %v7088_v33, %v7092_v51  ;;  %v7101_v29 = vmax.f32 %v7089_v39, %v7093_v56  ;;  %v7065_v54 = vadd.f32 %v13502_v37, %v7043_v12  ;;  %v7080_v3 = vmax.f32 %v7064_v21, 0.0  ;;  %v7526_v37 = vld [vmem:[%s13591_s8] ss:$0 sm:$0xff] }
 0x6e2   : > { %v7106_v57 = vmax.f32 %v7100_v0, %v7101_v29  ;;  %v7081_v27 = vmax.f32 %v7065_v54, 0.0  ;;  %v7096_v19 = vmax.f32 %v7080_v3, %v7084_v4 }
 0x6e4   : > { %v7097_v35 = vmax.f32 %v7081_v27, %v7085_v17 }
 0x6e6   : > { %v7104_v31 = vmax.f32 %v7096_v19, %v7097_v35 }
 0x74f   : > { %v8521_v25 = vpop.permute.xlu1 %8520 }
 0x750   : > { %v8523_v50 = vunpack.i.h.bf16 %v8521_v25  ;;  %v8522_v38 = vunpack.i.l.bf16 %v8521_v25 }
 0x752   : > { %v7116_v62 = vsel %vm825_vm2, %v7104_v31, %v8523_v50  ;;  %v7117_v49 = vsel %vm825_vm2, %v7106_v57, %v8522_v38 }
 0x753   : > { %v7118_v28 = vpack.c.bf16 %v7116_v62, %v7116_v62  ;;  %v7119_v44 = vpack.c.bf16 %v7117_v49, %v7117_v49 }
 0x755   : > { %7287 = vmatprep.mubr.bf16.mxu1 %v7119_v44 }
 0x756   : > { %7288 = vmatmul.mubr.bf16.vlgmr.msra.gmra.mrb[52].mxu1 %v7118_v28 }
 0x829   : > { %v7743_v41 = vpop.f32.mrb[52].mxu1 }
 0x82a   : > { %v7744_v32 = vpop.f32.mrb[53].mxu1 }
 0x82b   : > { %v7745_v45 = vadd.f32 %v7744_v32, %v7743_v41  ;;  %v7746_v60 = vpop.f32.mrb[54].mxu1 }
 0x82c   : > { %v7747_v47 = vpop.f32.mrb[55].mxu1 }
 0x82d   : > { %v7290_v23 = vadd.f32 %v7745_v45, %v7526_v37 }
 0x82f   : > { %8562 = vtanh.f32 %v7290_v23 }
 0x839   : > { %v8563_v5 = vpop.eup %8562 }
 0x83a   : > { %7297 = vst [vmem:[#allocation5] sm:$0xff] %v8563_v5 }
 0x83b PF: > { %p8094_p6 = scmp.eq.s32.totalorder %s8681_s10, 3  ;;  %s8624_s29 = smov [#allocation5]  }
 0x83c   : > { %s7305_s14 = sshll.u32 %s8624_s29, 4  ;;  %s7306_s14 = int_to_ptr.vmem [resolvable:$true] %s7305_s14 }
 0x83d   : > { %s8578_s15 = scalar_lea.vmem %s7306_s14, 128  ;;  %p8585_p10 = scmp.lt.s32.totalorder %s7306_s14, %s7306_s14 }
 0x83e   : > { %p8579_p7 = scmp.ne.s32.totalorder %s7306_s14, %s8578_s15  ;;  %p8586_p11 = scmp.lt.s32.totalorder %s8578_s15, %s8578_s15 }
 0x840   : > { %p8580_p8 = pnand %p8579_p7, %p8094_p6  ;;  %p8587_p12 = por %p8586_p11, %p8585_p10 }
 0x842   : > { %p8581_p9 = pneg %p8580_p8 }
 0x844   : > { %p8588_p13 = pnand %p8587_p12, %p8581_p9 }
 0x846   : > { %8591 = shalt.err (!%p8588_p13)
}
 0x847   : > { %s8592_s18 = scalar_lea.hbm %s13592_s9, 128 }
 0x848   : > { %p8593_p0 = scmp.ne.s32.totalorder %s13592_s9, %s8592_s18  ;;  %p8598_p3 = scmp.lt.u32.totalorder %s8592_s18, %s13592_s9 }
 0x84a   : > { %p8594_p1 = pnand %p8593_p0, %p8094_p6 }
 0x84c   : > { %p8595_p2 = pneg %p8594_p1 }
 0x84e   : > { %p8600_p4 = pnand %p8598_p3, %p8595_p2 }
 0x850   : > { %8603 = shalt.err (!%p8600_p4)
}
 0x851   : > { %8091 = dma.vmem_to_hbm [thread:$0]  (%p8094_p6), %s7306_s14, 128, %s13592_s9, [#allocation6]  }
 0x852   : > { %8609 = dma.done.wait (%p8094_p6), [#allocation6], 128  }
 0x853   : > { %8611 = vsyncadd (%p8094_p6), [#allocation6], 4294967168 }
 0x854 PF: > { %s20_s30 = sadd.s32 1, %s8614_s30  }
 0x855   : > { %p17_p5 = scmp.ge.s32.totalorder %s20_s30, 6  }
 0x857   :  { %19 = sbr.rel (!%p17_p5) target bundleno = 1 (0x1), region = 92 }
 0x85e   :  { %7318 = vsyncpa [#allocation6], 1 }
 0x85f   :  { %7320 = vsyncpa [#allocation6 + $0x1], 1 }

</bundles_post_ra>
